<compile_context>
chip_gen: v7x
topology: tpu7x:2x2x1
jax: 0.10.0
libtpu: 0.0.40
codegen_flags: <defaults>
</compile_context>

<pallas_src>
import functools
import itertools

import numpy as np
import jax
import jax.numpy as jnp
from jax.experimental import pallas as pl
from jax.experimental.pallas import tpu as pltpu


# ----------------------------------------------------------------------------
# Config (mirror of the PyTorch Config class, torch-free)
# ----------------------------------------------------------------------------
class Config:
    def __init__(self):
        self.enable_offset = True
        self.offset_max = 7
        self.enable_flip = True
        self.enable_swap = True
        self.enable_color_permutation = True
        self.enable_color_multiplication = True
        self.color_multiplication_mode = 'color'
        self.enable_scale = True
        self.set_scale_levels(8)
        self.fast_and_approximate = False
        self.batch_size = 1
        self.average_over = 1
        self.dtype = jnp.float32

    def set_scale_levels(self, num_scales):
        self.num_scales = num_scales
        self.scale_probabilities = [1.0 / float(i) ** 2 for i in range(1, self.num_scales + 1)]

    def set_scale_levels_by_image_size(self, image_h, image_w):
        image_size = min(image_h, image_w)
        self.set_scale_levels(max(1, image_size // 64))


# ----------------------------------------------------------------------------
# Ensemble sampling (host-side numpy, deterministic) and application (JAX glue)
# ----------------------------------------------------------------------------
def sample_ensemble_np(config, rng):
    n = config.batch_size
    offset_xy = rng.integers(0, config.offset_max, size=(n, 2))
    cumulative_sum = np.cumsum(config.scale_probabilities)
    u = cumulative_sum[-1] * rng.uniform(0.0, 1.0)
    scale_level = next((i for i, p in enumerate(cumulative_sum) if u < p), len(cumulative_sum))
    scale_level = max(min(scale_level, config.num_scales), 1)
    scale_offset_xy = rng.integers(0, scale_level, size=(2,))
    flips = np.arange(0, (n + 3) // 4 * 4, dtype=np.int32) % 4
    flips = rng.permutation(flips)[:n]
    swap_xy = 0

    def sample_colors():
        color = rng.random(n).astype(np.float32)
        color = color + np.arange(0, n, dtype=np.float32)
        color = color / n
        return rng.permutation(color)

    colors_r = sample_colors().reshape((-1, 1, 1, 1))
    colors_g = sample_colors().reshape((-1, 1, 1, 1))
    colors_b = sample_colors().reshape((-1, 1, 1, 1))
    if config.color_multiplication_mode == 'color':
        color_factors = np.concatenate([colors_r, colors_g, colors_b], axis=1)
    elif config.color_multiplication_mode == 'brightness':
        color_factors = np.concatenate([colors_r, colors_r, colors_r], axis=1)
    else:
        raise Exception('Unknown color multiplication mode.')
    color_factors = 0.2 + 0.8 * color_factors

    permutations = np.asarray(list(itertools.permutations(range(3))), dtype=np.int32)
    repeat_count = (n + len(permutations) - 1) // len(permutations)
    permutations = np.tile(permutations, (repeat_count, 1))
    permutations = rng.permutation(permutations, axis=0)[:n, :].flatten()
    base_indices = 3 * np.repeat(np.arange(0, n, dtype=np.int32), 3)
    permutations = permutations + base_indices
    return (offset_xy, flips, swap_xy, color_factors, permutations, scale_offset_xy, scale_level)


def apply_ensemble_jax(config, sampled_ensemble_params, X):
    # X: (N, C, H, W) jnp array; all ensemble parameters are concrete host ints/arrays.
    (offset_xy, flips, swap_xy, color_factors,
     permutations, scale_offset_xy, scale_level) = sampled_ensemble_params
    N, C, H, W = X.shape

    if config.enable_scale and scale_level != 1:
        pad_left = int(scale_offset_xy[1])
        full_width = (scale_level - 1 + W + scale_level - 1) // scale_level * scale_level
        pad_right = full_width - W - pad_left
        pad_bottom = int(scale_offset_xy[0])
        full_height = (scale_level - 1 + H + scale_level - 1) // scale_level * scale_level
        pad_top = full_height - H - pad_bottom
        # torch F.pad([l, r, b, t]) => W gets (l, r), H gets (b, t)
        X = jnp.pad(X, ((0, 0), (0, 0), (pad_bottom, pad_top), (pad_left, pad_right)), mode='reflect')
        N, C, H, W = X.shape
        X = X.reshape(N, C, H // scale_level, scale_level, W // scale_level, scale_level).mean(axis=(3, 5))
        N, C, H, W = X.shape

    if config.enable_offset:
        padded_list = []
        for i in range(config.batch_size):
            pad_bottom = config.offset_max - int(offset_xy[i, 0])
            pad_left = config.offset_max - int(offset_xy[i, 1])
            pad_top = int(offset_xy[i, 0])
            pad_right = int(offset_xy[i, 1])
            padded = jnp.pad(X[i], ((0, 0), (pad_bottom, pad_top), (pad_left, pad_right)), mode='reflect')
            padded_list.append(padded)
        X = jnp.stack(padded_list, axis=0)
        N, C, H, W = X.shape

    if config.enable_flip:
        flipped_list = []
        for i in range(config.batch_size):
            f = int(flips[i])
            xi = X[i]
            if f == 0:
                xi = jnp.flip(xi, axis=2)
            elif f == 1:
                xi = jnp.flip(xi, axis=1)
            elif f == 2:
                xi = jnp.flip(xi, axis=(1, 2))
            # f == 3: no flip (matches the reference `else` branch)
            flipped_list.append(xi)
        X = jnp.stack(flipped_list, axis=0)

    if config.enable_swap and swap_xy:
        X = jnp.transpose(X, (0, 1, 3, 2))
        N, C, H, W = X.shape

    if config.enable_color_permutation:
        Y = X.reshape(N * C, H * W)
        Y = Y[jnp.asarray(permutations, dtype=jnp.int32)]
        X = Y.reshape(N, C, H, W)

    if config.enable_color_multiplication:
        X = X * jnp.asarray(color_factors, dtype=X.dtype)

    return X


# ----------------------------------------------------------------------------
# Pallas: fused per-layer kernel
#   conv-as-matmul (+bias+ReLU) for LEFT and RIGHT + LPIPS distance epilogue
# ----------------------------------------------------------------------------
def _round_up(x, m):
    return (x + m - 1) // m * m


def _fused_layer_kernel(al_ref, ar_ref, w_ref, b_ref, lin_ref, *out_refs,
                        apply_relu, write_features):
    # MXU matmuls in bf16 operands, f32 accumulation; one shared weight block.
    fl = jnp.dot(al_ref[...], w_ref[...], preferred_element_type=jnp.float32) + b_ref[...]
    fr = jnp.dot(ar_ref[...], w_ref[...], preferred_element_type=jnp.float32) + b_ref[...]
    if apply_relu:
        fl = jnp.maximum(fl, 0.0)
        fr = jnp.maximum(fr, 0.0)

    if write_features:
        yl_ref, yr_ref, d_ref = out_refs
        yl_ref[...] = fl.astype(yl_ref.dtype)
        yr_ref[...] = fr.astype(yr_ref.dtype)
    else:
        (d_ref,) = out_refs

    # LPIPS distance epilogue (f32): unit-normalize over channels (lane dim),
    # squared diff, per-channel LPIPS weights, channel sum.  The channel sums
    # ride the XLU slot and the reciprocal rides the EUP slot, so the epilogue
    # is nearly free next to the MXU work.  Reference LPIPS eps: x / (||x||+eps).
    eps = 1e-10
    inv_l = pl.reciprocal(jnp.sqrt(jnp.sum(fl * fl, axis=-1, keepdims=True)) + eps, approx=True)
    inv_r = pl.reciprocal(jnp.sqrt(jnp.sum(fr * fr, axis=-1, keepdims=True)) + eps, approx=True)
    diff = fl * inv_l - fr * inv_r
    d_ref[...] = jnp.sum(diff * diff * lin_ref[...], axis=-1, keepdims=True)


def _extract_patches(x, *, stride, pad=1):
    """x: (N, H, W, Cin) -> A: (N*Ho*Wo, 9*Cin) patches (row-major (n, ho, wo))."""
    # TODO(synk): replace this JAX-side im2col with an in-kernel implicit GEMM
    # (halo'd input windows + 9 per-tap jnp.dot accumulations into a VMEM f32
    # scratch) to eliminate the 9x patch expansion in HBM for large images.
    N, H, W, Cin = x.shape
    kh = kw = 3
    xp = jnp.pad(x, ((0, 0), (pad, pad), (pad, pad), (0, 0)))
    Hp, Wp = H + 2 * pad, W + 2 * pad
    Ho = (Hp - kh) // stride + 1
    Wo = (Wp - kw) // stride + 1
    cols = []
    for i in range(kh):
        for j in range(kw):
            cols.append(xp[:, i:i + stride * (Ho - 1) + 1:stride,
                           j:j + stride * (Wo - 1) + 1:stride, :])
    patches = jnp.stack(cols, axis=3)                      # (N, Ho, Wo, 9, Cin)
    A = patches.reshape(N * Ho * Wo, kh * kw * Cin)
    return A, (N, Ho, Wo)


def fused_conv_lpips_layer(xl, xr, w, b, lin, *, stride, relu=True,
                           write_features=True, tile_m=512):
    """One LPIPS layer for both ensemble batches in a single pallas_call.

    xl, xr : (N, H, W, Cin) NHWC activations (f32 or bf16)
    w      : (9*Cin, Cout) conv weights;  b: (Cout,);  lin: (Cout,) LPIPS weights
    Returns (yl, yr, d) with yl/yr: (N, Ho, Wo, Cout) bf16 (or None if
    write_features=False) and d: (N,) per-sample layer distance.
    """
    Al, (N, Ho, Wo) = _extract_patches(xl, stride=stride, pad=1)
    Ar, _ = _extract_patches(xr, stride=stride, pad=1)
    M, K = Al.shape
    Cout = w.shape[-1]

    tm = min(tile_m, _round_up(M, 128))          # multiples of 128: safe for bf16 tiling
    Mp = _round_up(M, tm)
    Al = jnp.pad(Al, ((0, Mp - M), (0, 0))).astype(jnp.bfloat16)
    Ar = jnp.pad(Ar, ((0, Mp - M), (0, 0))).astype(jnp.bfloat16)
    wb = w.astype(jnp.bfloat16)
    b2 = b.reshape(1, Cout).astype(jnp.float32)
    lin2 = lin.reshape(1, Cout).astype(jnp.float32)

    out_shape = []
    out_specs = []
    if write_features:
        out_shape += [jax.ShapeDtypeStruct((Mp, Cout), jnp.bfloat16),
                      jax.ShapeDtypeStruct((Mp, Cout), jnp.bfloat16)]
        out_specs += [pl.BlockSpec((tm, Cout), lambda i: (i, 0)),
                      pl.BlockSpec((tm, Cout), lambda i: (i, 0))]
    out_shape.append(jax.ShapeDtypeStruct((Mp, 1), jnp.float32))
    out_specs.append(pl.BlockSpec((tm, 1), lambda i: (i, 0)))

    kernel = functools.partial(_fused_layer_kernel,
                               apply_relu=relu, write_features=write_features)
    outs = pl.pallas_call(
        kernel,
        out_shape=tuple(out_shape),
        grid=(Mp // tm,),
        in_specs=[
            pl.BlockSpec((tm, K), lambda i: (i, 0)),      # left patches
            pl.BlockSpec((tm, K), lambda i: (i, 0)),      # right patches
            pl.BlockSpec((K, Cout), lambda i: (0, 0)),    # weights (revisited block)
            pl.BlockSpec((1, Cout), lambda i: (0, 0)),    # bias
            pl.BlockSpec((1, Cout), lambda i: (0, 0)),    # LPIPS channel weights
        ],
        out_specs=tuple(out_specs),
        compiler_params=pltpu.CompilerParams(
            dimension_semantics=("parallel",),
            vmem_limit_bytes=32 * 1024 * 1024,
        ),
    )(Al, Ar, wb, b2, lin2)

    if write_features:
        yl, yr, d_rows = outs
        yl = yl[:M].reshape(N, Ho, Wo, Cout)
        yr = yr[:M].reshape(N, Ho, Wo, Cout)
    else:
        d_rows = outs[0] if isinstance(outs, (tuple, list)) else outs
        yl = yr = None

    # Drop the zero-padded tail rows *before* the spatial mean (padded rows go
    # through bias/ReLU/normalize in the kernel but are sliced off here).
    d = jnp.mean(d_rows[:M, 0].reshape(N, Ho * Wo), axis=1)
    return yl, yr, d


# ----------------------------------------------------------------------------
# Synthetic LPIPS (PerceptualLoss stand-in): 3 conv layers, LPIPS-style distance
# ----------------------------------------------------------------------------
def _lpips_forward(weights, shift, scale, left_nchw, right_nchw, *, normalize, strides):
    l, r = left_nchw, right_nchw
    if normalize:                       # map [0, 1] -> [-1, 1]
        l = 2.0 * l - 1.0
        r = 2.0 * r - 1.0
    l = (l - shift) / scale
    r = (r - shift) / scale
    xl = jnp.transpose(l, (0, 2, 3, 1))     # NCHW -> NHWC (channels on lane dim)
    xr = jnp.transpose(r, (0, 2, 3, 1))
    total = None
    n_layers = len(strides)
    for li, ((w, b, lin), stride) in enumerate(zip(weights, strides)):
        last = li == n_layers - 1
        xl, xr, d = fused_conv_lpips_layer(
            xl, xr, w, b, lin, stride=stride, relu=True, write_features=not last)
        total = d if total is None else total + d
    return total                            # (N,)


# One jit covers normalization, all im2col glue and every pallas_call; shapes are
# identical across ensemble evaluations so this traces once and is reused.
_lpips_forward_jit = jax.jit(_lpips_forward, static_argnames=("normalize", "strides"))


class SyntheticLPIPS:
    """Stand-in for PerceptualLoss: 3 conv layers + LPIPS-style weighted distance."""

    def __init__(self, key):
        # (Cin, Cout, stride) per layer; weights are deterministic & synthetic.
        layer_defs = [(3, 16, 1), (16, 32, 2), (32, 32, 2)]
        weights = []
        strides = []
        for (cin, cout, stride) in layer_defs:
            key, kw_, kb_, kl_ = jax.random.split(key, 4)
            fan_in = 9 * cin
            w = jax.random.normal(kw_, (fan_in, cout), dtype=jnp.float32) * (2.0 / fan_in) ** 0.5
            b = jax.random.normal(kb_, (cout,), dtype=jnp.float32) * 0.01
            lin = jax.random.uniform(kl_, (cout,), dtype=jnp.float32, minval=0.05, maxval=1.0)
            weights.append((w, b, lin))
            strides.append(int(stride))
        self.weights = tuple(weights)
        self.strides = tuple(strides)
        self.shift = jnp.array([-0.030, -0.088, -0.188], dtype=jnp.float32).reshape(1, 3, 1, 1)
        self.scale = jnp.array([0.458, 0.448, 0.450], dtype=jnp.float32).reshape(1, 3, 1, 1)

    def __call__(self, left_nchw, right_nchw, normalize=True):
        return _lpips_forward_jit(self.weights, self.shift, self.scale,
                                  left_nchw, right_nchw,
                                  normalize=bool(normalize), strides=self.strides)


# ----------------------------------------------------------------------------
# ElpipsMetric forward
# ----------------------------------------------------------------------------
def elpips_forward(config, lpips, imagesLeft, imagesRight, host_rng, normalize=True):
    assert imagesLeft.ndim == imagesRight.ndim == 4
    assert imagesLeft.shape[0] == imagesRight.shape[0]
    image_num = imagesLeft.shape[0]
    losses = []
    for i in range(image_num):
        params = sample_ensemble_np(config, host_rng)
        batch_left = jnp.repeat(imagesLeft[i][None], config.batch_size, axis=0)
        batch_right = jnp.repeat(imagesRight[i][None], config.batch_size, axis=0)
        batch_left = apply_ensemble_jax(config, params, batch_left)
        batch_right = apply_ensemble_jax(config, params, batch_right)
        # NOTE: the reference ElpipsMetric.forward hardcodes normalize=True when
        # calling compute_single (its own `normalize` argument is ignored); we
        # mirror that behavior exactly.
        lpips_losses = lpips(batch_left, batch_right, normalize=True)
        losses.append(jnp.mean(lpips_losses))
    return jnp.stack(losses, axis=0)


if __name__ == "__main__":
    key = jax.random.PRNGKey(0)
    k_left, k_right, k_net = jax.random.split(key, 3)

    image_num, C, H, W = 2, 3, 16, 16
    imagesLeft = jax.random.uniform(k_left, (image_num, C, H, W), dtype=jnp.float32)
    imagesRight = jax.random.uniform(k_right, (image_num, C, H, W), dtype=jnp.float32)

    config = Config()
    config.batch_size = 2
    config.set_scale_levels_by_image_size(H, W)   # -> 1 scale level for 16x16 images

    lpips = SyntheticLPIPS(k_net)
    host_rng = np.random.default_rng(0)           # deterministic ensemble sampling

    out = elpips_forward(config, lpips, imagesLeft, imagesRight, host_rng, normalize=True)
    out = jax.block_until_ready(out)
    assert out.shape == (image_num,)
    assert bool(jnp.all(jnp.isfinite(out)))
    print("KERNEL_OK")
</pallas_src>

<mosaic_0001>
module attributes {stable_mosaic.version = 11 : i64} {
  func.func @_fused_layer_kernel(%arg0: i32, %arg1: memref<512x27xbf16, #tpu.memory_space<vmem>>, %arg2: memref<512x27xbf16, #tpu.memory_space<vmem>>, %arg3: memref<27x16xbf16, #tpu.memory_space<vmem>>, %arg4: memref<1x16xf32, #tpu.memory_space<vmem>>, %arg5: memref<1x16xf32, #tpu.memory_space<vmem>>, %arg6: memref<512x16xbf16, #tpu.memory_space<vmem>>, %arg7: memref<512x16xbf16, #tpu.memory_space<vmem>>, %arg8: memref<512x1xf32, #tpu.memory_space<vmem>>) attributes {dimension_semantics = [#tpu.dimension_semantics<parallel>], iteration_bounds = array<i64: 3>, scalar_prefetch = 0 : i64, scratch_operands = 0 : i64, tpu.core_type = #tpu.core_type<tc>, window_params = [{transform_indices = @transform_0, window_bounds = array<i64: 512, 27>}, {transform_indices = @transform_1, window_bounds = array<i64: 512, 27>}, {pipeline_mode = #tpu.pipeline_mode<synchronous>, transform_indices = @transform_2, window_bounds = array<i64: 27, 16>}, {pipeline_mode = #tpu.pipeline_mode<synchronous>, transform_indices = @transform_3, window_bounds = array<i64: 1, 16>}, {pipeline_mode = #tpu.pipeline_mode<synchronous>, transform_indices = @transform_4, window_bounds = array<i64: 1, 16>}, {transform_indices = @transform_5, window_bounds = array<i64: 512, 16>}, {transform_indices = @transform_6, window_bounds = array<i64: 512, 16>}, {transform_indices = @transform_7, window_bounds = array<i64: 512, 1>}]} {
    %c0 = arith.constant 0 : index
    %c0_0 = arith.constant 0 : index
    %0 = vector.load %arg1[%c0, %c0_0] : memref<512x27xbf16, #tpu.memory_space<vmem>>, vector<512x27xbf16>
    %c0_1 = arith.constant 0 : index
    %c0_2 = arith.constant 0 : index
    %1 = vector.load %arg3[%c0_1, %c0_2] : memref<27x16xbf16, #tpu.memory_space<vmem>>, vector<27x16xbf16>
    %cst = arith.constant dense<0.000000e+00> : vector<512x16xf32>
    %2 = tpu.matmul %0, %1, %cst {dimension_numbers = #tpu.dot_dimension_numbers<[1], [0], [0], [1], [0, 0, 1, 1], [], []>} : vector<512x27xbf16>, vector<27x16xbf16>, vector<512x16xf32> -> vector<512x16xf32>
    %c0_3 = arith.constant 0 : index
    %c0_4 = arith.constant 0 : index
    %3 = vector.load %arg4[%c0_3, %c0_4] : memref<1x16xf32, #tpu.memory_space<vmem>>, vector<1x16xf32>
    %4 = vector.broadcast %3 : vector<1x16xf32> to vector<512x16xf32>
    %5 = arith.addf %2, %4 : vector<512x16xf32>
    %c0_5 = arith.constant 0 : index
    %c0_6 = arith.constant 0 : index
    %6 = vector.load %arg2[%c0_5, %c0_6] : memref<512x27xbf16, #tpu.memory_space<vmem>>, vector<512x27xbf16>
    %c0_7 = arith.constant 0 : index
    %c0_8 = arith.constant 0 : index
    %7 = vector.load %arg3[%c0_7, %c0_8] : memref<27x16xbf16, #tpu.memory_space<vmem>>, vector<27x16xbf16>
    %cst_9 = arith.constant dense<0.000000e+00> : vector<512x16xf32>
    %8 = tpu.matmul %6, %7, %cst_9 {dimension_numbers = #tpu.dot_dimension_numbers<[1], [0], [0], [1], [0, 0, 1, 1], [], []>} : vector<512x27xbf16>, vector<27x16xbf16>, vector<512x16xf32> -> vector<512x16xf32>
    %c0_10 = arith.constant 0 : index
    %c0_11 = arith.constant 0 : index
    %9 = vector.load %arg4[%c0_10, %c0_11] : memref<1x16xf32, #tpu.memory_space<vmem>>, vector<1x16xf32>
    %10 = vector.broadcast %9 : vector<1x16xf32> to vector<512x16xf32>
    %11 = arith.addf %8, %10 : vector<512x16xf32>
    %cst_12 = arith.constant 0.000000e+00 : f32
    %12 = vector.broadcast %cst_12 : f32 to vector<512x16xf32>
    %13 = arith.maximumf %5, %12 : vector<512x16xf32>
    %cst_13 = arith.constant 0.000000e+00 : f32
    %14 = vector.broadcast %cst_13 : f32 to vector<512x16xf32>
    %15 = arith.maximumf %11, %14 : vector<512x16xf32>
    %16 = arith.truncf %13 : vector<512x16xf32> to vector<512x16xbf16>
    %c0_14 = arith.constant 0 : index
    %c0_15 = arith.constant 0 : index
    %17 = vector.load %arg6[%c0_14, %c0_15] : memref<512x16xbf16, #tpu.memory_space<vmem>>, vector<512x16xbf16>
    tpu.vector_store %arg6[%c0_14, %c0_15], %16 {strides = array<i32>} : memref<512x16xbf16, #tpu.memory_space<vmem>>, vector<512x16xbf16>,
    %18 = arith.truncf %15 : vector<512x16xf32> to vector<512x16xbf16>
    %c0_16 = arith.constant 0 : index
    %c0_17 = arith.constant 0 : index
    %19 = vector.load %arg7[%c0_16, %c0_17] : memref<512x16xbf16, #tpu.memory_space<vmem>>, vector<512x16xbf16>
    tpu.vector_store %arg7[%c0_16, %c0_17], %18 {strides = array<i32>} : memref<512x16xbf16, #tpu.memory_space<vmem>>, vector<512x16xbf16>,
    %20 = arith.mulf %13, %13 : vector<512x16xf32>
    %cst_18 = arith.constant dense<0.000000e+00> : vector<512xf32>
    %21 = vector.multi_reduction <add>, %20, %cst_18 [1] : vector<512x16xf32> to vector<512xf32>
    %22 = vector.shape_cast %21 : vector<512xf32> to vector<512x1xf32>
    %23 = math.sqrt %22 : vector<512x1xf32>
    %cst_19 = arith.constant 1.000000e-10 : f32
    %24 = vector.broadcast %cst_19 : f32 to vector<512x1xf32>
    %25 = arith.addf %23, %24 : vector<512x1xf32>
    %26 = tpu.reciprocal %25 {approx = true} : vector<512x1xf32> -> vector<512x1xf32>
    %27 = arith.mulf %15, %15 : vector<512x16xf32>
    %cst_20 = arith.constant dense<0.000000e+00> : vector<512xf32>
    %28 = vector.multi_reduction <add>, %27, %cst_20 [1] : vector<512x16xf32> to vector<512xf32>
    %29 = vector.shape_cast %28 : vector<512xf32> to vector<512x1xf32>
    %30 = math.sqrt %29 : vector<512x1xf32>
    %cst_21 = arith.constant 1.000000e-10 : f32
    %31 = vector.broadcast %cst_21 : f32 to vector<512x1xf32>
    %32 = arith.addf %30, %31 : vector<512x1xf32>
    %33 = tpu.reciprocal %32 {approx = true} : vector<512x1xf32> -> vector<512x1xf32>
    %34 = vector.broadcast %26 : vector<512x1xf32> to vector<512x16xf32>
    %35 = arith.mulf %13, %34 : vector<512x16xf32>
    %36 = vector.broadcast %33 : vector<512x1xf32> to vector<512x16xf32>
    %37 = arith.mulf %15, %36 : vector<512x16xf32>
    %38 = arith.subf %35, %37 : vector<512x16xf32>
    %39 = arith.mulf %38, %38 : vector<512x16xf32>
    %c0_22 = arith.constant 0 : index
    %c0_23 = arith.constant 0 : index
    %40 = vector.load %arg5[%c0_22, %c0_23] : memref<1x16xf32, #tpu.memory_space<vmem>>, vector<1x16xf32>
    %41 = vector.broadcast %40 : vector<1x16xf32> to vector<512x16xf32>
    %42 = arith.mulf %39, %41 : vector<512x16xf32>
    %cst_24 = arith.constant dense<0.000000e+00> : vector<512xf32>
    %43 = vector.multi_reduction <add>, %42, %cst_24 [1] : vector<512x16xf32> to vector<512xf32>
    %44 = vector.shape_cast %43 : vector<512xf32> to vector<512x1xf32>
    %c0_25 = arith.constant 0 : index
    %c0_26 = arith.constant 0 : index
    %45 = vector.load %arg8[%c0_25, %c0_26] : memref<512x1xf32, #tpu.memory_space<vmem>>, vector<512x1xf32>
    tpu.vector_store %arg8[%c0_25, %c0_26], %44 {strides = array<i32>} : memref<512x1xf32, #tpu.memory_space<vmem>>, vector<512x1xf32>,
    return
  }
  func.func @transform_0(%arg0: i32) -> (i32, i32) {
    %c0_i32 = arith.constant 0 : i32
    %c0_i32_0 = arith.constant 0 : i32
    return %arg0, %c0_i32 : i32, i32
  }
  func.func @transform_1(%arg0: i32) -> (i32, i32) {
    %c0_i32 = arith.constant 0 : i32
    %c0_i32_0 = arith.constant 0 : i32
    return %arg0, %c0_i32 : i32, i32
  }
  func.func @transform_2(%arg0: i32) -> (i32, i32) {
    %c0_i32 = arith.constant 0 : i32
    %c0_i32_0 = arith.constant 0 : i32
    %c0_i32_1 = arith.constant 0 : i32
    return %c0_i32, %c0_i32_0 : i32, i32
  }
  func.func @transform_3(%arg0: i32) -> (i32, i32) {
    %c0_i32 = arith.constant 0 : i32
    %c0_i32_0 = arith.constant 0 : i32
    %c0_i32_1 = arith.constant 0 : i32
    return %c0_i32, %c0_i32_0 : i32, i32
  }
  func.func @transform_4(%arg0: i32) -> (i32, i32) {
    %c0_i32 = arith.constant 0 : i32
    %c0_i32_0 = arith.constant 0 : i32
    %c0_i32_1 = arith.constant 0 : i32
    return %c0_i32, %c0_i32_0 : i32, i32
  }
  func.func @transform_5(%arg0: i32) -> (i32, i32) {
    %c0_i32 = arith.constant 0 : i32
    %c0_i32_0 = arith.constant 0 : i32
    return %arg0, %c0_i32 : i32, i32
  }
  func.func @transform_6(%arg0: i32) -> (i32, i32) {
    %c0_i32 = arith.constant 0 : i32
    %c0_i32_0 = arith.constant 0 : i32
    return %arg0, %c0_i32 : i32, i32
  }
  func.func @transform_7(%arg0: i32) -> (i32, i32) {
    %c0_i32 = arith.constant 0 : i32
    %c0_i32_0 = arith.constant 0 : i32
    return %arg0, %c0_i32 : i32, i32
  }
}

module attributes {stable_mosaic.version = 11 : i64} {
  func.func @_fused_layer_kernel(%arg0: i32, %arg1: memref<384x144xbf16, #tpu.memory_space<vmem>>, %arg2: memref<384x144xbf16, #tpu.memory_space<vmem>>, %arg3: memref<144x32xbf16, #tpu.memory_space<vmem>>, %arg4: memref<1x32xf32, #tpu.memory_space<vmem>>, %arg5: memref<1x32xf32, #tpu.memory_space<vmem>>, %arg6: memref<384x32xbf16, #tpu.memory_space<vmem>>, %arg7: memref<384x32xbf16, #tpu.memory_space<vmem>>, %arg8: memref<384x1xf32, #tpu.memory_space<vmem>>) attributes {dimension_semantics = [#tpu.dimension_semantics<parallel>], iteration_bounds = array<i64: 1>, scalar_prefetch = 0 : i64, scratch_operands = 0 : i64, tpu.core_type = #tpu.core_type<tc>, window_params = [{transform_indices = @transform_0, window_bounds = array<i64: 384, 144>}, {transform_indices = @transform_1, window_bounds = array<i64: 384, 144>}, {pipeline_mode = #tpu.pipeline_mode<synchronous>, transform_indices = @transform_2, window_bounds = array<i64: 144, 32>}, {pipeline_mode = #tpu.pipeline_mode<synchronous>, transform_indices = @transform_3, window_bounds = array<i64: 1, 32>}, {pipeline_mode = #tpu.pipeline_mode<synchronous>, transform_indices = @transform_4, window_bounds = array<i64: 1, 32>}, {transform_indices = @transform_5, window_bounds = array<i64: 384, 32>}, {transform_indices = @transform_6, window_bounds = array<i64: 384, 32>}, {transform_indices = @transform_7, window_bounds = array<i64: 384, 1>}]} {
    %c0 = arith.constant 0 : index
    %c0_0 = arith.constant 0 : index
    %0 = vector.load %arg1[%c0, %c0_0] : memref<384x144xbf16, #tpu.memory_space<vmem>>, vector<384x144xbf16>
    %c0_1 = arith.constant 0 : index
    %c0_2 = arith.constant 0 : index
    %1 = vector.load %arg3[%c0_1, %c0_2] : memref<144x32xbf16, #tpu.memory_space<vmem>>, vector<144x32xbf16>
    %cst = arith.constant dense<0.000000e+00> : vector<384x32xf32>
    %2 = tpu.matmul %0, %1, %cst {dimension_numbers = #tpu.dot_dimension_numbers<[1], [0], [0], [1], [0, 0, 1, 1], [], []>} : vector<384x144xbf16>, vector<144x32xbf16>, vector<384x32xf32> -> vector<384x32xf32>
    %c0_3 = arith.constant 0 : index
    %c0_4 = arith.constant 0 : index
    %3 = vector.load %arg4[%c0_3, %c0_4] : memref<1x32xf32, #tpu.memory_space<vmem>>, vector<1x32xf32>
    %4 = vector.broadcast %3 : vector<1x32xf32> to vector<384x32xf32>
    %5 = arith.addf %2, %4 : vector<384x32xf32>
    %c0_5 = arith.constant 0 : index
    %c0_6 = arith.constant 0 : index
    %6 = vector.load %arg2[%c0_5, %c0_6] : memref<384x144xbf16, #tpu.memory_space<vmem>>, vector<384x144xbf16>
    %c0_7 = arith.constant 0 : index
    %c0_8 = arith.constant 0 : index
    %7 = vector.load %arg3[%c0_7, %c0_8] : memref<144x32xbf16, #tpu.memory_space<vmem>>, vector<144x32xbf16>
    %cst_9 = arith.constant dense<0.000000e+00> : vector<384x32xf32>
    %8 = tpu.matmul %6, %7, %cst_9 {dimension_numbers = #tpu.dot_dimension_numbers<[1], [0], [0], [1], [0, 0, 1, 1], [], []>} : vector<384x144xbf16>, vector<144x32xbf16>, vector<384x32xf32> -> vector<384x32xf32>
    %c0_10 = arith.constant 0 : index
    %c0_11 = arith.constant 0 : index
    %9 = vector.load %arg4[%c0_10, %c0_11] : memref<1x32xf32, #tpu.memory_space<vmem>>, vector<1x32xf32>
    %10 = vector.broadcast %9 : vector<1x32xf32> to vector<384x32xf32>
    %11 = arith.addf %8, %10 : vector<384x32xf32>
    %cst_12 = arith.constant 0.000000e+00 : f32
    %12 = vector.broadcast %cst_12 : f32 to vector<384x32xf32>
    %13 = arith.maximumf %5, %12 : vector<384x32xf32>
    %cst_13 = arith.constant 0.000000e+00 : f32
    %14 = vector.broadcast %cst_13 : f32 to vector<384x32xf32>
    %15 = arith.maximumf %11, %14 : vector<384x32xf32>
    %16 = arith.truncf %13 : vector<384x32xf32> to vector<384x32xbf16>
    %c0_14 = arith.constant 0 : index
    %c0_15 = arith.constant 0 : index
    %17 = vector.load %arg6[%c0_14, %c0_15] : memref<384x32xbf16, #tpu.memory_space<vmem>>, vector<384x32xbf16>
    tpu.vector_store %arg6[%c0_14, %c0_15], %16 {strides = array<i32>} : memref<384x32xbf16, #tpu.memory_space<vmem>>, vector<384x32xbf16>,
    %18 = arith.truncf %15 : vector<384x32xf32> to vector<384x32xbf16>
    %c0_16 = arith.constant 0 : index
    %c0_17 = arith.constant 0 : index
    %19 = vector.load %arg7[%c0_16, %c0_17] : memref<384x32xbf16, #tpu.memory_space<vmem>>, vector<384x32xbf16>
    tpu.vector_store %arg7[%c0_16, %c0_17], %18 {strides = array<i32>} : memref<384x32xbf16, #tpu.memory_space<vmem>>, vector<384x32xbf16>,
    %20 = arith.mulf %13, %13 : vector<384x32xf32>
    %cst_18 = arith.constant dense<0.000000e+00> : vector<384xf32>
    %21 = vector.multi_reduction <add>, %20, %cst_18 [1] : vector<384x32xf32> to vector<384xf32>
    %22 = vector.shape_cast %21 : vector<384xf32> to vector<384x1xf32>
    %23 = math.sqrt %22 : vector<384x1xf32>
    %cst_19 = arith.constant 1.000000e-10 : f32
    %24 = vector.broadcast %cst_19 : f32 to vector<384x1xf32>
    %25 = arith.addf %23, %24 : vector<384x1xf32>
    %26 = tpu.reciprocal %25 {approx = true} : vector<384x1xf32> -> vector<384x1xf32>
    %27 = arith.mulf %15, %15 : vector<384x32xf32>
    %cst_20 = arith.constant dense<0.000000e+00> : vector<384xf32>
    %28 = vector.multi_reduction <add>, %27, %cst_20 [1] : vector<384x32xf32> to vector<384xf32>
    %29 = vector.shape_cast %28 : vector<384xf32> to vector<384x1xf32>
    %30 = math.sqrt %29 : vector<384x1xf32>
    %cst_21 = arith.constant 1.000000e-10 : f32
    %31 = vector.broadcast %cst_21 : f32 to vector<384x1xf32>
    %32 = arith.addf %30, %31 : vector<384x1xf32>
    %33 = tpu.reciprocal %32 {approx = true} : vector<384x1xf32> -> vector<384x1xf32>
    %34 = vector.broadcast %26 : vector<384x1xf32> to vector<384x32xf32>
    %35 = arith.mulf %13, %34 : vector<384x32xf32>
    %36 = vector.broadcast %33 : vector<384x1xf32> to vector<384x32xf32>
    %37 = arith.mulf %15, %36 : vector<384x32xf32>
    %38 = arith.subf %35, %37 : vector<384x32xf32>
    %39 = arith.mulf %38, %38 : vector<384x32xf32>
    %c0_22 = arith.constant 0 : index
    %c0_23 = arith.constant 0 : index
    %40 = vector.load %arg5[%c0_22, %c0_23] : memref<1x32xf32, #tpu.memory_space<vmem>>, vector<1x32xf32>
    %41 = vector.broadcast %40 : vector<1x32xf32> to vector<384x32xf32>
    %42 = arith.mulf %39, %41 : vector<384x32xf32>
    %cst_24 = arith.constant dense<0.000000e+00> : vector<384xf32>
    %43 = vector.multi_reduction <add>, %42, %cst_24 [1] : vector<384x32xf32> to vector<384xf32>
    %44 = vector.shape_cast %43 : vector<384xf32> to vector<384x1xf32>
    %c0_25 = arith.constant 0 : index
    %c0_26 = arith.constant 0 : index
    %45 = vector.load %arg8[%c0_25, %c0_26] : memref<384x1xf32, #tpu.memory_space<vmem>>, vector<384x1xf32>
    tpu.vector_store %arg8[%c0_25, %c0_26], %44 {strides = array<i32>} : memref<384x1xf32, #tpu.memory_space<vmem>>, vector<384x1xf32>,
    return
  }
  func.func @transform_0(%arg0: i32) -> (i32, i32) {
    %c0_i32 = arith.constant 0 : i32
    %c0_i32_0 = arith.constant 0 : i32
    return %arg0, %c0_i32 : i32, i32
  }
  func.func @transform_1(%arg0: i32) -> (i32, i32) {
    %c0_i32 = arith.constant 0 : i32
    %c0_i32_0 = arith.constant 0 : i32
    return %arg0, %c0_i32 : i32, i32
  }
  func.func @transform_2(%arg0: i32) -> (i32, i32) {
    %c0_i32 = arith.constant 0 : i32
    %c0_i32_0 = arith.constant 0 : i32
    %c0_i32_1 = arith.constant 0 : i32
    return %c0_i32, %c0_i32_0 : i32, i32
  }
  func.func @transform_3(%arg0: i32) -> (i32, i32) {
    %c0_i32 = arith.constant 0 : i32
    %c0_i32_0 = arith.constant 0 : i32
    %c0_i32_1 = arith.constant 0 : i32
    return %c0_i32, %c0_i32_0 : i32, i32
  }
  func.func @transform_4(%arg0: i32) -> (i32, i32) {
    %c0_i32 = arith.constant 0 : i32
    %c0_i32_0 = arith.constant 0 : i32
    %c0_i32_1 = arith.constant 0 : i32
    return %c0_i32, %c0_i32_0 : i32, i32
  }
  func.func @transform_5(%arg0: i32) -> (i32, i32) {
    %c0_i32 = arith.constant 0 : i32
    %c0_i32_0 = arith.constant 0 : i32
    return %arg0, %c0_i32 : i32, i32
  }
  func.func @transform_6(%arg0: i32) -> (i32, i32) {
    %c0_i32 = arith.constant 0 : i32
    %c0_i32_0 = arith.constant 0 : i32
    return %arg0, %c0_i32 : i32, i32
  }
  func.func @transform_7(%arg0: i32) -> (i32, i32) {
    %c0_i32 = arith.constant 0 : i32
    %c0_i32_0 = arith.constant 0 : i32
    return %arg0, %c0_i32 : i32, i32
  }
}

module attributes {stable_mosaic.version = 11 : i64} {
  func.func @_fused_layer_kernel(%arg0: i32, %arg1: memref<128x288xbf16, #tpu.memory_space<vmem>>, %arg2: memref<128x288xbf16, #tpu.memory_space<vmem>>, %arg3: memref<288x32xbf16, #tpu.memory_space<vmem>>, %arg4: memref<1x32xf32, #tpu.memory_space<vmem>>, %arg5: memref<1x32xf32, #tpu.memory_space<vmem>>, %arg6: memref<128x1xf32, #tpu.memory_space<vmem>>) attributes {dimension_semantics = [#tpu.dimension_semantics<parallel>], iteration_bounds = array<i64: 1>, scalar_prefetch = 0 : i64, scratch_operands = 0 : i64, tpu.core_type = #tpu.core_type<tc>, window_params = [{transform_indices = @transform_0, window_bounds = array<i64: 128, 288>}, {transform_indices = @transform_1, window_bounds = array<i64: 128, 288>}, {pipeline_mode = #tpu.pipeline_mode<synchronous>, transform_indices = @transform_2, window_bounds = array<i64: 288, 32>}, {pipeline_mode = #tpu.pipeline_mode<synchronous>, transform_indices = @transform_3, window_bounds = array<i64: 1, 32>}, {pipeline_mode = #tpu.pipeline_mode<synchronous>, transform_indices = @transform_4, window_bounds = array<i64: 1, 32>}, {transform_indices = @transform_5, window_bounds = array<i64: 128, 1>}]} {
    %c0 = arith.constant 0 : index
    %c0_0 = arith.constant 0 : index
    %0 = vector.load %arg1[%c0, %c0_0] : memref<128x288xbf16, #tpu.memory_space<vmem>>, vector<128x288xbf16>
    %c0_1 = arith.constant 0 : index
    %c0_2 = arith.constant 0 : index
    %1 = vector.load %arg3[%c0_1, %c0_2] : memref<288x32xbf16, #tpu.memory_space<vmem>>, vector<288x32xbf16>
    %cst = arith.constant dense<0.000000e+00> : vector<128x32xf32>
    %2 = tpu.matmul %0, %1, %cst {dimension_numbers = #tpu.dot_dimension_numbers<[1], [0], [0], [1], [0, 0, 1, 1], [], []>} : vector<128x288xbf16>, vector<288x32xbf16>, vector<128x32xf32> -> vector<128x32xf32>
    %c0_3 = arith.constant 0 : index
    %c0_4 = arith.constant 0 : index
    %3 = vector.load %arg4[%c0_3, %c0_4] : memref<1x32xf32, #tpu.memory_space<vmem>>, vector<1x32xf32>
    %4 = vector.broadcast %3 : vector<1x32xf32> to vector<128x32xf32>
    %5 = arith.addf %2, %4 : vector<128x32xf32>
    %c0_5 = arith.constant 0 : index
    %c0_6 = arith.constant 0 : index
    %6 = vector.load %arg2[%c0_5, %c0_6] : memref<128x288xbf16, #tpu.memory_space<vmem>>, vector<128x288xbf16>
    %c0_7 = arith.constant 0 : index
    %c0_8 = arith.constant 0 : index
    %7 = vector.load %arg3[%c0_7, %c0_8] : memref<288x32xbf16, #tpu.memory_space<vmem>>, vector<288x32xbf16>
    %cst_9 = arith.constant dense<0.000000e+00> : vector<128x32xf32>
    %8 = tpu.matmul %6, %7, %cst_9 {dimension_numbers = #tpu.dot_dimension_numbers<[1], [0], [0], [1], [0, 0, 1, 1], [], []>} : vector<128x288xbf16>, vector<288x32xbf16>, vector<128x32xf32> -> vector<128x32xf32>
    %c0_10 = arith.constant 0 : index
    %c0_11 = arith.constant 0 : index
    %9 = vector.load %arg4[%c0_10, %c0_11] : memref<1x32xf32, #tpu.memory_space<vmem>>, vector<1x32xf32>
    %10 = vector.broadcast %9 : vector<1x32xf32> to vector<128x32xf32>
    %11 = arith.addf %8, %10 : vector<128x32xf32>
    %cst_12 = arith.constant 0.000000e+00 : f32
    %12 = vector.broadcast %cst_12 : f32 to vector<128x32xf32>
    %13 = arith.maximumf %5, %12 : vector<128x32xf32>
    %cst_13 = arith.constant 0.000000e+00 : f32
    %14 = vector.broadcast %cst_13 : f32 to vector<128x32xf32>
    %15 = arith.maximumf %11, %14 : vector<128x32xf32>
    %16 = arith.mulf %13, %13 : vector<128x32xf32>
    %cst_14 = arith.constant dense<0.000000e+00> : vector<128xf32>
    %17 = vector.multi_reduction <add>, %16, %cst_14 [1] : vector<128x32xf32> to vector<128xf32>
    %18 = vector.shape_cast %17 : vector<128xf32> to vector<128x1xf32>
    %19 = math.sqrt %18 : vector<128x1xf32>
    %cst_15 = arith.constant 1.000000e-10 : f32
    %20 = vector.broadcast %cst_15 : f32 to vector<128x1xf32>
    %21 = arith.addf %19, %20 : vector<128x1xf32>
    %22 = tpu.reciprocal %21 {approx = true} : vector<128x1xf32> -> vector<128x1xf32>
    %23 = arith.mulf %15, %15 : vector<128x32xf32>
    %cst_16 = arith.constant dense<0.000000e+00> : vector<128xf32>
    %24 = vector.multi_reduction <add>, %23, %cst_16 [1] : vector<128x32xf32> to vector<128xf32>
    %25 = vector.shape_cast %24 : vector<128xf32> to vector<128x1xf32>
    %26 = math.sqrt %25 : vector<128x1xf32>
    %cst_17 = arith.constant 1.000000e-10 : f32
    %27 = vector.broadcast %cst_17 : f32 to vector<128x1xf32>
    %28 = arith.addf %26, %27 : vector<128x1xf32>
    %29 = tpu.reciprocal %28 {approx = true} : vector<128x1xf32> -> vector<128x1xf32>
    %30 = vector.broadcast %22 : vector<128x1xf32> to vector<128x32xf32>
    %31 = arith.mulf %13, %30 : vector<128x32xf32>
    %32 = vector.broadcast %29 : vector<128x1xf32> to vector<128x32xf32>
    %33 = arith.mulf %15, %32 : vector<128x32xf32>
    %34 = arith.subf %31, %33 : vector<128x32xf32>
    %35 = arith.mulf %34, %34 : vector<128x32xf32>
    %c0_18 = arith.constant 0 : index
    %c0_19 = arith.constant 0 : index
    %36 = vector.load %arg5[%c0_18, %c0_19] : memref<1x32xf32, #tpu.memory_space<vmem>>, vector<1x32xf32>
    %37 = vector.broadcast %36 : vector<1x32xf32> to vector<128x32xf32>
    %38 = arith.mulf %35, %37 : vector<128x32xf32>
    %cst_20 = arith.constant dense<0.000000e+00> : vector<128xf32>
    %39 = vector.multi_reduction <add>, %38, %cst_20 [1] : vector<128x32xf32> to vector<128xf32>
    %40 = vector.shape_cast %39 : vector<128xf32> to vector<128x1xf32>
    %c0_21 = arith.constant 0 : index
    %c0_22 = arith.constant 0 : index
    %41 = vector.load %arg6[%c0_21, %c0_22] : memref<128x1xf32, #tpu.memory_space<vmem>>, vector<128x1xf32>
    tpu.vector_store %arg6[%c0_21, %c0_22], %40 {strides = array<i32>} : memref<128x1xf32, #tpu.memory_space<vmem>>, vector<128x1xf32>,
    return
  }
  func.func @transform_0(%arg0: i32) -> (i32, i32) {
    %c0_i32 = arith.constant 0 : i32
    %c0_i32_0 = arith.constant 0 : i32
    return %arg0, %c0_i32 : i32, i32
  }
  func.func @transform_1(%arg0: i32) -> (i32, i32) {
    %c0_i32 = arith.constant 0 : i32
    %c0_i32_0 = arith.constant 0 : i32
    return %arg0, %c0_i32 : i32, i32
  }
  func.func @transform_2(%arg0: i32) -> (i32, i32) {
    %c0_i32 = arith.constant 0 : i32
    %c0_i32_0 = arith.constant 0 : i32
    %c0_i32_1 = arith.constant 0 : i32
    return %c0_i32, %c0_i32_0 : i32, i32
  }
  func.func @transform_3(%arg0: i32) -> (i32, i32) {
    %c0_i32 = arith.constant 0 : i32
    %c0_i32_0 = arith.constant 0 : i32
    %c0_i32_1 = arith.constant 0 : i32
    return %c0_i32, %c0_i32_0 : i32, i32
  }
  func.func @transform_4(%arg0: i32) -> (i32, i32) {
    %c0_i32 = arith.constant 0 : i32
    %c0_i32_0 = arith.constant 0 : i32
    %c0_i32_1 = arith.constant 0 : i32
    return %c0_i32, %c0_i32_0 : i32, i32
  }
  func.func @transform_5(%arg0: i32) -> (i32, i32) {
    %c0_i32 = arith.constant 0 : i32
    %c0_i32_0 = arith.constant 0 : i32
    return %arg0, %c0_i32 : i32, i32
  }
}

</mosaic_0001>

<bundles_post_ra>
// kernel: _lpips_forward.3
= control target key start
LH: loop header
LB: loop body
LE: loop exit
PB: predicated region body
PF: predicated region fallthrough
CT: control target
= control target key end

     0   :  { %s5982_s24 = smov 0   ;;  %s10260_s0 = inlined_call_operand.vmem [shape: bf16[1536,27], index: 0, kind: input, shape index: {}]   ;;  %s10261_s1 = inlined_call_operand.vmem [shape: bf16[1536,27], index: 1, kind: input, shape index: {}]   ;;  %s10262_s2 = inlined_call_operand.vmem [shape: bf16[27,16], index: 2, kind: input, shape index: {}]   ;;  %s10263_s3 = inlined_call_operand.vmem [shape: f32[1,16], index: 3, kind: input, shape index: {}]   ;;  %s10264_s4 = inlined_call_operand.vmem [shape: f32[1,16], index: 4, kind: input, shape index: {}]   ;;  %s10265_s5 = inlined_call_operand.vmem [shape: bf16[1536,16], index: 5, kind: output, shape index: {0}]   ;;  %s10266_s6 = inlined_call_operand.vmem [shape: bf16[1536,16], index: 6, kind: output, shape index: {1}]   ;;  %s10267_s7 = inlined_call_operand.vmem [shape: f32[1536,1], index: 7, kind: output, shape index: {2}]  }
   0x1 LB: > { %s4734_s25 = sadd.s32 4294967295, %s5939_s24   ;;  %p4738_p0 = scmp.ge.s32.totalorder %s5939_s24, 1  ;;  %s5939_s24 = sphi %s5982_s24, %s18_s24  }
   0x2   : > { %p254_p1 = scmp.lt.s32.totalorder %s5939_s24, 4 }
   0x4   : > { %p255_p2 = pnand %p4738_p0, %p254_p1 }
   0x6   : > { %258 = sbr.rel (%p255_p2) target bundleno = 954 (0x3ba), region = 40 }
   0xd   : > { %v5352_v0 = vld [vmem:[%s10262_s2] sm:$0xff]   ;;  %vm675_vm0 = vcmask 1044480   ;;  %v5353_v1 = vld [vmem:[%s10262_s2 + $0x8] sm:$0x3f]   ;;  %vm676_vm1 = vcmask 1045504   ;;  %s4739_s30 = sshll.u32 %s4734_s25, 6 }
   0xe   : > { %5207 = vmatprep.subr.bf16.mxu0 %v5352_v0  ;;  %5275 = vmatprep.subr.bf16.mxu1 %v5352_v0  ;;  %v5941_v2 = vmov 65535   ;;  %p302_p3 = scmp.lt.s32.totalorder %s4739_s30, 191  ;;  %vm578_vm2 = vcmask 220160   ;;  %vm1964_vm3 = vcmask 125952   ;;  %vm2413_vm4 = vcmask 130048  }
   0xf   : > { %5208 = vmatpush3.bf16.msra.mxu0 %v5352_v0  ;;  %5276 = vmatpush3.bf16.msra.mxu1 %v5352_v0  ;;  %v677_v3 = vsel %vm675_vm0, 4294967295, %v5941_v2 }
  0x10   : > { %v678_v4 = vsel %vm676_vm1, %v677_v3, 0  ;;  %s10770_s30 = smov (!%p302_p3, %s4739_s30), 191 }
  0x11   : > { %v680_v5 = vand.u32 %v5353_v1, %v678_v4  ;;  %s5999_s8 = sshll.u32 %s10770_s30, 2  ;;  %s4748_s10 = sshll.u32 %s10770_s30, 3 }
  0x12   : > { %s6005_s11 = scalar_lea.vmem %s10260_s0, %s5999_s8  ;;  %s6011_s14 = scalar_lea.vmem %s10261_s1, %s5999_s8 }
  0x13   : > { %5209 = vmatprep.subr.bf16.mxu0 %v680_v5  ;;  %5277 = vmatprep.subr.bf16.mxu1 %v680_v5  ;;  %v5354_v6 = vld [vmem:[%s6005_s11] sm:$0xff]   ;;  %v5356_v8 = vld [vmem:[%s6005_s11 + $0x8] sm:$0xff]   ;;  %v5358_v10 = vld [vmem:[%s6005_s11 + $0x10] sm:$0xff]   ;;  %s6157_s19 = scalar_lea.vmem %s10265_s5, %s5999_s8  ;;  %s6171_s22 = scalar_lea.vmem %s10266_s6, %s5999_s8 }
  0x14   : > { %5210 = vmatpush3.bf16.msra.mxu0 %v680_v5  ;;  %5278 = vmatpush3.bf16.msra.mxu1 %v680_v5  ;;  %v5355_v7 = vld [vmem:[%s6011_s14] sm:$0xff]   ;;  %v5357_v9 = vld [vmem:[%s6011_s14 + $0x8] sm:$0xff]   ;;  %v5360_v11 = vld [vmem:[%s6011_s14 + $0x10] sm:$0xff]   ;;  %s10037_s12 = scalar_lea.vmem %s10267_s7, %s4748_s10 }
  0x15   : > { %5211 = vmatprep.mubr.msk.bf16.mxu0 %vm578_vm2, %v5354_v6  ;;  %5279 = vmatprep.mubr.msk.bf16.mxu1 %vm578_vm2, %v5355_v7  ;;  %v5359_v12 = vld [vmem:[%s6005_s11 + $0x18] sm:$0xff]   ;;  %v5362_v14 = vld [vmem:[%s6005_s11 + $0x20] sm:$0xff]   ;;  %v5363_v16 = vld [vmem:[%s6005_s11 + $0x28] sm:$0xff]  }
  0x16   : > { %v5361_v13 = vld [vmem:[%s6011_s14 + $0x18] sm:$0xff]   ;;  %v5364_v15 = vld [vmem:[%s6011_s14 + $0x20] sm:$0xff]   ;;  %v5365_v17 = vld [vmem:[%s6011_s14 + $0x28] sm:$0xff]  }
  0x17   : > { %5212 = vmatmul.mubr.msk.bf16.vlgmr.msra.gmra.mrb[0].mxu0 %vm578_vm2, %v5356_v8  ;;  %5280 = vmatmul.mubr.msk.bf16.vlgmr.msra.gmra.mrb[0].mxu1 %vm578_vm2, %v5357_v9  ;;  %v5366_v18 = vld [vmem:[%s6005_s11 + $0x30] sm:$0xff]   ;;  %v5367_v20 = vld [vmem:[%s6005_s11 + $0x38] sm:$0xff]   ;;  %v5370_v22 = vld [vmem:[%s6005_s11 + $0x40] sm:$0xff]  }
  0x18   : > { %5215 = vmatprep.mubr.msk.bf16.mxu0 %vm578_vm2, %v5358_v10  ;;  %5283 = vmatprep.mubr.msk.bf16.mxu1 %vm578_vm2, %v5360_v11  ;;  %v5368_v19 = vld [vmem:[%s6011_s14 + $0x30] sm:$0xff]   ;;  %v5369_v21 = vld [vmem:[%s6011_s14 + $0x38] sm:$0xff]   ;;  %v5372_v23 = vld [vmem:[%s6011_s14 + $0x40] sm:$0xff]  }
  0x19   : > { %v5371_v24 = vld [vmem:[%s6005_s11 + $0x48] sm:$0xff]   ;;  %v5374_v26 = vld [vmem:[%s6005_s11 + $0x50] sm:$0xff]   ;;  %v5375_v28 = vld [vmem:[%s6005_s11 + $0x58] sm:$0xff]  }
  0x1a   : > { %v5373_v25 = vld [vmem:[%s6011_s14 + $0x48] sm:$0xff]   ;;  %v5376_v27 = vld [vmem:[%s6011_s14 + $0x50] sm:$0xff]   ;;  %v5377_v29 = vld [vmem:[%s6011_s14 + $0x58] sm:$0xff]  }
  0x1b   : > { %v5378_v30 = vld [vmem:[%s6005_s11 + $0x60] sm:$0xff]   ;;  %v5379_v32 = vld [vmem:[%s6005_s11 + $0x68] sm:$0xff]   ;;  %v5382_v34 = vld [vmem:[%s6005_s11 + $0x70] sm:$0xff]  }
  0x1c   : > { %v5380_v31 = vld [vmem:[%s6011_s14 + $0x60] sm:$0xff]   ;;  %v5381_v33 = vld [vmem:[%s6011_s14 + $0x68] sm:$0xff]   ;;  %v5384_v35 = vld [vmem:[%s6011_s14 + $0x70] sm:$0xff]  }
  0x1d   : > { %v5383_v36 = vld [vmem:[%s6005_s11 + $0x78] sm:$0xff]   ;;  %v5386_v38 = vld [vmem:[%s6005_s11 + $0x80] sm:$0xff]   ;;  %v5387_v40 = vld [vmem:[%s6005_s11 + $0x88] sm:$0xff]  }
  0x1e   : > { %v5385_v37 = vld [vmem:[%s6011_s14 + $0x78] sm:$0xff]   ;;  %v5388_v39 = vld [vmem:[%s6011_s14 + $0x80] sm:$0xff]   ;;  %v5389_v41 = vld [vmem:[%s6011_s14 + $0x88] sm:$0xff]  }
  0x1f   : > { %5216 = vmatmul.mubr.msk.bf16.gmra.mrb[4].mxu0 %vm578_vm2, %v5359_v12  ;;  %5284 = vmatmul.mubr.msk.bf16.gmra.mrb[4].mxu1 %vm578_vm2, %v5361_v13  ;;  %v5390_v42 = vld [vmem:[%s6005_s11 + $0x90] sm:$0xff]   ;;  %v5391_v44 = vld [vmem:[%s6005_s11 + $0x98] sm:$0xff]   ;;  %v5394_v46 = vld [vmem:[%s6005_s11 + $0xa0] sm:$0xff]  }
  0x20   : > { %5219 = vmatprep.mubr.msk.bf16.mxu0 %vm578_vm2, %v5362_v14  ;;  %5287 = vmatprep.mubr.msk.bf16.mxu1 %vm578_vm2, %v5364_v15  ;;  %v5392_v43 = vld [vmem:[%s6011_s14 + $0x90] sm:$0xff]   ;;  %v5393_v45 = vld [vmem:[%s6011_s14 + $0x98] sm:$0xff]   ;;  %v5396_v47 = vld [vmem:[%s6011_s14 + $0xa0] sm:$0xff]  }
  0x21   : > { %v5395_v48 = vld [vmem:[%s6005_s11 + $0xa8] sm:$0xff]   ;;  %v5398_v50 = vld [vmem:[%s6005_s11 + $0xb0] sm:$0xff]   ;;  %v5399_v52 = vld [vmem:[%s6005_s11 + $0xb8] sm:$0xff]  }
  0x22   : > { %v5397_v49 = vld [vmem:[%s6011_s14 + $0xa8] sm:$0xff]   ;;  %v5400_v51 = vld [vmem:[%s6011_s14 + $0xb0] sm:$0xff]   ;;  %v5401_v53 = vld [vmem:[%s6011_s14 + $0xb8] sm:$0xff]  }
  0x23   : > { %v5402_v54 = vld [vmem:[%s6005_s11 + $0xc0] sm:$0xff]   ;;  %v5403_v56 = vld [vmem:[%s6005_s11 + $0xc8] sm:$0xff]   ;;  %v5406_v58 = vld [vmem:[%s6005_s11 + $0xd0] sm:$0xff]  }
  0x24   : > { %v5404_v55 = vld [vmem:[%s6011_s14 + $0xc0] sm:$0xff]   ;;  %v5405_v57 = vld [vmem:[%s6011_s14 + $0xc8] sm:$0xff]   ;;  %v5408_v59 = vld [vmem:[%s6011_s14 + $0xd0] sm:$0xff]  }
  0x25   : > { %v5407_v60 = vld [vmem:[%s6005_s11 + $0xd8] sm:$0xff]   ;;  %v5410_v62 = vld [vmem:[%s6005_s11 + $0xe0] sm:$0xff]   ;;  %v5411_v0 = vld [vmem:[%s6005_s11 + $0xe8] sm:$0xff]  }
  0x26   : > { %v5409_v61 = vld [vmem:[%s6011_s14 + $0xd8] sm:$0xff]   ;;  %v5412_v63 = vld [vmem:[%s6011_s14 + $0xe0] sm:$0xff]   ;;  %v5413_v1 = vld [vmem:[%s6011_s14 + $0xe8] sm:$0xff]  }
  0x27   : > { %5220 = vmatmul.mubr.msk.bf16.gmra.mrb[8].mxu0 %vm578_vm2, %v5363_v16  ;;  %5288 = vmatmul.mubr.msk.bf16.gmra.mrb[8].mxu1 %vm578_vm2, %v5365_v17  ;;  %v5414_v2 = vld [vmem:[%s6005_s11 + $0xf0] sm:$0xff]   ;;  %v5415_v4 = vld [vmem:[%s6005_s11 + $0xf8] sm:$0xff]   ;;  %v6144_v6 = vld [vmem:[%s10263_s3] ss:$0 sm:$0xff] }
  0x28   : > { %5223 = vmatprep.mubr.msk.bf16.mxu0 %vm578_vm2, %v5366_v18  ;;  %5291 = vmatprep.mubr.msk.bf16.mxu1 %vm578_vm2, %v5368_v19  ;;  %v5416_v3 = vld [vmem:[%s6011_s14 + $0xf0] sm:$0xff]   ;;  %v5417_v5 = vld [vmem:[%s6011_s14 + $0xf8] sm:$0xff]  }
  0x2f   : > { %5224 = vmatmul.mubr.msk.bf16.gmra.mrb[12].mxu0 %vm578_vm2, %v5367_v20  ;;  %5292 = vmatmul.mubr.msk.bf16.gmra.mrb[12].mxu1 %vm578_vm2, %v5369_v21 }
  0x30   : > { %5227 = vmatprep.mubr.msk.bf16.mxu0 %vm578_vm2, %v5370_v22  ;;  %5295 = vmatprep.mubr.msk.bf16.mxu1 %vm578_vm2, %v5372_v23 }
  0x37   : > { %5228 = vmatmul.mubr.msk.bf16.gmra.mrb[16].mxu0 %vm578_vm2, %v5371_v24  ;;  %5296 = vmatmul.mubr.msk.bf16.gmra.mrb[16].mxu1 %vm578_vm2, %v5373_v25 }
  0x38   : > { %5231 = vmatprep.mubr.msk.bf16.mxu0 %vm578_vm2, %v5374_v26  ;;  %5299 = vmatprep.mubr.msk.bf16.mxu1 %vm578_vm2, %v5376_v27 }
  0x3f   : > { %5232 = vmatmul.mubr.msk.bf16.gmra.mrb[20].mxu0 %vm578_vm2, %v5375_v28  ;;  %5300 = vmatmul.mubr.msk.bf16.gmra.mrb[20].mxu1 %vm578_vm2, %v5377_v29 }
  0x40   : > { %5235 = vmatprep.mubr.msk.bf16.mxu0 %vm578_vm2, %v5378_v30  ;;  %5303 = vmatprep.mubr.msk.bf16.mxu1 %vm578_vm2, %v5380_v31 }
  0x47   : > { %5236 = vmatmul.mubr.msk.bf16.gmra.mrb[24].mxu0 %vm578_vm2, %v5379_v32  ;;  %5304 = vmatmul.mubr.msk.bf16.gmra.mrb[24].mxu1 %vm578_vm2, %v5381_v33 }
  0x48   : > { %5239 = vmatprep.mubr.msk.bf16.mxu0 %vm578_vm2, %v5382_v34  ;;  %5307 = vmatprep.mubr.msk.bf16.mxu1 %vm578_vm2, %v5384_v35 }
  0x4f   : > { %5240 = vmatmul.mubr.msk.bf16.gmra.mrb[28].mxu0 %vm578_vm2, %v5383_v36  ;;  %5308 = vmatmul.mubr.msk.bf16.gmra.mrb[28].mxu1 %vm578_vm2, %v5385_v37 }
  0x50   : > { %5243 = vmatprep.mubr.msk.bf16.mxu0 %vm578_vm2, %v5386_v38  ;;  %5311 = vmatprep.mubr.msk.bf16.mxu1 %vm578_vm2, %v5388_v39 }
  0x57   : > { %5244 = vmatmul.mubr.msk.bf16.gmra.mrb[32].mxu0 %vm578_vm2, %v5387_v40  ;;  %5312 = vmatmul.mubr.msk.bf16.gmra.mrb[32].mxu1 %vm578_vm2, %v5389_v41 }
  0x58   : > { %5247 = vmatprep.mubr.msk.bf16.mxu0 %vm578_vm2, %v5390_v42  ;;  %5315 = vmatprep.mubr.msk.bf16.mxu1 %vm578_vm2, %v5392_v43 }
  0x5f   : > { %5248 = vmatmul.mubr.msk.bf16.gmra.mrb[36].mxu0 %vm578_vm2, %v5391_v44  ;;  %5316 = vmatmul.mubr.msk.bf16.gmra.mrb[36].mxu1 %vm578_vm2, %v5393_v45 }
  0x60   : > { %5251 = vmatprep.mubr.msk.bf16.mxu0 %vm578_vm2, %v5394_v46  ;;  %5319 = vmatprep.mubr.msk.bf16.mxu1 %vm578_vm2, %v5396_v47 }
  0x67   : > { %5252 = vmatmul.mubr.msk.bf16.gmra.mrb[40].mxu0 %vm578_vm2, %v5395_v48  ;;  %5320 = vmatmul.mubr.msk.bf16.gmra.mrb[40].mxu1 %vm578_vm2, %v5397_v49 }
  0x68   : > { %5255 = vmatprep.mubr.msk.bf16.mxu0 %vm578_vm2, %v5398_v50  ;;  %5323 = vmatprep.mubr.msk.bf16.mxu1 %vm578_vm2, %v5400_v51 }
  0x6f   : > { %5256 = vmatmul.mubr.msk.bf16.gmra.mrb[44].mxu0 %vm578_vm2, %v5399_v52  ;;  %5324 = vmatmul.mubr.msk.bf16.gmra.mrb[44].mxu1 %vm578_vm2, %v5401_v53 }
  0x70   : > { %5259 = vmatprep.mubr.msk.bf16.mxu0 %vm578_vm2, %v5402_v54  ;;  %5327 = vmatprep.mubr.msk.bf16.mxu1 %vm578_vm2, %v5404_v55 }
  0x77   : > { %5260 = vmatmul.mubr.msk.bf16.gmra.mrb[48].mxu0 %vm578_vm2, %v5403_v56  ;;  %5328 = vmatmul.mubr.msk.bf16.gmra.mrb[48].mxu1 %vm578_vm2, %v5405_v57 }
  0x78   : > { %5263 = vmatprep.mubr.msk.bf16.mxu0 %vm578_vm2, %v5406_v58  ;;  %5331 = vmatprep.mubr.msk.bf16.mxu1 %vm578_vm2, %v5408_v59 }
  0x7f   : > { %5264 = vmatmul.mubr.msk.bf16.gmra.mrb[52].mxu0 %vm578_vm2, %v5407_v60  ;;  %5332 = vmatmul.mubr.msk.bf16.gmra.mrb[52].mxu1 %vm578_vm2, %v5409_v61 }
  0x80   : > { %5267 = vmatprep.mubr.msk.bf16.mxu0 %vm578_vm2, %v5410_v62  ;;  %5335 = vmatprep.mubr.msk.bf16.mxu1 %vm578_vm2, %v5412_v63 }
  0x87   : > { %5268 = vmatmul.mubr.msk.bf16.gmra.mrb[56].mxu0 %vm578_vm2, %v5411_v0  ;;  %5336 = vmatmul.mubr.msk.bf16.gmra.mrb[56].mxu1 %vm578_vm2, %v5413_v1 }
  0x88   : > { %5271 = vmatprep.mubr.msk.bf16.mxu0 %vm578_vm2, %v5414_v2  ;;  %5339 = vmatprep.mubr.msk.bf16.mxu1 %vm578_vm2, %v5416_v3 }
  0x8f   : > { %5272 = vmatmul.mubr.msk.bf16.gmra.mrb[60].mxu0 %vm578_vm2, %v5415_v4  ;;  %5340 = vmatmul.mubr.msk.bf16.gmra.mrb[60].mxu1 %vm578_vm2, %v5417_v5 }
  0xea   : > { %v5213_v7 = vpop.f32.mrb[0].mxu0  ;;  %v5281_v9 = vpop.f32.mrb[0].mxu1 }
  0xeb   : > { %v725_v8 = vadd.f32 %v5213_v7, %v6144_v6  ;;  %v716_v10 = vpop.f32.mrb[1].mxu0  ;;  %v1334_v11 = vadd.f32 %v5281_v9, %v6144_v6  ;;  %v1325_v13 = vpop.f32.mrb[1].mxu1 }
  0xec   : > { %v717_v12 = vadd.f32 %v6144_v6, %v716_v10  ;;  %v5214_v14 = vpop.f32.mrb[2].mxu0  ;;  %v1326_v16 = vadd.f32 %v6144_v6, %v1325_v13  ;;  %v5282_v18 = vpop.f32.mrb[2].mxu1 }
  0xed   : > { %v6149_v15 = vmax.f32 %v725_v8, 0.0  ;;  %v728_v17 = vadd.f32 %v5214_v14, %v6144_v6  ;;  %v719_v19 = vpop.f32.mrb[3].mxu0  ;;  %v6159_v20 = vmax.f32 %v1334_v11, 0.0  ;;  %v1337_v22 = vadd.f32 %v5282_v18, %v6144_v6  ;;  %v1328_v24 = vpop.f32.mrb[3].mxu1 }
  0xee   : > { %v6161_v21 = vmax.f32 %v717_v12, 0.0  ;;  %v720_v23 = vadd.f32 %v6144_v6, %v719_v19  ;;  %v6173_v26 = vmax.f32 %v1326_v16, 0.0  ;;  %v1329_v28 = vadd.f32 %v6144_v6, %v1328_v24 }
  0xef   : > { %10409 = vst [vmem:[#allocation2_spill] sm:$0xff] %v6149_v15  ;;  %10410 = vst [vmem:[#allocation3_spill] sm:$0xff] %v6159_v20  ;;  %v5013_v25 = vpack.c.bf16 %v6149_v15, %v6149_v15  ;;  %v6175_v27 = vmax.f32 %v728_v17, 0.0  ;;  %v5077_v29 = vpack.c.bf16 %v6159_v20, %v6159_v20  ;;  %v6182_v31 = vmax.f32 %v1337_v22, 0.0 }
  0xf0   : > { %10411 = vst [vmem:[#allocation4_spill] sm:$0xff] %v6161_v21  ;;  %10412 = vst [vmem:[#allocation5_spill] sm:$0xff] %v6173_v26  ;;  %v5011_v30 = vpack.c.bf16 %v6161_v21, %v6161_v21  ;;  %v6184_v32 = vmax.f32 %v720_v23, 0.0  ;;  %v5075_v33 = vpack.c.bf16 %v6173_v26, %v6173_v26  ;;  %v6192_v35 = vmax.f32 %v1329_v28, 0.0 }
  0xf1   : > { %10413 = vst [vmem:[#allocation6_spill] sm:$0xff] %v6175_v27  ;;  %10414 = vst [vmem:[#allocation7_spill] sm:$0xff] %v6182_v31  ;;  %v5014_v34 = vpack.c.bf16 %v6175_v27, %v6175_v27  ;;  %v3184_v36 = vmul.f32 %v6159_v20, %v6159_v20  ;;  %v5078_v37 = vpack.c.bf16 %v6182_v31, %v6182_v31 }
  0xf2   : > { %10415 = vst [vmem:[#allocation8_spill] sm:$0xff] %v6184_v32  ;;  %1967 = vst.msk [vmem:[%s6157_s19 + $0x8] sm:$0xf] %vm1964_vm3, %v5013_v25  ;;  %v5012_v38 = vpack.c.bf16 %v6184_v32, %v6184_v32  ;;  %v2351_v39 = vmul.f32 %v6149_v15, %v6149_v15  ;;  %v5217_v40 = vpop.f32.mrb[4].mxu0  ;;  %v5076_v41 = vpack.c.bf16 %v6192_v35, %v6192_v35  ;;  %v5285_v46 = vpop.f32.mrb[4].mxu1 }
  0xf3   : > { %10416 = vst [vmem:[#allocation9_spill] sm:$0xff] %v6192_v35  ;;  %2287 = vst.msk [vmem:[%s6171_s22 + $0x8] sm:$0xf] %vm1964_vm3, %v5077_v29  ;;  %v3252_v42 = vsel %vm2413_vm4, %v3184_v36, 0.0  ;;  %v741_v43 = vadd.f32 %v5217_v40, %v6144_v6  ;;  %v732_v44 = vpop.f32.mrb[5].mxu0  ;;  %v2349_v45 = vmul.f32 %v6161_v21, %v6161_v21  ;;  %v2352_v48 = vmul.f32 %v6175_v27, %v6175_v27  ;;  %v1341_v52 = vpop.f32.mrb[5].mxu1 }
  0xf4   : > { %1965 = vst.msk [vmem:[%s6157_s19] sm:$0xf] %vm1964_vm3, %v5011_v30  ;;  %2285 = vst.msk [vmem:[%s6171_s22] sm:$0xf] %vm1964_vm3, %v5075_v33  ;;  %3253 = vadd.xlane.f32.xlu0 %v3252_v42  ;;  %v2420_v47 = vsel %vm2413_vm4, %v2351_v39, 0.0  ;;  %v733_v49 = vadd.f32 %v6144_v6, %v732_v44  ;;  %v5218_v50 = vpop.f32.mrb[6].mxu0  ;;  %v1350_v51 = vadd.f32 %v5285_v46, %v6144_v6 }
  0xf5   : > { %1968 = vst.msk [vmem:[%s6157_s19 + $0xc] sm:$0xf] %vm1964_vm3, %v5014_v34  ;;  %2288 = vst.msk [vmem:[%s6171_s22 + $0xc] sm:$0xf] %vm1964_vm3, %v5078_v37  ;;  %2421 = vadd.xlane.f32.xlu1 %v2420_v47  ;;  %v6227_v53 = vmax.f32 %v741_v43, 0.0  ;;  %v2414_v54 = vsel %vm2413_vm4, %v2349_v45, 0.0  ;;  %v744_v55 = vadd.f32 %v5218_v50, %v6144_v6  ;;  %v1342_v57 = vadd.f32 %v6144_v6, %v1341_v52 }
  0xf6   : > { %1966 = vst.msk [vmem:[%s6157_s19 + $0x4] sm:$0xf] %vm1964_vm3, %v5012_v38  ;;  %2286 = vst.msk [vmem:[%s6171_s22 + $0x4] sm:$0xf] %vm1964_vm3, %v5076_v41  ;;  %v735_v56 = vpop.f32.mrb[7].mxu0  ;;  %v5286_v58 = vpop.f32.mrb[6].mxu1  ;;  %v3185_v62 = vmul.f32 %v6182_v31, %v6182_v31  ;;  %v3182_v3 = vmul.f32 %v6173_v26, %v6173_v26  ;;  %v3183_v14 = vmul.f32 %v6192_v35, %v6192_v35 }
  0xf7   : > { %10417 = vst [vmem:[#allocation10_spill] sm:$0xff] %v6227_v53  ;;  %v6232_v59 = vmax.f32 %v733_v49, 0.0  ;;  %v736_v60 = vadd.f32 %v6144_v6, %v735_v56  ;;  %v6235_v61 = vmax.f32 %v1350_v51, 0.0  ;;  %v1344_v63 = vpop.f32.mrb[7].mxu1  ;;  %v5017_v0 = vpack.c.bf16 %v6227_v53, %v6227_v53 }
  0xf8   : > { %v6241_v1 = vmax.f32 %v744_v55, 0.0  ;;  %v6243_v2 = vmax.f32 %v1342_v57, 0.0  ;;  %v2423_v4 = vsel %vm2413_vm4, %v2352_v48, 0.0  ;;  %2415 = vadd.xlane.f32.xlu0 %v2414_v54  ;;  %v1353_v11 = vadd.f32 %v5286_v58, %v6144_v6 }
  0xf9   : > { %10418 = vst [vmem:[#allocation11_spill] sm:$0xff] %v6232_v59  ;;  %10419 = vst [vmem:[#allocation12_spill] sm:$0xff] %v6235_v61  ;;  %v5015_v5 = vpack.c.bf16 %v6232_v59, %v6232_v59  ;;  %v6250_v7 = vmax.f32 %v736_v60, 0.0  ;;  %v5081_v8 = vpack.c.bf16 %v6235_v61, %v6235_v61  ;;  %2424 = vadd.xlane.f32.xlu1 %v2423_v4  ;;  %v3255_v18 = vsel %vm2413_vm4, %v3185_v62, 0.0 }
  0xfa   : > { %10420 = vst [vmem:[#allocation13_spill] sm:$0xff] %v6241_v1  ;;  %10421 = vst [vmem:[#allocation14_spill] sm:$0xff] %v6243_v2  ;;  %v5018_v9 = vpack.c.bf16 %v6241_v1, %v6241_v1  ;;  %v5079_v10 = vpack.c.bf16 %v6243_v2, %v6243_v2  ;;  %v1345_v13 = vadd.f32 %v6144_v6, %v1344_v63  ;;  %v5221_v17 = vpop.f32.mrb[8].mxu0  ;;  %v3246_v19 = vsel %vm2413_vm4, %v3182_v3, 0.0  ;;  %v5289_v25 = vpop.f32.mrb[8].mxu1 }
  0xfb   : > { %10422 = vst [vmem:[#allocation15_spill] sm:$0xff] %v6250_v7  ;;  %1971 = vst.msk [vmem:[%s6157_s19 + $0x18] sm:$0xf] %vm1964_vm3, %v5017_v0  ;;  %v5016_v12 = vpack.c.bf16 %v6250_v7, %v6250_v7  ;;  %v2350_v16 = vmul.f32 %v6184_v32, %v6184_v32  ;;  %v6278_v22 = vmax.f32 %v1353_v11, 0.0  ;;  %v757_v23 = vadd.f32 %v5221_v17, %v6144_v6  ;;  %v748_v24 = vpop.f32.mrb[9].mxu0  ;;  %v1357_v36 = vpop.f32.mrb[9].mxu1 }
  0xfc   : > { %1969 = vst.msk [vmem:[%s6157_s19 + $0x10] sm:$0xf] %vm1964_vm3, %v5015_v5  ;;  %2291 = vst.msk [vmem:[%s6171_s22 + $0x18] sm:$0xf] %vm1964_vm3, %v5081_v8  ;;  %3247 = vadd.xlane.f32.xlu0 %v3246_v19  ;;  %v6283_v28 = vmax.f32 %v1345_v13, 0.0  ;;  %v2356_v29 = vmul.f32 %v6241_v1, %v6241_v1  ;;  %v2355_v30 = vmul.f32 %v6227_v53, %v6227_v53  ;;  %v5222_v34 = vpop.f32.mrb[10].mxu0 }
  0xfd   : > { %1972 = vst.msk [vmem:[%s6157_s19 + $0x1c] sm:$0xf] %vm1964_vm3, %v5018_v9  ;;  %2289 = vst.msk [vmem:[%s6171_s22 + $0x10] sm:$0xf] %vm1964_vm3, %v5079_v10  ;;  %v749_v33 = vadd.f32 %v6144_v6, %v748_v24  ;;  %3256 = vadd.xlane.f32.xlu1 %v3255_v18  ;;  %v5082_v37 = vpack.c.bf16 %v6278_v22, %v6278_v22  ;;  %v6292_v38 = vmax.f32 %v757_v23, 0.0  ;;  %v751_v39 = vpop.f32.mrb[11].mxu0 }
  0xfe   : > { %10423 = vst [vmem:[#allocation16_spill] sm:$0xff] %v6278_v22  ;;  %1970 = vst.msk [vmem:[%s6157_s19 + $0x14] sm:$0xf] %vm1964_vm3, %v5016_v12  ;;  %v5290_v40 = vpop.f32.mrb[10].mxu1  ;;  %v5080_v41 = vpack.c.bf16 %v6283_v28, %v6283_v28  ;;  %v3249_v42 = vsel %vm2413_vm4, %v3183_v14, 0.0  ;;  %v2417_v43 = vsel %vm2413_vm4, %v2350_v16, 0.0  ;;  %v760_v47 = vadd.f32 %v5222_v34, %v6144_v6 }
  0xff   : > { %10424 = vst [vmem:[#allocation17_spill] sm:$0xff] %v6283_v28  ;;  %10425 = vst [vmem:[#allocation18_spill] sm:$0xff] %v6292_v38  ;;  %v6298_v44 = vmax.f32 %v749_v33, 0.0  ;;  %v1360_v45 = vpop.f32.mrb[11].mxu1  ;;  %v5021_v46 = vpack.c.bf16 %v6292_v38, %v6292_v38  ;;  %v752_v48 = vadd.f32 %v6144_v6, %v751_v39  ;;  %v1366_v49 = vadd.f32 %v5289_v25, %v6144_v6 }
 0x100   : > { %2292 = vst.msk [vmem:[%s6171_s22 + $0x1c] sm:$0xf] %vm1964_vm3, %v5082_v37  ;;  %2290 = vst.msk [vmem:[%s6171_s22 + $0x14] sm:$0xf] %vm1964_vm3, %v5080_v41  ;;  %2418 = vadd.xlane.f32.xlu0 %v2417_v43  ;;  %v2435_v50 = vsel %vm2413_vm4, %v2356_v29, 0.0  ;;  %v2432_v51 = vsel %vm2413_vm4, %v2355_v30, 0.0  ;;  %v1358_v54 = vadd.f32 %v6144_v6, %v1357_v36  ;;  %v3189_v55 = vmul.f32 %v6278_v22, %v6278_v22 }
 0x101   : > { %10426 = vst [vmem:[#allocation19_spill] sm:$0xff] %v6298_v44  ;;  %v5019_v52 = vpack.c.bf16 %v6298_v44, %v6298_v44  ;;  %3250 = vadd.xlane.f32.xlu1 %v3249_v42  ;;  %1975 = vst.msk [vmem:[%s6157_s19 + $0x28] sm:$0xf] %vm1964_vm3, %v5021_v46  ;;  %v6318_v56 = vmax.f32 %v760_v47, 0.0  ;;  %v6320_v57 = vmax.f32 %v752_v48, 0.0  ;;  %v6322_v58 = vmax.f32 %v1366_v49, 0.0 }
 0x102   : > { %v3188_v60 = vmul.f32 %v6235_v61, %v6235_v61  ;;  %v6328_v62 = vmax.f32 %v1358_v54, 0.0  ;;  %v1369_v63 = vadd.f32 %v5290_v40, %v6144_v6  ;;  %v1361_v0 = vadd.f32 %v6144_v6, %v1360_v45  ;;  %v5225_v3 = vpop.f32.mrb[12].mxu0  ;;  %v5293_v11 = vpop.f32.mrb[12].mxu1 }
 0x103   : > { %10427 = vst [vmem:[#allocation20_spill] sm:$0xff] %v6318_v56  ;;  %10428 = vst [vmem:[#allocation21_spill] sm:$0xff] %v6320_v57  ;;  %v5022_v4 = vpack.c.bf16 %v6318_v56, %v6318_v56  ;;  %v5020_v5 = vpack.c.bf16 %v6320_v57, %v6320_v57  ;;  %v5085_v8 = vpack.c.bf16 %v6322_v58, %v6322_v58  ;;  %v764_v10 = vpop.f32.mrb[13].mxu0  ;;  %v1373_v18 = vpop.f32.mrb[13].mxu1  ;;  %v3267_v34 = vsel %vm2413_vm4, %v3189_v55, 0.0 }
 0x104   : > { %10429 = vst [vmem:[#allocation22_spill] sm:$0xff] %v6322_v58  ;;  %1973 = vst.msk [vmem:[%s6157_s19 + $0x20] sm:$0xf] %vm1964_vm3, %v5019_v52  ;;  %v2354_v9 = vmul.f32 %v6250_v7, %v6250_v7  ;;  %2433 = vadd.xlane.f32.xlu0 %v2432_v51  ;;  %v5083_v12 = vpack.c.bf16 %v6328_v62, %v6328_v62  ;;  %v2353_v13 = vmul.f32 %v6232_v59, %v6232_v59  ;;  %v5226_v17 = vpop.f32.mrb[14].mxu0  ;;  %v5294_v23 = vpop.f32.mrb[14].mxu1 }
 0x105   : > { %10430 = vst [vmem:[#allocation23_spill] sm:$0xff] %v6328_v62  ;;  %v6344_v14 = vmax.f32 %v1369_v63, 0.0  ;;  %v6346_v16 = vmax.f32 %v1361_v0, 0.0  ;;  %2436 = vadd.xlane.f32.xlu1 %v2435_v50  ;;  %1976 = vst.msk [vmem:[%s6157_s19 + $0x2c] sm:$0xf] %vm1964_vm3, %v5022_v4  ;;  %v767_v19 = vpop.f32.mrb[15].mxu0  ;;  %v773_v29 = vadd.f32 %v5225_v3, %v6144_v6  ;;  %v765_v30 = vadd.f32 %v6144_v6, %v764_v10 }
 0x106   : > { %1974 = vst.msk [vmem:[%s6157_s19 + $0x24] sm:$0xf] %vm1964_vm3, %v5020_v5  ;;  %2295 = vst.msk [vmem:[%s6171_s22 + $0x28] sm:$0xf] %vm1964_vm3, %v5085_v8  ;;  %v1376_v33 = vpop.f32.mrb[15].mxu1  ;;  %v3264_v36 = vsel %vm2413_vm4, %v3188_v60, 0.0  ;;  %v776_v42 = vadd.f32 %v5226_v17, %v6144_v6  ;;  %v768_v43 = vadd.f32 %v6144_v6, %v767_v19  ;;  %v1382_v45 = vadd.f32 %v5293_v11, %v6144_v6 }
 0x107   : > { %10431 = vst [vmem:[#allocation24_spill] sm:$0xff] %v6344_v14  ;;  %10432 = vst [vmem:[#allocation25_spill] sm:$0xff] %v6346_v16  ;;  %v5086_v24 = vpack.c.bf16 %v6344_v14, %v6344_v14  ;;  %v5084_v25 = vpack.c.bf16 %v6346_v16, %v6346_v16  ;;  %v2429_v37 = vsel %vm2413_vm4, %v2354_v9, 0.0  ;;  %v2426_v39 = vsel %vm2413_vm4, %v2353_v13, 0.0 }
 0x108   : > { %2293 = vst.msk [vmem:[%s6171_s22 + $0x20] sm:$0xf] %vm1964_vm3, %v5083_v12  ;;  %3265 = vadd.xlane.f32.xlu0 %v3264_v36  ;;  %v6370_v40 = vmax.f32 %v773_v29, 0.0  ;;  %v6372_v41 = vmax.f32 %v765_v30, 0.0  ;;  %v1374_v46 = vadd.f32 %v6144_v6, %v1373_v18  ;;  %v3187_v47 = vmul.f32 %v6283_v28, %v6283_v28 }
 0x109   : > { %2296 = vst.msk [vmem:[%s6171_s22 + $0x2c] sm:$0xf] %vm1964_vm3, %v5086_v24  ;;  %2294 = vst.msk [vmem:[%s6171_s22 + $0x24] sm:$0xf] %vm1964_vm3, %v5084_v25  ;;  %3268 = vadd.xlane.f32.xlu1 %v3267_v34  ;;  %v3186_v48 = vmul.f32 %v6243_v2, %v6243_v2  ;;  %v6386_v52 = vmax.f32 %v776_v42, 0.0  ;;  %v6388_v54 = vmax.f32 %v768_v43, 0.0  ;;  %v2360_v3 = vmul.f32 %v6318_v56, %v6318_v56 }
 0x10a   : > { %10433 = vst [vmem:[#allocation26_spill] sm:$0xff] %v6370_v40  ;;  %10434 = vst [vmem:[#allocation27_spill] sm:$0xff] %v6372_v41  ;;  %v5025_v49 = vpack.c.bf16 %v6370_v40, %v6370_v40  ;;  %v5023_v50 = vpack.c.bf16 %v6372_v41, %v6372_v41  ;;  %v5229_v51 = vpop.f32.mrb[16].mxu0  ;;  %v6390_v55 = vmax.f32 %v1382_v45, 0.0  ;;  %v6392_v60 = vmax.f32 %v1374_v46, 0.0  ;;  %v5297_v0 = vpop.f32.mrb[16].mxu1 }
 0x10b   : > { %10435 = vst [vmem:[#allocation28_spill] sm:$0xff] %v6386_v52  ;;  %10436 = vst [vmem:[#allocation29_spill] sm:$0xff] %v6388_v54  ;;  %v780_v63 = vpop.f32.mrb[17].mxu0  ;;  %v2359_v4 = vmul.f32 %v6292_v38, %v6292_v38  ;;  %v1385_v5 = vadd.f32 %v5294_v23, %v6144_v6  ;;  %v1377_v8 = vadd.f32 %v6144_v6, %v1376_v33  ;;  %v1389_v10 = vpop.f32.mrb[17].mxu1  ;;  %v3261_v30 = vsel %vm2413_vm4, %v3187_v47, 0.0 }
 0x10c   : > { %10437 = vst [vmem:[#allocation30_spill] sm:$0xff] %v6390_v55  ;;  %10438 = vst [vmem:[#allocation31_spill] sm:$0xff] %v6392_v60  ;;  %2427 = vadd.xlane.f32.xlu0 %v2426_v39  ;;  %v5230_v9 = vpop.f32.mrb[18].mxu0  ;;  %v5026_v11 = vpack.c.bf16 %v6386_v52, %v6386_v52  ;;  %v5024_v12 = vpack.c.bf16 %v6388_v54, %v6388_v54  ;;  %v5089_v13 = vpack.c.bf16 %v6390_v55, %v6390_v55  ;;  %v5298_v19 = vpop.f32.mrb[18].mxu1 }
 0x10d   : > { %1979 = vst.msk [vmem:[%s6157_s19 + $0x38] sm:$0xf] %vm1964_vm3, %v5025_v49  ;;  %1977 = vst.msk [vmem:[%s6157_s19 + $0x30] sm:$0xf] %vm1964_vm3, %v5023_v50  ;;  %2430 = vadd.xlane.f32.xlu1 %v2429_v37  ;;  %v5087_v17 = vpack.c.bf16 %v6392_v60, %v6392_v60  ;;  %v783_v18 = vpop.f32.mrb[19].mxu0  ;;  %v3192_v23 = vmul.f32 %v6322_v58, %v6322_v58  ;;  %v6414_v24 = vmax.f32 %v1385_v5, 0.0 }
 0x10e   : > { %v6416_v25 = vmax.f32 %v1377_v8, 0.0  ;;  %v1392_v29 = vpop.f32.mrb[19].mxu1  ;;  %v3258_v33 = vsel %vm2413_vm4, %v3186_v48, 0.0  ;;  %1980 = vst.msk [vmem:[%s6157_s19 + $0x3c] sm:$0xf] %vm1964_vm3, %v5026_v11  ;;  %v789_v37 = vadd.f32 %v5229_v51, %v6144_v6  ;;  %v781_v39 = vadd.f32 %v6144_v6, %v780_v63 }
 0x10f   : > { %10439 = vst [vmem:[#allocation32_spill] sm:$0xff] %v6414_v24  ;;  %1978 = vst.msk [vmem:[%s6157_s19 + $0x34] sm:$0xf] %vm1964_vm3, %v5024_v12  ;;  %v5090_v34 = vpack.c.bf16 %v6414_v24, %v6414_v24  ;;  %v2447_v42 = vsel %vm2413_vm4, %v2360_v3, 0.0  ;;  %v2444_v43 = vsel %vm2413_vm4, %v2359_v4, 0.0  ;;  %v3193_v45 = vmul.f32 %v6344_v14, %v6344_v14 }
 0x110   : > { %10440 = vst [vmem:[#allocation33_spill] sm:$0xff] %v6416_v25  ;;  %2299 = vst.msk [vmem:[%s6171_s22 + $0x38] sm:$0xf] %vm1964_vm3, %v5089_v13  ;;  %3259 = vadd.xlane.f32.xlu0 %v3258_v33  ;;  %v5088_v36 = vpack.c.bf16 %v6416_v25, %v6416_v25  ;;  %v3276_v46 = vsel %vm2413_vm4, %v3192_v23, 0.0  ;;  %v2358_v47 = vmul.f32 %v6320_v57, %v6320_v57  ;;  %v6445_v48 = vmax.f32 %v789_v37, 0.0 }
 0x111   : > { %2297 = vst.msk [vmem:[%s6171_s22 + $0x30] sm:$0xf] %vm1964_vm3, %v5087_v17  ;;  %3262 = vadd.xlane.f32.xlu1 %v3261_v30  ;;  %2300 = vst.msk [vmem:[%s6171_s22 + $0x3c] sm:$0xf] %vm1964_vm3, %v5090_v34  ;;  %v6447_v49 = vmax.f32 %v781_v39, 0.0  ;;  %v792_v51 = vadd.f32 %v5230_v9, %v6144_v6  ;;  %v784_v63 = vadd.f32 %v6144_v6, %v783_v18 }
 0x112   : > { %2298 = vst.msk [vmem:[%s6171_s22 + $0x34] sm:$0xf] %vm1964_vm3, %v5088_v36  ;;  %10441 = vst [vmem:[#allocation34_spill] sm:$0xff] %v6445_v48  ;;  %v5233_v50 = vpop.f32.mrb[20].mxu0  ;;  %v1398_v3 = vadd.f32 %v5297_v0, %v6144_v6  ;;  %v1390_v4 = vadd.f32 %v6144_v6, %v1389_v10  ;;  %v5301_v8 = vpop.f32.mrb[20].mxu1  ;;  %v2357_v11 = vmul.f32 %v6298_v44, %v6298_v44 }
 0x113   : > { %10442 = vst [vmem:[#allocation35_spill] sm:$0xff] %v6447_v49  ;;  %v796_v5 = vpop.f32.mrb[21].mxu0  ;;  %v3191_v12 = vmul.f32 %v6346_v16, %v6346_v16  ;;  %v5029_v9 = vpack.c.bf16 %v6445_v48, %v6445_v48  ;;  %v5027_v13 = vpack.c.bf16 %v6447_v49, %v6447_v49  ;;  %v1405_v17 = vpop.f32.mrb[21].mxu1  ;;  %v6461_v10 = vmax.f32 %v792_v51, 0.0 }
 0x114   : > { %2445 = vadd.xlane.f32.xlu0 %v2444_v43  ;;  %v5234_v0 = vpop.f32.mrb[22].mxu0  ;;  %v6463_v18 = vmax.f32 %v784_v63, 0.0  ;;  %v6465_v23 = vmax.f32 %v1398_v3, 0.0  ;;  %v6467_v30 = vmax.f32 %v1390_v4, 0.0  ;;  %v6469_v34 = vpop.f32.mrb[22].mxu1  ;;  %v3190_v36 = vmul.f32 %v6328_v62, %v6328_v62 }
 0x115   : > { %2448 = vadd.xlane.f32.xlu1 %v2447_v42  ;;  %10443 = vst [vmem:[#allocation36_spill] sm:$0xff] %v6461_v10  ;;  %v799_v33 = vpop.f32.mrb[23].mxu0  ;;  %v2364_v37 = vmul.f32 %v6386_v52, %v6386_v52  ;;  %1983 = vst.msk [vmem:[%s6157_s19 + $0x48] sm:$0xf] %vm1964_vm3, %v5029_v9  ;;  %v1401_v39 = vadd.f32 %v5298_v19, %v6144_v6  ;;  %v1393_v42 = vadd.f32 %v6144_v6, %v1392_v29  ;;  %v1408_v43 = vpop.f32.mrb[23].mxu1 }
 0x116   : > { %10444 = vst [vmem:[#allocation37_spill] sm:$0xff] %v6463_v18  ;;  %10445 = vst [vmem:[#allocation38_spill] sm:$0xff] %v6465_v23  ;;  %v5030_v51 = vpack.c.bf16 %v6461_v10, %v6461_v10  ;;  %v5028_v63 = vpack.c.bf16 %v6463_v18, %v6463_v18  ;;  %v5093_v3 = vpack.c.bf16 %v6465_v23, %v6465_v23  ;;  %v3279_v19 = vsel %vm2413_vm4, %v3193_v45, 0.0 }
 0x117   : > { %10446 = vst [vmem:[#allocation39_spill] sm:$0xff] %v6467_v30  ;;  %1981 = vst.msk [vmem:[%s6157_s19 + $0x40] sm:$0xf] %vm1964_vm3, %v5027_v13  ;;  %v5091_v4 = vpack.c.bf16 %v6467_v30, %v6467_v30  ;;  %v6490_v29 = vmax.f32 %v1401_v39, 0.0  ;;  %v6492_v9 = vmax.f32 %v1393_v42, 0.0  ;;  %v2441_v13 = vsel %vm2413_vm4, %v2358_v47, 0.0 }
 0x118   : > { %3277 = vadd.xlane.f32.xlu0 %v3276_v46  ;;  %v2438_v52 = vsel %vm2413_vm4, %v2357_v11, 0.0  ;;  %v3273_v62 = vsel %vm2413_vm4, %v3191_v12, 0.0  ;;  %v2363_v44 = vmul.f32 %v6370_v40, %v6370_v40  ;;  %1984 = vst.msk [vmem:[%s6157_s19 + $0x4c] sm:$0xf] %vm1964_vm3, %v5030_v51  ;;  %1982 = vst.msk [vmem:[%s6157_s19 + $0x44] sm:$0xf] %vm1964_vm3, %v5028_v63  ;;  %v805_v47 = vadd.f32 %v5233_v50, %v6144_v6 }
 0x119   : > { %10447 = vst [vmem:[#allocation40_spill] sm:$0xff] %v6490_v29  ;;  %10448 = vst [vmem:[#allocation41_spill] sm:$0xff] %v6492_v9  ;;  %3280 = vadd.xlane.f32.xlu1 %v3279_v19  ;;  %v5094_v45 = vpack.c.bf16 %v6490_v29, %v6490_v29  ;;  %v5092_v46 = vpack.c.bf16 %v6492_v9, %v6492_v9  ;;  %v797_v11 = vadd.f32 %v6144_v6, %v796_v5 }
 0x11a   : > { %2303 = vst.msk [vmem:[%s6171_s22 + $0x48] sm:$0xf] %vm1964_vm3, %v5093_v3  ;;  %2301 = vst.msk [vmem:[%s6171_s22 + $0x40] sm:$0xf] %vm1964_vm3, %v5091_v4  ;;  %v5237_v12 = vpop.f32.mrb[24].mxu0  ;;  %v3270_v39 = vsel %vm2413_vm4, %v3190_v36, 0.0  ;;  %v3197_v51 = vmul.f32 %v6414_v24, %v6414_v24  ;;  %v3196_v63 = vmul.f32 %v6390_v55, %v6390_v55  ;;  %v2362_v50 = vmul.f32 %v6388_v54, %v6388_v54 }
 0x11b   : > { %v6515_v42 = vsel %vm2413_vm4, %v2364_v37, 0.0  ;;  %v812_v3 = vpop.f32.mrb[25].mxu0  ;;  %v6521_v4 = vpop.f32.mrb[24].mxu1  ;;  %v2361_v5 = vmul.f32 %v6372_v41, %v6372_v41  ;;  %2304 = vst.msk [vmem:[%s6171_s22 + $0x4c] sm:$0xf] %vm1964_vm3, %v5094_v45  ;;  %v6531_v36 = vmax.f32 %v805_v47, 0.0  ;;  %v800_v54 = vadd.f32 %v6144_v6, %v799_v33 }
 0x11c   : > { %2439 = vadd.xlane.f32.xlu0 %v2438_v52  ;;  %2302 = vst.msk [vmem:[%s6171_s22 + $0x44] sm:$0xf] %vm1964_vm3, %v5092_v46  ;;  %v6533_v37 = vmax.f32 %v797_v11, 0.0  ;;  %v6535_v19 = vpop.f32.mrb[26].mxu0  ;;  %v6537_v55 = vpop.f32.mrb[25].mxu1  ;;  %v808_v52 = vadd.f32 %v5234_v0, %v6144_v6  ;;  %v1414_v40 = vadd.f32 %v5301_v8, %v6144_v6  ;;  %v1406_v45 = vadd.f32 %v6144_v6, %v1405_v17 }
 0x11d   : > { %10449 = vst [vmem:[#allocation42_spill] sm:$0xff] %v6531_v36  ;;  %2442 = vadd.xlane.f32.xlu1 %v2441_v13  ;;  %v815_v46 = vpop.f32.mrb[27].mxu0  ;;  %v6543_v47 = vpop.f32.mrb[26].mxu1  ;;  %v3195_v11 = vmul.f32 %v6416_v25, %v6416_v25  ;;  %v3194_v41 = vmul.f32 %v6392_v60, %v6392_v60  ;;  %v5033_v0 = vpack.c.bf16 %v6531_v36, %v6531_v36  ;;  %v6557_v17 = vmax.f32 %v800_v54, 0.0 }
 0x11e   : > { %10450 = vst [vmem:[#allocation43_spill] sm:$0xff] %v6533_v37  ;;  %v5031_v33 = vpack.c.bf16 %v6533_v37, %v6533_v37  ;;  %v6553_v8 = vpop.f32.mrb[27].mxu1  ;;  %v6555_v13 = vmax.f32 %v808_v52, 0.0  ;;  %v6559_v24 = vmax.f32 %v1414_v40, 0.0  ;;  %v6561_v16 = vmax.f32 %v1406_v45, 0.0 }
 0x11f   : > { %10452 = vst [vmem:[#allocation45_spill] sm:$0xff] %v6557_v17  ;;  %v2368_v60 = vmul.f32 %v6461_v10, %v6461_v10  ;;  %v2367_v25 = vmul.f32 %v6445_v48, %v6445_v48  ;;  %1987 = vst.msk [vmem:[%s6157_s19 + $0x58] sm:$0xf] %vm1964_vm3, %v5033_v0  ;;  %v1417_v52 = vadd.f32 %v6469_v34, %v6144_v6  ;;  %v2456_v34 = vsel %vm2413_vm4, %v2363_v44, 0.0 }
 0x120   : > { %10451 = vst [vmem:[#allocation44_spill] sm:$0xff] %v6555_v13  ;;  %10453 = vst [vmem:[#allocation46_spill] sm:$0xff] %v6559_v24  ;;  %3271 = vadd.xlane.f32.xlu0 %v3270_v39  ;;  %v1409_v40 = vadd.f32 %v6144_v6, %v1408_v43  ;;  %v5034_v54 = vpack.c.bf16 %v6555_v13, %v6555_v13  ;;  %v5032_v39 = vpack.c.bf16 %v6557_v17, %v6557_v17 }
 0x121   : > { %10454 = vst [vmem:[#allocation47_spill] sm:$0xff] %v6561_v16  ;;  %1985 = vst.msk [vmem:[%s6157_s19 + $0x50] sm:$0xf] %vm1964_vm3, %v5031_v33  ;;  %3274 = vadd.xlane.f32.xlu1 %v3273_v62  ;;  %v5097_v45 = vpack.c.bf16 %v6559_v24, %v6559_v24  ;;  %v5095_v0 = vpack.c.bf16 %v6561_v16, %v6561_v16  ;;  %v3291_v43 = vsel %vm2413_vm4, %v3197_v51, 0.0  ;;  %v6584_v33 = vmax.f32 %v1417_v52, 0.0 }
 0x122   : > { %v6586_v62 = vmax.f32 %v1409_v40, 0.0  ;;  %v6588_v48 = vpop.f32.mrb[28].mxu0  ;;  %v3288_v10 = vsel %vm2413_vm4, %v3196_v63, 0.0  ;;  %v6592_v57 = vsel %vm2413_vm4, %v2362_v50, 0.0  ;;  %v2450_v58 = vsel %vm2413_vm4, %v2361_v5, 0.0  ;;  %v6608_v51 = vpop.f32.mrb[28].mxu1 }
 0x123   : > { %10455 = vst [vmem:[#allocation48_spill] sm:$0xff] %v6584_v33  ;;  %v6596_v38 = vsel %vm2413_vm4, %v3195_v11, 0.0  ;;  %1988 = vst.msk [vmem:[%s6157_s19 + $0x5c] sm:$0xf] %vm1964_vm3, %v5034_v54  ;;  %v6606_v44 = vpop.f32.mrb[29].mxu0  ;;  %v5098_v63 = vpack.c.bf16 %v6584_v33, %v6584_v33  ;;  %v821_v5 = vadd.f32 %v5237_v12, %v6144_v6  ;;  %v813_v11 = vadd.f32 %v6144_v6, %v812_v3  ;;  %v6618_v40 = vpop.f32.mrb[29].mxu1 }
 0x124   : > { %10456 = vst [vmem:[#allocation49_spill] sm:$0xff] %v6586_v62  ;;  %1986 = vst.msk [vmem:[%s6157_s19 + $0x54] sm:$0xf] %vm1964_vm3, %v5032_v39  ;;  %2457 = vadd.xlane.f32.xlu0 %v2456_v34  ;;  %v5096_v50 = vpack.c.bf16 %v6586_v62, %v6586_v62  ;;  %v6616_v52 = vpop.f32.mrb[30].mxu0  ;;  %v6622_v54 = vsel %vm2413_vm4, %v3194_v41, 0.0  ;;  %v6625_v39 = vsel %vm2413_vm4, %v2368_v60, 0.0  ;;  %v3201_v12 = vmul.f32 %v6490_v29, %v6490_v29 }
 0x125   : > { %2307 = vst.msk [vmem:[%s6171_s22 + $0x58] sm:$0xf] %vm1964_vm3, %v5097_v45  ;;  %2305 = vst.msk [vmem:[%s6171_s22 + $0x50] sm:$0xf] %vm1964_vm3, %v5095_v0  ;;  %2460 = vadd.xlane.f32.xlu1 %v6515_v42  ;;  %v6628_v45 = vsel %vm2413_vm4, %v2367_v25, 0.0  ;;  %v6632_v0 = vpop.f32.mrb[31].mxu0  ;;  %v3200_v34 = vmul.f32 %v6465_v23, %v6465_v23  ;;  %v2366_v41 = vmul.f32 %v6463_v18, %v6463_v18 }
 0x126   : > { %v6634_v3 = vpop.f32.mrb[30].mxu1  ;;  %2308 = vst.msk [vmem:[%s6171_s22 + $0x5c] sm:$0xf] %vm1964_vm3, %v5098_v63  ;;  %2306 = vst.msk [vmem:[%s6171_s22 + $0x54] sm:$0xf] %vm1964_vm3, %v5096_v50  ;;  %v6644_v60 = vmax.f32 %v821_v5, 0.0  ;;  %v824_v29 = vadd.f32 %v6535_v19, %v6144_v6  ;;  %v816_v14 = vadd.f32 %v6144_v6, %v815_v46  ;;  %v1430_v18 = vadd.f32 %v6521_v4, %v6144_v6 }
 0x127   : > { %v6646_v25 = vmax.f32 %v813_v11, 0.0  ;;  %v6648_v42 = vpop.f32.mrb[31].mxu1  ;;  %v1422_v63 = vadd.f32 %v6144_v6, %v6537_v55  ;;  %v2365_v50 = vmul.f32 %v6447_v49, %v6447_v49  ;;  %v3199_v5 = vmul.f32 %v6492_v9, %v6492_v9 }
 0x128   : > { %10457 = vst [vmem:[#allocation50_spill] sm:$0xff] %v6644_v60  ;;  %3289 = vadd.xlane.f32.xlu0 %v3288_v10  ;;  %v5037_v19 = vpack.c.bf16 %v6644_v60, %v6644_v60  ;;  %v6665_v11 = vmax.f32 %v824_v29, 0.0  ;;  %v6667_v4 = vmax.f32 %v816_v14, 0.0  ;;  %v6669_v23 = vmax.f32 %v1430_v18, 0.0 }
 0x129   : > { %10458 = vst [vmem:[#allocation51_spill] sm:$0xff] %v6646_v25  ;;  %v5035_v46 = vpack.c.bf16 %v6646_v25, %v6646_v25  ;;  %3292 = vadd.xlane.f32.xlu1 %v3291_v43  ;;  %v6671_v55 = vmax.f32 %v1422_v63, 0.0  ;;  %v3198_v10 = vmul.f32 %v6467_v30, %v6467_v30  ;;  %v2372_v49 = vmul.f32 %v6555_v13, %v6555_v13 }
 0x12a   : > { %10459 = vst [vmem:[#allocation52_spill] sm:$0xff] %v6665_v11  ;;  %10460 = vst [vmem:[#allocation53_spill] sm:$0xff] %v6667_v4  ;;  %v1433_v29 = vadd.f32 %v6543_v47, %v6144_v6  ;;  %v1425_v14 = vadd.f32 %v6144_v6, %v6553_v8  ;;  %v6685_v18 = vpop.f32.mrb[32].mxu0  ;;  %v5038_v43 = vpack.c.bf16 %v6665_v11, %v6665_v11  ;;  %v6697_v8 = vpop.f32.mrb[32].mxu1  ;;  %v6703_v30 = vsel %vm2413_vm4, %v3200_v34, 0.0 }
 0x12b   : > { %10461 = vst [vmem:[#allocation54_spill] sm:$0xff] %v6669_v23  ;;  %10462 = vst [vmem:[#allocation55_spill] sm:$0xff] %v6671_v55  ;;  %v5036_v63 = vpack.c.bf16 %v6667_v4, %v6667_v4  ;;  %v5101_v13 = vpack.c.bf16 %v6669_v23, %v6669_v23  ;;  %v6695_v47 = vpop.f32.mrb[33].mxu0  ;;  %v6711_v59 = vpop.f32.mrb[33].mxu1  ;;  %v6715_v28 = vsel %vm2413_vm4, %v2366_v41, 0.0  ;;  %v2371_v34 = vmul.f32 %v6531_v36, %v6531_v36 }
 0x12c   : > { %1991 = vst.msk [vmem:[%s6157_s19 + $0x68] sm:$0xf] %vm1964_vm3, %v5037_v19  ;;  %1989 = vst.msk [vmem:[%s6157_s19 + $0x60] sm:$0xf] %vm1964_vm3, %v5035_v46  ;;  %v5099_v19 = vpack.c.bf16 %v6671_v55, %v6671_v55  ;;  %2451 = vadd.xlane.f32.xlu0 %v2450_v58  ;;  %v6700_v46 = vsel %vm2413_vm4, %v3201_v12, 0.0  ;;  %v6705_v9 = vmax.f32 %v1433_v29, 0.0  ;;  %v837_v29 = vadd.f32 %v6588_v48, %v6144_v6 }
 0x12d   : > { %v6707_v56 = vmax.f32 %v1425_v14, 0.0  ;;  %v6709_v2 = vpop.f32.mrb[34].mxu0  ;;  %2454 = vadd.xlane.f32.xlu1 %v6592_v57  ;;  %v6718_v58 = vsel %vm2413_vm4, %v2365_v50, 0.0  ;;  %v6721_v12 = vsel %vm2413_vm4, %v3199_v5, 0.0  ;;  %1992 = vst.msk [vmem:[%s6157_s19 + $0x6c] sm:$0xf] %vm1964_vm3, %v5038_v43  ;;  %v3204_v36 = vmul.f32 %v6559_v24, %v6559_v24 }
 0x12e   : > { %10463 = vst [vmem:[#allocation56_spill] sm:$0xff] %v6705_v9  ;;  %1990 = vst.msk [vmem:[%s6157_s19 + $0x64] sm:$0xf] %vm1964_vm3, %v5036_v63  ;;  %v6733_v57 = vpop.f32.mrb[35].mxu0  ;;  %v6735_v41 = vpop.f32.mrb[34].mxu1  ;;  %v5102_v50 = vpack.c.bf16 %v6705_v9, %v6705_v9  ;;  %v6748_v43 = vsel %vm2413_vm4, %v3198_v10, 0.0  ;;  %v2370_v48 = vmul.f32 %v6557_v17, %v6557_v17  ;;  %v840_v24 = vadd.f32 %v6616_v52, %v6144_v6 }
 0x12f   : > { %10464 = vst [vmem:[#allocation57_spill] sm:$0xff] %v6707_v56  ;;  %2311 = vst.msk [vmem:[%s6171_s22 + $0x68] sm:$0xf] %vm1964_vm3, %v5101_v13  ;;  %v5100_v5 = vpack.c.bf16 %v6707_v56, %v6707_v56  ;;  %v829_v13 = vadd.f32 %v6144_v6, %v6606_v44  ;;  %v6745_v14 = vpop.f32.mrb[35].mxu1  ;;  %v6751_v63 = vsel %vm2413_vm4, %v2372_v49, 0.0  ;;  %v2369_v44 = vmul.f32 %v6533_v37, %v6533_v37 }
 0x130   : > { %2309 = vst.msk [vmem:[%s6171_s22 + $0x60] sm:$0xf] %vm1964_vm3, %v5099_v19  ;;  %v3205_v19 = vmul.f32 %v6584_v33, %v6584_v33  ;;  %3283 = vadd.xlane.f32.xlu0 %v6622_v54  ;;  %2312 = vst.msk [vmem:[%s6171_s22 + $0x6c] sm:$0xf] %vm1964_vm3, %v5102_v50  ;;  %v6766_v49 = vmax.f32 %v837_v29, 0.0  ;;  %v832_v54 = vadd.f32 %v6144_v6, %v6632_v0  ;;  %v6844_v1 = vsel %vm2413_vm4, %v3204_v36, 0.0 }
 0x131   : > { %2310 = vst.msk [vmem:[%s6171_s22 + $0x64] sm:$0xf] %vm1964_vm3, %v5100_v5  ;;  %v6768_v10 = vmax.f32 %v829_v13, 0.0  ;;  %3286 = vadd.xlane.f32.xlu1 %v6596_v38  ;;  %v1446_v17 = vadd.f32 %v6608_v51, %v6144_v6  ;;  %v1438_v50 = vadd.f32 %v6144_v6, %v6618_v40  ;;  %v3203_v5 = vmul.f32 %v6586_v62, %v6586_v62 }
 0x132   : > { %10465 = vst [vmem:[#allocation58_spill] sm:$0xff] %v6766_v49  ;;  %v3202_v38 = vmul.f32 %v6561_v16, %v6561_v16  ;;  %v5041_v52 = vpack.c.bf16 %v6766_v49, %v6766_v49  ;;  %v6787_v29 = vpop.f32.mrb[36].mxu0  ;;  %v6789_v51 = vmax.f32 %v840_v24, 0.0  ;;  %v6791_v13 = vmax.f32 %v832_v54, 0.0  ;;  %v6799_v33 = vpop.f32.mrb[36].mxu1 }
 0x133   : > { %10466 = vst [vmem:[#allocation59_spill] sm:$0xff] %v6768_v10  ;;  %v5039_v0 = vpack.c.bf16 %v6768_v10, %v6768_v10  ;;  %v6793_v40 = vmax.f32 %v1446_v17, 0.0  ;;  %v6795_v37 = vmax.f32 %v1438_v50, 0.0  ;;  %v6797_v62 = vpop.f32.mrb[37].mxu0  ;;  %v2376_v16 = vmul.f32 %v6665_v11, %v6665_v11  ;;  %v6816_v50 = vpop.f32.mrb[37].mxu1 }
 0x134   : > { %10467 = vst [vmem:[#allocation60_spill] sm:$0xff] %v6789_v51  ;;  %10468 = vst [vmem:[#allocation61_spill] sm:$0xff] %v6791_v13  ;;  %2469 = vadd.xlane.f32.xlu0 %v6628_v45  ;;  %v2375_v7 = vmul.f32 %v6644_v60, %v6644_v60  ;;  %v1449_v24 = vadd.f32 %v6634_v3, %v6144_v6  ;;  %v1441_v17 = vadd.f32 %v6144_v6, %v6648_v42  ;;  %v6814_v54 = vpop.f32.mrb[38].mxu0  ;;  %v6829_v60 = vpop.f32.mrb[38].mxu1 }
 0x135   : > { %10469 = vst [vmem:[#allocation62_spill] sm:$0xff] %v6793_v40  ;;  %10470 = vst [vmem:[#allocation63_spill] sm:$0xff] %v6795_v37  ;;  %2472 = vadd.xlane.f32.xlu1 %v6625_v39  ;;  %v5042_v45 = vpack.c.bf16 %v6789_v51, %v6789_v51  ;;  %v5105_v3 = vpack.c.bf16 %v6793_v40, %v6793_v40  ;;  %v5103_v42 = vpack.c.bf16 %v6795_v37, %v6795_v37  ;;  %v6841_v22 = vpop.f32.mrb[39].mxu1 }
 0x136   : > { %1995 = vst.msk [vmem:[%s6157_s19 + $0x78] sm:$0xf] %vm1964_vm3, %v5041_v52  ;;  %1993 = vst.msk [vmem:[%s6157_s19 + $0x70] sm:$0xf] %vm1964_vm3, %v5039_v0  ;;  %v5040_v52 = vpack.c.bf16 %v6791_v13, %v6791_v13  ;;  %v6827_v0 = vpop.f32.mrb[39].mxu0  ;;  %v6832_v39 = vsel %vm2413_vm4, %v2371_v34, 0.0  ;;  %v2380_v35 = vmul.f32 %v6789_v51, %v6789_v51 }
 0x137   : > { %v6835_v11 = vsel %vm2413_vm4, %v3205_v19, 0.0  ;;  %v6837_v61 = vmax.f32 %v1449_v24, 0.0  ;;  %v6839_v53 = vmax.f32 %v1441_v17, 0.0  ;;  %v6847_v26 = vsel %vm2413_vm4, %v2370_v48, 0.0  ;;  %1996 = vst.msk [vmem:[%s6157_s19 + $0x7c] sm:$0xf] %vm1964_vm3, %v5042_v45 }
 0x138   : > { %v6850_v21 = vsel %vm2413_vm4, %v2369_v44, 0.0  ;;  %v6853_v34 = vsel %vm2413_vm4, %v3203_v5, 0.0  ;;  %1994 = vst.msk [vmem:[%s6157_s19 + $0x74] sm:$0xf] %vm1964_vm3, %v5040_v52  ;;  %2315 = vst.msk [vmem:[%s6171_s22 + $0x78] sm:$0xf] %vm1964_vm3, %v5105_v3  ;;  %3301 = vadd.xlane.f32.xlu0 %v6703_v30  ;;  %v853_v48 = vadd.f32 %v6685_v18, %v6144_v6  ;;  %v845_v44 = vadd.f32 %v6144_v6, %v6695_v47 }
 0x139   : > { %10471 = vst [vmem:[#allocation64_spill] sm:$0xff] %v6837_v61  ;;  %10472 = vst [vmem:[#allocation65_spill] sm:$0xff] %v6839_v53  ;;  %v5106_v36 = vpack.c.bf16 %v6837_v61, %v6837_v61  ;;  %v5104_v19 = vpack.c.bf16 %v6839_v53, %v6839_v53  ;;  %3304 = vadd.xlane.f32.xlu1 %v6700_v46  ;;  %v6874_v5 = vsel %vm2413_vm4, %v3202_v38, 0.0  ;;  %v6877_v24 = vsel %vm2413_vm4, %v2376_v16, 0.0 }
 0x13a   : > { %2313 = vst.msk [vmem:[%s6171_s22 + $0x70] sm:$0xf] %vm1964_vm3, %v5103_v42  ;;  %v6880_v30 = vsel %vm2413_vm4, %v2375_v7, 0.0  ;;  %v3209_v17 = vmul.f32 %v6705_v9, %v6705_v9  ;;  %v3208_v18 = vmul.f32 %v6669_v23, %v6669_v23  ;;  %v2374_v47 = vmul.f32 %v6667_v4, %v6667_v4  ;;  %v6896_v38 = vpop.f32.mrb[40].mxu0 }
 0x13b   : > { %2316 = vst.msk [vmem:[%s6171_s22 + $0x7c] sm:$0xf] %vm1964_vm3, %v5106_v36  ;;  %2314 = vst.msk [vmem:[%s6171_s22 + $0x74] sm:$0xf] %vm1964_vm3, %v5104_v19  ;;  %v6892_v46 = vmax.f32 %v853_v48, 0.0  ;;  %v6894_v16 = vmax.f32 %v845_v44, 0.0  ;;  %v856_v7 = vadd.f32 %v6709_v2, %v6144_v6  ;;  %v848_v45 = vadd.f32 %v6144_v6, %v6733_v57 }
 0x13c   : > { %v1462_v52 = vadd.f32 %v6697_v8, %v6144_v6  ;;  %v1454_v3 = vadd.f32 %v6144_v6, %v6711_v59  ;;  %v6906_v42 = vpop.f32.mrb[41].mxu0  ;;  %v6908_v36 = vpop.f32.mrb[40].mxu1  ;;  %2463 = vadd.xlane.f32.xlu0 %v6718_v58  ;;  %v2373_v19 = vmul.f32 %v6646_v25, %v6646_v25  ;;  %v3207_v2 = vmul.f32 %v6707_v56, %v6707_v56 }
 0x13d   : > { %10473 = vst [vmem:[#allocation66_spill] sm:$0xff] %v6892_v46  ;;  %10474 = vst [vmem:[#allocation67_spill] sm:$0xff] %v6894_v16  ;;  %v5045_v8 = vpack.c.bf16 %v6892_v46, %v6892_v46  ;;  %v5043_v59 = vpack.c.bf16 %v6894_v16, %v6894_v16  ;;  %v6919_v57 = vpop.f32.mrb[42].mxu0  ;;  %v6921_v48 = vpop.f32.mrb[41].mxu1  ;;  %2466 = vadd.xlane.f32.xlu1 %v6715_v28  ;;  %v6924_v58 = vmax.f32 %v856_v7, 0.0  ;;  %v6926_v44 = vmax.f32 %v848_v45, 0.0 }
 0x13e   : > { %v6928_v25 = vmax.f32 %v1462_v52, 0.0  ;;  %v6930_v4 = vmax.f32 %v1454_v3, 0.0  ;;  %v6932_v56 = vpop.f32.mrb[43].mxu0  ;;  %v6934_v23 = vpop.f32.mrb[42].mxu1  ;;  %v3206_v9 = vmul.f32 %v6671_v55, %v6671_v55  ;;  %v1465_v28 = vadd.f32 %v6735_v41, %v6144_v6 }
 0x13f   : > { %10475 = vst [vmem:[#allocation68_spill] sm:$0xff] %v6924_v58  ;;  %10476 = vst [vmem:[#allocation69_spill] sm:$0xff] %v6926_v44  ;;  %v1457_v7 = vadd.f32 %v6144_v6, %v6745_v14  ;;  %v6948_v45 = vpop.f32.mrb[43].mxu1  ;;  %v5046_v52 = vpack.c.bf16 %v6924_v58, %v6924_v58  ;;  %v5044_v3 = vpack.c.bf16 %v6926_v44, %v6926_v44  ;;  %v6960_v6 = vsel %vm2413_vm4, %v3209_v17, 0.0 }
 0x140   : > { %10477 = vst [vmem:[#allocation70_spill] sm:$0xff] %v6928_v25  ;;  %10478 = vst [vmem:[#allocation71_spill] sm:$0xff] %v6930_v4  ;;  %v5107_v41 = vpack.c.bf16 %v6930_v4, %v6930_v4  ;;  %3295 = vadd.xlane.f32.xlu0 %v6748_v43  ;;  %v6963_v14 = vsel %vm2413_vm4, %v3208_v18, 0.0  ;;  %v6971_v55 = vsel %vm2413_vm4, %v2374_v47, 0.0  ;;  %v6974_v32 = vsel %vm2413_vm4, %v2373_v19, 0.0 }
 0x141   : > { %1999 = vst.msk [vmem:[%s6157_s19 + $0x88] sm:$0xf] %vm1964_vm3, %v5045_v8  ;;  %1997 = vst.msk [vmem:[%s6157_s19 + $0x80] sm:$0xf] %vm1964_vm3, %v5043_v59  ;;  %v5109_v8 = vpack.c.bf16 %v6928_v25, %v6928_v25  ;;  %v6965_v59 = vmax.f32 %v1465_v28, 0.0  ;;  %v6967_v51 = vmax.f32 %v1457_v7, 0.0  ;;  %3298 = vadd.xlane.f32.xlu1 %v6721_v12  ;;  %v2379_v17 = vmul.f32 %v6766_v49, %v6766_v49 }
 0x142   : > { %v6977_v43 = vsel %vm2413_vm4, %v3207_v2, 0.0  ;;  %2000 = vst.msk [vmem:[%s6157_s19 + $0x8c] sm:$0xf] %vm1964_vm3, %v5046_v52  ;;  %1998 = vst.msk [vmem:[%s6157_s19 + $0x84] sm:$0xf] %vm1964_vm3, %v5044_v3  ;;  %v7002_v28 = vpop.f32.mrb[44].mxu0  ;;  %v3213_v3 = vmul.f32 %v6837_v61, %v6837_v61 }
 0x143   : > { %10479 = vst [vmem:[#allocation72_spill] sm:$0xff] %v6965_v59  ;;  %10480 = vst [vmem:[#allocation73_spill] sm:$0xff] %v6967_v51  ;;  %v5110_v12 = vpack.c.bf16 %v6965_v59, %v6965_v59  ;;  %v5108_v18 = vpack.c.bf16 %v6967_v51, %v6967_v51  ;;  %v6996_v47 = vld [vmem:[%s10263_s3] ss:$0 sm:$0xff]  ;;  %v7005_v7 = vsel %vm2413_vm4, %v3206_v9, 0.0  ;;  %v7008_v52 = vsel %vm2413_vm4, %v2380_v35, 0.0 }
 0x144   : > { %2319 = vst.msk [vmem:[%s6171_s22 + $0x88] sm:$0xf] %vm1964_vm3, %v5109_v8  ;;  %2317 = vst.msk [vmem:[%s6171_s22 + $0x80] sm:$0xf] %vm1964_vm3, %v5107_v41  ;;  %v869_v19 = vadd.f32 %v6996_v47, %v6787_v29  ;;  %v861_v2 = vadd.f32 %v6996_v47, %v6797_v62  ;;  %v3212_v8 = vmul.f32 %v6793_v40, %v6793_v40  ;;  %v7014_v41 = vpop.f32.mrb[45].mxu0  ;;  %v7016_v29 = vpop.f32.mrb[44].mxu1  ;;  %2481 = vadd.xlane.f32.xlu0 %v6832_v39 }
 0x145   : > { %10481 = vst [vmem:[#allocation74_spill] sm:$0xff] %v7008_v52  ;;  %v2378_v62 = vmul.f32 %v6791_v13, %v6791_v13  ;;  %v2377_v9 = vmul.f32 %v6768_v10, %v6768_v10  ;;  %2320 = vst.msk [vmem:[%s6171_s22 + $0x8c] sm:$0xf] %vm1964_vm3, %v5110_v12  ;;  %v7031_v40 = vpop.f32.mrb[46].mxu0  ;;  %v7033_v61 = vpop.f32.mrb[45].mxu1  ;;  %2484 = vadd.xlane.f32.xlu1 %v6751_v63  ;;  %v872_v39 = vadd.f32 %v6996_v47, %v6814_v54 }
 0x146   : > { %2318 = vst.msk [vmem:[%s6171_s22 + $0x84] sm:$0xf] %vm1964_vm3, %v5108_v18  ;;  %v7027_v35 = vmax.f32 %v869_v19, 0.0  ;;  %v7029_v49 = vmax.f32 %v861_v2, 0.0  ;;  %v864_v10 = vadd.f32 %v6996_v47, %v6827_v0  ;;  %v1478_v12 = vadd.f32 %v6996_v47, %v6799_v33  ;;  %v7044_v19 = vpop.f32.mrb[47].mxu0  ;;  %v7046_v2 = vpop.f32.mrb[46].mxu1 }
 0x147   : > { %v1470_v18 = vadd.f32 %v6996_v47, %v6816_v50  ;;  %v3211_v63 = vmul.f32 %v6839_v53, %v6839_v53  ;;  %v3210_v54 = vmul.f32 %v6795_v37, %v6795_v37  ;;  %v7056_v13 = vpop.f32.mrb[47].mxu1  ;;  %v7058_v50 = vmax.f32 %v872_v39, 0.0 }
 0x148   : > { %10482 = vst [vmem:[#allocation75_spill] sm:$0xff] %v7027_v35  ;;  %10483 = vst [vmem:[#allocation76_spill] sm:$0xff] %v7029_v49  ;;  %v5049_v0 = vpack.c.bf16 %v7027_v35, %v7027_v35  ;;  %v5047_v33 = vpack.c.bf16 %v7029_v49, %v7029_v49  ;;  %v7060_v20 = vmax.f32 %v864_v10, 0.0  ;;  %v7062_v15 = vmax.f32 %v1478_v12, 0.0  ;;  %3313 = vadd.xlane.f32.xlu0 %v6844_v1 }
 0x149   : > { %10484 = vst [vmem:[#allocation77_spill] sm:$0xff] %v7058_v50  ;;  %v7064_v31 = vmax.f32 %v1470_v18, 0.0  ;;  %v2384_v37 = vmul.f32 %v6924_v58, %v6924_v58  ;;  %v2383_v53 = vmul.f32 %v6892_v46, %v6892_v46  ;;  %v1481_v10 = vadd.f32 %v6996_v47, %v6829_v60  ;;  %3316 = vadd.xlane.f32.xlu1 %v6835_v11 }
 0x14a   : > { %10485 = vst [vmem:[#allocation78_spill] sm:$0xff] %v7060_v20  ;;  %10486 = vst [vmem:[#allocation79_spill] sm:$0xff] %v7062_v15  ;;  %v1473_v39 = vadd.f32 %v6996_v47, %v6841_v22  ;;  %v5050_v1 = vpack.c.bf16 %v7058_v50, %v7058_v50  ;;  %v5048_v12 = vpack.c.bf16 %v7060_v20, %v7060_v20  ;;  %v7092_v22 = vsel %vm2413_vm4, %v3213_v3, 0.0  ;;  %v7098_v46 = vpop.f32.mrb[48].mxu0 }
 0x14b   : > { %10487 = vst [vmem:[#allocation80_spill] sm:$0xff] %v7064_v31  ;;  %2003 = vst.msk [vmem:[%s6157_s19 + $0x98] sm:$0xf] %vm1964_vm3, %v5049_v0  ;;  %v5113_v18 = vpack.c.bf16 %v7062_v15, %v7062_v15  ;;  %v5111_v60 = vpack.c.bf16 %v7064_v31, %v7064_v31  ;;  %v7089_v0 = vsel %vm2413_vm4, %v2379_v17, 0.0  ;;  %v7094_v11 = vmax.f32 %v1481_v10, 0.0  ;;  %v7120_v3 = vpop.f32.mrb[49].mxu0 }
 0x14c   : > { %2001 = vst.msk [vmem:[%s6157_s19 + $0x90] sm:$0xf] %vm1964_vm3, %v5047_v33  ;;  %v7096_v33 = vmax.f32 %v1473_v39, 0.0  ;;  %v7101_v58 = vsel %vm2413_vm4, %v3212_v8, 0.0  ;;  %v7104_v27 = vsel %vm2413_vm4, %v2378_v62, 0.0  ;;  %v7107_v52 = vsel %vm2413_vm4, %v2377_v9, 0.0  ;;  %2475 = vadd.xlane.f32.xlu0 %v6850_v21 }
 0x14d   : > { %10488 = vst [vmem:[#allocation81_spill] sm:$0xff] %v7094_v11  ;;  %10490 = vst [vmem:[#allocation83_spill] sm:$0xff] %v7104_v27  ;;  %v7110_v17 = vsel %vm2413_vm4, %v3211_v63, 0.0  ;;  %v7122_v8 = vpop.f32.mrb[48].mxu1  ;;  %v5114_v62 = vpack.c.bf16 %v7094_v11, %v7094_v11  ;;  %v885_v63 = vadd.f32 %v6996_v47, %v6896_v38  ;;  %v877_v10 = vadd.f32 %v6996_v47, %v6906_v42  ;;  %v7133_v39 = vpop.f32.mrb[50].mxu0 }
 0x14e   : > { %10489 = vst [vmem:[#allocation82_spill] sm:$0xff] %v7096_v33  ;;  %10491 = vst [vmem:[#allocation84_spill] sm:$0xff] %v7110_v17  ;;  %v5112_v9 = vpack.c.bf16 %v7096_v33, %v7096_v33  ;;  %2478 = vadd.xlane.f32.xlu1 %v6847_v26  ;;  %v7139_v21 = vsel %vm2413_vm4, %v3210_v54, 0.0  ;;  %v3217_v38 = vmul.f32 %v6965_v59, %v6965_v59 }
 0x14f   : > { %2004 = vst.msk [vmem:[%s6157_s19 + $0x9c] sm:$0xf] %vm1964_vm3, %v5050_v1  ;;  %2002 = vst.msk [vmem:[%s6157_s19 + $0x94] sm:$0xf] %vm1964_vm3, %v5048_v12  ;;  %v7135_v1 = vpop.f32.mrb[49].mxu1  ;;  %v7142_v12 = vsel %vm2413_vm4, %v2384_v37, 0.0  ;;  %v3216_v17 = vmul.f32 %v6928_v25, %v6928_v25  ;;  %v2382_v26 = vmul.f32 %v6926_v44, %v6926_v44  ;;  %v888_v59 = vadd.f32 %v6996_v47, %v6919_v57 }
 0x150   : > { %2323 = vst.msk [vmem:[%s6171_s22 + $0x98] sm:$0xf] %vm1964_vm3, %v5113_v18  ;;  %2321 = vst.msk [vmem:[%s6171_s22 + $0x90] sm:$0xf] %vm1964_vm3, %v5111_v60  ;;  %v7145_v18 = vsel %vm2413_vm4, %v2383_v53, 0.0  ;;  %v7149_v60 = vpop.f32.mrb[51].mxu0  ;;  %v880_v25 = vadd.f32 %v6996_v47, %v6932_v56  ;;  %v1494_v44 = vadd.f32 %v6996_v47, %v6908_v36  ;;  %3307 = vadd.xlane.f32.xlu0 %v6874_v5 }
 0x151   : > { %10492 = vst [vmem:[#allocation85_spill] sm:$0xff] %v7139_v21  ;;  %10493 = vst [vmem:[#allocation86_spill] sm:$0xff] %v7142_v12  ;;  %v7151_v42 = vpop.f32.mrb[50].mxu1  ;;  %v7161_v37 = vmax.f32 %v885_v63, 0.0  ;;  %v7163_v53 = vmax.f32 %v877_v10, 0.0  ;;  %v3215_v63 = vmul.f32 %v6967_v51, %v6967_v51  ;;  %v7185_v36 = vmax.f32 %v888_v59, 0.0 }
 0x152   : > { %10494 = vst [vmem:[#allocation87_spill] sm:$0xff] %v7145_v18  ;;  %2324 = vst.msk [vmem:[%s6171_s22 + $0x9c] sm:$0xf] %vm1964_vm3, %v5114_v62  ;;  %v7165_v54 = vpop.f32.mrb[51].mxu1  ;;  %v1486_v62 = vadd.f32 %v6996_v47, %v6921_v48  ;;  %3310 = vadd.xlane.f32.xlu1 %v6853_v34  ;;  %v7187_v10 = vmax.f32 %v880_v25, 0.0  ;;  %v7189_v48 = vmax.f32 %v1494_v44, 0.0  ;;  %v2388_v51 = vmul.f32 %v7058_v50, %v7058_v50 }
 0x153   : > { %2322 = vst.msk [vmem:[%s6171_s22 + $0x94] sm:$0xf] %vm1964_vm3, %v5112_v9  ;;  %10495 = vst [vmem:[#allocation88_spill] sm:$0xff] %v7161_v37  ;;  %v2381_v9 = vmul.f32 %v6894_v16, %v6894_v16  ;;  %v5053_v57 = vpack.c.bf16 %v7161_v37, %v7161_v37  ;;  %v5051_v56 = vpack.c.bf16 %v7163_v53, %v7163_v53  ;;  %v7205_v44 = vpop.f32.mrb[52].mxu0 }
 0x154   : > { %10496 = vst [vmem:[#allocation89_spill] sm:$0xff] %v7163_v53  ;;  %10497 = vst [vmem:[#allocation90_spill] sm:$0xff] %v7185_v36  ;;  %v7191_v5 = vmax.f32 %v1486_v62, 0.0  ;;  %v3214_v16 = vmul.f32 %v6930_v4, %v6930_v4  ;;  %v1497_v34 = vadd.f32 %v6996_v47, %v6934_v23  ;;  %v1489_v25 = vadd.f32 %v6996_v47, %v6948_v45  ;;  %v7215_v23 = vpop.f32.mrb[53].mxu0  ;;  %v7217_v45 = vpop.f32.mrb[52].mxu1 }
 0x155   : > { %10498 = vst [vmem:[#allocation91_spill] sm:$0xff] %v7187_v10  ;;  %10499 = vst [vmem:[#allocation92_spill] sm:$0xff] %v7189_v48  ;;  %v5054_v59 = vpack.c.bf16 %v7185_v36, %v7185_v36  ;;  %v5052_v62 = vpack.c.bf16 %v7187_v10, %v7187_v10  ;;  %v5117_v50 = vpack.c.bf16 %v7189_v48, %v7189_v48  ;;  %2493 = vadd.xlane.f32.xlu0 %v6880_v30  ;;  %v7230_v21 = vpop.f32.mrb[54].mxu0  ;;  %v7232_v27 = vpop.f32.mrb[53].mxu1 }
 0x156   : > { %10500 = vst [vmem:[#allocation93_spill] sm:$0xff] %v7191_v5  ;;  %2007 = vst.msk [vmem:[%s6157_s19 + $0xa8] sm:$0xf] %vm1964_vm3, %v5053_v57  ;;  %v5115_v57 = vpack.c.bf16 %v7191_v5, %v7191_v5  ;;  %v7224_v4 = vsel %vm2413_vm4, %v3216_v17, 0.0  ;;  %v7226_v12 = vmax.f32 %v1497_v34, 0.0  ;;  %v7228_v18 = vmax.f32 %v1489_v25, 0.0  ;;  %2496 = vadd.xlane.f32.xlu1 %v6877_v24 }
 0x157   : > { %2005 = vst.msk [vmem:[%s6157_s19 + $0xa0] sm:$0xf] %vm1964_vm3, %v5051_v56  ;;  %10501 = vst [vmem:[#allocation94_spill] sm:$0xff] %v7217_v45  ;;  %v7221_v56 = vsel %vm2413_vm4, %v3217_v38, 0.0  ;;  %v7236_v45 = vsel %vm2413_vm4, %v2382_v26, 0.0  ;;  %v7239_v30 = vsel %vm2413_vm4, %v2381_v9, 0.0  ;;  %v2387_v17 = vmul.f32 %v7027_v35, %v7027_v35 }
 0x158   : > { %10502 = vst [vmem:[#allocation95_spill] sm:$0xff] %v7221_v56  ;;  %10503 = vst [vmem:[#allocation96_spill] sm:$0xff] %v7226_v12  ;;  %v7242_v38 = vsel %vm2413_vm4, %v3215_v63, 0.0  ;;  %v7254_v24 = vpop.f32.mrb[55].mxu0  ;;  %v7256_v26 = vpop.f32.mrb[54].mxu1  ;;  %v5118_v9 = vpack.c.bf16 %v7226_v12, %v7226_v12  ;;  %v5116_v63 = vpack.c.bf16 %v7228_v18, %v7228_v18  ;;  %v901_v34 = vadd.f32 %v6996_v47, %v7002_v28 }
 0x159   : > { %10504 = vst [vmem:[#allocation97_spill] sm:$0xff] %v7228_v18  ;;  %10505 = vst [vmem:[#allocation98_spill] sm:$0xff] %v7236_v45  ;;  %v7266_v25 = vpop.f32.mrb[55].mxu1  ;;  %v3220_v35 = vmul.f32 %v7062_v15, %v7062_v15  ;;  %3325 = vadd.xlane.f32.xlu0 %v6963_v14  ;;  %v2386_v28 = vmul.f32 %v7060_v20, %v7060_v20  ;;  %v904_v15 = vadd.f32 %v6996_v47, %v7031_v40 }
 0x15a   : > { %10506 = vst [vmem:[#allocation99_spill] sm:$0xff] %v7239_v30  ;;  %10507 = vst [vmem:[#allocation100_spill] sm:$0xff] %v7242_v38  ;;  %3328 = vadd.xlane.f32.xlu1 %v6960_v6  ;;  %v896_v14 = vadd.f32 %v6996_v47, %v7044_v19  ;;  %v1510_v20 = vadd.f32 %v6996_v47, %v7016_v29  ;;  %v3218_v6 = vmul.f32 %v7064_v31, %v7064_v31 }
 0x15b   : > { %2008 = vst.msk [vmem:[%s6157_s19 + $0xac] sm:$0xf] %vm1964_vm3, %v5054_v59  ;;  %2006 = vst.msk [vmem:[%s6157_s19 + $0xa4] sm:$0xf] %vm1964_vm3, %v5052_v62  ;;  %v7269_v59 = vsel %vm2413_vm4, %v3214_v16, 0.0  ;;  %v7272_v62 = vsel %vm2413_vm4, %v2388_v51, 0.0  ;;  %v2392_v31 = vmul.f32 %v7185_v36, %v7185_v36 }
 0x15c   : > { %2327 = vst.msk [vmem:[%s6171_s22 + $0xa8] sm:$0xf] %vm1964_vm3, %v5117_v50  ;;  %2325 = vst.msk [vmem:[%s6171_s22 + $0xa0] sm:$0xf] %vm1964_vm3, %v5115_v57  ;;  %v893_v50 = vadd.f32 %v6996_v47, %v7014_v41  ;;  %v3221_v57 = vmul.f32 %v7094_v11, %v7094_v11  ;;  %v2385_v41 = vmul.f32 %v7029_v49, %v7029_v49  ;;  %v7287_v51 = vmax.f32 %v901_v34, 0.0  ;;  %v7308_v34 = vpop.f32.mrb[56].mxu0 }
 0x15d   : > { %10508 = vst [vmem:[#allocation101_spill] sm:$0xff] %v7269_v59  ;;  %10509 = vst [vmem:[#allocation102_spill] sm:$0xff] %v7272_v62  ;;  %v7310_v29 = vmax.f32 %v904_v15, 0.0  ;;  %v7320_v11 = vpop.f32.mrb[56].mxu1  ;;  %2487 = vadd.xlane.f32.xlu0 %v6974_v32  ;;  %v2391_v62 = vmul.f32 %v7161_v37, %v7161_v37  ;;  %v1513_v15 = vadd.f32 %v6996_v47, %v7046_v2  ;;  %v7365_v30 = vsel %vm2413_vm4, %v3220_v35, 0.0 }
 0x15e   : > { %2328 = vst.msk [vmem:[%s6171_s22 + $0xac] sm:$0xf] %vm1964_vm3, %v5118_v9  ;;  %2326 = vst.msk [vmem:[%s6171_s22 + $0xa4] sm:$0xf] %vm1964_vm3, %v5116_v63  ;;  %v7289_v16 = vmax.f32 %v893_v50, 0.0  ;;  %v1502_v9 = vadd.f32 %v6996_v47, %v7033_v61  ;;  %v3219_v63 = vmul.f32 %v7096_v33, %v7096_v33  ;;  %v5057_v40 = vpack.c.bf16 %v7287_v51, %v7287_v51  ;;  %v7318_v33 = vpop.f32.mrb[57].mxu0 }
 0x15f   : > { %10510 = vst [vmem:[#allocation103_spill] sm:$0xff] %v7287_v51  ;;  %10512 = vst [vmem:[#allocation105_spill] sm:$0xff] %v7310_v29  ;;  %v7312_v50 = vmax.f32 %v896_v14, 0.0  ;;  %v7314_v61 = vmax.f32 %v1510_v20, 0.0  ;;  %v1505_v20 = vadd.f32 %v6996_v47, %v7056_v13  ;;  %v7335_v14 = vpop.f32.mrb[58].mxu0  ;;  %2490 = vadd.xlane.f32.xlu1 %v6971_v55  ;;  %v5058_v32 = vpack.c.bf16 %v7310_v29, %v7310_v29 }
 0x160   : > { %10511 = vst [vmem:[#allocation104_spill] sm:$0xff] %v7289_v16  ;;  %v5055_v19 = vpack.c.bf16 %v7289_v16, %v7289_v16  ;;  %v7316_v49 = vmax.f32 %v1502_v9, 0.0  ;;  %2011 = vst.msk [vmem:[%s6157_s19 + $0xb8] sm:$0xf] %vm1964_vm3, %v5057_v40  ;;  %v7337_v9 = vpop.f32.mrb[57].mxu1  ;;  %v7353_v55 = vsel %vm2413_vm4, %v2387_v17, 0.0 }
 0x161   : > { %10513 = vst [vmem:[#allocation106_spill] sm:$0xff] %v7312_v50  ;;  %10514 = vst [vmem:[#allocation107_spill] sm:$0xff] %v7314_v61  ;;  %v5056_v40 = vpack.c.bf16 %v7312_v50, %v7312_v50  ;;  %v5121_v2 = vpack.c.bf16 %v7314_v61, %v7314_v61  ;;  %v7350_v37 = vpop.f32.mrb[58].mxu1  ;;  %v7356_v36 = vsel %vm2413_vm4, %v3221_v57, 0.0  ;;  %v7358_v38 = vmax.f32 %v1513_v15, 0.0  ;;  %3319 = vadd.xlane.f32.xlu0 %v7005_v7 }
 0x162   : > { %10515 = vst [vmem:[#allocation108_spill] sm:$0xff] %v7316_v49  ;;  %2009 = vst.msk [vmem:[%s6157_s19 + $0xb0] sm:$0xf] %vm1964_vm3, %v5055_v19  ;;  %v5119_v13 = vpack.c.bf16 %v7316_v49, %v7316_v49  ;;  %v7348_v19 = vpop.f32.mrb[59].mxu0  ;;  %v7360_v59 = vmax.f32 %v1505_v20, 0.0  ;;  %v7362_v45 = vpop.f32.mrb[59].mxu1  ;;  %v3225_v20 = vmul.f32 %v7226_v12, %v7226_v12 }
 0x163   : > { %10516 = vst [vmem:[#allocation109_spill] sm:$0xff] %v7350_v37  ;;  %10517 = vst [vmem:[#allocation110_spill] sm:$0xff] %v7358_v38  ;;  %v7368_v56 = vsel %vm2413_vm4, %v2386_v28, 0.0  ;;  %v7371_v37 = vsel %vm2413_vm4, %v2385_v41, 0.0  ;;  %v7374_v17 = vsel %vm2413_vm4, %v3219_v63, 0.0  ;;  %v5122_v35 = vpack.c.bf16 %v7358_v38, %v7358_v38  ;;  %3322 = vadd.xlane.f32.xlu1 %v6977_v43 }
 0x164   : > { %10518 = vst [vmem:[#allocation111_spill] sm:$0xff] %v7360_v59  ;;  %2012 = vst.msk [vmem:[%s6157_s19 + $0xbc] sm:$0xf] %vm1964_vm3, %v5058_v32  ;;  %v5120_v57 = vpack.c.bf16 %v7360_v59, %v7360_v59  ;;  %v917_v28 = vadd.f32 %v6996_v47, %v7098_v46  ;;  %v909_v41 = vadd.f32 %v6996_v47, %v7120_v3  ;;  %v7395_v63 = vsel %vm2413_vm4, %v3218_v6, 0.0 }
 0x165   : > { %2010 = vst.msk [vmem:[%s6157_s19 + $0xb4] sm:$0xf] %vm1964_vm3, %v5056_v40  ;;  %2331 = vst.msk [vmem:[%s6171_s22 + $0xb8] sm:$0xf] %vm1964_vm3, %v5121_v2  ;;  %v7398_v15 = vsel %vm2413_vm4, %v2392_v31, 0.0  ;;  %v7401_v7 = vsel %vm2413_vm4, %v2391_v62, 0.0  ;;  %v3224_v46 = vmul.f32 %v7189_v48, %v7189_v48  ;;  %v2390_v3 = vmul.f32 %v7187_v10, %v7187_v10  ;;  %2505 = vadd.xlane.f32.xlu0 %v7089_v0 }
 0x166   : > { %2329 = vst.msk [vmem:[%s6171_s22 + $0xb0] sm:$0xf] %vm1964_vm3, %v5119_v13  ;;  %10519 = vst [vmem:[#allocation112_spill] sm:$0xff] %v7398_v15  ;;  %v7413_v43 = vmax.f32 %v917_v28, 0.0  ;;  %v7415_v31 = vmax.f32 %v909_v41, 0.0  ;;  %v920_v62 = vadd.f32 %v6996_v47, %v7133_v39  ;;  %v912_v6 = vadd.f32 %v6996_v47, %v7149_v60  ;;  %v7482_v48 = vpop.f32.mrb[60].mxu1 }
 0x167   : > { %2332 = vst.msk [vmem:[%s6171_s22 + $0xbc] sm:$0xf] %vm1964_vm3, %v5122_v35  ;;  %2330 = vst.msk [vmem:[%s6171_s22 + $0xb4] sm:$0xf] %vm1964_vm3, %v5120_v57  ;;  %v1526_v32 = vadd.f32 %v6996_v47, %v7122_v8  ;;  %v1518_v40 = vadd.f32 %v6996_v47, %v7135_v1  ;;  %v2389_v2 = vmul.f32 %v7163_v53, %v7163_v53  ;;  %v7434_v8 = vpop.f32.mrb[60].mxu0  ;;  %v10522_v35 = vld [vmem:[#allocation74_spill] sm:$0xff] }
 0x168   : > { %10520 = vst [vmem:[#allocation113_spill] sm:$0xff] %v7413_v43  ;;  %10521 = vst [vmem:[#allocation114_spill] sm:$0xff] %v7415_v31  ;;  %v3223_v13 = vmul.f32 %v7228_v18, %v7228_v18  ;;  %v5061_v39 = vpack.c.bf16 %v7413_v43, %v7413_v43  ;;  %v5059_v60 = vpack.c.bf16 %v7415_v31, %v7415_v31  ;;  %2508 = vadd.xlane.f32.xlu1 %v10522_v35  ;;  %v7445_v41 = vpop.f32.mrb[61].mxu0 }
 0x169   : > { %v7437_v1 = vmax.f32 %v920_v62, 0.0  ;;  %v7439_v57 = vmax.f32 %v912_v6, 0.0  ;;  %v7441_v0 = vmax.f32 %v1526_v32, 0.0  ;;  %v7443_v28 = vmax.f32 %v1518_v40, 0.0  ;;  %v7459_v32 = vpop.f32.mrb[62].mxu0  ;;  %3337 = vadd.xlane.f32.xlu0 %v7101_v58 }
 0x16a   : > { %v3222_v53 = vmul.f32 %v7191_v5, %v7191_v5  ;;  %v2396_v18 = vmul.f32 %v7310_v29, %v7310_v29  ;;  %2015 = vst.msk [vmem:[%s6157_s19 + $0xc8] sm:$0xf] %vm1964_vm3, %v5061_v39  ;;  %2013 = vst.msk [vmem:[%s6157_s19 + $0xc0] sm:$0xf] %vm1964_vm3, %v5059_v60  ;;  %v1529_v62 = vadd.f32 %v6996_v47, %v7151_v42  ;;  %v7469_v60 = vpop.f32.mrb[63].mxu0  ;;  %v7476_v29 = vsel %vm2413_vm4, %v3224_v46, 0.0 }
 0x16b   : > { %10523 = vst [vmem:[#allocation74_spill] sm:$0xff] %v7437_v1  ;;  %10524 = vst [vmem:[#allocation115_spill] sm:$0xff] %v7439_v57  ;;  %v1521_v6 = vadd.f32 %v6996_v47, %v7165_v54  ;;  %v5062_v40 = vpack.c.bf16 %v7437_v1, %v7437_v1  ;;  %v5060_v35 = vpack.c.bf16 %v7439_v57, %v7439_v57  ;;  %v7473_v54 = vsel %vm2413_vm4, %v3225_v20, 0.0 }
 0x16c   : > { %10525 = vst [vmem:[#allocation116_spill] sm:$0xff] %v7441_v0  ;;  %10526 = vst [vmem:[#allocation117_spill] sm:$0xff] %v7443_v28  ;;  %v5125_v39 = vpack.c.bf16 %v7441_v0, %v7441_v0  ;;  %v5123_v42 = vpack.c.bf16 %v7443_v28, %v7443_v28  ;;  %v7478_v5 = vmax.f32 %v1529_v62, 0.0  ;;  %3340 = vadd.xlane.f32.xlu1 %v7092_v22  ;;  %v7486_v12 = vsel %vm2413_vm4, %v2390_v3, 0.0  ;;  %v7504_v22 = vpop.f32.mrb[61].mxu1 }
 0x16d   : > { %v7480_v10 = vmax.f32 %v1521_v6, 0.0  ;;  %v7489_v15 = vsel %vm2413_vm4, %v2389_v2, 0.0  ;;  %v7492_v58 = vsel %vm2413_vm4, %v3223_v13, 0.0  ;;  %v2395_v20 = vmul.f32 %v7287_v51, %v7287_v51  ;;  %2016 = vst.msk [vmem:[%s6157_s19 + $0xcc] sm:$0xf] %vm1964_vm3, %v5062_v40  ;;  %v7514_v62 = vpop.f32.mrb[62].mxu1  ;;  %2499 = vadd.xlane.f32.xlu0 %v7107_v52 }
 0x16e   : > { %10527 = vst [vmem:[#allocation118_spill] sm:$0xff] %v7478_v5  ;;  %10529 = vst [vmem:[#allocation120_spill] sm:$0xff] %v7492_v58  ;;  %v5126_v46 = vpack.c.bf16 %v7478_v5, %v7478_v5  ;;  %v933_v2 = vadd.f32 %v6996_v47, %v7205_v44  ;;  %v925_v13 = vadd.f32 %v6996_v47, %v7215_v23  ;;  %v7517_v6 = vsel %vm2413_vm4, %v3222_v53, 0.0  ;;  %v10534_v51 = vld [vmem:[#allocation83_spill] sm:$0xff] }
 0x16f   : > { %10528 = vst [vmem:[#allocation119_spill] sm:$0xff] %v7480_v10  ;;  %2014 = vst.msk [vmem:[%s6157_s19 + $0xc4] sm:$0xf] %vm1964_vm3, %v5060_v35  ;;  %v5124_v3 = vpack.c.bf16 %v7480_v10, %v7480_v10  ;;  %v7520_v40 = vsel %vm2413_vm4, %v2396_v18, 0.0  ;;  %v3229_v35 = vmul.f32 %v7358_v38, %v7358_v38  ;;  %v2394_v44 = vmul.f32 %v7312_v50, %v7312_v50 }
 0x170   : > { %2335 = vst.msk [vmem:[%s6171_s22 + $0xc8] sm:$0xf] %vm1964_vm3, %v5125_v39  ;;  %2333 = vst.msk [vmem:[%s6171_s22 + $0xc0] sm:$0xf] %vm1964_vm3, %v5123_v42  ;;  %v3228_v39 = vmul.f32 %v7314_v61, %v7314_v61  ;;  %v7526_v42 = vpop.f32.mrb[63].mxu1  ;;  %v2393_v53 = vmul.f32 %v7289_v16, %v7289_v16  ;;  %v7537_v18 = vmax.f32 %v933_v2, 0.0  ;;  %2502 = vadd.xlane.f32.xlu1 %v10534_v51 }
 0x171   : > { %10530 = vst [vmem:[#allocation121_spill] sm:$0xff] %v7517_v6  ;;  %10531 = vst [vmem:[#allocation122_spill] sm:$0xff] %v7520_v40  ;;  %v7539_v23 = vmax.f32 %v925_v13, 0.0  ;;  %v936_v52 = vadd.f32 %v6996_v47, %v7230_v21  ;;  %v928_v50 = vadd.f32 %v6996_v47, %v7254_v24  ;;  %v10535_v61 = vld [vmem:[#allocation94_spill] sm:$0xff]  ;;  %v3226_v51 = vmul.f32 %v7316_v49, %v7316_v49 }
 0x172   : > { %2336 = vst.msk [vmem:[%s6171_s22 + $0xcc] sm:$0xf] %vm1964_vm3, %v5126_v46  ;;  %2334 = vst.msk [vmem:[%s6171_s22 + $0xc4] sm:$0xf] %vm1964_vm3, %v5124_v3  ;;  %v1542_v16 = vadd.f32 %v6996_v47, %v10535_v61  ;;  %v1534_v46 = vadd.f32 %v6996_v47, %v7232_v27  ;;  %v3227_v3 = vmul.f32 %v7360_v59, %v7360_v59  ;;  %v10540_v27 = vld [vmem:[#allocation85_spill] sm:$0xff]  ;;  %v7602_v40 = vsel %vm2413_vm4, %v2394_v44, 0.0 }
 0x173   : > { %10532 = vst [vmem:[#allocation123_spill] sm:$0xff] %v7537_v18  ;;  %10533 = vst [vmem:[#allocation124_spill] sm:$0xff] %v7539_v23  ;;  %v5065_v2 = vpack.c.bf16 %v7537_v18, %v7537_v18  ;;  %v5063_v21 = vpack.c.bf16 %v7539_v23, %v7539_v23  ;;  %v7558_v13 = vmax.f32 %v936_v52, 0.0  ;;  %v7560_v24 = vmax.f32 %v928_v50, 0.0  ;;  %3331 = vadd.xlane.f32.xlu0 %v10540_v27  ;;  %v10541_v52 = vld [vmem:[#allocation84_spill] sm:$0xff] }
 0x174   : > { %v7562_v61 = vmax.f32 %v1542_v16, 0.0  ;;  %v7564_v38 = vmax.f32 %v1534_v46, 0.0  ;;  %v2400_v59 = vmul.f32 %v7437_v1, %v7437_v1  ;;  %v2399_v49 = vmul.f32 %v7413_v43, %v7413_v43  ;;  %3334 = vadd.xlane.f32.xlu1 %v10541_v52 }
 0x175   : > { %10536 = vst [vmem:[#allocation83_spill] sm:$0xff] %v7558_v13  ;;  %10537 = vst [vmem:[#allocation94_spill] sm:$0xff] %v7560_v24  ;;  %v1545_v50 = vadd.f32 %v6996_v47, %v7256_v26  ;;  %v1537_v16 = vadd.f32 %v6996_v47, %v7266_v25  ;;  %v5066_v46 = vpack.c.bf16 %v7558_v13, %v7558_v13  ;;  %v7589_v27 = vsel %vm2413_vm4, %v2395_v20, 0.0  ;;  %v10544_v20 = vld [vmem:[#allocation87_spill] sm:$0xff] }
 0x176   : > { %10538 = vst [vmem:[#allocation125_spill] sm:$0xff] %v7562_v61  ;;  %10539 = vst [vmem:[#allocation126_spill] sm:$0xff] %v7564_v38  ;;  %v5127_v26 = vpack.c.bf16 %v7564_v38, %v7564_v38  ;;  %v7592_v25 = vsel %vm2413_vm4, %v3229_v35, 0.0  ;;  %v7599_v1 = vsel %vm2413_vm4, %v3228_v39, 0.0  ;;  %v7605_v58 = vsel %vm2413_vm4, %v2393_v53, 0.0 }
 0x177   : > { %2019 = vst.msk [vmem:[%s6157_s19 + $0xd8] sm:$0xf] %vm1964_vm3, %v5065_v2  ;;  %2017 = vst.msk [vmem:[%s6157_s19 + $0xd0] sm:$0xf] %vm1964_vm3, %v5063_v21  ;;  %v5064_v2 = vpack.c.bf16 %v7560_v24, %v7560_v24  ;;  %v5129_v21 = vpack.c.bf16 %v7562_v61, %v7562_v61  ;;  %v7594_v52 = vmax.f32 %v1545_v50, 0.0  ;;  %v7596_v43 = vmax.f32 %v1537_v16, 0.0  ;;  %2517 = vadd.xlane.f32.xlu0 %v10544_v20 }
 0x178   : > { %v7608_v6 = vsel %vm2413_vm4, %v3227_v3, 0.0  ;;  %2020 = vst.msk [vmem:[%s6157_s19 + $0xdc] sm:$0xf] %vm1964_vm3, %v5066_v46  ;;  %2337 = vst.msk [vmem:[%s6171_s22 + $0xd0] sm:$0xf] %vm1964_vm3, %v5127_v26  ;;  %v949_v44 = vadd.f32 %v6996_v47, %v7308_v34  ;;  %v941_v53 = vadd.f32 %v6996_v47, %v7318_v33  ;;  %v10545_v3 = vld [vmem:[#allocation86_spill] sm:$0xff]  ;;  %v3232_v34 = vmul.f32 %v7441_v0, %v7441_v0 }
 0x179   : > { %10542 = vst [vmem:[#allocation85_spill] sm:$0xff] %v7594_v52  ;;  %10543 = vst [vmem:[#allocation84_spill] sm:$0xff] %v7596_v43  ;;  %v5130_v35 = vpack.c.bf16 %v7594_v52, %v7594_v52  ;;  %v5128_v39 = vpack.c.bf16 %v7596_v43, %v7596_v43  ;;  %2520 = vadd.xlane.f32.xlu1 %v10545_v3  ;;  %v7629_v50 = vsel %vm2413_vm4, %v3226_v51, 0.0  ;;  %v7632_v16 = vsel %vm2413_vm4, %v2400_v59, 0.0 }
 0x17a   : > { %2018 = vst.msk [vmem:[%s6157_s19 + $0xd4] sm:$0xf] %vm1964_vm3, %v5064_v2  ;;  %2339 = vst.msk [vmem:[%s6171_s22 + $0xd8] sm:$0xf] %vm1964_vm3, %v5129_v21  ;;  %v7635_v46 = vsel %vm2413_vm4, %v2399_v49, 0.0  ;;  %v3233_v2 = vmul.f32 %v7478_v5, %v7478_v5  ;;  %v2398_v33 = vmul.f32 %v7439_v57, %v7439_v57  ;;  %v7647_v51 = vmax.f32 %v949_v44, 0.0 }
 0x17b   : > { %2340 = vst.msk [vmem:[%s6171_s22 + $0xdc] sm:$0xf] %vm1964_vm3, %v5130_v35  ;;  %2338 = vst.msk [vmem:[%s6171_s22 + $0xd4] sm:$0xf] %vm1964_vm3, %v5128_v39  ;;  %v7649_v59 = vmax.f32 %v941_v53, 0.0  ;;  %v952_v49 = vadd.f32 %v6996_v47, %v7335_v14  ;;  %v944_v21 = vadd.f32 %v6996_v47, %v7348_v19  ;;  %v1558_v26 = vadd.f32 %v6996_v47, %v7320_v11  ;;  %v10548_v44 = vld [vmem:[#allocation95_spill] sm:$0xff] }
 0x17c   : > { %10546 = vst [vmem:[#allocation87_spill] sm:$0xff] %v7647_v51  ;;  %v1550_v20 = vadd.f32 %v6996_v47, %v7337_v9  ;;  %3349 = vadd.xlane.f32.xlu0 %v7224_v4  ;;  %v2397_v35 = vmul.f32 %v7415_v31, %v7415_v31  ;;  %v3231_v39 = vmul.f32 %v7480_v10, %v7480_v10  ;;  %v10553_v10 = vld [vmem:[#allocation109_spill] sm:$0xff]  ;;  %v10557_v57 = vld [vmem:[#allocation98_spill] sm:$0xff]  ;;  %v7709_v0 = vsel %vm2413_vm4, %v3232_v34, 0.0 }
 0x17d   : > { %10547 = vst [vmem:[#allocation86_spill] sm:$0xff] %v7649_v59  ;;  %v5069_v14 = vpack.c.bf16 %v7647_v51, %v7647_v51  ;;  %v5067_v19 = vpack.c.bf16 %v7649_v59, %v7649_v59  ;;  %3352 = vadd.xlane.f32.xlu1 %v10548_v44  ;;  %v7669_v11 = vmax.f32 %v952_v49, 0.0  ;;  %v7671_v53 = vmax.f32 %v944_v21, 0.0 }
 0x17e   : > { %v7673_v9 = vmax.f32 %v1558_v26, 0.0  ;;  %v7675_v4 = vmax.f32 %v1550_v20, 0.0  ;;  %v3230_v3 = vmul.f32 %v7443_v28, %v7443_v28  ;;  %v2404_v31 = vmul.f32 %v7558_v13, %v7558_v13 }
 0x17f   : > { %10549 = vst [vmem:[#allocation95_spill] sm:$0xff] %v7669_v11  ;;  %10550 = vst [vmem:[#allocation127_spill] sm:$0xff] %v7671_v53  ;;  %v1561_v49 = vadd.f32 %v6996_v47, %v10553_v10  ;;  %v1553_v21 = vadd.f32 %v6996_v47, %v7362_v45  ;;  %v5070_v26 = vpack.c.bf16 %v7669_v11, %v7669_v11  ;;  %v10554_v10 = vld [vmem:[#allocation99_spill] sm:$0xff]  ;;  %v7699_v44 = vsel %vm2413_vm4, %v3233_v2, 0.0 }
 0x180   : > { %10551 = vst [vmem:[#allocation128_spill] sm:$0xff] %v7673_v9  ;;  %10552 = vst [vmem:[#allocation129_spill] sm:$0xff] %v7675_v4  ;;  %v5068_v20 = vpack.c.bf16 %v7671_v53, %v7671_v53  ;;  %2511 = vadd.xlane.f32.xlu0 %v10554_v10  ;;  %v2403_v45 = vmul.f32 %v7537_v18, %v7537_v18  ;;  %v7712_v5 = vsel %vm2413_vm4, %v2398_v33, 0.0  ;;  %v7715_v10 = vsel %vm2413_vm4, %v2397_v35, 0.0 }
 0x181   : > { %2023 = vst.msk [vmem:[%s6157_s19 + $0xe8] sm:$0xf] %vm1964_vm3, %v5069_v14  ;;  %2021 = vst.msk [vmem:[%s6157_s19 + $0xe0] sm:$0xf] %vm1964_vm3, %v5067_v19  ;;  %v5133_v14 = vpack.c.bf16 %v7673_v9, %v7673_v9  ;;  %v5131_v19 = vpack.c.bf16 %v7675_v4, %v7675_v4  ;;  %v7703_v13 = vmax.f32 %v1561_v49, 0.0  ;;  %v7705_v28 = vmax.f32 %v1553_v21, 0.0  ;;  %2514 = vadd.xlane.f32.xlu1 %v10557_v57 }
 0x182   : > { %v7718_v2 = vsel %vm2413_vm4, %v3231_v39, 0.0  ;;  %2024 = vst.msk [vmem:[%s6157_s19 + $0xec] sm:$0xf] %vm1964_vm3, %v5070_v26  ;;  %2022 = vst.msk [vmem:[%s6157_s19 + $0xe4] sm:$0xf] %vm1964_vm3, %v5068_v20  ;;  %v965_v33 = vadd.f32 %v6996_v47, %v7434_v8  ;;  %v957_v35 = vadd.f32 %v6996_v47, %v7445_v41  ;;  %v7737_v39 = vsel %vm2413_vm4, %v3230_v3, 0.0 }
 0x183   : > { %10555 = vst [vmem:[#allocation109_spill] sm:$0xff] %v7703_v13  ;;  %10556 = vst [vmem:[#allocation99_spill] sm:$0xff] %v7705_v28  ;;  %v5134_v57 = vpack.c.bf16 %v7703_v13, %v7703_v13  ;;  %v5132_v34 = vpack.c.bf16 %v7705_v28, %v7705_v28  ;;  %v7740_v49 = vsel %vm2413_vm4, %v2404_v31, 0.0  ;;  %v3237_v21 = vmul.f32 %v7594_v52, %v7594_v52  ;;  %v10558_v20 = vld [vmem:[#allocation101_spill] sm:$0xff]  ;;  %v10561_v3 = vld [vmem:[#allocation100_spill] sm:$0xff] }
 0x184   : > { %2343 = vst.msk [vmem:[%s6171_s22 + $0xe8] sm:$0xf] %vm1964_vm3, %v5133_v14  ;;  %2341 = vst.msk [vmem:[%s6171_s22 + $0xe0] sm:$0xf] %vm1964_vm3, %v5131_v19  ;;  %v3236_v26 = vmul.f32 %v7562_v61, %v7562_v61  ;;  %3343 = vadd.xlane.f32.xlu0 %v10558_v20  ;;  %v7748_v14 = vsel %vm2413_vm4, %v2403_v45, 0.0  ;;  %v2402_v8 = vmul.f32 %v7560_v24, %v7560_v24  ;;  %v7756_v31 = vmax.f32 %v965_v33, 0.0  ;;  %v7761_v19 = vpop.xlane.xlu0 %3253 }
 0x185   : > { %2344 = vst.msk [vmem:[%s6171_s22 + $0xec] sm:$0xf] %vm1964_vm3, %v5134_v57  ;;  %2342 = vst.msk [vmem:[%s6171_s22 + $0xe4] sm:$0xf] %vm1964_vm3, %v5132_v34  ;;  %v7758_v41 = vmax.f32 %v957_v35, 0.0  ;;  %3346 = vadd.xlane.f32.xlu1 %v10561_v3  ;;  %v968_v20 = vadd.f32 %v6996_v47, %v7459_v32  ;;  %v960_v45 = vadd.f32 %v6996_v47, %v7469_v60  ;;  %5418 = vrsqrt.f32 %v7761_v19  ;;  %v7772_v34 = vpop.xlane.xlu1 %2421 }
 0x186   : > { %10559 = vst [vmem:[#allocation98_spill] sm:$0xff] %v7756_v31  ;;  %v1574_v24 = vadd.f32 %v6996_v47, %v7482_v48  ;;  %v1566_v57 = vadd.f32 %v6996_v47, %v7504_v22  ;;  %v2401_v33 = vmul.f32 %v7539_v23, %v7539_v23  ;;  %v3235_v35 = vmul.f32 %v7596_v43, %v7596_v43  ;;  %v10562_v23 = vld [vmem:[#allocation102_spill] sm:$0xff] }
 0x187   : > { %10560 = vst [vmem:[#allocation101_spill] sm:$0xff] %v7758_v41  ;;  %v3234_v32 = vmul.f32 %v7564_v38, %v7564_v38  ;;  %5420 = vrsqrt.f32 %v7772_v34  ;;  %v7782_v48 = vsel %vm2413_vm4, %v3237_v21, 0.0  ;;  %v7785_v60 = vsel %vm2413_vm4, %v3236_v26, 0.0 }
 0x188   : > { %v2408_v22 = vmul.f32 %v7669_v11, %v7669_v11  ;;  %2529 = vadd.xlane.f32.xlu0 %v7353_v55  ;;  %v7791_v3 = vsel %vm2413_vm4, %v2402_v8, 0.0  ;;  %v2407_v38 = vmul.f32 %v7647_v51, %v7647_v51  ;;  %v5073_v21 = vpack.c.bf16 %v7756_v31, %v7756_v31  ;;  %v7800_v43 = vpop.xlane.xlu0 %2415 }
 0x189   : > { %v5071_v26 = vpack.c.bf16 %v7758_v41, %v7758_v41  ;;  %2532 = vadd.xlane.f32.xlu1 %v10562_v23  ;;  %v7802_v11 = vmax.f32 %v968_v20, 0.0  ;;  %v7804_v55 = vmax.f32 %v960_v45, 0.0  ;;  %v7806_v8 = vmax.f32 %v1574_v24, 0.0  ;;  %v7810_v18 = vpop.xlane.xlu1 %2424 }
 0x18a   : > { %v7808_v61 = vmax.f32 %v1566_v57, 0.0  ;;  %5422 = vrsqrt.f32 %v7800_v43  ;;  %v7814_v51 = vsel %vm2413_vm4, %v2401_v33, 0.0  ;;  %v7817_v52 = vsel %vm2413_vm4, %v3235_v35, 0.0  ;;  %2027 = vst.msk [vmem:[%s6157_s19 + $0xf8] sm:$0xf] %vm1964_vm3, %v5073_v21 }
 0x18b   : > { %10563 = vst [vmem:[#allocation100_spill] sm:$0xff] %v7802_v11  ;;  %10564 = vst [vmem:[#allocation102_spill] sm:$0xff] %v7804_v55  ;;  %v7820_v23 = vsel %vm2413_vm4, %v3234_v32, 0.0  ;;  %5424 = vrsqrt.f32 %v7810_v18  ;;  %v7828_v24 = vsel %vm2413_vm4, %v2408_v22, 0.0  ;;  %v3241_v20 = vmul.f32 %v7703_v13, %v7703_v13 }
 0x18c   : > { %10565 = vst [vmem:[#allocation130_spill] sm:$0xff] %v7806_v8  ;;  %10566 = vst [vmem:[#allocation131_spill] sm:$0xff] %v7808_v61  ;;  %v3240_v45 = vmul.f32 %v7673_v9, %v7673_v9  ;;  %3361 = vadd.xlane.f32.xlu0 %v7365_v30  ;;  %v5074_v57 = vpack.c.bf16 %v7802_v11, %v7802_v11  ;;  %v5072_v33 = vpack.c.bf16 %v7804_v55, %v7804_v55  ;;  %v7846_v30 = vpop.xlane.xlu0 %3247 }
 0x18d   : > { %2025 = vst.msk [vmem:[%s6157_s19 + $0xf0] sm:$0xf] %vm1964_vm3, %v5071_v26  ;;  %v5137_v35 = vpack.c.bf16 %v7806_v8, %v7806_v8  ;;  %v5135_v32 = vpack.c.bf16 %v7808_v61, %v7808_v61  ;;  %vm3454_vm5 = vcmp.eq.f32.partialorder %v7761_v19, inf  ;;  %vm3456_vm6 = vcmp.eq.f32.partialorder %v7761_v19, 0.0  ;;  %3364 = vadd.xlane.f32.xlu1 %v7356_v36  ;;  %v7856_v9 = vpop.xlane.xlu1 %3256 }
 0x18e   : > { %v7849_v22 = vsel %vm2413_vm4, %v2407_v38, 0.0  ;;  %v1577_v21 = vadd.f32 %v6996_v47, %v7514_v62  ;;  %v3457_v26 = vand.u32 2147483648, %v7761_v19  ;;  %vm2622_vm7 = vcmp.eq.f32.partialorder %v7772_v34, inf  ;;  %2028 = vst.msk [vmem:[%s6157_s19 + $0xfc] sm:$0xf] %vm1964_vm3, %v5074_v57 }
 0x18f   : > { %vm2624_vm8 = vcmp.eq.f32.partialorder %v7772_v34, 0.0  ;;  %5426 = vrsqrt.f32 %v7846_v30  ;;  %2026 = vst.msk [vmem:[%s6157_s19 + $0xf4] sm:$0xf] %vm1964_vm3, %v5072_v33  ;;  %2347 = vst.msk [vmem:[%s6171_s22 + $0xf8] sm:$0xf] %vm1964_vm3, %v5137_v35  ;;  %v2625_v36 = vand.u32 2147483648, %v7772_v34  ;;  %v5419_v13 = vpop.eup %5418 }
 0x190   : > { %2345 = vst.msk [vmem:[%s6171_s22 + $0xf0] sm:$0xf] %vm1964_vm3, %v5135_v32  ;;  %5428 = vrsqrt.f32 %v7856_v9  ;;  %v7870_v38 = vsel %vm2413_vm4, %v3241_v20, 0.0  ;;  %v7873_v62 = vsel %vm2413_vm4, %v3240_v45, 0.0  ;;  %vm2629_vm9 = vcmp.eq.f32.partialorder %v7810_v18, inf  ;;  %2523 = vadd.xlane.f32.xlu0 %v7371_v37  ;;  %v7884_v45 = vpop.xlane.xlu0 %2418 }
 0x191   : > { %vm2608_vm10 = vcmp.eq.f32.partialorder %v7800_v43, inf  ;;  %vm2610_vm11 = vcmp.eq.f32.partialorder %v7800_v43, 0.0  ;;  %v2611_v57 = vand.u32 2147483648, %v7800_v43  ;;  %v5421_v33 = vpop.eup %5420  ;;  %v3453_v35 = vmul.f32 %v5419_v13, %v7761_v19  ;;  %2526 = vadd.xlane.f32.xlu1 %v7368_v56  ;;  %v7889_v41 = vpop.xlane.xlu1 %3250 }
 0x192   : > { %vm2631_vm12 = vcmp.eq.f32.partialorder %v7810_v18, 0.0  ;;  %v2632_v20 = vand.u32 2147483648, %v7810_v18  ;;  %v7886_v32 = vmax.f32 %v1577_v21, 0.0  ;;  %v2621_v61 = vmul.f32 %v5421_v33, %v7772_v34 }
 0x193   : > { %5430 = vrsqrt.f32 %v7884_v45  ;;  %v2406_v37 = vmul.f32 %v7671_v53, %v7671_v53  ;;  %v2405_v13 = vmul.f32 %v7649_v59, %v7649_v59  ;;  %v3455_v56 = vsel %vm3454_vm5, %v7761_v19, %v3453_v35 }
 0x194   : > { %10567 = vst [vmem:[#allocation132_spill] sm:$0xff] %v7886_v32  ;;  %vm3440_vm13 = vcmp.eq.f32.partialorder %v7846_v30, inf  ;;  %5432 = vrsqrt.f32 %v7889_v41  ;;  %v1569_v21 = vadd.f32 %v6996_v47, %v7526_v42  ;;  %v5423_v33 = vpop.eup %5422  ;;  %v3458_v55 = vsel %vm3456_vm6, %v3457_v26, %v3455_v56  ;;  %3355 = vadd.xlane.f32.xlu0 %v7395_v63  ;;  %v7916_v42 = vpop.xlane.xlu0 %2433 }
 0x195   : > { %v2623_v53 = vsel %vm2622_vm7, %v7772_v34, %v2621_v61  ;;  %vm3442_vm14 = vcmp.eq.f32.partialorder %v7846_v30, 0.0  ;;  %v3443_v59 = vand.u32 2147483648, %v7846_v30  ;;  %v5425_v35 = vpop.eup %5424  ;;  %v2607_v47 = vmul.f32 %v5423_v33, %v7800_v43  ;;  %3358 = vadd.xlane.f32.xlu1 %v7374_v17  ;;  %v7923_v34 = vpop.xlane.xlu1 %2436 }
 0x196   : > { %v2626_v8 = vsel %vm2624_vm8, %v2625_v36, %v2623_v53  ;;  %vm3461_vm15 = vcmp.eq.f32.partialorder %v7856_v9, inf  ;;  %v5138_v61 = vpack.c.bf16 %v7886_v32, %v7886_v32  ;;  %v2628_v19 = vmul.f32 %v5425_v35, %v7810_v18 }
 0x197   : > { %vm3463_vm0 = vcmp.eq.f32.partialorder %v7856_v9, 0.0  ;;  %v3464_v63 = vand.u32 2147483648, %v7856_v9  ;;  %5434 = vrsqrt.f32 %v7916_v42  ;;  %v3888_v53 = vadd.f32 1e-10, %v3458_v55 }
 0x198   : > { %v2609_v17 = vsel %vm2608_vm10, %v7800_v43, %v2607_v47  ;;  %v7930_v26 = vsel %vm2413_vm4, %v2406_v37, 0.0  ;;  %v7933_v36 = vsel %vm2413_vm4, %v2405_v13, 0.0  ;;  %2348 = vst.msk [vmem:[%s6171_s22 + $0xfc] sm:$0xf] %vm1964_vm3, %v5138_v61  ;;  %v3056_v33 = vadd.f32 1e-10, %v2626_v8  ;;  %2541 = vadd.xlane.f32.xlu0 %v7401_v7  ;;  %v7950_v61 = vpop.xlane.xlu0 %3265 }
 0x199   : > { %v5427_v56 = vpop.eup %5426  ;;  %v2630_v35 = vsel %vm2629_vm9, %v7810_v18, %v2628_v19  ;;  %v2612_v55 = vsel %vm2610_vm11, %v2611_v57, %v2609_v17  ;;  %v7943_v47 = vmax.f32 %v1569_v21, 0.0  ;;  %5436 = vrsqrt.f32 %v7923_v34  ;;  %v10569_v8 = vld [vmem:[#allocation112_spill] sm:$0xff]  ;;  %v7959_v18 = vpop.xlane.xlu1 %3268 }
 0x19a   : > { %v5429_v37 = vpop.eup %5428  ;;  %v2633_v13 = vsel %vm2631_vm12, %v2632_v20, %v2630_v35  ;;  %v3439_v32 = vmul.f32 %v5427_v56, %v7846_v30  ;;  %2544 = vadd.xlane.f32.xlu1 %v10569_v8  ;;  %v7954_v43 = vmul.f32 %v7705_v28, %v7705_v28  ;;  %vm2615_vm1 = vcmp.eq.f32.partialorder %v7884_v45, inf }
 0x19b   : > { %10568 = vst [vmem:[#allocation133_spill] sm:$0xff] %v7943_v47  ;;  %v3460_v7 = vmul.f32 %v5429_v37, %v7856_v9  ;;  %vm2617_vm2 = vcmp.eq.f32.partialorder %v7884_v45, 0.0  ;;  %v7963_v57 = vmul.f32 %v7675_v4, %v7675_v4  ;;  %5438 = vrcp.f32 %v3888_v53 }
 0x19c   : > { %v3054_v20 = vadd.f32 1e-10, %v2612_v55  ;;  %v3441_v21 = vsel %vm3440_vm13, %v7846_v30, %v3439_v32  ;;  %vm3447_vm5 = vcmp.eq.f32.partialorder %v7889_v41, inf  ;;  %5440 = vrcp.f32 %v3056_v33  ;;  %3373 = vadd.xlane.f32.xlu0 %v7476_v29  ;;  %v7981_v33 = vpop.xlane.xlu0 %2427 }
 0x19d   : > { %v5431_v19 = vpop.eup %5430  ;;  %v3057_v17 = vadd.f32 1e-10, %v2633_v13  ;;  %v3462_v56 = vsel %vm3461_vm15, %v7856_v9, %v3460_v7  ;;  %v3444_v35 = vsel %vm3442_vm14, %v3443_v59, %v3441_v21  ;;  %vm3449_vm6 = vcmp.eq.f32.partialorder %v7889_v41, 0.0  ;;  %v7987_v9 = vpop.xlane.xlu1 %2430 }
 0x19e   : > { %v5433_v53 = vpop.eup %5432  ;;  %v3465_v55 = vsel %vm3463_vm0, %v3464_v63, %v3462_v56  ;;  %v2614_v32 = vmul.f32 %v5431_v19, %v7884_v45  ;;  %5442 = vrsqrt.f32 %v7959_v18  ;;  %3376 = vadd.xlane.f32.xlu1 %v7473_v54  ;;  %v3450_v59 = vand.u32 2147483648, %v7889_v41 }
 0x19f   : > { %v3446_v37 = vmul.f32 %v5433_v53, %v7889_v41  ;;  %v2618_v29 = vand.u32 2147483648, %v7884_v45  ;;  %5444 = vrsqrt.f32 %v7950_v61  ;;  %v3886_v30 = vadd.f32 1e-10, %v3444_v35 }
 0x1a0   : > { %5446 = vrcp.f32 %v3054_v20  ;;  %v2616_v63 = vsel %vm2615_vm1, %v7884_v45, %v2614_v32  ;;  %vm2650_vm7 = vcmp.eq.f32.partialorder %v7916_v42, inf  ;;  %v3889_v13 = vadd.f32 1e-10, %v3465_v55  ;;  %2535 = vadd.xlane.f32.xlu0 %v7489_v15  ;;  %v8004_v21 = vpop.xlane.xlu0 %3259  ;;  %v10570_v55 = vld [vmem:[#allocation121_spill] sm:$0xff] }
 0x1a1   : > { %v5435_v54 = vpop.eup %5434  ;;  %5448 = vrcp.f32 %v3057_v17  ;;  %v3448_v8 = vsel %vm3447_vm5, %v7889_v41, %v3446_v37  ;;  %v2619_v7 = vsel %vm2617_vm2, %v2618_v29, %v2616_v63  ;;  %vm2657_vm8 = vcmp.eq.f32.partialorder %v7923_v34, inf  ;;  %v8010_v15 = vpop.xlane.xlu1 %3262  ;;  %v10571_v41 = vld [vmem:[#allocation120_spill] sm:$0xff] }
 0x1a2   : > { %vm2659_vm9 = vcmp.eq.f32.partialorder %v7923_v34, 0.0  ;;  %v2649_v20 = vmul.f32 %v5435_v54, %v7916_v42  ;;  %5450 = vrsqrt.f32 %v7987_v9  ;;  %2538 = vadd.xlane.f32.xlu1 %v7486_v12  ;;  %v2660_v19 = vand.u32 2147483648, %v7923_v34 }
 0x1a3   : > { %vm2652_vm10 = vcmp.eq.f32.partialorder %v7916_v42, 0.0  ;;  %v2653_v45 = vand.u32 2147483648, %v7916_v42  ;;  %5452 = vrsqrt.f32 %v7981_v33  ;;  %v5437_v17 = vpop.eup %5436  ;;  %v3451_v56 = vsel %vm3449_vm6, %v3450_v59, %v3448_v8 }
 0x1a4   : > { %5454 = vrcp.f32 %v3886_v30  ;;  %v3055_v35 = vadd.f32 1e-10, %v2619_v7  ;;  %v2651_v12 = vsel %vm2650_vm7, %v7916_v42, %v2649_v20  ;;  %v2656_v53 = vmul.f32 %v5437_v17, %v7923_v34  ;;  %3367 = vadd.xlane.f32.xlu0 %v10570_v55  ;;  %v8028_v59 = vpop.xlane.xlu0 %2445 }
 0x1a5   : > { %5456 = vrcp.f32 %v3889_v13  ;;  %vm3489_vm11 = vcmp.eq.f32.partialorder %v7959_v18, inf  ;;  %vm3491_vm12 = vcmp.eq.f32.partialorder %v7959_v18, 0.0  ;;  %v8021_v32 = vpop.eup %5438  ;;  %v3492_v37 = vand.u32 2147483648, %v7959_v18  ;;  %v8038_v13 = vpop.xlane.xlu1 %2448 }
 0x1a6   : > { %vm3482_vm13 = vcmp.eq.f32.partialorder %v7950_v61, inf  ;;  %vm3484_vm14 = vcmp.eq.f32.partialorder %v7950_v61, 0.0  ;;  %5458 = vrsqrt.f32 %v8010_v15  ;;  %3370 = vadd.xlane.f32.xlu1 %v10571_v41  ;;  %v8030_v29 = vpop.eup %5440  ;;  %v3887_v30 = vadd.f32 1e-10, %v3451_v56 }
 0x1a7   : > { %v2658_v63 = vsel %vm2657_vm8, %v7923_v34, %v2656_v53  ;;  %v2654_v54 = vsel %vm2652_vm10, %v2653_v45, %v2651_v12  ;;  %5460 = vrsqrt.f32 %v8004_v21  ;;  %v3485_v20 = vand.u32 2147483648, %v7950_v61 }
 0x1a8   : > { %v5443_v8 = vpop.eup %5442  ;;  %5462 = vrcp.f32 %v3055_v35  ;;  %v2661_v7 = vsel %vm2659_vm9, %v2660_v19, %v2658_v63  ;;  %vm2643_vm15 = vcmp.eq.f32.partialorder %v7987_v9, inf  ;;  %vm2645_vm0 = vcmp.eq.f32.partialorder %v7987_v9, 0.0  ;;  %2553 = vadd.xlane.f32.xlu0 %v7589_v27  ;;  %v10572_v19 = vld [vmem:[#allocation122_spill] sm:$0xff]  ;;  %v8055_v12 = vpop.xlane.xlu0 %3277 }
 0x1a9   : > { %v5445_v17 = vpop.eup %5444  ;;  %v3488_v56 = vmul.f32 %v5443_v8, %v7959_v18  ;;  %v2646_v42 = vand.u32 2147483648, %v7987_v9  ;;  %5464 = vrsqrt.f32 %v8038_v13  ;;  %v3060_v35 = vadd.f32 1e-10, %v2654_v54  ;;  %v8063_v41 = vpop.xlane.xlu1 %3280 }
 0x1aa   : > { %v8049_v45 = vpop.eup %5446  ;;  %v3481_v34 = vmul.f32 %v5445_v17, %v7950_v61  ;;  %vm2636_vm1 = vcmp.eq.f32.partialorder %v7981_v33, inf  ;;  %5466 = vrsqrt.f32 %v8028_v59  ;;  %2556 = vadd.xlane.f32.xlu1 %v10572_v19  ;;  %v3061_v55 = vadd.f32 1e-10, %v2661_v7 }
 0x1ab   : > { %v8057_v53 = vpop.eup %5448  ;;  %5468 = vrcp.f32 %v3887_v30  ;;  %v3490_v27 = vsel %vm3489_vm11, %v7959_v18, %v3488_v56  ;;  %vm2638_vm2 = vcmp.eq.f32.partialorder %v7981_v33, 0.0  ;;  %v2639_v17 = vand.u32 2147483648, %v7981_v33 }
 0x1ac   : > { %v5451_v63 = vpop.eup %5450  ;;  %v3493_v54 = vsel %vm3491_vm12, %v3492_v37, %v3490_v27  ;;  %v3483_v8 = vsel %vm3482_vm13, %v7950_v61, %v3481_v34  ;;  %5470 = vrsqrt.f32 %v8063_v41  ;;  %vm3475_vm5 = vcmp.eq.f32.partialorder %v8010_v15, inf  ;;  %3385 = vadd.xlane.f32.xlu0 %v7599_v1  ;;  %v8083_v27 = vpop.xlane.xlu0 %2439 }
 0x1ad   : > { %v5453_v30 = vpop.eup %5452  ;;  %v3893_v7 = vadd.f32 1e-10, %v3493_v54  ;;  %v3486_v56 = vsel %vm3484_vm14, %v3485_v20, %v3483_v8  ;;  %v2642_v19 = vmul.f32 %v5451_v63, %v7987_v9  ;;  %5472 = vrcp.f32 %v3060_v35  ;;  %v8091_v35 = vpop.xlane.xlu1 %2442 }
 0x1ae   : > { %v8077_v18 = vpop.eup %5454  ;;  %v2635_v37 = vmul.f32 %v5453_v30, %v7981_v33  ;;  %vm3477_vm6 = vcmp.eq.f32.partialorder %v8010_v15, 0.0  ;;  %v3478_v34 = vand.u32 2147483648, %v8010_v15  ;;  %3388 = vadd.xlane.f32.xlu1 %v7592_v25  ;;  %5474 = vrcp.f32 %v3061_v55 }
 0x1af   : > { %v8085_v61 = vpop.eup %5456  ;;  %v3892_v20 = vadd.f32 1e-10, %v3486_v56  ;;  %v2644_v1 = vsel %vm2643_vm15, %v7987_v9, %v2642_v19  ;;  %vm3468_vm7 = vcmp.eq.f32.partialorder %v8004_v21, inf  ;;  %5476 = vrcp.f32 %v3893_v7 }
 0x1b0   : > { %v5459_v63 = vpop.eup %5458  ;;  %v2647_v54 = vsel %vm2645_vm0, %v2646_v42, %v2644_v1  ;;  %v2637_v25 = vsel %vm2636_vm1, %v7981_v33, %v2635_v37  ;;  %vm3470_vm8 = vcmp.eq.f32.partialorder %v8004_v21, 0.0  ;;  %v3471_v56 = vand.u32 2147483648, %v8004_v21  ;;  %2547 = vadd.xlane.f32.xlu0 %v7605_v58  ;;  %v8111_v33 = vpop.xlane.xlu0 %3271 }
 0x1b1   : > { %v5461_v55 = vpop.eup %5460  ;;  %v2640_v8 = vsel %vm2638_vm2, %v2639_v17, %v2637_v25  ;;  %v3474_v30 = vmul.f32 %v5459_v63, %v8010_v15  ;;  %5478 = vrsqrt.f32 %v8055_v12  ;;  %v3059_v42 = vadd.f32 1e-10, %v2647_v54  ;;  %v8118_v37 = vpop.xlane.xlu1 %3274 }
 0x1b2   : > { %v8105_v9 = vpop.eup %5462  ;;  %v3467_v7 = vmul.f32 %v5461_v55, %v8004_v21  ;;  %vm2685_vm9 = vcmp.eq.f32.partialorder %v8038_v13, inf  ;;  %5480 = vrsqrt.f32 %v8091_v35  ;;  %2550 = vadd.xlane.f32.xlu1 %v7602_v40  ;;  %vm2687_vm10 = vcmp.eq.f32.partialorder %v8038_v13, 0.0 }
 0x1b3   : > { %v5465_v17 = vpop.eup %5464  ;;  %5482 = vrcp.f32 %v3892_v20  ;;  %v3476_v19 = vsel %vm3475_vm5, %v8010_v15, %v3474_v30  ;;  %v2688_v58 = vand.u32 2147483648, %v8038_v13  ;;  %v3058_v63 = vadd.f32 1e-10, %v2640_v8 }
 0x1b4   : > { %v5467_v1 = vpop.eup %5466  ;;  %v3479_v54 = vsel %vm3477_vm6, %v3478_v34, %v3476_v19  ;;  %v3469_v40 = vsel %vm3468_vm7, %v8004_v21, %v3467_v7  ;;  %v2684_v20 = vmul.f32 %v5465_v17, %v8038_v13  ;;  %vm2678_vm11 = vcmp.eq.f32.partialorder %v8028_v59, inf  ;;  %3379 = vadd.xlane.f32.xlu0 %v7629_v50  ;;  %v8139_v21 = vpop.xlane.xlu0 %2457 }
 0x1b5   : > { %v8126_v25 = vpop.eup %5468  ;;  %v3472_v55 = vsel %vm3470_vm8, %v3471_v56, %v3469_v40  ;;  %v2677_v30 = vmul.f32 %v5467_v1, %v8028_v59  ;;  %5484 = vrsqrt.f32 %v8083_v27  ;;  %v3891_v34 = vadd.f32 1e-10, %v3479_v54 }
 0x1b6   : > { %v5471_v15 = vpop.eup %5470  ;;  %5486 = vrcp.f32 %v3059_v42  ;;  %v2686_v8 = vsel %vm2685_vm9, %v8038_v13, %v2684_v20  ;;  %vm2680_vm12 = vcmp.eq.f32.partialorder %v8028_v59, 0.0  ;;  %3382 = vadd.xlane.f32.xlu1 %v7608_v6  ;;  %v3890_v56 = vadd.f32 1e-10, %v3472_v55  ;;  %v8145_v42 = vpop.xlane.xlu1 %2460 }
 0x1b7   : > { %v2689_v7 = vsel %vm2687_vm10, %v2688_v58, %v2686_v8  ;;  %v2679_v17 = vsel %vm2678_vm11, %v8028_v59, %v2677_v30  ;;  %v3516_v50 = vmul.f32 %v5471_v15, %v8063_v41  ;;  %v8147_v19 = vpop.eup %5472  ;;  %5488 = vrcp.f32 %v3058_v63 }
 0x1b8   : > { %v2681_v1 = vand.u32 2147483648, %v8028_v59  ;;  %vm3517_vm13 = vcmp.eq.f32.partialorder %v8063_v41, inf  ;;  %vm3519_vm14 = vcmp.eq.f32.partialorder %v8063_v41, 0.0  ;;  %v8152_v6 = vpop.eup %5474  ;;  %v3065_v54 = vadd.f32 1e-10, %v2689_v7  ;;  %2565 = vadd.xlane.f32.xlu0 %v7635_v46  ;;  %v8165_v20 = vpop.xlane.xlu0 %3289 }
 0x1b9   : > { %v3518_v13 = vsel %vm3517_vm13, %v8063_v41, %v3516_v50  ;;  %v3520_v58 = vand.u32 2147483648, %v8063_v41  ;;  %5490 = vrsqrt.f32 %v8118_v37  ;;  %v8158_v40 = vpop.eup %5476  ;;  %vm3510_vm15 = vcmp.eq.f32.partialorder %v8055_v12, inf }
 0x1ba   : > { %5492 = vrcp.f32 %v3891_v34  ;;  %v2682_v63 = vsel %vm2680_vm12, %v2681_v1, %v2679_v17  ;;  %vm3512_vm0 = vcmp.eq.f32.partialorder %v8055_v12, 0.0  ;;  %2568 = vadd.xlane.f32.xlu1 %v7632_v16  ;;  %v3513_v46 = vand.u32 2147483648, %v8055_v12  ;;  %v8171_v15 = vpop.xlane.xlu1 %3292 }
 0x1bb   : > { %v5479_v55 = vpop.eup %5478  ;;  %5494 = vrcp.f32 %v3890_v56  ;;  %v3521_v30 = vsel %vm3519_vm14, %v3520_v58, %v3518_v13  ;;  %vm2671_vm1 = vcmp.eq.f32.partialorder %v8091_v35, inf  ;;  %vm2673_vm2 = vcmp.eq.f32.partialorder %v8091_v35, 0.0 }
 0x1bc   : > { %v5481_v59 = vpop.eup %5480  ;;  %v3509_v34 = vmul.f32 %v5479_v55, %v8055_v12  ;;  %v2674_v16 = vand.u32 2147483648, %v8091_v35  ;;  %5496 = vrsqrt.f32 %v8111_v33  ;;  %v3064_v41 = vadd.f32 1e-10, %v2682_v63  ;;  %3397 = vadd.xlane.f32.xlu0 %v7709_v0  ;;  %v8188_v50 = vpop.xlane.xlu0 %2451 }
 0x1bd   : > { %v8177_v8 = vpop.eup %5482  ;;  %5498 = vrcp.f32 %v3065_v54  ;;  %v2670_v56 = vmul.f32 %v5481_v59, %v8091_v35  ;;  %vm2664_vm5 = vcmp.eq.f32.partialorder %v8083_v27, inf  ;;  %v3897_v7 = vadd.f32 1e-10, %v3521_v30 }
 0x1be   : > { %v3511_v17 = vsel %vm3510_vm15, %v8055_v12, %v3509_v34  ;;  %vm2666_vm6 = vcmp.eq.f32.partialorder %v8083_v27, 0.0  ;;  %5500 = vrsqrt.f32 %v8145_v42  ;;  %3400 = vadd.xlane.f32.xlu1 %v7699_v44  ;;  %v2667_v13 = vand.u32 2147483648, %v8083_v27  ;;  %v8197_v58 = vpop.xlane.xlu1 %2454 }
 0x1bf   : > { %v5485_v1 = vpop.eup %5484  ;;  %v3514_v54 = vsel %vm3512_vm0, %v3513_v46, %v3511_v17  ;;  %v2672_v0 = vsel %vm2671_vm1, %v8091_v35, %v2670_v56  ;;  %5502 = vrsqrt.f32 %v8139_v21  ;;  %vm3503_vm7 = vcmp.eq.f32.partialorder %v8118_v37, inf }
 0x1c0   : > { %v8199_v63 = vpop.eup %5486  ;;  %v3896_v55 = vadd.f32 1e-10, %v3514_v54  ;;  %v2675_v44 = vsel %vm2673_vm2, %v2674_v16, %v2672_v0  ;;  %v2663_v30 = vmul.f32 %v5485_v1, %v8083_v27  ;;  %5504 = vrsqrt.f32 %v8171_v15  ;;  %2559 = vadd.xlane.f32.xlu0 %v7715_v10  ;;  %v8214_v35 = vpop.xlane.xlu0 %3283 }
 0x1c1   : > { %5506 = vrcp.f32 %v3064_v41  ;;  %vm3505_vm8 = vcmp.eq.f32.partialorder %v8118_v37, 0.0  ;;  %v3506_v12 = vand.u32 2147483648, %v8118_v37  ;;  %v8209_v46 = vpop.eup %5488  ;;  %v3063_v59 = vadd.f32 1e-10, %v2675_v44 }
 0x1c2   : > { %5508 = vrcp.f32 %v3897_v7  ;;  %vm3496_vm9 = vcmp.eq.f32.partialorder %v8111_v33, inf  ;;  %vm3498_vm10 = vcmp.eq.f32.partialorder %v8111_v33, 0.0  ;;  %2562 = vadd.xlane.f32.xlu1 %v7712_v5  ;;  %v2665_v16 = vsel %vm2664_vm5, %v8083_v27, %v2663_v30  ;;  %v8221_v41 = vpop.xlane.xlu1 %3286 }
 0x1c3   : > { %v5491_v34 = vpop.eup %5490  ;;  %5510 = vrcp.f32 %v3896_v55  ;;  %v3499_v10 = vand.u32 2147483648, %v8111_v33  ;;  %vm2713_vm11 = vcmp.eq.f32.partialorder %v8145_v42, inf  ;;  %vm2715_vm12 = vcmp.eq.f32.partialorder %v8145_v42, 0.0 }
 0x1c4   : > { %v8223_v56 = vpop.eup %5492  ;;  %v3502_v7 = vmul.f32 %v5491_v34, %v8118_v37  ;;  %v2716_v5 = vand.u32 2147483648, %v8145_v42  ;;  %5512 = vrsqrt.f32 %v8165_v20  ;;  %vm2706_vm13 = vcmp.eq.f32.partialorder %v8139_v21, inf  ;;  %3391 = vadd.xlane.f32.xlu0 %v7737_v39  ;;  %v8243_v44 = vpop.xlane.xlu0 %2469 }
 0x1c5   : > { %v8229_v17 = vpop.eup %5494  ;;  %vm2708_vm14 = vcmp.eq.f32.partialorder %v8139_v21, 0.0  ;;  %v2709_v1 = vand.u32 2147483648, %v8139_v21  ;;  %5514 = vrsqrt.f32 %v8197_v58  ;;  %v2668_v0 = vsel %vm2666_vm6, %v2667_v13, %v2665_v16 }
 0x1c6   : > { %v5497_v54 = vpop.eup %5496  ;;  %5516 = vrcp.f32 %v3063_v59  ;;  %v3504_v55 = vsel %vm3503_vm7, %v8118_v37, %v3502_v7  ;;  %vm3545_vm15 = vcmp.eq.f32.partialorder %v8171_v15, inf  ;;  %3394 = vadd.xlane.f32.xlu1 %v7718_v2  ;;  %vm3547_vm0 = vcmp.eq.f32.partialorder %v8171_v15, 0.0  ;;  %v8251_v27 = vpop.xlane.xlu1 %2472 }
 0x1c7   : > { %v8245_v30 = vpop.eup %5498  ;;  %v3495_v34 = vmul.f32 %v5497_v54, %v8111_v33  ;;  %v3548_v39 = vand.u32 2147483648, %v8171_v15  ;;  %5518 = vrsqrt.f32 %v8188_v50  ;;  %v3507_v59 = vsel %vm3505_vm8, %v3506_v12, %v3504_v55 }
 0x1c8   : > { %v5501_v13 = vpop.eup %5500  ;;  %vm3538_vm1 = vcmp.eq.f32.partialorder %v8165_v20, inf  ;;  %v3541_v2 = vand.u32 2147483648, %v8165_v20  ;;  %5520 = vrsqrt.f32 %v8221_v41  ;;  %v3062_v7 = vadd.f32 1e-10, %v2668_v0  ;;  %2577 = vadd.xlane.f32.xlu0 %v7748_v14 }
 0x1c9   : > { %v5503_v16 = vpop.eup %5502  ;;  %v3497_v54 = vsel %vm3496_vm9, %v8111_v33, %v3495_v34  ;;  %v2712_v4 = vmul.f32 %v5501_v13, %v8145_v42  ;;  %vm3540_vm2 = vcmp.eq.f32.partialorder %v8165_v20, 0.0  ;;  %vm2699_vm5 = vcmp.eq.f32.partialorder %v8197_v58, inf  ;;  %v8272_v34 = vpop.xlane.xlu0 %3301 }
 0x1ca   : > { %5522 = vrsqrt.f32 %v8214_v35  ;;  %v5505_v37 = vpop.eup %5504  ;;  %v3500_v12 = vsel %vm3498_vm10, %v3499_v10, %v3497_v54  ;;  %v2705_v0 = vmul.f32 %v5503_v16, %v8139_v21  ;;  %vm2701_vm6 = vcmp.eq.f32.partialorder %v8197_v58, 0.0  ;;  %2580 = vadd.xlane.f32.xlu1 %v7740_v49  ;;  %v8282_v10 = vpop.xlane.xlu1 %3304 }
 0x1cb   : > { %v2702_v55 = vand.u32 2147483648, %v8197_v58  ;;  %v8274_v13 = vpop.eup %5506  ;;  %v3895_v28 = vadd.f32 1e-10, %v3507_v59  ;;  %v2714_v14 = vsel %vm2713_vm11, %v8145_v42, %v2712_v4  ;;  %v3544_v33 = vmul.f32 %v5505_v37, %v8171_v15 }
 0x1cc   : > { %10573 = vst [vmem:[#allocation112_spill] sm:$0xff] %v8274_v13  ;;  %vm2692_vm7 = vcmp.eq.f32.partialorder %v8188_v50, inf  ;;  %5524 = vrsqrt.f32 %v8251_v27  ;;  %v8284_v16 = vpop.eup %5508  ;;  %v3894_v49 = vadd.f32 1e-10, %v3500_v12  ;;  %v2717_v54 = vsel %vm2715_vm12, %v2716_v5, %v2714_v14  ;;  %3409 = vadd.xlane.f32.xlu0 %v7785_v60 }
 0x1cd   : > { %v2707_v59 = vsel %vm2706_vm13, %v8139_v21, %v2705_v0  ;;  %vm2694_vm8 = vcmp.eq.f32.partialorder %v8188_v50, 0.0  ;;  %v8292_v4 = vpop.eup %5510  ;;  %5526 = vrcp.f32 %v3062_v7  ;;  %v3069_v37 = vadd.f32 1e-10, %v2717_v54  ;;  %v8306_v21 = vpop.xlane.xlu0 %2463 }
 0x1ce   : > { %v2710_v13 = vsel %vm2708_vm14, %v2709_v1, %v2707_v59  ;;  %v3546_v12 = vsel %vm3545_vm15, %v8171_v15, %v3544_v33  ;;  %v5513_v42 = vpop.eup %5512  ;;  %v2695_v0 = vand.u32 2147483648, %v8188_v50  ;;  %vm3531_vm9 = vcmp.eq.f32.partialorder %v8221_v41, inf  ;;  %3412 = vadd.xlane.f32.xlu1 %v7782_v48  ;;  %v8310_v60 = vpop.xlane.xlu1 %2466 }
 0x1cf   : > { %v3549_v5 = vsel %vm3547_vm0, %v3548_v39, %v3546_v12  ;;  %5528 = vrsqrt.f32 %v8243_v44  ;;  %v5515_v1 = vpop.eup %5514  ;;  %v3068_v7 = vadd.f32 1e-10, %v2710_v13  ;;  %v3537_v14 = vmul.f32 %v5513_v42, %v8165_v20 }
 0x1d0   : > { %5530 = vrcp.f32 %v3895_v28  ;;  %vm3533_vm10 = vcmp.eq.f32.partialorder %v8221_v41, 0.0  ;;  %v8312_v15 = vpop.eup %5516  ;;  %v2698_v39 = vmul.f32 %v5515_v1, %v8197_v58  ;;  %v3534_v33 = vand.u32 2147483648, %v8221_v41  ;;  %2571 = vadd.xlane.f32.xlu0 %v7814_v51 }
 0x1d1   : > { %5532 = vrcp.f32 %v3894_v49  ;;  %vm3524_vm11 = vcmp.eq.f32.partialorder %v8214_v35, inf  ;;  %v5519_v48 = vpop.eup %5518  ;;  %v3901_v54 = vadd.f32 1e-10, %v3549_v5  ;;  %v3539_v28 = vsel %vm3538_vm1, %v8165_v20, %v3537_v14 }
 0x1d2   : > { %5534 = vrcp.f32 %v3069_v37  ;;  %vm3526_vm12 = vcmp.eq.f32.partialorder %v8214_v35, 0.0  ;;  %v5521_v13 = vpop.eup %5520  ;;  %v3542_v49 = vsel %vm3540_vm2, %v3541_v2, %v3539_v28  ;;  %v2700_v59 = vsel %vm2699_vm5, %v8197_v58, %v2698_v39  ;;  %2574 = vadd.xlane.f32.xlu1 %v7791_v3  ;;  %v8330_v37 = vpop.xlane.xlu0 %3295 }
 0x1d3   : > { %v2691_v12 = vmul.f32 %v5519_v48, %v8188_v50  ;;  %5536 = vrsqrt.f32 %v8282_v10  ;;  %v3900_v5 = vadd.f32 1e-10, %v3542_v49  ;;  %v2703_v51 = vsel %vm2701_vm6, %v2702_v55, %v2700_v59  ;;  %v8335_v2 = vpop.xlane.xlu1 %3298 }
 0x1d4   : > { %v5523_v42 = vpop.eup %5522  ;;  %5538 = vrcp.f32 %v3068_v7  ;;  %v3530_v20 = vmul.f32 %v5521_v13, %v8221_v41  ;;  %v3067_v1 = vadd.f32 1e-10, %v2703_v51  ;;  %v3527_v55 = vand.u32 2147483648, %v8214_v35  ;;  %3403 = vadd.xlane.f32.xlu0 %v7820_v23 }
 0x1d5   : > { %v2693_v14 = vsel %vm2692_vm7, %v8188_v50, %v2691_v12  ;;  %v3523_v39 = vmul.f32 %v5523_v42, %v8214_v35  ;;  %5540 = vrsqrt.f32 %v8272_v34  ;;  %vm2741_vm13 = vcmp.eq.f32.partialorder %v8251_v27, inf }
 0x1d6   : > { %v5525_v3 = vpop.eup %5524  ;;  %5542 = vrcp.f32 %v3901_v54  ;;  %v2696_v7 = vsel %vm2694_vm8, %v2695_v0, %v2693_v14  ;;  %v3532_v58 = vsel %vm3531_vm9, %v8221_v41, %v3530_v20  ;;  %3406 = vadd.xlane.f32.xlu1 %v7817_v52  ;;  %v8355_v50 = vpop.xlane.xlu0 %2481  ;;  %v2744_v52 = vand.u32 2147483648, %v8251_v27 }
 0x1d7   : > { %5544 = vrcp.f32 %v3900_v5  ;;  %v3066_v48 = vadd.f32 1e-10, %v2696_v7  ;;  %v3535_v28 = vsel %vm3533_vm10, %v3534_v33, %v3532_v58  ;;  %v3525_v54 = vsel %vm3524_vm11, %v8214_v35, %v3523_v39  ;;  %v8357_v0 = vpop.eup %5526  ;;  %v8362_v59 = vpop.xlane.xlu1 %2484 }
 0x1d8   : > { %5546 = vrcp.f32 %v3067_v1  ;;  %v3899_v13 = vadd.f32 1e-10, %v3535_v28  ;;  %v3528_v23 = vsel %vm3526_vm12, %v3527_v55, %v3525_v54  ;;  %v2740_v49 = vmul.f32 %v5525_v3, %v8251_v27  ;;  %2589 = vadd.xlane.f32.xlu0 %v7849_v22 }
 0x1d9   : > { %v5529_v41 = vpop.eup %5528  ;;  %5548 = vrcp.f32 %v3066_v48  ;;  %v3898_v33 = vadd.f32 1e-10, %v3528_v23  ;;  %vm2743_vm14 = vcmp.eq.f32.partialorder %v8251_v27, 0.0  ;;  %vm2734_vm15 = vcmp.eq.f32.partialorder %v8243_v44, inf }
 0x1da   : > { %v8366_v12 = vpop.eup %5530  ;;  %5550 = vrcp.f32 %v3899_v13  ;;  %v2742_v42 = vsel %vm2741_vm13, %v8251_v27, %v2740_v49  ;;  %v2733_v35 = vmul.f32 %v5529_v41, %v8243_v44  ;;  %v2737_v20 = vand.u32 2147483648, %v8243_v44  ;;  %2592 = vadd.xlane.f32.xlu1 %v7828_v24  ;;  %v8377_v1 = vpop.xlane.xlu0 %3313 }
 0x1db   : > { %v8372_v5 = vpop.eup %5532  ;;  %5552 = vrcp.f32 %v3898_v33  ;;  %v2745_v51 = vsel %vm2743_vm14, %v2744_v52, %v2742_v42  ;;  %vm2736_vm0 = vcmp.eq.f32.partialorder %v8243_v44, 0.0  ;;  %v8384_v22 = vpop.xlane.xlu1 %3316  ;;  %vm3573_vm1 = vcmp.eq.f32.partialorder %v8282_v10, inf }
 0x1dc   : > { %v8379_v14 = vpop.eup %5534  ;;  %v3073_v39 = vadd.f32 1e-10, %v2745_v51  ;;  %v2735_v27 = vsel %vm2734_vm15, %v8243_v44, %v2733_v35  ;;  %5554 = vrsqrt.f32 %v8310_v60  ;;  %v8390_v24 = vmul.f32 %v7802_v11, %v7802_v11  ;;  %3421 = vadd.xlane.f32.xlu0 %v7873_v62 }
 0x1dd   : > { %v5537_v3 = vpop.eup %5536  ;;  %v2738_v7 = vsel %vm2736_vm0, %v2737_v20, %v2735_v27  ;;  %5556 = vrsqrt.f32 %v8306_v21  ;;  %vm3575_vm2 = vcmp.eq.f32.partialorder %v8282_v10, 0.0  ;;  %v3576_v28 = vand.u32 2147483648, %v8282_v10 }
 0x1de   : > { %v8392_v58 = vpop.eup %5538  ;;  %5558 = vrcp.f32 %v3073_v39  ;;  %v3072_v55 = vadd.f32 1e-10, %v2738_v7  ;;  %v3572_v44 = vmul.f32 %v5537_v3, %v8282_v10  ;;  %vm3566_vm5 = vcmp.eq.f32.partialorder %v8272_v34, inf  ;;  %3424 = vadd.xlane.f32.xlu1 %v7870_v38  ;;  %v8402_v54 = vpop.xlane.xlu0 %2475 }
 0x1df   : > { %v5541_v48 = vpop.eup %5540  ;;  %vm3568_vm6 = vcmp.eq.f32.partialorder %v8272_v34, 0.0  ;;  %5560 = vrsqrt.f32 %v8335_v2  ;;  %v3569_v49 = vand.u32 2147483648, %v8272_v34  ;;  %v8411_v41 = vpop.xlane.xlu1 %2478  ;;  %vm2727_vm7 = vcmp.eq.f32.partialorder %v8310_v60, inf }
 0x1e0   : > { %v8404_v13 = vpop.eup %5542  ;;  %5562 = vrcp.f32 %v3072_v55  ;;  %v3574_v62 = vsel %vm3573_vm1, %v8282_v10, %v3572_v44  ;;  %v3565_v23 = vmul.f32 %v5541_v48, %v8272_v34  ;;  %vm2729_vm8 = vcmp.eq.f32.partialorder %v8310_v60, 0.0  ;;  %2583 = vadd.xlane.f32.xlu0 %v7933_v36 }
 0x1e1   : > { %v8413_v33 = vpop.eup %5544  ;;  %v3577_v38 = vsel %vm3575_vm2, %v3576_v28, %v3574_v62  ;;  %5564 = vrsqrt.f32 %v8330_v37  ;;  %v2730_v51 = vand.u32 2147483648, %v8310_v60  ;;  %vm2720_vm9 = vcmp.eq.f32.partialorder %v8306_v21, inf }
 0x1e2   : > { %v8420_v52 = vpop.eup %5546  ;;  %v3905_v42 = vadd.f32 1e-10, %v3577_v38  ;;  %v3567_v35 = vsel %vm3566_vm5, %v8272_v34, %v3565_v23  ;;  %5566 = vrsqrt.f32 %v8362_v59  ;;  %vm2722_vm10 = vcmp.eq.f32.partialorder %v8306_v21, 0.0  ;;  %2586 = vadd.xlane.f32.xlu1 %v7930_v26  ;;  %v8436_v39 = vpop.xlane.xlu0 %3307 }
 0x1e3   : > { %10574 = vst [vmem:[#allocation121_spill] sm:$0xff] %v8420_v52  ;;  %v8428_v10 = vpop.eup %5548  ;;  %v3570_v20 = vsel %vm3568_vm6, %v3569_v49, %v3567_v35  ;;  %5568 = vrsqrt.f32 %v8355_v50  ;;  %v2723_v36 = vand.u32 2147483648, %v8306_v21  ;;  %vm3559_vm11 = vcmp.eq.f32.partialorder %v8335_v2, inf  ;;  %v8442_v34 = vpop.xlane.xlu1 %3310 }
 0x1e4   : > { %10575 = vst [vmem:[#allocation120_spill] sm:$0xff] %v8428_v10  ;;  %v8438_v27 = vpop.eup %5550  ;;  %5570 = vrcp.f32 %v3905_v42  ;;  %v3904_v3 = vadd.f32 1e-10, %v3570_v20  ;;  %vm3561_vm12 = vcmp.eq.f32.partialorder %v8335_v2, 0.0  ;;  %v3562_v55 = vand.u32 2147483648, %v8335_v2 }
 0x1e5   : > { %10576 = vst [vmem:[#allocation122_spill] sm:$0xff] %v8438_v27  ;;  %v8444_v7 = vpop.eup %5552  ;;  %vm3552_vm13 = vcmp.eq.f32.partialorder %v8330_v37, inf  ;;  %5572 = vrsqrt.f32 %v8384_v22  ;;  %vm3554_vm14 = vcmp.eq.f32.partialorder %v8330_v37, 0.0  ;;  %v3555_v44 = vand.u32 2147483648, %v8330_v37 }
 0x1e6   : > { %10577 = vst [vmem:[#allocation134_spill] sm:$0xff] %v8444_v7  ;;  %v5555_v26 = vpop.eup %5554  ;;  %5574 = vrcp.f32 %v3904_v3  ;;  %vm2769_vm15 = vcmp.eq.f32.partialorder %v8362_v59, inf  ;;  %vm2771_vm0 = vcmp.eq.f32.partialorder %v8362_v59, 0.0  ;;  %v2772_v62 = vand.u32 2147483648, %v8362_v59  ;;  %v8457_v23 = vpop.xlane.xlu0 %2493 }
 0x1e7   : > { %v5557_v48 = vpop.eup %5556  ;;  %v2726_v28 = vmul.f32 %v5555_v26, %v8310_v60  ;;  %5576 = vrsqrt.f32 %v8377_v1  ;;  %vm2762_vm1 = vcmp.eq.f32.partialorder %v8355_v50, inf  ;;  %vm2764_vm2 = vcmp.eq.f32.partialorder %v8355_v50, 0.0  ;;  %v8465_v42 = vpop.xlane.xlu1 %2496 }
 0x1e8   : > { %v8459_v49 = vpop.eup %5558  ;;  %v2719_v38 = vmul.f32 %v5557_v48, %v8306_v21  ;;  %5578 = vrsqrt.f32 %v8411_v41  ;;  %v2765_v3 = vand.u32 2147483648, %v8355_v50  ;;  %vm3601_vm5 = vcmp.eq.f32.partialorder %v8384_v22, inf }
 0x1e9   : > { %10578 = vst [vmem:[#allocation135_spill] sm:$0xff] %v8459_v49  ;;  %v5561_v35 = vpop.eup %5560  ;;  %v2728_v20 = vsel %vm2727_vm7, %v8310_v60, %v2726_v28  ;;  %5580 = vrsqrt.f32 %v8402_v54  ;;  %vm3603_vm6 = vcmp.eq.f32.partialorder %v8384_v22, 0.0  ;;  %vm3594_vm7 = vcmp.eq.f32.partialorder %v8377_v1, inf }
 0x1ea   : > { %v8473_v48 = vpop.eup %5562  ;;  %v2731_v11 = vsel %vm2729_vm8, %v2730_v51, %v2728_v20  ;;  %v2721_v49 = vsel %vm2720_vm9, %v8306_v21, %v2719_v38  ;;  %v3558_v7 = vmul.f32 %v5561_v35, %v8335_v2  ;;  %5582 = vrsqrt.f32 %v8442_v34  ;;  %v8489_v38 = vpop.xlane.xlu0 %3325 }
 0x1eb   : > { %10579 = vst [vmem:[#allocation136_spill] sm:$0xff] %v8473_v48  ;;  %v5565_v28 = vpop.eup %5564  ;;  %v3071_v10 = vadd.f32 1e-10, %v2731_v11  ;;  %v2724_v26 = vsel %vm2722_vm10, %v2723_v36, %v2721_v49  ;;  %vm3596_vm8 = vcmp.eq.f32.partialorder %v8377_v1, 0.0  ;;  %5584 = vrsqrt.f32 %v8436_v39  ;;  %v8498_v21 = vpop.xlane.xlu1 %3328 }
 0x1ec   : > { %v5567_v35 = vpop.eup %5566  ;;  %v3070_v20 = vadd.f32 1e-10, %v2724_v26  ;;  %v3560_v48 = vsel %vm3559_vm11, %v8335_v2, %v3558_v7  ;;  %v3551_v11 = vmul.f32 %v5565_v28, %v8330_v37  ;;  %vm2757_vm10 = vcmp.eq.f32.partialorder %v8411_v41, 0.0 }
 0x1ed   : > { %v5569_v36 = vpop.eup %5568  ;;  %v3563_v49 = vsel %vm3561_vm12, %v3562_v55, %v3560_v48  ;;  %v2768_v26 = vmul.f32 %v5567_v35, %v8362_v59  ;;  %v2751_v7 = vand.u32 2147483648, %v8402_v54  ;;  %5586 = vrcp.f32 %v3071_v10 }
 0x1ee   : > { %v8506_v28 = vpop.eup %5570  ;;  %v3903_v51 = vadd.f32 1e-10, %v3563_v49  ;;  %v3553_v60 = vsel %vm3552_vm13, %v8330_v37, %v3551_v11  ;;  %v2761_v27 = vmul.f32 %v5569_v36, %v8355_v50  ;;  %vm2750_vm12 = vcmp.eq.f32.partialorder %v8402_v54, 0.0  ;;  %v8520_v48 = vpop.xlane.xlu0 %2487 }
 0x1ef   : > { %10580 = vst [vmem:[#allocation137_spill] sm:$0xff] %v8506_v28  ;;  %vm3587_vm9 = vcmp.eq.f32.partialorder %v8442_v34, inf  ;;  %v5573_v2 = vpop.eup %5572  ;;  %5588 = vrcp.f32 %v3070_v20  ;;  %v3556_v55 = vsel %vm3554_vm14, %v3555_v44, %v3553_v60  ;;  %v2770_v10 = vsel %vm2769_vm15, %v8362_v59, %v2768_v26  ;;  %v8529_v44 = vpop.xlane.xlu1 %2490 }
 0x1f0   : > { %vm3589_vm11 = vcmp.eq.f32.partialorder %v8442_v34, 0.0  ;;  %v8522_v35 = vpop.eup %5574  ;;  %5590 = vrcp.f32 %v3903_v51  ;;  %v3902_v11 = vadd.f32 1e-10, %v3556_v55  ;;  %v2773_v36 = vsel %vm2771_vm0, %v2772_v62, %v2770_v10 }
 0x1f1   : > { %10581 = vst [vmem:[#allocation138_spill] sm:$0xff] %v8522_v35  ;;  %v2763_v37 = vsel %vm2762_vm1, %v8355_v50, %v2761_v27  ;;  %v5577_v60 = vpop.eup %5576  ;;  %v3077_v20 = vadd.f32 1e-10, %v2773_v36  ;;  %v3600_v26 = vmul.f32 %v5573_v2, %v8384_v22  ;;  %v5136_v51 = vpack.c.bf16 %v7943_v47, %v7943_v47 }
 0x1f2   : > { %v2766_v49 = vsel %vm2764_vm2, %v2765_v3, %v2763_v37  ;;  %v5579_v55 = vpop.eup %5578  ;;  %5592 = vrcp.f32 %v3902_v11  ;;  %v3593_v59 = vmul.f32 %v5577_v60, %v8377_v1  ;;  %v3590_v62 = vand.u32 2147483648, %v8442_v34  ;;  %v8548_v11 = vpop.xlane.xlu0 %3319 }
 0x1f3   : > { %v3417_v27 = vsel %vm2413_vm4, %v7954_v43, 0.0  ;;  %v5581_v10 = vpop.eup %5580  ;;  %v3076_v35 = vadd.f32 1e-10, %v2766_v49  ;;  %v3602_v50 = vsel %vm3601_vm5, %v8384_v22, %v3600_v26  ;;  %v2754_v3 = vmul.f32 %v5579_v55, %v8411_v41  ;;  %2346 = vst.msk [vmem:[%s6171_s22 + $0xf4] sm:$0xf] %vm1964_vm3, %v5136_v51  ;;  %v8558_v26 = vpop.xlane.xlu1 %3322 }
 0x1f4   : > { %3418 = vadd.xlane.f32.xlu1 %v3417_v27  ;;  %v3414_v2 = vsel %vm2413_vm4, %v7963_v57, 0.0  ;;  %v5583_v36 = vpop.eup %5582  ;;  %5594 = vrcp.f32 %v3077_v20  ;;  %v10582_v43 = vand.u32 2147483648, %v8384_v22  ;;  %v3595_v60 = vsel %vm3594_vm7, %v8377_v1, %v3593_v59 }
 0x1f5   : > { %v2747_v49 = vmul.f32 %v5581_v10, %v8402_v54  ;;  %3415 = vadd.xlane.f32.xlu0 %v3414_v2  ;;  %v10583_v57 = vand.u32 2147483648, %v8377_v1  ;;  %vm10584_vm3 = vcmp.eq.f32.partialorder %v8411_v41, inf  ;;  %v3586_v55 = vmul.f32 %v5583_v36, %v8442_v34  ;;  %v5585_v27 = vpop.eup %5584 }
 0x1f6   : > { %v3605_v37 = vsel %vm3603_vm6, %v10582_v43, %v3602_v50  ;;  %v2756_v22 = vsel %vm10584_vm3, %v8411_v41, %v2754_v3  ;;  %v10585_v59 = vand.u32 2147483648, %v8411_v41  ;;  %vm10586_vm13 = vcmp.eq.f32.partialorder %v8402_v54, inf  ;;  %v8581_v43 = vpop.xlane.xlu0 %2505 }
 0x1f7   : > { %v3909_v51 = vadd.f32 1e-10, %v3605_v37  ;;  %v3598_v20 = vsel %vm3596_vm8, %v10583_v57, %v3595_v60  ;;  %v2749_v2 = vsel %vm10586_vm13, %v8402_v54, %v2747_v49  ;;  %5596 = vrsqrt.f32 %v8465_v42  ;;  %v8583_v37 = vpop.eup %5586 }
 0x1f8   : > { %v3908_v50 = vadd.f32 1e-10, %v3598_v20  ;;  %v2759_v10 = vsel %vm2757_vm10, %v10585_v59, %v2756_v22  ;;  %5598 = vrcp.f32 %v3076_v35  ;;  %v2752_v3 = vsel %vm2750_vm12, %v2751_v7, %v2749_v2  ;;  %10587 = vst [vmem:[#allocation139_spill] sm:$0xff] %v8583_v37  ;;  %v8588_v35 = vpop.xlane.xlu1 %2508  ;;  %v10593_v2 = vld [vmem:[#allocation130_spill] sm:$0xff] }
 0x1f9   : > { %v3075_v1 = vadd.f32 1e-10, %v2759_v10  ;;  %v3588_v36 = vsel %vm3587_vm9, %v8442_v34, %v3586_v55  ;;  %5600 = vrcp.f32 %v3909_v51  ;;  %v3074_v41 = vadd.f32 1e-10, %v2752_v3  ;;  %v8590_v57 = vpop.eup %5588 }
 0x1fa   : > { %v3591_v60 = vsel %vm3589_vm11, %v3590_v62, %v3588_v36  ;;  %v3579_v49 = vmul.f32 %v5585_v27, %v8436_v39  ;;  %10588 = vst [vmem:[#allocation140_spill] sm:$0xff] %v8590_v57  ;;  %5602 = vrcp.f32 %v3908_v50  ;;  %vm3580_vm14 = vcmp.eq.f32.partialorder %v8436_v39, inf  ;;  %v8593_v54 = vpop.eup %5590  ;;  %v8597_v34 = vpop.xlane.xlu0 %3337 }
 0x1fb   : > { %10589 = vst [vmem:[#allocation141_spill] sm:$0xff] %v8593_v54  ;;  %5604 = vrcp.f32 %v3075_v1  ;;  %v3907_v7 = vadd.f32 1e-10, %v3591_v60  ;;  %v3583_v51 = vand.u32 2147483648, %v8436_v39  ;;  %vm3582_vm15 = vcmp.eq.f32.partialorder %v8436_v39, 0.0 }
 0x1fc   : > { %v3581_v20 = vsel %vm3580_vm14, %v8436_v39, %v3579_v49  ;;  %5606 = vrcp.f32 %v3074_v41  ;;  %v8599_v62 = vpop.eup %5592  ;;  %v2603_v22 = vsel %vm2413_vm4, %v8390_v24, 0.0  ;;  %v2411_v55 = vmul.f32 %v7756_v31, %v7756_v31  ;;  %v8607_v27 = vpop.xlane.xlu1 %3340  ;;  %v10592_v24 = vld [vmem:[#allocation132_spill] sm:$0xff] }
 0x1fd   : > { %10590 = vst [vmem:[#allocation142_spill] sm:$0xff] %v8599_v62  ;;  %5608 = vrsqrt.f32 %v8457_v23  ;;  %v3584_v50 = vsel %vm3582_vm15, %v3583_v51, %v3581_v20  ;;  %2604 = vadd.xlane.f32.xlu1 %v2603_v22  ;;  %vm2797_vm0 = vcmp.eq.f32.partialorder %v8465_v42, inf  ;;  %v3245_v39 = vmul.f32 %v10592_v24, %v10592_v24 }
 0x1fe   : > { %5610 = vrsqrt.f32 %v8498_v21  ;;  %v8610_v59 = vpop.eup %5594  ;;  %v2600_v10 = vsel %vm2413_vm4, %v2411_v55, 0.0  ;;  %v3244_v1 = vmul.f32 %v10593_v2, %v10593_v2  ;;  %v8619_v3 = vpop.xlane.xlu0 %2499  ;;  %v3906_v41 = vadd.f32 1e-10, %v3584_v50 }
 0x1ff   : > { %10591 = vst [vmem:[#allocation143_spill] sm:$0xff] %v8610_v59  ;;  %5612 = vrcp.f32 %v3907_v7  ;;  %2601 = vadd.xlane.f32.xlu0 %v2600_v10  ;;  %vm2799_vm1 = vcmp.eq.f32.partialorder %v8465_v42, 0.0  ;;  %v2800_v60 = vand.u32 2147483648, %v8465_v42  ;;  %vm2790_vm2 = vcmp.eq.f32.partialorder %v8457_v23, inf  ;;  %v10596_v10 = vld [vmem:[#allocation102_spill] sm:$0xff]  ;;  %v10601_v59 = vld [vmem:[#allocation131_spill] sm:$0xff] }
 0x200   : > { %5614 = vrsqrt.f32 %v8489_v38  ;;  %v8624_v49 = vpop.xlane.xlu1 %2502  ;;  %v3435_v51 = vsel %vm2413_vm4, %v3245_v39, 0.0  ;;  %vm2792_vm5 = vcmp.eq.f32.partialorder %v8457_v23, 0.0  ;;  %v2793_v55 = vand.u32 2147483648, %v8457_v23 }
 0x201   : > { %v5597_v36 = vpop.eup %5596  ;;  %5616 = vrsqrt.f32 %v8529_v44  ;;  %3436 = vadd.xlane.f32.xlu1 %v3435_v51  ;;  %v3432_v50 = vsel %vm2413_vm4, %v3244_v1, 0.0  ;;  %v2410_v31 = vmul.f32 %v10596_v10, %v10596_v10  ;;  %vm3629_vm6 = vcmp.eq.f32.partialorder %v8498_v21, inf }
 0x202   : > { %v8626_v7 = vpop.eup %5598  ;;  %v2796_v20 = vmul.f32 %v5597_v36, %v8465_v42  ;;  %5618 = vrsqrt.f32 %v8520_v48  ;;  %v10598_v36 = vld [vmem:[#allocation101_spill] sm:$0xff]  ;;  %v8648_v51 = vpop.xlane.xlu0 %3331  ;;  %vm3631_vm7 = vcmp.eq.f32.partialorder %v8498_v21, 0.0  ;;  %v3632_v10 = vand.u32 2147483648, %v8498_v21 }
 0x203   : > { %10594 = vst [vmem:[#allocation144_spill] sm:$0xff] %v8626_v7  ;;  %v8632_v22 = vpop.eup %5600  ;;  %3433 = vadd.xlane.f32.xlu0 %v3432_v50  ;;  %v2409_v24 = vmul.f32 %v10598_v36, %v10598_v36  ;;  %5620 = vrsqrt.f32 %v8558_v26  ;;  %vm3622_vm8 = vcmp.eq.f32.partialorder %v8489_v38, inf  ;;  %vm3624_vm9 = vcmp.eq.f32.partialorder %v8489_v38, 0.0 }
 0x204   : > { %10595 = vst [vmem:[#allocation145_spill] sm:$0xff] %v8632_v22  ;;  %v8639_v2 = vpop.eup %5602  ;;  %v2798_v39 = vsel %vm2797_vm0, %v8465_v42, %v2796_v20  ;;  %5622 = vrcp.f32 %v3906_v41  ;;  %v8655_v20 = vpop.xlane.xlu1 %3334  ;;  %v3625_v50 = vand.u32 2147483648, %v8489_v38  ;;  %v2597_v36 = vsel %vm2413_vm4, %v2410_v31, 0.0 }
 0x205   : > { %10597 = vst [vmem:[#allocation146_spill] sm:$0xff] %v8639_v2  ;;  %v8650_v1 = vpop.eup %5604  ;;  %5624 = vrsqrt.f32 %v8548_v11  ;;  %v2801_v41 = vsel %vm2799_vm1, %v2800_v60, %v2798_v39  ;;  %2598 = vadd.xlane.f32.xlu1 %v2597_v36  ;;  %v2594_v7 = vsel %vm2413_vm4, %v2409_v24, 0.0  ;;  %v3243_v22 = vmul.f32 %v7943_v47, %v7943_v47 }
 0x206   : > { %10599 = vst [vmem:[#allocation147_spill] sm:$0xff] %v8650_v1  ;;  %v8657_v2 = vpop.eup %5606  ;;  %vm2783_vm10 = vcmp.eq.f32.partialorder %v8529_v44, inf  ;;  %vm2785_vm11 = vcmp.eq.f32.partialorder %v8529_v44, 0.0  ;;  %v2786_v31 = vand.u32 2147483648, %v8529_v44  ;;  %v8674_v42 = vpop.xlane.xlu0 %2517  ;;  %vm2776_vm12 = vcmp.eq.f32.partialorder %v8520_v48, inf }
 0x207   : > { %10600 = vst [vmem:[#allocation148_spill] sm:$0xff] %v8657_v2  ;;  %v5609_v1 = vpop.eup %5608  ;;  %v3242_v2 = vmul.f32 %v10601_v59, %v10601_v59  ;;  %2595 = vadd.xlane.f32.xlu0 %v2594_v7  ;;  %vm2778_vm3 = vcmp.eq.f32.partialorder %v8520_v48, 0.0  ;;  %5626 = vrsqrt.f32 %v8588_v35  ;;  %v3429_v59 = vsel %vm2413_vm4, %v3243_v22, 0.0 }
 0x208   : > { %v5611_v62 = vpop.eup %5610  ;;  %v2789_v57 = vmul.f32 %v5609_v1, %v8457_v23  ;;  %v8682_v39 = vpop.xlane.xlu1 %2520  ;;  %v3081_v1 = vadd.f32 1e-10, %v2801_v41  ;;  %5628 = vrsqrt.f32 %v8581_v43  ;;  %v2779_v28 = vand.u32 2147483648, %v8520_v48 }
 0x209   : > { %v8676_v60 = vpop.eup %5612  ;;  %v3628_v24 = vmul.f32 %v5611_v62, %v8498_v21  ;;  %3430 = vadd.xlane.f32.xlu1 %v3429_v59  ;;  %v3426_v41 = vsel %vm2413_vm4, %v3242_v2, 0.0  ;;  %vm3615_vm13 = vcmp.eq.f32.partialorder %v8558_v26, inf  ;;  %vm3617_vm14 = vcmp.eq.f32.partialorder %v8558_v26, 0.0 }
 0x20a   : > { %10602 = vst [vmem:[#allocation149_spill] sm:$0xff] %v8676_v60  ;;  %v5615_v36 = vpop.eup %5614  ;;  %v2791_v7 = vsel %vm2790_vm2, %v8457_v23, %v2789_v57  ;;  %v8701_v23 = vpop.xlane.xlu0 %3349  ;;  %5630 = vrcp.f32 %v3081_v1  ;;  %vm3608_vm15 = vcmp.eq.f32.partialorder %v8548_v11, inf  ;;  %v10605_v1 = vld [vmem:[#allocation2_spill] sm:$0xff]  ;;  %vm3610_vm0 = vcmp.eq.f32.partialorder %v8548_v11, 0.0 }
 0x20b   : > { %v5617_v47 = vpop.eup %5616  ;;  %v2794_v62 = vsel %vm2792_vm5, %v2793_v55, %v2791_v7  ;;  %v3630_v60 = vsel %vm3629_vm6, %v8498_v21, %v3628_v24  ;;  %v3621_v54 = vmul.f32 %v5615_v36, %v8489_v38  ;;  %3427 = vadd.xlane.f32.xlu0 %v3426_v41  ;;  %v10603_v24 = vld [vmem:[#allocation6_spill] sm:$0xff]  ;;  %v10604_v7 = vld [vmem:[#allocation7_spill] sm:$0xff]  ;;  %vm2825_vm1 = vcmp.eq.f32.partialorder %v8588_v35, inf }
 0x20c   : > { %v5619_v37 = vpop.eup %5618  ;;  %v3633_v57 = vsel %vm3631_vm7, %v3632_v10, %v3630_v60  ;;  %v2782_v22 = vmul.f32 %v5617_v47, %v8529_v44  ;;  %v3080_v55 = vadd.f32 1e-10, %v2794_v62  ;;  %v8708_v21 = vpop.xlane.xlu1 %3352  ;;  %v4017_v36 = vmul.f32 %v8057_v53, %v10603_v24 }
 0x20d   : > { %v3623_v59 = vsel %vm3622_vm8, %v8489_v38, %v3621_v54  ;;  %v2775_v2 = vmul.f32 %v5619_v37, %v8520_v48  ;;  %v5621_v10 = vpop.eup %5620  ;;  %v4081_v54 = vmul.f32 %v8085_v61, %v10604_v7  ;;  %v3913_v37 = vadd.f32 1e-10, %v3633_v57 }
 0x20e   : > { %v3626_v47 = vsel %vm3624_vm9, %v3625_v50, %v3623_v59  ;;  %v2784_v60 = vsel %vm2783_vm10, %v8529_v44, %v2782_v22  ;;  %v8719_v62 = vpop.eup %5622  ;;  %v3618_v38 = vand.u32 2147483648, %v8558_v26  ;;  %v3614_v53 = vmul.f32 %v5621_v10, %v8558_v26  ;;  %v8728_v52 = vpop.xlane.xlu0 %2511  ;;  %v10606_v10 = vld [vmem:[#allocation3_spill] sm:$0xff] }
 0x20f   : > { %v2777_v41 = vsel %vm2776_vm12, %v8520_v48, %v2775_v2  ;;  %v5625_v50 = vpop.eup %5624  ;;  %v3912_v59 = vadd.f32 1e-10, %v3626_v47  ;;  %v2787_v22 = vsel %vm2785_vm11, %v2786_v31, %v2784_v60  ;;  %v4145_v24 = vsub.f32 %v4017_v36, %v4081_v54 }
 0x210   : > { %5632 = vrcp.f32 %v3080_v55  ;;  %v3607_v61 = vmul.f32 %v5625_v50, %v8548_v11  ;;  %v4016_v57 = vmul.f32 %v8030_v29, %v10605_v1  ;;  %v8734_v2 = vpop.xlane.xlu1 %2514  ;;  %v2780_v47 = vsel %vm2778_vm3, %v2779_v28, %v2777_v41  ;;  %v8749_v28 = vld [vmem:[%s10264_s4] ss:$0 sm:$0xff] }
 0x211   : > { %v3616_v44 = vsel %vm3615_vm13, %v8558_v26, %v3614_v53  ;;  %v4209_v31 = vmul.f32 %v4145_v24, %v4145_v24  ;;  %v4080_v55 = vmul.f32 %v8021_v32, %v10606_v10  ;;  %v5627_v60 = vpop.eup %5626  ;;  %5634 = vrcp.f32 %v3913_v37 }
 0x212   : > { %v3079_v36 = vadd.f32 1e-10, %v2787_v22  ;;  %v3619_v7 = vsel %vm3617_vm14, %v3618_v38, %v3616_v44  ;;  %v3609_v29 = vsel %vm3608_vm15, %v8548_v11, %v3607_v61  ;;  %v5629_v48 = vpop.eup %5628  ;;  %5636 = vrcp.f32 %v3912_v59  ;;  %v8753_v32 = vpop.xlane.xlu0 %3343 }
 0x213   : > { %v3611_v54 = vand.u32 2147483648, %v8548_v11  ;;  %v4280_v41 = vmul.f32 %v8749_v28, %v4209_v31  ;;  %v3078_v37 = vadd.f32 1e-10, %v2780_v47  ;;  %v4144_v26 = vsub.f32 %v4016_v57, %v4080_v55  ;;  %v10607_v55 = vld [vmem:[#allocation8_spill] sm:$0xff] }
 0x214   : > { %5638 = vrsqrt.f32 %v8607_v27  ;;  %v8757_v38 = vpop.xlane.xlu1 %3346  ;;  %v3911_v50 = vadd.f32 1e-10, %v3619_v7  ;;  %v2824_v53 = vmul.f32 %v5627_v60, %v8588_v35  ;;  %v2817_v24 = vmul.f32 %v5629_v48, %v8581_v43  ;;  %v8768_v57 = vpop.eup %5630 }
 0x215   : > { %v3612_v22 = vsel %vm3610_vm0, %v3611_v54, %v3609_v29  ;;  %v4350_v59 = vsel %vm2413_vm4, %v4280_v41, 0.0  ;;  %5640 = vrcp.f32 %v3079_v36  ;;  %v4208_v61 = vmul.f32 %v4144_v26, %v4144_v26  ;;  %v10608_v36 = vld [vmem:[#allocation9_spill] sm:$0xff]  ;;  %v10609_v41 = vld [vmem:[#allocation4_spill] sm:$0xff] }
 0x216   : > { %4351 = vadd.xlane.f32.xlu1 %v4350_v59  ;;  %vm2827_vm2 = vcmp.eq.f32.partialorder %v8588_v35, 0.0  ;;  %v2828_v11 = vand.u32 2147483648, %v8588_v35  ;;  %5642 = vrsqrt.f32 %v8597_v34  ;;  %v8766_v1 = vpop.xlane.xlu0 %2529  ;;  %v3910_v47 = vadd.f32 1e-10, %v3612_v22  ;;  %v10610_v26 = vld [vmem:[#allocation5_spill] sm:$0xff] }
 0x217   : > { %5644 = vrcp.f32 %v3078_v37  ;;  %vm2818_vm5 = vcmp.eq.f32.partialorder %v8581_v43, inf  ;;  %v4279_v44 = vmul.f32 %v8749_v28, %v4208_v61  ;;  %v2826_v10 = vsel %vm2825_vm1, %v8588_v35, %v2824_v53 }
 0x218   : > { %v8772_v31 = vpop.xlane.xlu1 %2532  ;;  %5646 = vrcp.f32 %v3911_v50  ;;  %v4015_v60 = vmul.f32 %v8105_v9, %v10607_v55  ;;  %v4079_v7 = vmul.f32 %v8126_v25, %v10608_v36  ;;  %v2819_v48 = vsel %vm2818_vm5, %v8581_v43, %v2817_v24 }
 0x219   : > { %v4347_v54 = vsel %vm2413_vm4, %v4279_v44, 0.0  ;;  %v4014_v37 = vmul.f32 %v8049_v45, %v10609_v41  ;;  %v4078_v50 = vmul.f32 %v8077_v18, %v10610_v26  ;;  %vm2820_vm6 = vcmp.eq.f32.partialorder %v8581_v43, 0.0  ;;  %v10611_v44 = vld [vmem:[#allocation13_spill] sm:$0xff] }
 0x21a   : > { %v8779_v29 = vpop.eup %5632  ;;  %v2821_v22 = vand.u32 2147483648, %v8581_v43  ;;  %4348 = vadd.xlane.f32.xlu0 %v4347_v54  ;;  %v4143_v9 = vsub.f32 %v4015_v60, %v4079_v7  ;;  %5648 = vrsqrt.f32 %v8624_v49  ;;  %v8790_v25 = vpop.xlane.xlu0 %3361  ;;  %v2829_v59 = vsel %vm2827_vm2, %v2828_v11, %v2826_v10  ;;  %v10612_v7 = vld [vmem:[#allocation16_spill] sm:$0xff]  ;;  %v10613_v11 = vld [vmem:[#allocation10_spill] sm:$0xff] }
 0x21b   : > { %v8792_v53 = vpop.eup %5634  ;;  %vm3657_vm7 = vcmp.eq.f32.partialorder %v8607_v27, inf  ;;  %v4142_v45 = vsub.f32 %v4014_v37, %v4078_v50  ;;  %5650 = vrsqrt.f32 %v8619_v3  ;;  %v4021_v55 = vmul.f32 %v8152_v6, %v10611_v44  ;;  %v10614_v54 = vld [vmem:[#allocation12_spill] sm:$0xff] }
 0x21c   : > { %v8798_v18 = vpop.xlane.xlu1 %3364  ;;  %v8800_v24 = vpop.eup %5636  ;;  %5652 = vrcp.f32 %v3910_v47  ;;  %v2822_v43 = vsel %vm2820_vm6, %v2821_v22, %v2819_v48  ;;  %v4207_v61 = vmul.f32 %v4143_v9, %v4143_v9  ;;  %v4085_v35 = vmul.f32 %v8158_v40, %v10612_v7 }
 0x21d   : > { %v4206_v36 = vmul.f32 %v4142_v45, %v4142_v45  ;;  %v4020_v10 = vmul.f32 %v8147_v19, %v10613_v11  ;;  %v4084_v41 = vmul.f32 %v8177_v8, %v10614_v54  ;;  %v3085_v37 = vadd.f32 1e-10, %v2829_v59 }
 0x21e   : > { %v5639_v60 = vpop.eup %5638  ;;  %vm3659_vm8 = vcmp.eq.f32.partialorder %v8607_v27, 0.0  ;;  %v4278_v47 = vmul.f32 %v8749_v28, %v4207_v61  ;;  %5654 = vrsqrt.f32 %v8655_v20  ;;  %v8813_v48 = vpop.xlane.xlu0 %2523  ;;  %v3084_v26 = vadd.f32 1e-10, %v2822_v43 }
 0x21f   : > { %v8815_v6 = vpop.eup %5640  ;;  %v4277_v40 = vmul.f32 %v8749_v28, %v4206_v36  ;;  %v4149_v50 = vsub.f32 %v4021_v55, %v4085_v35  ;;  %v4148_v22 = vsub.f32 %v4020_v10, %v4084_v41  ;;  %v3656_v8 = vmul.f32 %v5639_v60, %v8607_v27 }
 0x220   : > { %v8818_v19 = vpop.xlane.xlu1 %2526  ;;  %v5643_v9 = vpop.eup %5642  ;;  %v3660_v59 = vand.u32 2147483648, %v8607_v27  ;;  %v4344_v45 = vsel %vm2413_vm4, %v4278_v47, 0.0  ;;  %5656 = vrsqrt.f32 %v8648_v51  ;;  %vm3650_vm9 = vcmp.eq.f32.partialorder %v8597_v34, inf  ;;  %v10616_v47 = vld [vmem:[#allocation15_spill] sm:$0xff] }
 0x221   : > { %v8824_v61 = vpop.eup %5644  ;;  %v3649_v44 = vmul.f32 %v5643_v9, %v8597_v34  ;;  %4345 = vadd.xlane.f32.xlu1 %v4344_v45  ;;  %v4341_v43 = vsel %vm2413_vm4, %v4277_v40, 0.0  ;;  %v4213_v55 = vmul.f32 %v4149_v50, %v4149_v50  ;;  %5658 = vrcp.f32 %v3085_v37  ;;  %v10617_v50 = vld [vmem:[#allocation17_spill] sm:$0xff] }
 0x222   : > { %10615 = vst [vmem:[#allocation6_spill] sm:$0xff] %v8824_v61  ;;  %v8829_v36 = vpop.eup %5646  ;;  %vm3652_vm10 = vcmp.eq.f32.partialorder %v8597_v34, 0.0  ;;  %v3653_v60 = vand.u32 2147483648, %v8597_v34  ;;  %4342 = vadd.xlane.f32.xlu0 %v4341_v43  ;;  %v4212_v7 = vmul.f32 %v4148_v22, %v4148_v22  ;;  %v8833_v35 = vpop.xlane.xlu0 %3355  ;;  %5660 = vrcp.f32 %v3084_v26 }
 0x223   : > { %vm2811_vm11 = vcmp.eq.f32.partialorder %v8624_v49, inf  ;;  %vm2813_vm12 = vcmp.eq.f32.partialorder %v8624_v49, 0.0  ;;  %v4284_v11 = vmul.f32 %v8749_v28, %v4213_v55  ;;  %v3658_v41 = vsel %vm3657_vm7, %v8607_v27, %v3656_v8 }
 0x224   : > { %v8838_v10 = vpop.xlane.xlu1 %3358  ;;  %v5649_v54 = vpop.eup %5648  ;;  %v4283_v37 = vmul.f32 %v8749_v28, %v4212_v7  ;;  %v4019_v40 = vmul.f32 %v8199_v63, %v10616_v47  ;;  %v4083_v26 = vmul.f32 %v8223_v56, %v10617_v50  ;;  %v3651_v9 = vsel %vm3650_vm9, %v8597_v34, %v3649_v44  ;;  %v10618_v47 = vld [vmem:[#allocation11_spill] sm:$0xff]  ;;  %v10619_v50 = vld [vmem:[#allocation14_spill] sm:$0xff] }
 0x225   : > { %v5651_v22 = vpop.eup %5650  ;;  %v2810_v45 = vmul.f32 %v5649_v54, %v8624_v49  ;;  %v2814_v43 = vand.u32 2147483648, %v8624_v49  ;;  %v4362_v55 = vsel %vm2413_vm4, %v4284_v11, 0.0  ;;  %v4018_v56 = vmul.f32 %v8209_v46, %v10618_v47 }
 0x226   : > { %v8854_v8 = vpop.eup %5652  ;;  %4363 = vadd.xlane.f32.xlu1 %v4362_v55  ;;  %v4359_v7 = vsel %vm2413_vm4, %v4283_v37, 0.0  ;;  %v4147_v63 = vsub.f32 %v4019_v40, %v4083_v26  ;;  %v4082_v61 = vmul.f32 %v8229_v17, %v10619_v50  ;;  %v3661_v44 = vsel %vm3659_vm8, %v3660_v59, %v3658_v41  ;;  %v8873_v59 = vpop.xlane.xlu0 %2541 }
 0x227   : > { %v2812_v54 = vsel %vm2811_vm11, %v8624_v49, %v2810_v45  ;;  %v2803_v11 = vmul.f32 %v5651_v22, %v8619_v3  ;;  %vm2804_vm3 = vcmp.eq.f32.partialorder %v8619_v3, inf  ;;  %4360 = vadd.xlane.f32.xlu0 %v4359_v7  ;;  %v3654_v46 = vsel %vm3652_vm10, %v3653_v60, %v3651_v9 }
 0x228   : > { %v8868_v37 = vpop.xlane.xlu1 %2544  ;;  %v5655_v40 = vpop.eup %5654  ;;  %vm2806_vm13 = vcmp.eq.f32.partialorder %v8619_v3, 0.0  ;;  %v4211_v17 = vmul.f32 %v4147_v63, %v4147_v63  ;;  %v4146_v27 = vsub.f32 %v4018_v56, %v4082_v61  ;;  %v2807_v41 = vand.u32 2147483648, %v8619_v3 }
 0x229   : > { %v3642_v26 = vmul.f32 %v5655_v40, %v8655_v20  ;;  %vm3643_vm14 = vcmp.eq.f32.partialorder %v8655_v20, inf  ;;  %5662 = vrsqrt.f32 %v8682_v39  ;;  %v3917_v45 = vadd.f32 1e-10, %v3661_v44 }
 0x22a   : > { %v5657_v22 = vpop.eup %5656  ;;  %v2815_v34 = vsel %vm2813_vm12, %v2814_v43, %v2812_v54  ;;  %v4282_v60 = vmul.f32 %v8749_v28, %v4211_v17  ;;  %v4210_v9 = vmul.f32 %v4146_v27, %v4146_v27  ;;  %v3916_v55 = vadd.f32 1e-10, %v3654_v46  ;;  %v8904_v17 = vpop.xlane.xlu0 %3373 }
 0x22b   : > { %v2805_v61 = vsel %vm2804_vm3, %v8619_v3, %v2803_v11  ;;  %vm3645_vm15 = vcmp.eq.f32.partialorder %v8655_v20, 0.0  ;;  %v3646_v7 = vand.u32 2147483648, %v8655_v20  ;;  %v8887_v63 = vpop.eup %5658  ;;  %v3644_v47 = vsel %vm3643_vm14, %v8655_v20, %v3642_v26  ;;  %v10620_v26 = vld [vmem:[#allocation20_spill] sm:$0xff] }
 0x22c   : > { %v3635_v56 = vmul.f32 %v5657_v22, %v8648_v51  ;;  %v4356_v49 = vsel %vm2413_vm4, %v4282_v60, 0.0  ;;  %v4281_v43 = vmul.f32 %v8749_v28, %v4210_v9  ;;  %v8893_v50 = vpop.eup %5660  ;;  %v3083_v44 = vadd.f32 1e-10, %v2815_v34  ;;  %v8898_v54 = vpop.xlane.xlu1 %3376  ;;  %v10621_v34 = vld [vmem:[#allocation24_spill] sm:$0xff] }
 0x22d   : > { %vm3636_vm0 = vcmp.eq.f32.partialorder %v8648_v51, inf  ;;  %vm3638_vm1 = vcmp.eq.f32.partialorder %v8648_v51, 0.0  ;;  %4357 = vadd.xlane.f32.xlu1 %v4356_v49  ;;  %5664 = vrsqrt.f32 %v8674_v42  ;;  %v2808_v11 = vsel %vm2806_vm13, %v2807_v41, %v2805_v61  ;;  %v10622_v41 = vld [vmem:[#allocation18_spill] sm:$0xff]  ;;  %v10623_v60 = vld [vmem:[#allocation112_spill] sm:$0xff] }
 0x22e   : > { %5666 = vrcp.f32 %v3917_v45  ;;  %v3639_v40 = vand.u32 2147483648, %v8648_v51  ;;  %v4353_v46 = vsel %vm2413_vm4, %v4281_v43, 0.0  ;;  %v3647_v27 = vsel %vm3645_vm15, %v3646_v7, %v3644_v47  ;;  %v10624_v61 = vld [vmem:[#allocation22_spill] sm:$0xff]  ;;  %v10625_v43 = vld [vmem:[#allocation21_spill] sm:$0xff] }
 0x22f   : > { %5668 = vrcp.f32 %v3916_v55  ;;  %4354 = vadd.xlane.f32.xlu0 %v4353_v46  ;;  %v4025_v22 = vmul.f32 %v8245_v30, %v10620_v26  ;;  %v4089_v45 = vmul.f32 %v8284_v16, %v10621_v34  ;;  %v3637_v3 = vsel %vm3636_vm0, %v8648_v51, %v3635_v56  ;;  %v8936_v51 = vpop.xlane.xlu0 %2535 }
 0x230   : > { %vm2853_vm2 = vcmp.eq.f32.partialorder %v8682_v39, inf  ;;  %v4024_v9 = vmul.f32 %v10623_v60, %v10622_v41  ;;  %v4088_v55 = vmul.f32 %v8292_v4, %v10624_v61  ;;  %5670 = vrsqrt.f32 %v8708_v21  ;;  %v8929_v26 = vpop.xlane.xlu1 %2538 }
 0x231   : > { %5672 = vrcp.f32 %v3083_v44  ;;  %v3082_v20 = vadd.f32 1e-10, %v2808_v11  ;;  %v2856_v7 = vand.u32 2147483648, %v8682_v39  ;;  %v4153_v30 = vsub.f32 %v4025_v22, %v4089_v45  ;;  %v10626_v11 = vld [vmem:[#allocation25_spill] sm:$0xff]  ;;  %v10627_v22 = vld [vmem:[#allocation19_spill] sm:$0xff] }
 0x232   : > { %v3915_v47 = vadd.f32 1e-10, %v3647_v27  ;;  %vm2846_vm5 = vcmp.eq.f32.partialorder %v8674_v42, inf  ;;  %v4152_v16 = vsub.f32 %v4024_v9, %v4088_v55  ;;  %5674 = vrsqrt.f32 %v8701_v23  ;;  %v10628_v45 = vld [vmem:[#allocation23_spill] sm:$0xff] }
 0x233   : > { %v5663_v56 = vpop.eup %5662  ;;  %v3640_v49 = vsel %vm3638_vm1, %v3639_v40, %v3637_v3  ;;  %vm2855_vm6 = vcmp.eq.f32.partialorder %v8682_v39, 0.0  ;;  %v4217_v4 = vmul.f32 %v4153_v30, %v4153_v30  ;;  %v4023_v44 = vmul.f32 %v8312_v15, %v10625_v43 }
 0x234   : > { %v4087_v46 = vmul.f32 %v8366_v12, %v10626_v11  ;;  %v4216_v27 = vmul.f32 %v4152_v16, %v4152_v16  ;;  %v4022_v34 = vmul.f32 %v8357_v0, %v10627_v22  ;;  %v4086_v41 = vmul.f32 %v8372_v5, %v10628_v45  ;;  %v8964_v22 = vpop.xlane.xlu0 %3367 }
 0x235   : > { %5676 = vrsqrt.f32 %v8734_v2  ;;  %v2852_v40 = vmul.f32 %v5663_v56, %v8682_v39  ;;  %v4288_v15 = vmul.f32 %v8749_v28, %v4217_v4  ;;  %v3914_v12 = vadd.f32 1e-10, %v3640_v49 }
 0x236   : > { %5678 = vrcp.f32 %v3082_v20  ;;  %v4151_v3 = vsub.f32 %v4023_v44, %v4087_v46  ;;  %vm2848_vm7 = vcmp.eq.f32.partialorder %v8674_v42, 0.0  ;;  %v4287_v60 = vmul.f32 %v8749_v28, %v4216_v27 }
 0x237   : > { %v4150_v9 = vsub.f32 %v4022_v34, %v4086_v41  ;;  %v5665_v0 = vpop.eup %5664  ;;  %v2849_v61 = vand.u32 2147483648, %v8674_v42  ;;  %v4374_v5 = vsel %vm2413_vm4, %v4288_v15, 0.0  ;;  %5680 = vrsqrt.f32 %v8728_v52 }
 0x238   : > { %v4215_v55 = vmul.f32 %v4151_v3, %v4151_v3  ;;  %v8945_v20 = vpop.eup %5666  ;;  %5682 = vrcp.f32 %v3915_v47  ;;  %v2845_v30 = vmul.f32 %v5665_v0, %v8674_v42  ;;  %4375 = vadd.xlane.f32.xlu1 %v4374_v5  ;;  %v4371_v16 = vsel %vm2413_vm4, %v4287_v60, 0.0  ;;  %v8957_v47 = vpop.xlane.xlu1 %3370  ;;  %v10630_v3 = vld [vmem:[#allocation32_spill] sm:$0xff]  ;;  %v10631_v5 = vld [vmem:[#allocation26_spill] sm:$0xff] }
 0x239   : > { %v4214_v56 = vmul.f32 %v4150_v9, %v4150_v9  ;;  %v8949_v49 = vpop.eup %5668  ;;  %v2854_v4 = vsel %vm2853_vm2, %v8682_v39, %v2852_v40  ;;  %4372 = vadd.xlane.f32.xlu0 %v4371_v16  ;;  %vm3685_vm8 = vcmp.eq.f32.partialorder %v8708_v21, inf  ;;  %vm3687_vm9 = vcmp.eq.f32.partialorder %v8708_v21, 0.0  ;;  %v10629_v40 = vld [vmem:[#allocation28_spill] sm:$0xff] }
 0x23a   : > { %v4286_v43 = vmul.f32 %v8749_v28, %v4215_v55  ;;  %v5671_v44 = vpop.eup %5670  ;;  %5684 = vrcp.f32 %v3914_v12  ;;  %v2847_v11 = vsel %vm2846_vm5, %v8674_v42, %v2845_v30  ;;  %v3688_v46 = vand.u32 2147483648, %v8708_v21  ;;  %v10632_v30 = vld [vmem:[#allocation30_spill] sm:$0xff] }
 0x23b   : > { %v4285_v27 = vmul.f32 %v8749_v28, %v4214_v56  ;;  %v8966_v34 = vpop.eup %5672  ;;  %v3684_v45 = vmul.f32 %v5671_v44, %v8708_v21  ;;  %v4029_v15 = vmul.f32 %v8379_v14, %v10629_v40  ;;  %v4093_v12 = vmul.f32 %v8404_v13, %v10630_v3 }
 0x23c   : > { %v4368_v41 = vsel %vm2413_vm4, %v4286_v43, 0.0  ;;  %v5675_v60 = vpop.eup %5674  ;;  %v2857_v9 = vsel %vm2855_vm6, %v2856_v7, %v2854_v4  ;;  %v4028_v55 = vmul.f32 %v8392_v58, %v10631_v5  ;;  %v4092_v16 = vmul.f32 %v8413_v33, %v10632_v30 }
 0x23d   : > { %4369 = vadd.xlane.f32.xlu1 %v4368_v41  ;;  %v4365_v0 = vsel %vm2413_vm4, %v4285_v27, 0.0  ;;  %v3686_v14 = vsel %vm3685_vm8, %v8708_v21, %v3684_v45  ;;  %v3677_v56 = vmul.f32 %v5675_v60, %v8701_v23  ;;  %v4157_v13 = vsub.f32 %v4029_v15, %v4093_v12  ;;  %v8995_v45 = vpop.xlane.xlu1 %2556 }
 0x23e   : > { %4366 = vadd.xlane.f32.xlu0 %v4365_v0  ;;  %5686 = vrsqrt.f32 %v8757_v38  ;;  %v2850_v7 = vsel %vm2848_vm7, %v2849_v61, %v2847_v11  ;;  %vm3678_vm10 = vcmp.eq.f32.partialorder %v8701_v23, inf  ;;  %vm3680_vm11 = vcmp.eq.f32.partialorder %v8701_v23, 0.0  ;;  %v9000_v11 = vpop.xlane.xlu0 %2553 }
 0x23f   : > { %v5677_v39 = vpop.eup %5676  ;;  %v4156_v58 = vsub.f32 %v4028_v55, %v4092_v16  ;;  %v3679_v4 = vsel %vm3678_vm10, %v8701_v23, %v3677_v56  ;;  %v3681_v43 = vand.u32 2147483648, %v8701_v23  ;;  %v4221_v27 = vmul.f32 %v4157_v13, %v4157_v13  ;;  %v10633_v56 = vld [vmem:[#allocation29_spill] sm:$0xff] }
 0x240   : > { %v8990_v33 = vpop.eup %5678  ;;  %v2838_v44 = vmul.f32 %v5677_v39, %v8734_v2  ;;  %v3089_v41 = vadd.f32 1e-10, %v2857_v9  ;;  %v3689_v42 = vsel %vm3687_vm9, %v3688_v46, %v3686_v14  ;;  %vm2839_vm12 = vcmp.eq.f32.partialorder %v8734_v2, inf  ;;  %v10634_v13 = vld [vmem:[#allocation121_spill] sm:$0xff] }
 0x241   : > { %v4220_v61 = vmul.f32 %v4156_v58, %v4156_v58  ;;  %v5681_v40 = vpop.eup %5680  ;;  %v3088_v15 = vadd.f32 1e-10, %v2850_v7  ;;  %v3682_v3 = vsel %vm3680_vm11, %v3681_v43, %v3679_v4  ;;  %vm2841_vm3 = vcmp.eq.f32.partialorder %v8734_v2, 0.0  ;;  %v10635_v7 = vld [vmem:[#allocation33_spill] sm:$0xff]  ;;  %v10636_v58 = vld [vmem:[#allocation122_spill] sm:$0xff]  ;;  %v9023_v43 = vpop.xlane.xlu1 %3388 }
 0x242   : > { %v4292_v23 = vmul.f32 %v8749_v28, %v4221_v27  ;;  %v9004_v12 = vpop.eup %5682  ;;  %v2840_v60 = vsel %vm2839_vm12, %v8734_v2, %v2838_v44  ;;  %v2831_v9 = vmul.f32 %v5681_v40, %v8728_v52  ;;  %5688 = vrsqrt.f32 %v8753_v32  ;;  %v10637_v27 = vld [vmem:[#allocation27_spill] sm:$0xff]  ;;  %v10640_v40 = vld [vmem:[#allocation134_spill] sm:$0xff] }
 0x243   : > { %v4291_v21 = vmul.f32 %v8749_v28, %v4220_v61  ;;  %v3921_v46 = vadd.f32 1e-10, %v3689_v42  ;;  %v2842_v0 = vand.u32 2147483648, %v8734_v2  ;;  %vm2832_vm13 = vcmp.eq.f32.partialorder %v8728_v52, inf  ;;  %v10639_v61 = vld [vmem:[#allocation31_spill] sm:$0xff]  ;;  %v9031_v2 = vpop.xlane.xlu0 %3385 }
 0x244   : > { %v4386_v5 = vsel %vm2413_vm4, %v4292_v23, 0.0  ;;  %v9013_v55 = vpop.eup %5684  ;;  %5690 = vrcp.f32 %v3089_v41  ;;  %v3920_v30 = vadd.f32 1e-10, %v3682_v3  ;;  %vm2834_vm14 = vcmp.eq.f32.partialorder %v8728_v52, 0.0  ;;  %v10638_v41 = vld [vmem:[#allocation120_spill] sm:$0xff] }
 0x245   : > { %4387 = vadd.xlane.f32.xlu1 %v4386_v5  ;;  %v4383_v16 = vsel %vm2413_vm4, %v4291_v21, 0.0  ;;  %5692 = vrcp.f32 %v3088_v15  ;;  %v2843_v14 = vsel %vm2841_vm3, %v2842_v0, %v2840_v60  ;;  %v4027_v39 = vmul.f32 %v10634_v13, %v10633_v56  ;;  %v10641_v13 = vld [vmem:[#allocation36_spill] sm:$0xff] }
 0x246   : > { %4384 = vadd.xlane.f32.xlu0 %v4383_v16  ;;  %v4091_v4 = vmul.f32 %v10636_v58, %v10635_v7  ;;  %v2833_v44 = vsel %vm2832_vm13, %v8728_v52, %v2831_v9  ;;  %v4026_v42 = vmul.f32 %v10638_v41, %v10637_v27  ;;  %v4090_v15 = vmul.f32 %v10640_v40, %v10639_v61  ;;  %v10642_v7 = vld [vmem:[#allocation135_spill] sm:$0xff]  ;;  %v10646_v41 = vld [vmem:[#allocation136_spill] sm:$0xff]  ;;  %v9051_v40 = vpop.xlane.xlu1 %2550 }
 0x247   : > { %5694 = vrsqrt.f32 %v8772_v31  ;;  %v2835_v23 = vand.u32 2147483648, %v8728_v52  ;;  %vm3671_vm15 = vcmp.eq.f32.partialorder %v8757_v38, inf  ;;  %vm3673_vm0 = vcmp.eq.f32.partialorder %v8757_v38, 0.0  ;;  %10649 = vst [vmem:[#allocation7_spill] sm:$0xff] %v9051_v40 }
 0x248   : > { %v5687_v3 = vpop.eup %5686  ;;  %5696 = vrcp.f32 %v3921_v46  ;;  %v4155_v60 = vsub.f32 %v4027_v39, %v4091_v4  ;;  %v3674_v9 = vand.u32 2147483648, %v8757_v38  ;;  %v4154_v21 = vsub.f32 %v4026_v42, %v4090_v15  ;;  %v10643_v39 = vld [vmem:[#allocation40_spill] sm:$0xff]  ;;  %v10648_v42 = vld [vmem:[#allocation138_spill] sm:$0xff] }
 0x249   : > { %5698 = vrcp.f32 %v3920_v30  ;;  %v3087_v0 = vadd.f32 1e-10, %v2843_v14  ;;  %v2836_v5 = vsel %vm2834_vm14, %v2835_v23, %v2833_v44  ;;  %v3670_v46 = vmul.f32 %v5687_v3, %v8757_v38  ;;  %v10644_v30 = vld [vmem:[#allocation137_spill] sm:$0xff]  ;;  %v10645_v14 = vld [vmem:[#allocation34_spill] sm:$0xff] }
 0x24a   : > { %v4219_v16 = vmul.f32 %v4155_v60, %v4155_v60  ;;  %5700 = vrsqrt.f32 %v8766_v1  ;;  %v4218_v56 = vmul.f32 %v4154_v21, %v4154_v21  ;;  %v4033_v58 = vmul.f32 %v10642_v7, %v10641_v13  ;;  %v10647_v44 = vld [vmem:[#allocation38_spill] sm:$0xff]  ;;  %v9056_v60 = vpop.xlane.xlu0 %2547 }
 0x24b   : > { %v4097_v4 = vmul.f32 %v10644_v30, %v10643_v39  ;;  %vm3664_vm1 = vcmp.eq.f32.partialorder %v8753_v32, inf  ;;  %v4032_v52 = vmul.f32 %v10646_v41, %v10645_v14  ;;  %v4096_v61 = vmul.f32 %v10648_v42, %v10647_v44  ;;  %10650 = vst [vmem:[#allocation2_spill] sm:$0xff] %v9056_v60 }
 0x24c   : > { %v4290_v27 = vmul.f32 %v8749_v28, %v4219_v16  ;;  %v5689_v15 = vpop.eup %5688  ;;  %vm3666_vm2 = vcmp.eq.f32.partialorder %v8753_v32, 0.0  ;;  %v4289_v3 = vmul.f32 %v8749_v28, %v4218_v56  ;;  %5702 = vrsqrt.f32 %v8798_v18 }
 0x24d   : > { %v4161_v23 = vsub.f32 %v4033_v58, %v4097_v4  ;;  %v3086_v21 = vadd.f32 1e-10, %v2836_v5  ;;  %v3663_v16 = vmul.f32 %v5689_v15, %v8753_v32  ;;  %v4160_v7 = vsub.f32 %v4032_v52, %v4096_v61  ;;  %v9083_v15 = vpop.xlane.xlu1 %3382 }
 0x24e   : > { %v4380_v13 = vsel %vm2413_vm4, %v4290_v27, 0.0  ;;  %v9060_v39 = vpop.eup %5690  ;;  %5704 = vrcp.f32 %v3087_v0  ;;  %v3672_v30 = vsel %vm3671_vm15, %v8757_v38, %v3670_v46  ;;  %v4377_v56 = vsel %vm2413_vm4, %v4289_v3, 0.0  ;;  %10651 = vst [vmem:[#allocation3_spill] sm:$0xff] %v9083_v15  ;;  %v10660_v15 = vld [vmem:[#allocation142_spill] sm:$0xff] }
 0x24f   : > { %4381 = vadd.xlane.f32.xlu1 %v4380_v13  ;;  %v4225_v58 = vmul.f32 %v4161_v23, %v4161_v23  ;;  %v9066_v4 = vpop.eup %5692  ;;  %v3665_v5 = vsel %vm3664_vm1, %v8753_v32, %v3663_v16  ;;  %v3667_v27 = vand.u32 2147483648, %v8753_v32  ;;  %4378 = vadd.xlane.f32.xlu0 %v4377_v56  ;;  %v4224_v14 = vmul.f32 %v4160_v7, %v4160_v7  ;;  %v10652_v13 = vld [vmem:[#allocation37_spill] sm:$0xff]  ;;  %v10653_v7 = vld [vmem:[#allocation139_spill] sm:$0xff] }
 0x250   : > { %5706 = vrsqrt.f32 %v8790_v25  ;;  %vm2881_vm5 = vcmp.eq.f32.partialorder %v8772_v31, inf  ;;  %vm2883_vm6 = vcmp.eq.f32.partialorder %v8772_v31, 0.0  ;;  %v2884_v46 = vand.u32 2147483648, %v8772_v31  ;;  %v10657_v32 = vld [vmem:[#allocation35_spill] sm:$0xff] }
 0x251   : > { %v5695_v0 = vpop.eup %5694  ;;  %v4296_v41 = vmul.f32 %v8749_v28, %v4225_v58  ;;  %5708 = vrcp.f32 %v3086_v21  ;;  %v3675_v44 = vsel %vm3673_vm0, %v3674_v9, %v3672_v30  ;;  %v4295_v61 = vmul.f32 %v8749_v28, %v4224_v14  ;;  %v10654_v21 = vld [vmem:[#allocation41_spill] sm:$0xff]  ;;  %v9094_v9 = vpop.xlane.xlu0 %3379 }
 0x252   : > { %v9077_v52 = vpop.eup %5696  ;;  %v2880_v42 = vmul.f32 %v5695_v0, %v8772_v31  ;;  %v3668_v23 = vsel %vm3666_vm2, %v3667_v27, %v3665_v5  ;;  %v4031_v56 = vmul.f32 %v10653_v7, %v10652_v13  ;;  %v10655_v58 = vld [vmem:[#allocation141_spill] sm:$0xff]  ;;  %10656 = vst [vmem:[#allocation8_spill] sm:$0xff] %v9094_v9  ;;  %v10658_v5 = vld [vmem:[#allocation140_spill] sm:$0xff]  ;;  %v3919_v13 = vadd.f32 1e-10, %v3675_v44  ;;  %v10669_v9 = vld [vmem:[#allocation46_spill] sm:$0xff] }
 0x253   : > { %v9085_v3 = vpop.eup %5698  ;;  %v4398_v16 = vsel %vm2413_vm4, %v4296_v41, 0.0  ;;  %v4095_v38 = vmul.f32 %v10655_v58, %v10654_v21  ;;  %v4395_v0 = vsel %vm2413_vm4, %v4295_v61, 0.0  ;;  %v4030_v27 = vmul.f32 %v10658_v5, %v10657_v32  ;;  %v10659_v41 = vld [vmem:[#allocation39_spill] sm:$0xff] }
 0x254   : > { %v5701_v30 = vpop.eup %5700  ;;  %v2882_v14 = vsel %vm2881_vm5, %v8772_v31, %v2880_v42  ;;  %4399 = vadd.xlane.f32.xlu1 %v4398_v16  ;;  %v4094_v60 = vmul.f32 %v10660_v15, %v10659_v41  ;;  %4396 = vadd.xlane.f32.xlu0 %v4395_v0  ;;  %5710 = vrsqrt.f32 %v8818_v19  ;;  %v3918_v58 = vadd.f32 1e-10, %v3668_v23 }
 0x255   : > { %v2873_v7 = vmul.f32 %v5701_v30, %v8766_v1  ;;  %v4159_v21 = vsub.f32 %v4031_v56, %v4095_v38  ;;  %vm2874_vm7 = vcmp.eq.f32.partialorder %v8766_v1, inf  ;;  %v2877_v42 = vand.u32 2147483648, %v8766_v1  ;;  %v9115_v56 = vpop.xlane.xlu1 %2568 }
 0x256   : > { %v4158_v16 = vsub.f32 %v4030_v27, %v4094_v60  ;;  %v5703_v61 = vpop.eup %5702  ;;  %v2885_v32 = vsel %vm2883_vm6, %v2884_v46, %v2882_v14  ;;  %5712 = vrsqrt.f32 %v8813_v48  ;;  %vm2876_vm8 = vcmp.eq.f32.partialorder %v8766_v1, 0.0  ;;  %10661 = vst [vmem:[#allocation9_spill] sm:$0xff] %v9115_v56  ;;  %v9121_v46 = vpop.xlane.xlu0 %2565 }
 0x257   : > { %v2875_v5 = vsel %vm2874_vm7, %v8766_v1, %v2873_v7  ;;  %v4223_v15 = vmul.f32 %v4159_v21, %v4159_v21  ;;  %v3712_v44 = vmul.f32 %v5703_v61, %v8798_v18  ;;  %vm3713_vm9 = vcmp.eq.f32.partialorder %v8798_v18, inf  ;;  %10662 = vst [vmem:[#allocation4_spill] sm:$0xff] %v9121_v46  ;;  %v10664_v61 = vld [vmem:[#allocation143_spill] sm:$0xff]  ;;  %v10668_v46 = vld [vmem:[#allocation144_spill] sm:$0xff] }
 0x258   : > { %v4222_v23 = vmul.f32 %v4158_v16, %v4158_v16  ;;  %v9117_v38 = vpop.eup %5704  ;;  %5714 = vrcp.f32 %v3919_v13  ;;  %v2878_v60 = vsel %vm2876_vm8, %v2877_v42, %v2875_v5  ;;  %vm3715_vm10 = vcmp.eq.f32.partialorder %v8798_v18, 0.0  ;;  %v10663_v16 = vld [vmem:[#allocation44_spill] sm:$0xff] }
 0x259   : > { %v4294_v31 = vmul.f32 %v8749_v28, %v4223_v15  ;;  %v3093_v14 = vadd.f32 1e-10, %v2885_v32  ;;  %v3716_v1 = vand.u32 2147483648, %v8798_v18  ;;  %vm3706_vm11 = vcmp.eq.f32.partialorder %v8790_v25, inf  ;;  %v10665_v5 = vld [vmem:[#allocation48_spill] sm:$0xff]  ;;  %v10666_v15 = vld [vmem:[#allocation145_spill] sm:$0xff] }
 0x25a   : > { %v5707_v30 = vpop.eup %5706  ;;  %v4293_v0 = vmul.f32 %v8749_v28, %v4222_v23  ;;  %5716 = vrcp.f32 %v3918_v58  ;;  %v3714_v27 = vsel %vm3713_vm9, %v8798_v18, %v3712_v44  ;;  %vm3708_vm12 = vcmp.eq.f32.partialorder %v8790_v25, 0.0  ;;  %v10667_v23 = vld [vmem:[#allocation42_spill] sm:$0xff] }
 0x25b   : > { %v3709_v41 = vand.u32 2147483648, %v8790_v25  ;;  %v4392_v13 = vsel %vm2413_vm4, %v4294_v31, 0.0  ;;  %v9130_v7 = vpop.eup %5708  ;;  %v3092_v21 = vadd.f32 1e-10, %v2878_v60  ;;  %v4037_v32 = vmul.f32 %v10664_v61, %v10663_v16  ;;  %v10670_v31 = vld [vmem:[#allocation146_spill] sm:$0xff] }
 0x25c   : > { %4393 = vadd.xlane.f32.xlu1 %v4392_v13  ;;  %v4389_v42 = vsel %vm2413_vm4, %v4293_v0, 0.0  ;;  %v4101_v58 = vmul.f32 %v10666_v15, %v10665_v5  ;;  %v3705_v44 = vmul.f32 %v5707_v30, %v8790_v25  ;;  %v4036_v56 = vmul.f32 %v10668_v46, %v10667_v23  ;;  %v9146_v13 = vpop.xlane.xlu1 %3400  ;;  %v10673_v5 = vld [vmem:[#allocation45_spill] sm:$0xff]  ;;  %v10674_v15 = vld [vmem:[#allocation147_spill] sm:$0xff] }
 0x25d   : > { %4390 = vadd.xlane.f32.xlu0 %v4389_v42  ;;  %v4100_v40 = vmul.f32 %v10670_v31, %v10669_v9  ;;  %5718 = vrsqrt.f32 %v8838_v10  ;;  %v3717_v60 = vsel %vm3715_vm10, %v3716_v1, %v3714_v27  ;;  %vm2867_vm3 = vcmp.eq.f32.partialorder %v8818_v19, inf  ;;  %10671 = vst [vmem:[#allocation5_spill] sm:$0xff] %v9146_v13  ;;  %v9151_v9 = vpop.xlane.xlu0 %3397  ;;  %v10675_v23 = vld [vmem:[#allocation49_spill] sm:$0xff] }
 0x25e   : > { %5720 = vrcp.f32 %v3093_v14  ;;  %v4165_v0 = vsub.f32 %v4037_v32, %v4101_v58  ;;  %v5711_v16 = vpop.eup %5710  ;;  %vm2869_vm13 = vcmp.eq.f32.partialorder %v8818_v19, 0.0  ;;  %v2870_v30 = vand.u32 2147483648, %v8818_v19  ;;  %10672 = vst [vmem:[#allocation13_spill] sm:$0xff] %v9151_v9  ;;  %v10676_v31 = vld [vmem:[#allocation149_spill] sm:$0xff] }
 0x25f   : > { %v4164_v46 = vsub.f32 %v4036_v56, %v4100_v40  ;;  %5722 = vrsqrt.f32 %v8833_v35  ;;  %v2866_v14 = vmul.f32 %v5711_v16, %v8818_v19  ;;  %vm2860_vm14 = vcmp.eq.f32.partialorder %v8813_v48, inf }
 0x260   : > { %v2863_v18 = vand.u32 2147483648, %v8813_v48  ;;  %v4229_v1 = vmul.f32 %v4165_v0, %v4165_v0  ;;  %v5713_v27 = vpop.eup %5712  ;;  %5724 = vrcp.f32 %v3092_v21  ;;  %v3925_v42 = vadd.f32 1e-10, %v3717_v60  ;;  %v10678_v0 = vld [vmem:[#allocation148_spill] sm:$0xff]  ;;  %v9181_v13 = vpop.xlane.xlu1 %2562 }
 0x261   : > { %v3707_v61 = vsel %vm3706_vm11, %v8790_v25, %v3705_v44  ;;  %v4228_v32 = vmul.f32 %v4164_v46, %v4164_v46  ;;  %v2859_v40 = vmul.f32 %v5713_v27, %v8813_v48  ;;  %v4035_v58 = vmul.f32 %v10674_v15, %v10673_v5  ;;  %v10677_v44 = vld [vmem:[#allocation43_spill] sm:$0xff]  ;;  %v9188_v25 = vpop.xlane.xlu0 %2559 }
 0x262   : > { %v4300_v56 = vmul.f32 %v8749_v28, %v4229_v1  ;;  %v4099_v16 = vmul.f32 %v10676_v31, %v10675_v23  ;;  %v9165_v9 = vpop.eup %5714  ;;  %v2868_v21 = vsel %vm2867_vm3, %v8818_v19, %v2866_v14  ;;  %v4034_v46 = vmul.f32 %v10678_v0, %v10677_v44  ;;  %v10679_v27 = vld [vmem:[#allocation47_spill] sm:$0xff]  ;;  %v10680_v0 = vld [vmem:[#allocation52_spill] sm:$0xff] }
 0x263   : > { %v4299_v60 = vmul.f32 %v8749_v28, %v4228_v32  ;;  %v4098_v1 = vmul.f32 %v8719_v62, %v10679_v27  ;;  %v3710_v5 = vsel %vm3708_vm12, %v3709_v41, %v3707_v61  ;;  %v2861_v15 = vsel %vm2860_vm14, %v8813_v48, %v2859_v40 }
 0x264   : > { %v4410_v23 = vsel %vm2413_vm4, %v4300_v56, 0.0  ;;  %v4163_v31 = vsub.f32 %v4035_v58, %v4099_v16  ;;  %v9183_v14 = vpop.eup %5716  ;;  %vm2862_vm15 = vcmp.eq.f32.partialorder %v8813_v48, 0.0  ;;  %5726 = vrsqrt.f32 %v8868_v37 }
 0x265   : > { %4411 = vadd.xlane.f32.xlu1 %v4410_v23  ;;  %v4407_v32 = vsel %vm2413_vm4, %v4299_v60, 0.0  ;;  %v4162_v62 = vsub.f32 %v4034_v46, %v4098_v1  ;;  %5728 = vrcp.f32 %v3925_v42  ;;  %v2871_v41 = vsel %vm2869_vm13, %v2870_v30, %v2868_v21 }
 0x266   : > { %v2864_v61 = vsel %vm2862_vm15, %v2863_v18, %v2861_v15  ;;  %4408 = vadd.xlane.f32.xlu0 %v4407_v32  ;;  %v4227_v40 = vmul.f32 %v4163_v31, %v4163_v31  ;;  %v3924_v58 = vadd.f32 1e-10, %v3710_v5  ;;  %vm3699_vm0 = vcmp.eq.f32.partialorder %v8838_v10, inf  ;;  %v10681_v15 = vld [vmem:[#allocation56_spill] sm:$0xff]  ;;  %v9208_v31 = vpop.xlane.xlu1 %3394 }
 0x267   : > { %v5719_v56 = vpop.eup %5718  ;;  %v4226_v48 = vmul.f32 %v4162_v62, %v4162_v62  ;;  %5730 = vrsqrt.f32 %v8873_v59  ;;  %vm3701_vm1 = vcmp.eq.f32.partialorder %v8838_v10, 0.0  ;;  %v3702_v42 = vand.u32 2147483648, %v8838_v10 }
 0x268   : > { %v9194_v16 = vpop.eup %5720  ;;  %v3698_v60 = vmul.f32 %v5719_v56, %v8838_v10  ;;  %v4298_v19 = vmul.f32 %v8749_v28, %v4227_v40  ;;  %v3091_v18 = vadd.f32 1e-10, %v2871_v41  ;;  %v3090_v21 = vadd.f32 1e-10, %v2864_v61  ;;  %v10682_v41 = vld [vmem:[#allocation50_spill] sm:$0xff]  ;;  %v9217_v56 = vpop.xlane.xlu0 %3391 }
 0x269   : > { %v5723_v30 = vpop.eup %5722  ;;  %v4297_v44 = vmul.f32 %v8749_v28, %v4226_v48  ;;  %v4041_v46 = vmul.f32 %v8768_v57, %v10680_v0  ;;  %v4105_v23 = vmul.f32 %v8792_v53, %v10681_v15  ;;  %5732 = vrcp.f32 %v3924_v58  ;;  %v10683_v61 = vld [vmem:[#allocation54_spill] sm:$0xff] }
 0x26a   : > { %v3700_v27 = vsel %vm3699_vm0, %v8838_v10, %v3698_v60  ;;  %v3691_v1 = vmul.f32 %v5723_v30, %v8833_v35  ;;  %v4404_v5 = vsel %vm2413_vm4, %v4298_v19, 0.0  ;;  %v9210_v32 = vpop.eup %5724  ;;  %v4040_v57 = vmul.f32 %v8779_v29, %v10682_v41  ;;  %v10686_v41 = vld [vmem:[#allocation51_spill] sm:$0xff] }
 0x26b   : > { %4405 = vadd.xlane.f32.xlu1 %v4404_v5  ;;  %v4401_v62 = vsel %vm2413_vm4, %v4297_v44, 0.0  ;;  %v4104_v40 = vmul.f32 %v8800_v24, %v10683_v61  ;;  %vm3692_vm2 = vcmp.eq.f32.partialorder %v8833_v35, inf  ;;  %vm3694_vm5 = vcmp.eq.f32.partialorder %v8833_v35, 0.0  ;;  %v10684_v5 = vld [vmem:[#allocation53_spill] sm:$0xff] }
 0x26c   : > { %4402 = vadd.xlane.f32.xlu0 %v4401_v62  ;;  %v4169_v53 = vsub.f32 %v4041_v46, %v4105_v23  ;;  %5734 = vrsqrt.f32 %v8898_v54  ;;  %v3703_v58 = vsel %vm3701_vm1, %v3702_v42, %v3700_v27  ;;  %v3693_v48 = vsel %vm3692_vm2, %v8833_v35, %v3691_v1  ;;  %v9236_v46 = vpop.xlane.xlu1 %2580  ;;  %v10685_v23 = vld [vmem:[#allocation57_spill] sm:$0xff] }
 0x26d   : > { %5736 = vrcp.f32 %v3091_v18  ;;  %v4168_v29 = vsub.f32 %v4040_v57, %v4104_v40  ;;  %v3695_v24 = vand.u32 2147483648, %v8833_v35  ;;  %vm2909_vm6 = vcmp.eq.f32.partialorder %v8868_v37, inf  ;;  %v10687_v57 = vld [vmem:[#allocation6_spill] sm:$0xff]  ;;  %v9245_v35 = vpop.xlane.xlu0 %2577 }
 0x26e   : > { %5738 = vrcp.f32 %v3090_v21  ;;  %v4233_v60 = vmul.f32 %v4169_v53, %v4169_v53  ;;  %v5727_v19 = vpop.eup %5726  ;;  %vm2911_vm7 = vcmp.eq.f32.partialorder %v8868_v37, 0.0  ;;  %v2912_v30 = vand.u32 2147483648, %v8868_v37 }
 0x26f   : > { %v4232_v44 = vmul.f32 %v4168_v29, %v4168_v29  ;;  %5740 = vrsqrt.f32 %v8904_v17  ;;  %v9230_v18 = vpop.eup %5728  ;;  %v3923_v10 = vadd.f32 1e-10, %v3703_v58  ;;  %v3696_v42 = vsel %vm3694_vm5, %v3695_v24, %v3693_v48 }
 0x270   : > { %v2908_v21 = vmul.f32 %v5727_v19, %v8868_v37  ;;  %v4304_v0 = vmul.f32 %v8749_v28, %v4233_v60  ;;  %v4039_v15 = vmul.f32 %v8815_v6, %v10684_v5  ;;  %v4103_v62 = vmul.f32 %v8829_v36, %v10685_v23 }
 0x271   : > { %v5731_v27 = vpop.eup %5730  ;;  %v4303_v1 = vmul.f32 %v8749_v28, %v4232_v44  ;;  %v4038_v61 = vmul.f32 %v10687_v57, %v10686_v41  ;;  %v10688_v28 = vld [vmem:[#allocation55_spill] sm:$0xff]  ;;  %vm2902_vm8 = vcmp.eq.f32.partialorder %v8873_v59, inf  ;;  %5742 = vrsqrt.f32 %v8929_v26 }
 0x272   : > { %v2910_v40 = vsel %vm2909_vm6, %v8868_v37, %v2908_v21  ;;  %v2901_v53 = vmul.f32 %v5731_v27, %v8873_v59  ;;  %v4422_v58 = vsel %vm2413_vm4, %v4304_v0, 0.0  ;;  %v4102_v48 = vmul.f32 %v8854_v8, %v10688_v28  ;;  %v9276_v37 = vld [vmem:[%s10264_s4] ss:$0 sm:$0xff] }
 0x273   : > { %4423 = vadd.xlane.f32.xlu1 %v4422_v58  ;;  %v4419_v6 = vsel %vm2413_vm4, %v4303_v1, 0.0  ;;  %v4167_v36 = vsub.f32 %v4039_v15, %v4103_v62  ;;  %v3922_v29 = vadd.f32 1e-10, %v3696_v42  ;;  %vm2904_vm9 = vcmp.eq.f32.partialorder %v8873_v59, 0.0  ;;  %v9259_v19 = vpop.eup %5732  ;;  %v9267_v1 = vpop.xlane.xlu1 %3412  ;;  %v10689_v58 = vld [vmem:[#allocation60_spill] sm:$0xff] }
 0x274   : > { %v2905_v24 = vand.u32 2147483648, %v8873_v59  ;;  %4420 = vadd.xlane.f32.xlu0 %v4419_v6  ;;  %v4166_v60 = vsub.f32 %v4038_v61, %v4102_v48  ;;  %v2913_v8 = vsel %vm2911_vm7, %v2912_v30, %v2910_v40  ;;  %v2903_v44 = vsel %vm2902_vm8, %v8873_v59, %v2901_v53  ;;  %v10690_v48 = vld [vmem:[#allocation64_spill] sm:$0xff] }
 0x275   : > { %vm3741_vm10 = vcmp.eq.f32.partialorder %v8898_v54, inf  ;;  %v4231_v21 = vmul.f32 %v4167_v36, %v4167_v36  ;;  %5744 = vrcp.f32 %v3923_v10  ;;  %vm3743_vm11 = vcmp.eq.f32.partialorder %v8898_v54, 0.0  ;;  %v9280_v10 = vpop.xlane.xlu0 %3409 }
 0x276   : > { %v5735_v0 = vpop.eup %5734  ;;  %v3744_v42 = vand.u32 2147483648, %v8898_v54  ;;  %v4230_v27 = vmul.f32 %v4166_v60, %v4166_v60  ;;  %vm3734_vm12 = vcmp.eq.f32.partialorder %v8904_v17, inf  ;;  %5746 = vrsqrt.f32 %v8936_v51  ;;  %v10692_v60 = vld [vmem:[#allocation62_spill] sm:$0xff] }
 0x277   : > { %v9269_v5 = vpop.eup %5736  ;;  %v3740_v15 = vmul.f32 %v5735_v0, %v8898_v54  ;;  %v4302_v30 = vmul.f32 %v9276_v37, %v4231_v21  ;;  %5748 = vrcp.f32 %v3922_v29  ;;  %v3097_v62 = vadd.f32 1e-10, %v2913_v8  ;;  %v10691_v29 = vld [vmem:[#allocation58_spill] sm:$0xff]  ;;  %v9306_v0 = vpop.xlane.xlu1 %2574 }
 0x278   : > { %v9282_v23 = vpop.eup %5738  ;;  %v2906_v41 = vsel %vm2904_vm9, %v2905_v24, %v2903_v44  ;;  %v4301_v57 = vmul.f32 %v9276_v37, %v4230_v27  ;;  %v4045_v28 = vmul.f32 %v8887_v63, %v10689_v58  ;;  %v4109_v6 = vmul.f32 %v8945_v20, %v10690_v48  ;;  %v10693_v58 = vld [vmem:[#allocation61_spill] sm:$0xff] }
 0x279   : > { %v5741_v61 = vpop.eup %5740  ;;  %v3742_v40 = vsel %vm3741_vm10, %v8898_v54, %v3740_v15  ;;  %v4416_v53 = vsel %vm2413_vm4, %v4302_v30, 0.0  ;;  %v4044_v24 = vmul.f32 %v8893_v50, %v10691_v29  ;;  %v4108_v8 = vmul.f32 %v8949_v49, %v10692_v60  ;;  %v9311_v30 = vpop.xlane.xlu0 %2571  ;;  %v10694_v48 = vld [vmem:[#allocation65_spill] sm:$0xff] }
 0x27a   : > { %v3733_v36 = vmul.f32 %v5741_v61, %v8904_v17  ;;  %4417 = vadd.xlane.f32.xlu1 %v4416_v53  ;;  %v4413_v59 = vsel %vm2413_vm4, %v4301_v57, 0.0  ;;  %v3096_v44 = vadd.f32 1e-10, %v2906_v41  ;;  %vm3736_vm3 = vcmp.eq.f32.partialorder %v8904_v17, 0.0 }
 0x27b   : > { %4414 = vadd.xlane.f32.xlu0 %v4413_v59  ;;  %v4173_v21 = vsub.f32 %v4045_v28, %v4109_v6  ;;  %5750 = vrsqrt.f32 %v8957_v47  ;;  %v3737_v63 = vand.u32 2147483648, %v8904_v17  ;;  %vm2895_vm13 = vcmp.eq.f32.partialorder %v8929_v26, inf  ;;  %v5743_v50 = vpop.eup %5742 }
 0x27c   : > { %vm2897_vm14 = vcmp.eq.f32.partialorder %v8929_v26, 0.0  ;;  %v4172_v20 = vsub.f32 %v4044_v24, %v4108_v8  ;;  %5752 = vrcp.f32 %v3097_v62  ;;  %v3745_v49 = vsel %vm3743_vm11, %v3744_v42, %v3742_v40  ;;  %v10695_v24 = vld [vmem:[#allocation59_spill] sm:$0xff] }
 0x27d   : > { %v2898_v27 = vand.u32 2147483648, %v8929_v26  ;;  %v4237_v15 = vmul.f32 %v4173_v21, %v4173_v21  ;;  %v3735_v41 = vsel %vm3734_vm12, %v8904_v17, %v3733_v36  ;;  %v2894_v57 = vmul.f32 %v5743_v50, %v8929_v26  ;;  %v10696_v8 = vld [vmem:[#allocation63_spill] sm:$0xff] }
 0x27e   : > { %v4236_v61 = vmul.f32 %v4172_v20, %v4172_v20  ;;  %5754 = vrsqrt.f32 %v8964_v22  ;;  %vm2888_vm15 = vcmp.eq.f32.partialorder %v8936_v51, inf  ;;  %v2891_v54 = vand.u32 2147483648, %v8936_v51 }
 0x27f   : > { %5756 = vrcp.f32 %v3096_v44  ;;  %v4308_v42 = vmul.f32 %v9276_v37, %v4237_v15  ;;  %v9321_v62 = vpop.eup %5744  ;;  %v3929_v40 = vadd.f32 1e-10, %v3745_v49  ;;  %v4043_v28 = vmul.f32 %v8966_v34, %v10693_v58 }
 0x280   : > { %v4307_v53 = vmul.f32 %v9276_v37, %v4236_v61  ;;  %v4107_v6 = vmul.f32 %v9004_v12, %v10694_v48  ;;  %v5747_v36 = vpop.eup %5746  ;;  %v3738_v59 = vsel %vm3736_vm3, %v3737_v63, %v3735_v41  ;;  %vm2890_vm0 = vcmp.eq.f32.partialorder %v8936_v51, 0.0  ;;  %v9343_v63 = vpop.xlane.xlu1 %3406 }
 0x281   : > { %v4434_v29 = vsel %vm2413_vm4, %v4308_v42, 0.0  ;;  %v4042_v60 = vmul.f32 %v8990_v33, %v10695_v24  ;;  %v4106_v44 = vmul.f32 %v9013_v55, %v10696_v8  ;;  %v9336_v21 = vpop.eup %5748  ;;  %v2896_v34 = vsel %vm2895_vm13, %v8929_v26, %v2894_v57  ;;  %v9348_v55 = vpop.xlane.xlu0 %3403 }
 0x282   : > { %4435 = vadd.xlane.f32.xlu1 %v4434_v29  ;;  %v4431_v17 = vsel %vm2413_vm4, %v4307_v53, 0.0  ;;  %vm3727_vm1 = vcmp.eq.f32.partialorder %v8957_v47, inf  ;;  %v4171_v12 = vsub.f32 %v4043_v28, %v4107_v6  ;;  %v2887_v20 = vmul.f32 %v5747_v36, %v8936_v51  ;;  %v10697_v28 = vld [vmem:[#allocation68_spill] sm:$0xff] }
 0x283   : > { %4432 = vadd.xlane.f32.xlu0 %v4431_v17  ;;  %vm3729_vm2 = vcmp.eq.f32.partialorder %v8957_v47, 0.0  ;;  %v4170_v33 = vsub.f32 %v4042_v60, %v4106_v44  ;;  %5758 = vrsqrt.f32 %v8995_v45  ;;  %v3928_v50 = vadd.f32 1e-10, %v3738_v59  ;;  %v10698_v6 = vld [vmem:[#allocation72_spill] sm:$0xff] }
 0x284   : > { %5760 = vrcp.f32 %v3929_v40  ;;  %v3730_v49 = vand.u32 2147483648, %v8957_v47  ;;  %v4235_v15 = vmul.f32 %v4171_v12, %v4171_v12  ;;  %v2899_v57 = vsel %vm2897_vm14, %v2898_v27, %v2896_v34  ;;  %v9373_v8 = vpop.xlane.xlu1 %2592 }
 0x285   : > { %v5751_v41 = vpop.eup %5750  ;;  %vm3720_vm5 = vcmp.eq.f32.partialorder %v8964_v22, inf  ;;  %v4234_v61 = vmul.f32 %v4170_v33, %v4170_v33  ;;  %5762 = vrsqrt.f32 %v9000_v11  ;;  %vm3722_vm6 = vcmp.eq.f32.partialorder %v8964_v22, 0.0  ;;  %v9380_v17 = vpop.xlane.xlu0 %2589 }
 0x286   : > { %v3726_v42 = vmul.f32 %v5751_v41, %v8957_v47  ;;  %v3723_v53 = vand.u32 2147483648, %v8964_v22  ;;  %v4306_v40 = vmul.f32 %v9276_v37, %v4235_v15  ;;  %v9359_v58 = vpop.eup %5752  ;;  %v2889_v26 = vsel %vm2888_vm15, %v8936_v51, %v2887_v20  ;;  %v10699_v20 = vld [vmem:[#allocation66_spill] sm:$0xff] }
 0x287   : > { %v4305_v27 = vmul.f32 %v9276_v37, %v4234_v61  ;;  %v4049_v48 = vmul.f32 %v9060_v39, %v10697_v28  ;;  %v4113_v36 = vmul.f32 %v9077_v52, %v10698_v6  ;;  %5764 = vrcp.f32 %v3928_v50  ;;  %v10700_v50 = vld [vmem:[#allocation70_spill] sm:$0xff]  ;;  %v10701_v6 = vld [vmem:[#allocation69_spill] sm:$0xff] }
 0x288   : > { %v5755_v59 = vpop.eup %5754  ;;  %v3095_v29 = vadd.f32 1e-10, %v2899_v57  ;;  %v3728_v24 = vsel %vm3727_vm1, %v8957_v47, %v3726_v42  ;;  %v4428_v60 = vsel %vm2413_vm4, %v4306_v40, 0.0  ;;  %vm2937_vm7 = vcmp.eq.f32.partialorder %v8995_v45, inf }
 0x289   : > { %v9375_v44 = vpop.eup %5756  ;;  %v3719_v34 = vmul.f32 %v5755_v59, %v8964_v22  ;;  %4429 = vadd.xlane.f32.xlu1 %v4428_v60  ;;  %v4425_v39 = vsel %vm2413_vm4, %v4305_v27, 0.0  ;;  %v4177_v52 = vsub.f32 %v4049_v48, %v4113_v36  ;;  %v2892_v12 = vsel %vm2890_vm0, %v2891_v54, %v2889_v26  ;;  %v10702_v59 = vld [vmem:[#allocation73_spill] sm:$0xff] }
 0x28a   : > { %4426 = vadd.xlane.f32.xlu0 %v4425_v39  ;;  %v4048_v33 = vmul.f32 %v9066_v4, %v10699_v20  ;;  %v4112_v15 = vmul.f32 %v9085_v3, %v10700_v50  ;;  %5766 = vrsqrt.f32 %v9023_v43  ;;  %v3731_v41 = vsel %vm3729_vm2, %v3730_v49, %v3728_v24  ;;  %v10703_v24 = vld [vmem:[#allocation67_spill] sm:$0xff] }
 0x28b   : > { %v3721_v57 = vsel %vm3720_vm5, %v8964_v22, %v3719_v34  ;;  %vm2939_vm8 = vcmp.eq.f32.partialorder %v8995_v45, 0.0  ;;  %v4241_v51 = vmul.f32 %v4177_v52, %v4177_v52  ;;  %5768 = vrcp.f32 %v3095_v29  ;;  %v9404_v22 = vpop.xlane.xlu1 %3424  ;;  %v9413_v34 = vpop.xlane.xlu0 %3421  ;;  %v10704_v20 = vld [vmem:[#allocation71_spill] sm:$0xff] }
 0x28c   : > { %v3724_v54 = vsel %vm3722_vm6, %v3723_v53, %v3721_v57  ;;  %v2940_v4 = vand.u32 2147483648, %v8995_v45  ;;  %v4176_v61 = vsub.f32 %v4048_v33, %v4112_v15  ;;  %v3094_v42 = vadd.f32 1e-10, %v2892_v12 }
 0x28d   : > { %v5759_v3 = vpop.eup %5758  ;;  %vm2930_vm9 = vcmp.eq.f32.partialorder %v9000_v11, inf  ;;  %v4312_v47 = vmul.f32 %v9276_v37, %v4241_v51  ;;  %5770 = vrsqrt.f32 %v9031_v2  ;;  %v3927_v40 = vadd.f32 1e-10, %v3731_v41 }
 0x28e   : > { %v9401_v49 = vpop.eup %5760  ;;  %v3926_v26 = vadd.f32 1e-10, %v3724_v54  ;;  %v2936_v27 = vmul.f32 %v5759_v3, %v8995_v45  ;;  %v4240_v28 = vmul.f32 %v4176_v61, %v4176_v61  ;;  %v4047_v36 = vmul.f32 %v9117_v38, %v10701_v6 }
 0x28f   : > { %v5763_v53 = vpop.eup %5762  ;;  %v4446_v48 = vsel %vm2413_vm4, %v4312_v47, 0.0  ;;  %v4111_v29 = vmul.f32 %v9165_v9, %v10702_v59  ;;  %v4046_v60 = vmul.f32 %v9130_v7, %v10703_v24  ;;  %v4110_v38 = vmul.f32 %v9183_v14, %v10704_v20  ;;  %v10705_v7 = vld [vmem:[#allocation7_spill] sm:$0xff]  ;;  %v10708_v24 = vld [vmem:[#allocation81_spill] sm:$0xff] }
 0x290   : > { %v2938_v39 = vsel %vm2937_vm7, %v8995_v45, %v2936_v27  ;;  %v2929_v52 = vmul.f32 %v5763_v53, %v9000_v11  ;;  %4447 = vadd.xlane.f32.xlu1 %v4446_v48  ;;  %v4311_v12 = vmul.f32 %v9276_v37, %v4240_v28  ;;  %vm2932_vm10 = vcmp.eq.f32.partialorder %v9000_v11, 0.0  ;;  %v10707_v48 = vld [vmem:[#allocation77_spill] sm:$0xff]  ;;  %v10710_v20 = vld [vmem:[#allocation79_spill] sm:$0xff] }
 0x291   : > { %v2933_v9 = vand.u32 2147483648, %v9000_v11  ;;  %v4175_v33 = vsub.f32 %v4047_v36, %v4111_v29  ;;  %5772 = vrsqrt.f32 %v10705_v7  ;;  %v9425_v50 = vpop.eup %5764  ;;  %vm3769_vm11 = vcmp.eq.f32.partialorder %v9023_v43, inf }
 0x292   : > { %5774 = vrcp.f32 %v3094_v42  ;;  %v4443_v15 = vsel %vm2413_vm4, %v4311_v12, 0.0  ;;  %v4174_v41 = vsub.f32 %v4046_v60, %v4110_v38  ;;  %v2941_v57 = vsel %vm2939_vm8, %v2940_v4, %v2938_v39  ;;  %v9436_v42 = vpop.xlane.xlu1 %2586  ;;  %v10706_v4 = vld [vmem:[#allocation2_spill] sm:$0xff]  ;;  %v10709_v39 = vld [vmem:[#allocation75_spill] sm:$0xff] }
 0x293   : > { %5776 = vrcp.f32 %v3927_v40  ;;  %v2931_v14 = vsel %vm2930_vm9, %v9000_v11, %v2929_v52  ;;  %4444 = vadd.xlane.f32.xlu0 %v4443_v15  ;;  %v4239_v51 = vmul.f32 %v4175_v33, %v4175_v33  ;;  %vm3771_vm12 = vcmp.eq.f32.partialorder %v9023_v43, 0.0  ;;  %v9442_v40 = vpop.xlane.xlu0 %2583  ;;  %v10711_v33 = vld [vmem:[#allocation3_spill] sm:$0xff] }
 0x294   : > { %v5767_v54 = vpop.eup %5766  ;;  %5778 = vrcp.f32 %v3926_v26  ;;  %v3772_v61 = vand.u32 2147483648, %v9023_v43  ;;  %v4238_v3 = vmul.f32 %v4174_v41, %v4174_v41  ;;  %vm3762_vm3 = vcmp.eq.f32.partialorder %v9031_v2, inf }
 0x295   : > { %v3768_v47 = vmul.f32 %v5767_v54, %v9023_v43  ;;  %v4310_v45 = vmul.f32 %v9276_v37, %v4239_v51  ;;  %5780 = vrsqrt.f32 %v10706_v4  ;;  %v9444_v27 = vpop.eup %5768  ;;  %v3101_v26 = vadd.f32 1e-10, %v2941_v57 }
 0x296   : > { %v2934_v28 = vsel %vm2932_vm10, %v2933_v9, %v2931_v14  ;;  %v4309_v53 = vmul.f32 %v9276_v37, %v4238_v3  ;;  %v4053_v6 = vmul.f32 %v9194_v16, %v10707_v48  ;;  %v4117_v60 = vmul.f32 %v9230_v18, %v10708_v24  ;;  %v9472_v41 = vpop.xlane.xlu1 %3418  ;;  %v10713_v48 = vld [vmem:[#allocation9_spill] sm:$0xff] }
 0x297   : > { %v5771_v36 = vpop.eup %5770  ;;  %v3770_v59 = vsel %vm3769_vm11, %v9023_v43, %v3768_v47  ;;  %v4440_v29 = vsel %vm2413_vm4, %v4310_v45, 0.0  ;;  %v4052_v52 = vmul.f32 %v9210_v32, %v10709_v39  ;;  %v4116_v38 = vmul.f32 %v9259_v19, %v10710_v20  ;;  %v9474_v54 = vpop.xlane.xlu0 %3415 }
 0x298   : > { %v3773_v11 = vsel %vm3771_vm12, %v3772_v61, %v3770_v59  ;;  %v3761_v12 = vmul.f32 %v5771_v36, %v9031_v2  ;;  %4441 = vadd.xlane.f32.xlu1 %v4440_v29  ;;  %v4437_v16 = vsel %vm2413_vm4, %v4309_v53, 0.0  ;;  %vm3764_vm13 = vcmp.eq.f32.partialorder %v9031_v2, 0.0 }
 0x299   : > { %v3765_v9 = vand.u32 2147483648, %v9031_v2  ;;  %4438 = vadd.xlane.f32.xlu0 %v4437_v16  ;;  %v4181_v18 = vsub.f32 %v4053_v6, %v4117_v60  ;;  %5782 = vrsqrt.f32 %v10711_v33  ;;  %v3100_v32 = vadd.f32 1e-10, %v2934_v28 }
 0x29a   : > { %v3763_v43 = vsel %vm3762_vm3, %v9031_v2, %v3761_v12  ;;  %vm2923_vm14 = vcmp.eq.f32.partialorder %v10705_v7, inf  ;;  %v4180_v15 = vsub.f32 %v4052_v52, %v4116_v38  ;;  %5784 = vrcp.f32 %v3101_v26  ;;  %v10712_v2 = vld [vmem:[#allocation8_spill] sm:$0xff]  ;;  %v9500_v12 = vpop.xlane.xlu1 %2604 }
 0x29b   : > { %v5773_v57 = vpop.eup %5772  ;;  %v3933_v19 = vadd.f32 1e-10, %v3773_v11  ;;  %v3766_v14 = vsel %vm3764_vm13, %v3765_v9, %v3763_v43  ;;  %v4245_v51 = vmul.f32 %v4181_v18, %v4181_v18  ;;  %vm2925_vm15 = vcmp.eq.f32.partialorder %v10705_v7, 0.0  ;;  %v10714_v11 = vld [vmem:[#allocation4_spill] sm:$0xff]  ;;  %v9505_v20 = vpop.xlane.xlu0 %2601  ;;  %v10715_v18 = vld [vmem:[#allocation78_spill] sm:$0xff] }
 0x29c   : > { %v9476_v61 = vpop.eup %5774  ;;  %v2922_v3 = vmul.f32 %v5773_v57, %v10705_v7  ;;  %v4244_v47 = vmul.f32 %v4180_v15, %v4180_v15  ;;  %5786 = vrsqrt.f32 %v10712_v2  ;;  %v3932_v28 = vadd.f32 1e-10, %v3766_v14  ;;  %v10716_v43 = vld [vmem:[#allocation82_spill] sm:$0xff]  ;;  %v10717_v14 = vld [vmem:[#allocation76_spill] sm:$0xff] }
 0x29d   : > { %v9481_v45 = vpop.eup %5776  ;;  %v2926_v53 = vand.u32 2147483648, %v10705_v7  ;;  %v4316_v26 = vmul.f32 %v9276_v37, %v4245_v51  ;;  %5788 = vrsqrt.f32 %v10713_v48  ;;  %vm2916_vm0 = vcmp.eq.f32.partialorder %v10706_v4, inf }
 0x29e   : > { %v9486_v6 = vpop.eup %5778  ;;  %5790 = vrcp.f32 %v3100_v32  ;;  %vm2918_vm1 = vcmp.eq.f32.partialorder %v10706_v4, 0.0  ;;  %v4315_v36 = vmul.f32 %v9276_v37, %v4244_v47  ;;  %v2924_v29 = vsel %vm2923_vm14, %v10705_v7, %v2922_v3  ;;  %v10718_v7 = vld [vmem:[#allocation80_spill] sm:$0xff]  ;;  %v10719_v47 = vld [vmem:[#allocation5_spill] sm:$0xff] }
 0x29f   : > { %v5781_v59 = vpop.eup %5780  ;;  %5792 = vrcp.f32 %v3933_v19  ;;  %v2919_v24 = vand.u32 2147483648, %v10706_v4  ;;  %v4458_v60 = vsel %vm2413_vm4, %v4316_v26, 0.0  ;;  %vm3755_vm2 = vcmp.eq.f32.partialorder %v10711_v33, inf }
 0x2a0   : > { %v2915_v39 = vmul.f32 %v5781_v59, %v10706_v4  ;;  %4459 = vadd.xlane.f32.xlu1 %v4458_v60  ;;  %v4455_v52 = vsel %vm2413_vm4, %v4315_v36, 0.0  ;;  %5794 = vrsqrt.f32 %v10714_v11  ;;  %vm3757_vm5 = vcmp.eq.f32.partialorder %v10711_v33, 0.0 }
 0x2a1   : > { %5796 = vrcp.f32 %v3932_v28  ;;  %4456 = vadd.xlane.f32.xlu0 %v4455_v52  ;;  %v3758_v16 = vand.u32 2147483648, %v10711_v33  ;;  %vm3748_vm6 = vcmp.eq.f32.partialorder %v10712_v2, inf  ;;  %v2927_v38 = vsel %vm2925_vm15, %v2926_v53, %v2924_v29  ;;  %v9534_v29 = vpop.xlane.xlu1 %3436 }
 0x2a2   : > { %v2917_v9 = vsel %vm2916_vm0, %v10706_v4, %v2915_v39  ;;  %vm3750_vm7 = vcmp.eq.f32.partialorder %v10712_v2, 0.0  ;;  %v4051_v32 = vmul.f32 %v9269_v5, %v10715_v18  ;;  %v4115_v15 = vmul.f32 %v9321_v62, %v10716_v43 }
 0x2a3   : > { %v5783_v57 = vpop.eup %5782  ;;  %v3751_v19 = vand.u32 2147483648, %v10712_v2  ;;  %v4050_v51 = vmul.f32 %v9282_v23, %v10717_v14  ;;  %v4114_v3 = vmul.f32 %v9336_v21, %v10718_v7  ;;  %5798 = vrsqrt.f32 %v10719_v47  ;;  %v10720_v23 = vld [vmem:[#allocation13_spill] sm:$0xff] }
 0x2a4   : > { %v2920_v28 = vsel %vm2918_vm1, %v2919_v24, %v2917_v9  ;;  %v3754_v53 = vmul.f32 %v5783_v57, %v10711_v33  ;;  %vm2965_vm8 = vcmp.eq.f32.partialorder %v10713_v48, inf  ;;  %v4179_v5 = vsub.f32 %v4051_v32, %v4115_v15  ;;  %v9527_v62 = vpop.eup %5784  ;;  %v9540_v9 = vpop.xlane.xlu0 %3433 }
 0x2a5   : > { %v3099_v26 = vadd.f32 1e-10, %v2927_v38  ;;  %vm2967_vm9 = vcmp.eq.f32.partialorder %v10713_v48, 0.0  ;;  %v4178_v36 = vsub.f32 %v4050_v51, %v4114_v3  ;;  %5800 = vrsqrt.f32 %v10720_v23 }
 0x2a6   : > { %v5787_v59 = vpop.eup %5786  ;;  %v2968_v21 = vand.u32 2147483648, %v10713_v48  ;;  %vm2958_vm10 = vcmp.eq.f32.partialorder %v10714_v11, inf  ;;  %vm2960_vm11 = vcmp.eq.f32.partialorder %v10714_v11, 0.0  ;;  %v4243_v4 = vmul.f32 %v4179_v5, %v4179_v5 }
 0x2a7   : > { %v5789_v24 = vpop.eup %5788  ;;  %v3098_v60 = vadd.f32 1e-10, %v2920_v28  ;;  %v3756_v39 = vsel %vm3755_vm2, %v10711_v33, %v3754_v53  ;;  %v3747_v52 = vmul.f32 %v5787_v59, %v10712_v2  ;;  %v4242_v38 = vmul.f32 %v4178_v36, %v4178_v36  ;;  %v9572_v59 = vpop.xlane.xlu1 %2598 }
 0x2a8   : > { %v9542_v18 = vpop.eup %5790  ;;  %v2964_v32 = vmul.f32 %v5789_v24, %v10713_v48  ;;  %v2961_v43 = vand.u32 2147483648, %v10714_v11  ;;  %v4314_v15 = vmul.f32 %v9276_v37, %v4243_v4  ;;  %5802 = vrsqrt.f32 %v9181_v13 }
 0x2a9   : > { %v9548_v57 = vpop.eup %5792  ;;  %5804 = vrcp.f32 %v3099_v26  ;;  %v3749_v14 = vsel %vm3748_vm6, %v10712_v2, %v3747_v52  ;;  %v4313_v51 = vmul.f32 %v9276_v37, %v4242_v38  ;;  %vm3797_vm12 = vcmp.eq.f32.partialorder %v10719_v47, inf }
 0x2aa   : > { %v5795_v7 = vpop.eup %5794  ;;  %v3759_v3 = vsel %vm3757_vm5, %v3758_v16, %v3756_v39  ;;  %v2966_v28 = vsel %vm2965_vm8, %v10713_v48, %v2964_v32  ;;  %v4452_v53 = vsel %vm2413_vm4, %v4314_v15, 0.0  ;;  %vm3799_vm3 = vcmp.eq.f32.partialorder %v10719_v47, 0.0  ;;  %v9580_v39 = vpop.xlane.xlu0 %2595 }
 0x2ab   : > { %v9562_v5 = vpop.eup %5796  ;;  %5806 = vrcp.f32 %v3098_v60  ;;  %v3752_v26 = vsel %vm3750_vm7, %v3751_v19, %v3749_v14  ;;  %v2957_v36 = vmul.f32 %v5795_v7, %v10714_v11  ;;  %4453 = vadd.xlane.f32.xlu1 %v4452_v53  ;;  %v4449_v33 = vsel %vm2413_vm4, %v4313_v51, 0.0  ;;  %v10721_v14 = vld [vmem:[#allocation90_spill] sm:$0xff]  ;;  %v10723_v7 = vld [vmem:[#allocation88_spill] sm:$0xff] }
 0x2ac   : > { %4450 = vadd.xlane.f32.xlu0 %v4449_v33  ;;  %v3800_v16 = vand.u32 2147483648, %v10719_v47  ;;  %vm3790_vm13 = vcmp.eq.f32.partialorder %v10720_v23, inf  ;;  %vm3792_vm14 = vcmp.eq.f32.partialorder %v10720_v23, 0.0  ;;  %5808 = vrsqrt.f32 %v9188_v25 }
 0x2ad   : > { %v5799_v4 = vpop.eup %5798  ;;  %v3931_v24 = vadd.f32 1e-10, %v3759_v3  ;;  %v2969_v2 = vsel %vm2967_vm9, %v2968_v21, %v2966_v28  ;;  %v2959_v19 = vsel %vm2958_vm10, %v10714_v11, %v2957_v36  ;;  %v3793_v60 = vand.u32 2147483648, %v10720_v23  ;;  %v10722_v21 = vld [vmem:[#allocation96_spill] sm:$0xff] }
 0x2ae   : > { %v3930_v52 = vadd.f32 1e-10, %v3752_v26  ;;  %v2962_v38 = vsel %vm2960_vm11, %v2961_v43, %v2959_v19  ;;  %v3796_v32 = vmul.f32 %v5799_v4, %v10719_v47  ;;  %vm2951_vm15 = vcmp.eq.f32.partialorder %v9181_v13, inf  ;;  %v10724_v28 = vld [vmem:[#allocation92_spill] sm:$0xff] }
 0x2af   : > { %v5801_v15 = vpop.eup %5800  ;;  %v4057_v48 = vmul.f32 %v9359_v58, %v10721_v14  ;;  %v4121_v51 = vmul.f32 %v9401_v49, %v10722_v21  ;;  %v4056_v3 = vmul.f32 %v9375_v44, %v10723_v7  ;;  %v4120_v53 = vmul.f32 %v9425_v50, %v10724_v28 }
 0x2b0   : > { %v3105_v26 = vadd.f32 1e-10, %v2969_v2  ;;  %v3798_v11 = vsel %vm3797_vm12, %v10719_v47, %v3796_v32  ;;  %v3789_v43 = vmul.f32 %v5801_v15, %v10720_v23  ;;  %5810 = vrsqrt.f32 %v9208_v31  ;;  %v9606_v2 = vpop.xlane.xlu1 %3430  ;;  %v9611_v15 = vpop.xlane.xlu0 %3427 }
 0x2b1   : > { %v3801_v58 = vsel %vm3799_vm3, %v3800_v16, %v3798_v11  ;;  %vm2953_vm0 = vcmp.eq.f32.partialorder %v9181_v13, 0.0  ;;  %v4185_v49 = vsub.f32 %v4057_v48, %v4121_v51  ;;  %v4184_v36 = vsub.f32 %v4056_v3, %v4120_v53 }
 0x2b2   : > { %v5803_v44 = vpop.eup %5802  ;;  %5812 = vrcp.f32 %v3931_v24  ;;  %v3104_v33 = vadd.f32 1e-10, %v2962_v38  ;;  %v3791_v50 = vsel %vm3790_vm13, %v10720_v23, %v3789_v43  ;;  %v2954_v4 = vand.u32 2147483648, %v9181_v13 }
 0x2b3   : > { %v9608_v19 = vpop.eup %5804  ;;  %5814 = vrcp.f32 %v3930_v52  ;;  %v2950_v47 = vmul.f32 %v5803_v44, %v9181_v13  ;;  %v4249_v16 = vmul.f32 %v4185_v49, %v4185_v49  ;;  %v4248_v32 = vmul.f32 %v4184_v36, %v4184_v36  ;;  %v10725_v44 = vld [vmem:[#allocation91_spill] sm:$0xff] }
 0x2b4   : > { %5816 = vrcp.f32 %v3105_v26  ;;  %v3937_v24 = vadd.f32 1e-10, %v3801_v58  ;;  %v3794_v38 = vsel %vm3792_vm14, %v3793_v60, %v3791_v50  ;;  %vm2944_vm1 = vcmp.eq.f32.partialorder %v9188_v25, inf  ;;  %v9635_v26 = vpop.xlane.xlu1 %4351  ;;  %v9641_v58 = vpop.xlane.xlu0 %4348  ;;  %v10726_v50 = vld [vmem:[#allocation97_spill] sm:$0xff] }
 0x2b5   : > { %v9616_v14 = vpop.eup %5806  ;;  %v2952_v48 = vsel %vm2951_vm15, %v9181_v13, %v2950_v47  ;;  %v4320_v52 = vmul.f32 %v9276_v37, %v4249_v16  ;;  %v4319_v21 = vmul.f32 %v9276_v37, %v4248_v32  ;;  %5818 = vrsqrt.f32 %v9217_v56  ;;  %v10727_v16 = vld [vmem:[#allocation89_spill] sm:$0xff] }
 0x2b6   : > { %v5809_v51 = vpop.eup %5808  ;;  %5820 = vrcp.f32 %v3104_v33  ;;  %v2955_v23 = vsel %vm2953_vm0, %v2954_v4, %v2952_v48  ;;  %vm2946_vm2 = vcmp.eq.f32.partialorder %v9188_v25, 0.0  ;;  %v2947_v60 = vand.u32 2147483648, %v9188_v25 }
 0x2b7   : > { %v3936_v7 = vadd.f32 1e-10, %v3794_v38  ;;  %v2943_v3 = vmul.f32 %v5809_v51, %v9188_v25  ;;  %v4470_v28 = vsel %vm2413_vm4, %v4320_v52, 0.0  ;;  %v4467_v53 = vsel %vm2413_vm4, %v4319_v21, 0.0 }
 0x2b8   : > { %4471 = vadd.xlane.f32.xlu1 %v4470_v28  ;;  %4468 = vadd.xlane.f32.xlu0 %v4467_v53  ;;  %vm3783_vm5 = vcmp.eq.f32.partialorder %v9208_v31, inf  ;;  %vm3785_vm6 = vcmp.eq.f32.partialorder %v9208_v31, 0.0  ;;  %v3786_v13 = vand.u32 2147483648, %v9208_v31  ;;  %5822 = vrsqrt.f32 %v9236_v46 }
 0x2b9   : > { %5824 = vrcp.f32 %v3937_v24  ;;  %v3103_v11 = vadd.f32 1e-10, %v2955_v23  ;;  %v2945_v43 = vsel %vm2944_vm1, %v9188_v25, %v2943_v3  ;;  %vm3776_vm7 = vcmp.eq.f32.partialorder %v9217_v56, inf  ;;  %v10728_v24 = vld [vmem:[#allocation93_spill] sm:$0xff] }
 0x2ba   : > { %v5811_v49 = vpop.eup %5810  ;;  %v2948_v36 = vsel %vm2946_vm2, %v2947_v60, %v2945_v43  ;;  %5826 = vrsqrt.f32 %v9245_v35  ;;  %v4055_v33 = vmul.f32 %v9444_v27, %v10725_v44  ;;  %v4119_v4 = vmul.f32 %v9481_v45, %v10726_v50  ;;  %v9672_v60 = vpop.xlane.xlu1 %4345 }
 0x2bb   : > { %5828 = vrcp.f32 %v3936_v7  ;;  %v3782_v47 = vmul.f32 %v5811_v49, %v9208_v31  ;;  %vm3778_vm8 = vcmp.eq.f32.partialorder %v9217_v56, 0.0  ;;  %v4054_v32 = vmul.f32 %v9476_v61, %v10727_v16 }
 0x2bc   : > { %v4118_v25 = vmul.f32 %v9486_v6, %v10728_v24  ;;  %v9656_v38 = vpop.eup %5812  ;;  %v3779_v48 = vand.u32 2147483648, %v9217_v56  ;;  %vm2993_vm9 = vcmp.eq.f32.partialorder %v9236_v46, inf  ;;  %v4183_v27 = vsub.f32 %v4055_v33, %v4119_v4 }
 0x2bd   : > { %5830 = vrsqrt.f32 %v9267_v1  ;;  %v9661_v45 = vpop.eup %5814  ;;  %v3102_v52 = vadd.f32 1e-10, %v2948_v36  ;;  %v3784_v61 = vsel %vm3783_vm5, %v9208_v31, %v3782_v47  ;;  %vm2995_vm10 = vcmp.eq.f32.partialorder %v9236_v46, 0.0 }
 0x2be   : > { %5832 = vrcp.f32 %v3103_v11  ;;  %v4182_v6 = vsub.f32 %v4054_v32, %v4118_v25  ;;  %v9667_v21 = vpop.eup %5816  ;;  %v2996_v51 = vand.u32 2147483648, %v9236_v46  ;;  %vm2986_vm11 = vcmp.eq.f32.partialorder %v9245_v35, inf  ;;  %v9678_v11 = vpop.xlane.xlu0 %4342 }
 0x2bf   : > { %v4247_v23 = vmul.f32 %v4183_v27, %v4183_v27  ;;  %5834 = vrsqrt.f32 %v9280_v10  ;;  %v5819_v7 = vpop.eup %5818  ;;  %v3787_v3 = vsel %vm3785_vm6, %v3786_v13, %v3784_v61  ;;  %vm2988_vm12 = vcmp.eq.f32.partialorder %v9245_v35, 0.0 }
 0x2c0   : > { %v2989_v28 = vand.u32 2147483648, %v9245_v35  ;;  %v4246_v53 = vmul.f32 %v4182_v6, %v4182_v6  ;;  %v9680_v43 = vpop.eup %5820  ;;  %v3775_v49 = vmul.f32 %v5819_v7, %v9217_v56  ;;  %vm3825_vm3 = vcmp.eq.f32.partialorder %v9267_v1, inf  ;;  %v10730_v6 = vld [vmem:[#allocation110_spill] sm:$0xff]  ;;  %v9707_v7 = vpop.xlane.xlu1 %4363 }
 0x2c1   : > { %v4318_v36 = vmul.f32 %v9276_v37, %v4247_v23  ;;  %5836 = vrsqrt.f32 %v9306_v0  ;;  %vm3827_vm13 = vcmp.eq.f32.partialorder %v9267_v1, 0.0  ;;  %v3828_v13 = vand.u32 2147483648, %v9267_v1 }
 0x2c2   : > { %5838 = vrcp.f32 %v3102_v52  ;;  %v4317_v31 = vmul.f32 %v9276_v37, %v4246_v53  ;;  %v5823_v44 = vpop.eup %5822  ;;  %v3935_v33 = vadd.f32 1e-10, %v3787_v3  ;;  %v3777_v50 = vsel %vm3776_vm7, %v9217_v56, %v3775_v49  ;;  %v10729_v52 = vld [vmem:[#allocation105_spill] sm:$0xff] }
 0x2c3   : > { %v4464_v4 = vsel %vm2413_vm4, %v4318_v36, 0.0  ;;  %5840 = vrsqrt.f32 %v9311_v30  ;;  %v9694_v47 = vpop.eup %5824  ;;  %v2992_v16 = vmul.f32 %v5823_v44, %v9236_v46  ;;  %vm3818_vm14 = vcmp.eq.f32.partialorder %v9280_v10, inf  ;;  %v10732_v36 = vld [vmem:[#allocation107_spill] sm:$0xff] }
 0x2c4   : > { %4465 = vadd.xlane.f32.xlu1 %v4464_v4  ;;  %v4461_v32 = vsel %vm2413_vm4, %v4317_v31, 0.0  ;;  %vm3820_vm15 = vcmp.eq.f32.partialorder %v9280_v10, 0.0  ;;  %v5827_v24 = vpop.eup %5826  ;;  %v3780_v25 = vsel %vm3778_vm8, %v3779_v48, %v3777_v50  ;;  %v3821_v27 = vand.u32 2147483648, %v9280_v10  ;;  %v10731_v48 = vld [vmem:[#allocation103_spill] sm:$0xff] }
 0x2c5   : > { %4462 = vadd.xlane.f32.xlu0 %v4461_v32  ;;  %v4061_v61 = vmul.f32 %v9527_v62, %v10729_v52  ;;  %v4125_v23 = vmul.f32 %v9548_v57, %v10730_v6  ;;  %v9709_v3 = vpop.eup %5828  ;;  %v2994_v53 = vsel %vm2993_vm9, %v9236_v46, %v2992_v16  ;;  %v2985_v56 = vmul.f32 %v5827_v24, %v9245_v35  ;;  %v9719_v62 = vpop.xlane.xlu0 %4360 }
 0x2c6   : > { %v4060_v49 = vmul.f32 %v9542_v18, %v10731_v48  ;;  %v4124_v31 = vmul.f32 %v9562_v5, %v10732_v36  ;;  %5842 = vrcp.f32 %v3935_v33  ;;  %v2997_v57 = vsel %vm2995_vm10, %v2996_v51, %v2994_v53 }
 0x2c7   : > { %v5831_v44 = vpop.eup %5830  ;;  %vm2979_vm0 = vcmp.eq.f32.partialorder %v9306_v0, inf  ;;  %v4189_v50 = vsub.f32 %v4061_v61, %v4125_v23  ;;  %v3934_v16 = vadd.f32 1e-10, %v3780_v25  ;;  %v2987_v18 = vsel %vm2986_vm11, %v9245_v35, %v2985_v56  ;;  %v9742_v56 = vpop.xlane.xlu1 %4357 }
 0x2c8   : > { %v9724_v4 = vpop.eup %5832  ;;  %v3824_v32 = vmul.f32 %v5831_v44, %v9267_v1  ;;  %v4188_v5 = vsub.f32 %v4060_v49, %v4124_v31  ;;  %v2990_v33 = vsel %vm2988_vm12, %v2989_v28, %v2987_v18  ;;  %vm2981_vm1 = vcmp.eq.f32.partialorder %v9306_v0, 0.0 }
 0x2c9   : > { %v5835_v24 = vpop.eup %5834  ;;  %v4253_v46 = vmul.f32 %v4189_v50, %v4189_v50  ;;  %5844 = vrsqrt.f32 %v9343_v63  ;;  %v3109_v51 = vadd.f32 1e-10, %v2997_v57  ;;  %v2982_v61 = vand.u32 2147483648, %v9306_v0  ;;  %v9750_v44 = vpop.xlane.xlu0 %4354 }
 0x2ca   : > { %v3826_v25 = vsel %vm3825_vm3, %v9267_v1, %v3824_v32  ;;  %v3817_v52 = vmul.f32 %v5835_v24, %v9280_v10  ;;  %v3108_v23 = vadd.f32 1e-10, %v2990_v33  ;;  %v4252_v53 = vmul.f32 %v4188_v5, %v4188_v5 }
 0x2cb   : > { %v5837_v6 = vpop.eup %5836  ;;  %v3829_v35 = vsel %vm3827_vm13, %v3828_v13, %v3826_v25  ;;  %v4324_v28 = vmul.f32 %v9276_v37, %v4253_v46  ;;  %5846 = vrcp.f32 %v3934_v16  ;;  %vm2972_vm2 = vcmp.eq.f32.partialorder %v9311_v30, inf }
 0x2cc   : > { %v9744_v48 = vpop.eup %5838  ;;  %v3941_v49 = vadd.f32 1e-10, %v3829_v35  ;;  %v3819_v36 = vsel %vm3818_vm14, %v9280_v10, %v3817_v52  ;;  %v2978_v31 = vmul.f32 %v5837_v6, %v9306_v0  ;;  %v4323_v50 = vmul.f32 %v9276_v37, %v4252_v53  ;;  %v10733_v35 = vld [vmem:[#allocation106_spill] sm:$0xff]  ;;  %v10734_v53 = vld [vmem:[#allocation111_spill] sm:$0xff] }
 0x2cd   : > { %v5841_v57 = vpop.eup %5840  ;;  %v3822_v1 = vsel %vm3820_vm15, %v3821_v27, %v3819_v36  ;;  %v4482_v13 = vsel %vm2413_vm4, %v4324_v28, 0.0  ;;  %5848 = vrsqrt.f32 %v9348_v55  ;;  %v2975_v10 = vand.u32 2147483648, %v9311_v30  ;;  %v9776_v25 = vpop.xlane.xlu0 %4372  ;;  %v10735_v36 = vld [vmem:[#allocation104_spill] sm:$0xff] }
 0x2ce   : > { %5850 = vrcp.f32 %v3109_v51  ;;  %v3940_v16 = vadd.f32 1e-10, %v3822_v1  ;;  %v2980_v18 = vsel %vm2979_vm0, %v9306_v0, %v2978_v31  ;;  %v2971_v32 = vmul.f32 %v5841_v57, %v9311_v30  ;;  %4483 = vadd.xlane.f32.xlu1 %v4482_v13  ;;  %v9771_v51 = vpop.xlane.xlu1 %4375  ;;  %v10736_v57 = vld [vmem:[#allocation108_spill] sm:$0xff] }
 0x2cf   : > { %5852 = vrcp.f32 %v3108_v23  ;;  %v4479_v27 = vsel %vm2413_vm4, %v4323_v50, 0.0  ;;  %v2983_v5 = vsel %vm2981_vm1, %v2982_v61, %v2980_v18  ;;  %vm2974_vm5 = vcmp.eq.f32.partialorder %v9311_v30, 0.0 }
 0x2d0   : > { %5854 = vrcp.f32 %v3941_v49  ;;  %v2973_v24 = vsel %vm2972_vm2, %v9311_v30, %v2971_v32  ;;  %4480 = vadd.xlane.f32.xlu0 %v4479_v27  ;;  %v9768_v33 = vpop.eup %5842  ;;  %vm3811_vm6 = vcmp.eq.f32.partialorder %v9343_v63, inf  ;;  %vm3813_vm7 = vcmp.eq.f32.partialorder %v9343_v63, 0.0 }
 0x2d1   : > { %v2976_v46 = vsel %vm2974_vm5, %v2975_v10, %v2973_v24  ;;  %5856 = vrsqrt.f32 %v9373_v8  ;;  %v3814_v0 = vand.u32 2147483648, %v9343_v63  ;;  %v3107_v61 = vadd.f32 1e-10, %v2983_v5  ;;  %v9809_v5 = vpop.xlane.xlu0 %4366 }
 0x2d2   : > { %5858 = vrcp.f32 %v3940_v16  ;;  %vm3804_vm8 = vcmp.eq.f32.partialorder %v9348_v55, inf  ;;  %v3807_v30 = vand.u32 2147483648, %v9348_v55  ;;  %v3106_v6 = vadd.f32 1e-10, %v2976_v46  ;;  %v9802_v16 = vpop.xlane.xlu1 %4369 }
 0x2d3   : > { %v5845_v52 = vpop.eup %5844  ;;  %5860 = vrsqrt.f32 %v9380_v17  ;;  %vm3806_vm9 = vcmp.eq.f32.partialorder %v9348_v55, 0.0  ;;  %v4059_v28 = vmul.f32 %v9608_v19, %v10733_v35  ;;  %v4123_v49 = vmul.f32 %v9656_v38, %v10734_v53 }
 0x2d4   : > { %v3810_v23 = vmul.f32 %v5845_v52, %v9343_v63  ;;  %vm3021_vm10 = vcmp.eq.f32.partialorder %v9373_v8, inf  ;;  %v4058_v31 = vmul.f32 %v9616_v14, %v10735_v36  ;;  %v4122_v1 = vmul.f32 %v9661_v45, %v10736_v57 }
 0x2d5   : > { %5862 = vrsqrt.f32 %v9404_v22  ;;  %v9793_v13 = vpop.eup %5846  ;;  %vm3023_vm11 = vcmp.eq.f32.partialorder %v9373_v8, 0.0  ;;  %v4187_v19 = vsub.f32 %v4059_v28, %v4123_v49  ;;  %v3024_v14 = vand.u32 2147483648, %v9373_v8 }
 0x2d6   : > { %v3812_v50 = vsel %vm3811_vm6, %v9343_v63, %v3810_v23  ;;  %5864 = vrsqrt.f32 %v9413_v34  ;;  %vm3014_vm12 = vcmp.eq.f32.partialorder %v9380_v17, inf  ;;  %v4186_v45 = vsub.f32 %v4058_v31, %v4122_v1 }
 0x2d7   : > { %v5849_v38 = vpop.eup %5848  ;;  %5866 = vrcp.f32 %v3107_v61  ;;  %vm3016_vm3 = vcmp.eq.f32.partialorder %v9380_v17, 0.0  ;;  %v3017_v10 = vand.u32 2147483648, %v9380_v17  ;;  %v4251_v27 = vmul.f32 %v4187_v19, %v4187_v19 }
 0x2d8   : > { %v9804_v18 = vpop.eup %5850  ;;  %5868 = vrcp.f32 %v3106_v6  ;;  %v3803_v32 = vmul.f32 %v5849_v38, %v9348_v55  ;;  %v3815_v46 = vsel %vm3813_vm7, %v3814_v0, %v3812_v50  ;;  %v4250_v52 = vmul.f32 %v4186_v45, %v4186_v45  ;;  %v10737_v50 = vld [vmem:[#allocation74_spill] sm:$0xff] }
 0x2d9   : > { %v9811_v24 = vpop.eup %5852  ;;  %vm3853_vm13 = vcmp.eq.f32.partialorder %v9404_v22, inf  ;;  %5870 = vrsqrt.f32 %v9436_v42  ;;  %v4322_v23 = vmul.f32 %v9276_v37, %v4251_v27  ;;  %vm3855_vm14 = vcmp.eq.f32.partialorder %v9404_v22, 0.0  ;;  %v10738_v38 = vld [vmem:[#allocation118_spill] sm:$0xff] }
 0x2da   : > { %v9817_v61 = vpop.eup %5854  ;;  %v3805_v6 = vsel %vm3804_vm8, %v9348_v55, %v3803_v32  ;;  %v3856_v35 = vand.u32 2147483648, %v9404_v22  ;;  %v4321_v63 = vmul.f32 %v9276_v37, %v4250_v52  ;;  %vm3846_vm15 = vcmp.eq.f32.partialorder %v9413_v34, inf  ;;  %v9842_v32 = vpop.xlane.xlu1 %4387 }
 0x2db   : > { %v5857_v28 = vpop.eup %5856  ;;  %vm3848_vm0 = vcmp.eq.f32.partialorder %v9413_v34, 0.0  ;;  %5872 = vrsqrt.f32 %v9442_v40  ;;  %v3939_v53 = vadd.f32 1e-10, %v3815_v46  ;;  %v4476_v36 = vsel %vm2413_vm4, %v4322_v23, 0.0  ;;  %v9851_v52 = vpop.xlane.xlu0 %4384  ;;  %v10740_v23 = vld [vmem:[#allocation116_spill] sm:$0xff] }
 0x2dc   : > { %v9829_v0 = vpop.eup %5858  ;;  %v3020_v49 = vmul.f32 %v5857_v28, %v9373_v8  ;;  %v3849_v31 = vand.u32 2147483648, %v9413_v34  ;;  %v3808_v1 = vsel %vm3806_vm9, %v3807_v30, %v3805_v6  ;;  %4477 = vadd.xlane.f32.xlu1 %v4476_v36  ;;  %v4473_v37 = vsel %vm2413_vm4, %v4321_v63, 0.0  ;;  %v10739_v30 = vld [vmem:[#allocation113_spill] sm:$0xff] }
 0x2dd   : > { %v5861_v57 = vpop.eup %5860  ;;  %vm3007_vm1 = vcmp.eq.f32.partialorder %v9436_v42, inf  ;;  %v4065_v19 = vmul.f32 %v9667_v21, %v10737_v50  ;;  %v4129_v45 = vmul.f32 %v9694_v47, %v10738_v38  ;;  %4474 = vadd.xlane.f32.xlu0 %v4473_v37  ;;  %vm3009_vm2 = vcmp.eq.f32.partialorder %v9436_v42, 0.0 }
 0x2de   : > { %v3022_v27 = vsel %vm3021_vm10, %v9373_v8, %v3020_v49  ;;  %v3013_v55 = vmul.f32 %v5861_v57, %v9380_v17  ;;  %v4064_v46 = vmul.f32 %v9680_v43, %v10739_v30  ;;  %v4128_v28 = vmul.f32 %v9709_v3, %v10740_v23 }
 0x2df   : > { %v5863_v21 = vpop.eup %5862  ;;  %v3025_v47 = vsel %vm3023_vm11, %v3024_v14, %v3022_v27  ;;  %v4193_v6 = vsub.f32 %v4065_v19, %v4129_v45  ;;  %5874 = vrsqrt.f32 %v9472_v41  ;;  %v3938_v49 = vadd.f32 1e-10, %v3808_v1 }
 0x2e0   : > { %v5865_v63 = vpop.eup %5864  ;;  %v3113_v36 = vadd.f32 1e-10, %v3025_v47  ;;  %v3015_v57 = vsel %vm3014_vm12, %v9380_v17, %v3013_v55  ;;  %v3852_v43 = vmul.f32 %v5863_v21, %v9404_v22  ;;  %v4192_v3 = vsub.f32 %v4064_v46, %v4128_v28  ;;  %v9884_v46 = vpop.xlane.xlu1 %4381 }
 0x2e1   : > { %v9862_v37 = vpop.eup %5866  ;;  %v3018_v8 = vsel %vm3016_vm3, %v3017_v10, %v3015_v57  ;;  %v3845_v14 = vmul.f32 %v5865_v63, %v9413_v34  ;;  %v4257_v50 = vmul.f32 %v4193_v6, %v4193_v6  ;;  %5876 = vrcp.f32 %v3939_v53  ;;  %v9881_v10 = vld [vmem:[%s10264_s4] ss:$0 sm:$0xff]  ;;  %v9889_v47 = vpop.xlane.xlu0 %4378 }
 0x2e2   : > { %v9867_v19 = vpop.eup %5868  ;;  %v3112_v1 = vadd.f32 1e-10, %v3018_v8  ;;  %v3854_v38 = vsel %vm3853_vm13, %v9404_v22, %v3852_v43  ;;  %v3010_v45 = vand.u32 2147483648, %v9436_v42  ;;  %v4256_v30 = vmul.f32 %v4192_v3, %v4192_v3 }
 0x2e3   : > { %v5871_v27 = vpop.eup %5870  ;;  %v3857_v55 = vsel %vm3855_vm14, %v3856_v35, %v3854_v38  ;;  %v3847_v17 = vsel %vm3846_vm15, %v9413_v34, %v3845_v14  ;;  %v4328_v53 = vmul.f32 %v9881_v10, %v4257_v50  ;;  %5878 = vrcp.f32 %v3938_v49 }
 0x2e4   : > { %v3945_v21 = vadd.f32 1e-10, %v3857_v55  ;;  %v3850_v22 = vsel %vm3848_vm0, %v3849_v31, %v3847_v17  ;;  %v3006_v35 = vmul.f32 %v5871_v27, %v9436_v42  ;;  %5880 = vrcp.f32 %v3113_v36  ;;  %v9906_v50 = vpop.xlane.xlu1 %4399  ;;  %v10741_v17 = vld [vmem:[#allocation115_spill] sm:$0xff] }
 0x2e5   : > { %v5873_v6 = vpop.eup %5872  ;;  %vm3000_vm5 = vcmp.eq.f32.partialorder %v9442_v40, inf  ;;  %v4494_v23 = vsel %vm2413_vm4, %v4328_v53, 0.0  ;;  %v4327_v28 = vmul.f32 %v9881_v10, %v4256_v30  ;;  %5882 = vrcp.f32 %v3112_v1  ;;  %v9910_v1 = vpop.xlane.xlu0 %4396  ;;  %v10742_v30 = vld [vmem:[#allocation119_spill] sm:$0xff] }
 0x2e6   : > { %v3944_v63 = vadd.f32 1e-10, %v3850_v22  ;;  %v3008_v49 = vsel %vm3007_vm1, %v9436_v42, %v3006_v35  ;;  %v2999_v34 = vmul.f32 %v5873_v6, %v9442_v40  ;;  %4495 = vadd.xlane.f32.xlu1 %v4494_v23  ;;  %5884 = vrcp.f32 %v3945_v21  ;;  %v10743_v35 = vld [vmem:[#allocation114_spill] sm:$0xff]  ;;  %v10744_v23 = vld [vmem:[#allocation117_spill] sm:$0xff] }
 0x2e7   : > { %v3011_v31 = vsel %vm3009_vm2, %v3010_v45, %v3008_v49  ;;  %v3003_v36 = vand.u32 2147483648, %v9442_v40  ;;  %v4491_v57 = vsel %vm2413_vm4, %v4327_v28, 0.0  ;;  %vm3002_vm6 = vcmp.eq.f32.partialorder %v9442_v40, 0.0 }
 0x2e8   : > { %v3001_v43 = vsel %vm3000_vm5, %v9442_v40, %v2999_v34  ;;  %4492 = vadd.xlane.f32.xlu0 %v4491_v57  ;;  %5886 = vrsqrt.f32 %v9474_v54  ;;  %v3111_v42 = vadd.f32 1e-10, %v3011_v31  ;;  %vm3839_vm7 = vcmp.eq.f32.partialorder %v9472_v41, inf }
 0x2e9   : > { %v5875_v8 = vpop.eup %5874  ;;  %v3004_v14 = vsel %vm3002_vm6, %v3003_v36, %v3001_v43  ;;  %5888 = vrsqrt.f32 %v9500_v12  ;;  %vm3841_vm8 = vcmp.eq.f32.partialorder %v9472_v41, 0.0  ;;  %v3842_v40 = vand.u32 2147483648, %v9472_v41 }
 0x2ea   : > { %5890 = vrcp.f32 %v3944_v63  ;;  %v3838_v3 = vmul.f32 %v5875_v8, %v9472_v41  ;;  %v3835_v38 = vand.u32 2147483648, %v9474_v54  ;;  %v3110_v27 = vadd.f32 1e-10, %v3004_v14  ;;  %v9944_v36 = vpop.xlane.xlu0 %4390 }
 0x2eb   : > { %5892 = vrsqrt.f32 %v9505_v20  ;;  %v9916_v45 = vpop.eup %5876  ;;  %vm3832_vm9 = vcmp.eq.f32.partialorder %v9474_v54, inf  ;;  %v4063_v53 = vmul.f32 %v9724_v4, %v10741_v17  ;;  %v4127_v21 = vmul.f32 %v9768_v33, %v10742_v30 }
 0x2ec   : > { %v3840_v55 = vsel %vm3839_vm7, %v9472_v41, %v3838_v3  ;;  %vm3834_vm10 = vcmp.eq.f32.partialorder %v9474_v54, 0.0  ;;  %v4062_v6 = vmul.f32 %v9744_v48, %v10743_v35  ;;  %v4126_v28 = vmul.f32 %v9793_v13, %v10744_v23  ;;  %v9938_v48 = vpop.xlane.xlu1 %4393 }
 0x2ed   : > { %v3843_v22 = vsel %vm3841_vm8, %v3842_v40, %v3840_v55  ;;  %5894 = vrsqrt.f32 %v9534_v29  ;;  %v9930_v41 = vpop.eup %5878  ;;  %vm3049_vm11 = vcmp.eq.f32.partialorder %v9500_v12, inf  ;;  %vm3051_vm12 = vcmp.eq.f32.partialorder %v9500_v12, 0.0 }
 0x2ee   : > { %5896 = vrcp.f32 %v3111_v42  ;;  %v4191_v4 = vsub.f32 %v4063_v53, %v4127_v21  ;;  %v9934_v33 = vpop.eup %5880  ;;  %v3943_v63 = vadd.f32 1e-10, %v3843_v22  ;;  %v3052_v49 = vand.u32 2147483648, %v9500_v12  ;;  %v10745_v22 = vld [vmem:[#allocation83_spill] sm:$0xff] }
 0x2ef   : > { %v4190_v34 = vsub.f32 %v4062_v6, %v4126_v28  ;;  %5898 = vrsqrt.f32 %v9540_v9  ;;  %v9940_v13 = vpop.eup %5882  ;;  %vm3042_vm3 = vcmp.eq.f32.partialorder %v9505_v20, inf  ;;  %vm3044_vm13 = vcmp.eq.f32.partialorder %v9505_v20, 0.0  ;;  %v10746_v6 = vld [vmem:[#allocation85_spill] sm:$0xff] }
 0x2f0   : > { %5900 = vrcp.f32 %v3110_v27  ;;  %v4255_v31 = vmul.f32 %v4191_v4, %v4191_v4  ;;  %v9946_v57 = vpop.eup %5884  ;;  %v3045_v43 = vand.u32 2147483648, %v9505_v20  ;;  %vm3881_vm14 = vcmp.eq.f32.partialorder %v9534_v29, inf }
 0x2f1   : > { %v4254_v8 = vmul.f32 %v4190_v34, %v4190_v34  ;;  %5902 = vrsqrt.f32 %v9572_v59  ;;  %vm3883_vm15 = vcmp.eq.f32.partialorder %v9534_v29, 0.0  ;;  %v3884_v3 = vand.u32 2147483648, %v9534_v29  ;;  %v10747_v34 = vld [vmem:[#allocation123_spill] sm:$0xff] }
 0x2f2   : > { %v5887_v14 = vpop.eup %5886  ;;  %v4326_v42 = vmul.f32 %v9881_v10, %v4255_v31  ;;  %5904 = vrsqrt.f32 %v9580_v39  ;;  %vm3874_vm0 = vcmp.eq.f32.partialorder %v9540_v9, inf  ;;  %v3877_v17 = vand.u32 2147483648, %v9540_v9 }
 0x2f3   : > { %v5889_v40 = vpop.eup %5888  ;;  %5906 = vrcp.f32 %v3943_v63  ;;  %v3831_v27 = vmul.f32 %v5887_v14, %v9474_v54  ;;  %v4325_v55 = vmul.f32 %v9881_v10, %v4254_v8  ;;  %vm3876_vm1 = vcmp.eq.f32.partialorder %v9540_v9, 0.0  ;;  %v10748_v8 = vld [vmem:[#allocation125_spill] sm:$0xff] }
 0x2f4   : > { %v9959_v53 = vpop.eup %5890  ;;  %v3048_v30 = vmul.f32 %v5889_v40, %v9500_v12  ;;  %v4488_v21 = vsel %vm2413_vm4, %v4326_v42, 0.0  ;;  %v4069_v35 = vmul.f32 %v9804_v18, %v10745_v22  ;;  %v4133_v23 = vmul.f32 %v9817_v61, %v10746_v6  ;;  %v9977_v18 = vpop.xlane.xlu1 %4411 }
 0x2f5   : > { %v5893_v28 = vpop.eup %5892  ;;  %v3833_v4 = vsel %vm3832_vm9, %v9474_v54, %v3831_v27  ;;  %4489 = vadd.xlane.f32.xlu1 %v4488_v21  ;;  %v4485_v63 = vsel %vm2413_vm4, %v4325_v55, 0.0  ;;  %vm3035_vm2 = vcmp.eq.f32.partialorder %v9572_v59, inf  ;;  %v4068_v31 = vmul.f32 %v9811_v24, %v10747_v34  ;;  %v9985_v55 = vpop.xlane.xlu0 %4408 }
 0x2f6   : > { %v4132_v14 = vmul.f32 %v9829_v0, %v10748_v8  ;;  %v3836_v61 = vsel %vm3834_vm10, %v3835_v38, %v3833_v4  ;;  %v3050_v42 = vsel %vm3049_vm11, %v9500_v12, %v3048_v30  ;;  %v3041_v40 = vmul.f32 %v5893_v28, %v9505_v20  ;;  %4486 = vadd.xlane.f32.xlu0 %v4485_v63 }
 0x2f7   : > { %v4197_v27 = vsub.f32 %v4069_v35, %v4133_v23  ;;  %v5895_v21 = vpop.eup %5894  ;;  %v3942_v24 = vadd.f32 1e-10, %v3836_v61  ;;  %v3053_v0 = vsel %vm3051_vm12, %v3052_v49, %v3050_v42  ;;  %5908 = vrsqrt.f32 %v9606_v2 }
 0x2f8   : > { %v4196_v22 = vsub.f32 %v4068_v31, %v4132_v14  ;;  %v9990_v54 = vpop.eup %5896  ;;  %v3117_v38 = vadd.f32 1e-10, %v3053_v0  ;;  %v3043_v30 = vsel %vm3042_vm3, %v9505_v20, %v3041_v40  ;;  %v3880_v6 = vmul.f32 %v5895_v21, %v9534_v29  ;;  %v4406_v61 = vpop.xlane.xlu1 %4405 }
 0x2f9   : > { %v4261_v35 = vmul.f32 %v4197_v27, %v4197_v27  ;;  %v5899_v23 = vpop.eup %5898  ;;  %v3046_v28 = vsel %vm3044_vm13, %v3045_v43, %v3043_v30  ;;  %vm3037_vm5 = vcmp.eq.f32.partialorder %v9572_v59, 0.0  ;;  %v3038_v12 = vand.u32 2147483648, %v9572_v59 }
 0x2fa   : > { %v4260_v49 = vmul.f32 %v4196_v22, %v4196_v22  ;;  %v10000_v4 = vpop.eup %5900  ;;  %5910 = vrcp.f32 %v3942_v24  ;;  %v3116_v63 = vadd.f32 1e-10, %v3046_v28  ;;  %v3882_v34 = vsel %vm3881_vm14, %v9534_v29, %v3880_v6  ;;  %v4403_v24 = vpop.xlane.xlu0 %4402 }
 0x2fb   : > { %v3873_v31 = vmul.f32 %v5899_v23, %v9540_v9  ;;  %v5903_v8 = vpop.eup %5902  ;;  %v3885_v20 = vsel %vm3883_vm15, %v3884_v3, %v3882_v34  ;;  %vm3028_vm6 = vcmp.eq.f32.partialorder %v9580_v39, inf  ;;  %v4332_v43 = vmul.f32 %v9881_v10, %v4261_v35 }
 0x2fc   : > { %v4331_v14 = vmul.f32 %v9881_v10, %v4260_v49  ;;  %v5905_v42 = vpop.eup %5904  ;;  %5912 = vrcp.f32 %v3117_v38  ;;  %v3949_v40 = vadd.f32 1e-10, %v3885_v20  ;;  %v3034_v21 = vmul.f32 %v5903_v8, %v9572_v59  ;;  %v10759_v20 = vld [vmem:[#allocation86_spill] sm:$0xff] }
 0x2fd   : > { %v3875_v27 = vsel %vm3874_vm0, %v9540_v9, %v3873_v31  ;;  %v10016_v29 = vpop.eup %5906  ;;  %v3027_v0 = vmul.f32 %v5905_v42, %v9580_v39  ;;  %v4506_v22 = vsel %vm2413_vm4, %v4332_v43, 0.0  ;;  %5914 = vrcp.f32 %v3116_v63  ;;  %v10749_v63 = vld [vmem:[#allocation94_spill] sm:$0xff]  ;;  %v10750_v31 = vld [vmem:[#allocation84_spill] sm:$0xff] }
 0x2fe   : > { %v3878_v3 = vsel %vm3876_vm1, %v3877_v17, %v3875_v27  ;;  %v4503_v38 = vsel %vm2413_vm4, %v4331_v14, 0.0  ;;  %v3036_v6 = vsel %vm3035_vm2, %v9572_v59, %v3034_v21  ;;  %vm3030_vm7 = vcmp.eq.f32.partialorder %v9580_v39, 0.0  ;;  %4507 = vadd.xlane.f32.xlu1 %v4506_v22 }
 0x2ff   : > { %v3948_v30 = vadd.f32 1e-10, %v3878_v3  ;;  %4504 = vadd.xlane.f32.xlu0 %v4503_v38  ;;  %v3039_v9 = vsel %vm3037_vm5, %v3038_v12, %v3036_v6  ;;  %v3029_v17 = vsel %vm3028_vm6, %v9580_v39, %v3027_v0  ;;  %v3031_v35 = vand.u32 2147483648, %v9580_v39 }
 0x300   : > { %5916 = vrsqrt.f32 %v9611_v15  ;;  %v3115_v23 = vadd.f32 1e-10, %v3039_v9  ;;  %vm3867_vm8 = vcmp.eq.f32.partialorder %v9606_v2, inf  ;;  %vm3869_vm9 = vcmp.eq.f32.partialorder %v9606_v2, 0.0  ;;  %v4424_v12 = vpop.xlane.xlu1 %4423 }
 0x301   : > { %5918 = vrcp.f32 %v3949_v40  ;;  %v5909_v59 = vpop.eup %5908  ;;  %v10041_v39 = vsel %vm3030_vm7, %v3031_v35, %v3029_v17  ;;  %v3870_v28 = vand.u32 2147483648, %v9606_v2  ;;  %vm4533_vm10 = vcmask 7168  }
 0x302   : > { %5920 = vrcp.f32 %v3948_v30  ;;  %v3866_v49 = vmul.f32 %v5909_v59, %v9606_v2  ;;  %4537 = vst.msk [vmem:[%s10037_s12 + $0x18] sm:$0xff] %vm4533_vm10, %v9635_v26  ;;  %4536 = vst.msk [vmem:[%s10037_s12 + $0x10] sm:$0xff] %vm4533_vm10, %v9641_v58  ;;  %v4067_v34 = vmul.f32 %v9862_v37, %v10749_v63  ;;  %v4131_v8 = vmul.f32 %v9916_v45, %v10750_v31  ;;  %v4421_v26 = vpop.xlane.xlu0 %4420  ;;  %v10751_v58 = vld [vmem:[#allocation124_spill] sm:$0xff] }
 0x303   : > { %5922 = vrcp.f32 %v3115_v23  ;;  %4535 = vst.msk [vmem:[%s10037_s12 + $0x8] sm:$0xff] %vm4533_vm10, %v9672_v60  ;;  %4534 = vst.msk [vmem:[%s10037_s12] sm:$0xff] %vm4533_vm10, %v9678_v11  ;;  %v4066_v60 = vmul.f32 %v9867_v19, %v10751_v58  ;;  %v10752_v11 = vld [vmem:[#allocation126_spill] sm:$0xff]  ;;  %v10756_v37 = vld [vmem:[#allocation128_spill] sm:$0xff]  ;;  %v3114_v21 = vadd.f32 1e-10, %v10041_v39 }
 0x304   : > { %4541 = vst.msk [vmem:[%s10037_s12 + $0x38] sm:$0xff] %vm4533_vm10, %v9707_v7  ;;  %4540 = vst.msk [vmem:[%s10037_s12 + $0x30] sm:$0xff] %vm4533_vm10, %v9719_v62  ;;  %v4130_v7 = vmul.f32 %v9930_v41, %v10752_v11  ;;  %v10753_v62 = vld [vmem:[#allocation95_spill] sm:$0xff]  ;;  %v4136_v19 = vmul.f32 %v9959_v53, %v10756_v37  ;;  %v4070_v53 = vmul.f32 %v10000_v4, %v10759_v20  ;;  %vm3860_vm11 = vcmp.eq.f32.partialorder %v9611_v15, inf  ;;  %v10762_v11 = vld [vmem:[#allocation100_spill] sm:$0xff] }
 0x305   : > { %4539 = vst.msk [vmem:[%s10037_s12 + $0x28] sm:$0xff] %vm4533_vm10, %v9742_v56  ;;  %4538 = vst.msk [vmem:[%s10037_s12 + $0x20] sm:$0xff] %vm4533_vm10, %v9750_v44  ;;  %v4073_v56 = vmul.f32 %v9934_v33, %v10753_v62  ;;  %v10754_v44 = vld [vmem:[#allocation109_spill] sm:$0xff]  ;;  %v3863_v17 = vand.u32 2147483648, %v9611_v15  ;;  %vm3862_vm12 = vcmp.eq.f32.partialorder %v9611_v15, 0.0 }
 0x306   : > { %4545 = vst.msk [vmem:[%s10037_s12 + $0x58] sm:$0xff] %vm4533_vm10, %v9771_v51  ;;  %4544 = vst.msk [vmem:[%s10037_s12 + $0x50] sm:$0xff] %vm4533_vm10, %v9776_v25  ;;  %v4137_v51 = vmul.f32 %v9946_v57, %v10754_v44  ;;  %v5911_v25 = vpop.eup %5910  ;;  %v10758_v57 = vld [vmem:[#allocation99_spill] sm:$0xff]  ;;  %v10763_v44 = vld [vmem:[#allocation102_spill] sm:$0xff] }
 0x307   : > { %4543 = vst.msk [vmem:[%s10037_s12 + $0x48] sm:$0xff] %vm4533_vm10, %v9802_v16  ;;  %4542 = vst.msk [vmem:[%s10037_s12 + $0x40] sm:$0xff] %vm4533_vm10, %v9809_v5  ;;  %v3868_v16 = vsel %vm3867_vm8, %v9606_v2, %v3866_v49  ;;  %v4195_v5 = vsub.f32 %v4067_v34, %v4131_v8  ;;  %v5913_v41 = vpop.eup %5912  ;;  %v10760_v2 = vld [vmem:[#allocation129_spill] sm:$0xff]  ;;  %v4418_v40 = vpop.xlane.xlu1 %4417  ;;  %v10761_v8 = vld [vmem:[#allocation132_spill] sm:$0xff] }
 0x308   : > { %4549 = vst.msk [vmem:[%s10037_s12 + $0x78] sm:$0xff] %vm4533_vm10, %v9842_v32  ;;  %4548 = vst.msk [vmem:[%s10037_s12 + $0x70] sm:$0xff] %vm4533_vm10, %v9851_v52  ;;  %v10755_v32 = vld [vmem:[#allocation87_spill] sm:$0xff]  ;;  %v4134_v43 = vmul.f32 %v5911_v25, %v10760_v2  ;;  %v5915_v14 = vpop.eup %5914  ;;  %v4415_v4 = vpop.xlane.xlu0 %4414  ;;  %v10764_v25 = vld [vmem:[#allocation133_spill] sm:$0xff] }
 0x309   : > { %4547 = vst.msk [vmem:[%s10037_s12 + $0x68] sm:$0xff] %vm4533_vm10, %v9884_v46  ;;  %4546 = vst.msk [vmem:[%s10037_s12 + $0x60] sm:$0xff] %vm4533_vm10, %v9889_v47  ;;  %v4072_v52 = vmul.f32 %v9940_v13, %v10755_v32  ;;  %v3871_v46 = vsel %vm3869_vm9, %v3870_v28, %v3868_v16  ;;  %v4194_v47 = vsub.f32 %v4066_v60, %v4130_v7 }
 0x30a   : > { %4553 = vst.msk [vmem:[%s10037_s12 + $0x98] sm:$0xff] %vm4533_vm10, %v9906_v50  ;;  %4552 = vst.msk [vmem:[%s10037_s12 + $0x90] sm:$0xff] %vm4533_vm10, %v9910_v1  ;;  %v4201_v50 = vsub.f32 %v4073_v56, %v4137_v51  ;;  %v10757_v1 = vld [vmem:[#allocation127_spill] sm:$0xff]  ;;  %v3947_v33 = vadd.f32 1e-10, %v3871_v46  ;;  %v5917_v27 = vpop.eup %5916  ;;  %v4198_v3 = vsub.f32 %v4070_v53, %v4134_v43  ;;  %v4077_v7 = vmul.f32 %v5913_v41, %v10762_v11  ;;  %v10765_v46 = vld [vmem:[#allocation130_spill] sm:$0xff] }
 0x30b   : > { %4551 = vst.msk [vmem:[%s10037_s12 + $0x88] sm:$0xff] %vm4533_vm10, %v9938_v48  ;;  %4550 = vst.msk [vmem:[%s10037_s12 + $0x80] sm:$0xff] %vm4533_vm10, %v9944_v36  ;;  %v4071_v45 = vmul.f32 %v9990_v54, %v10757_v1  ;;  %v4259_v48 = vmul.f32 %v4195_v5, %v4195_v5  ;;  %v4200_v36 = vsub.f32 %v4072_v52, %v4136_v19  ;;  %v5919_v0 = vpop.eup %5918  ;;  %v10766_v41 = vld [vmem:[#allocation98_spill] sm:$0xff] }
 0x30c   : > { %4557 = vst.msk [vmem:[%s10037_s12 + $0xb8] sm:$0xff] %vm4533_vm10, %v9977_v18  ;;  %4556 = vst.msk [vmem:[%s10037_s12 + $0xb0] sm:$0xff] %vm4533_vm10, %v9985_v55  ;;  %v4135_v18 = vmul.f32 %v10016_v29, %v10758_v57  ;;  %v4258_v13 = vmul.f32 %v4194_v47, %v4194_v47  ;;  %v4265_v55 = vmul.f32 %v4201_v50, %v4201_v50  ;;  %5924 = vrcp.f32 %v3947_v33  ;;  %v5921_v9 = vpop.eup %5920 }
 0x30d   : > { %4555 = vst.msk [vmem:[%s10037_s12 + $0xa8] sm:$0xff] %vm4533_vm10, %v4406_v61  ;;  %4554 = vst.msk [vmem:[%s10037_s12 + $0xa0] sm:$0xff] %vm4533_vm10, %v4403_v24  ;;  %v4330_v61 = vmul.f32 %v9881_v10, %v4259_v48  ;;  %v4264_v54 = vmul.f32 %v4200_v36, %v4200_v36  ;;  %v3859_v22 = vmul.f32 %v5917_v27, %v9611_v15  ;;  %v5923_v59 = vpop.eup %5922  ;;  %5926 = vrcp.f32 %v3114_v21  ;;  %v10767_v36 = vld [vmem:[#allocation101_spill] sm:$0xff] }
 0x30e   : > { %4561 = vst.msk [vmem:[%s10037_s12 + $0xd8] sm:$0xff] %vm4533_vm10, %v4424_v12  ;;  %4560 = vst.msk [vmem:[%s10037_s12 + $0xd0] sm:$0xff] %vm4533_vm10, %v4421_v26  ;;  %v4199_v42 = vsub.f32 %v4071_v45, %v4135_v18  ;;  %v4329_v24 = vmul.f32 %v9881_v10, %v4258_v13  ;;  %v4336_v29 = vmul.f32 %v9881_v10, %v4265_v55  ;;  %v10768_v13 = vld [vmem:[#allocation131_spill] sm:$0xff] }
 0x30f   : > { %4559 = vst.msk [vmem:[%s10037_s12 + $0xc8] sm:$0xff] %vm4533_vm10, %v4418_v40  ;;  %v4500_v38 = vsel %vm2413_vm4, %v4330_v61, 0.0  ;;  %v4335_v30 = vmul.f32 %v9881_v10, %v4264_v54  ;;  %4558 = vst.msk [vmem:[%s10037_s12 + $0xc0] sm:$0xff] %vm4533_vm10, %v4415_v4  ;;  %v4262_v23 = vmul.f32 %v4198_v3, %v4198_v3  ;;  %v3861_v39 = vsel %vm3860_vm11, %v9611_v15, %v3859_v22  ;;  %v4436_v58 = vpop.xlane.xlu1 %4435 }
 0x310   : > { %v4263_v6 = vmul.f32 %v4199_v42, %v4199_v42  ;;  %4501 = vadd.xlane.f32.xlu1 %v4500_v38  ;;  %v4497_v35 = vsel %vm2413_vm4, %v4329_v24, 0.0  ;;  %v4518_v28 = vsel %vm2413_vm4, %v4336_v29, 0.0  ;;  %v3864_v49 = vsel %vm3862_vm12, %v3863_v17, %v3861_v39  ;;  %4565 = vst.msk [vmem:[%s10037_s12 + $0xf8] sm:$0xff] %vm4533_vm10, %v4436_v58  ;;  %v4433_v62 = vpop.xlane.xlu0 %4432 }
 0x311   : > { %4498 = vadd.xlane.f32.xlu0 %v4497_v35  ;;  %v4515_v63 = vsel %vm2413_vm4, %v4335_v30, 0.0  ;;  %v4333_v34 = vmul.f32 %v9881_v10, %v4262_v23  ;;  %v3946_v31 = vadd.f32 1e-10, %v3864_v49  ;;  %v4141_v26 = vmul.f32 %v5919_v0, %v10761_v8  ;;  %4564 = vst.msk [vmem:[%s10037_s12 + $0xf0] sm:$0xff] %vm4533_vm10, %v4433_v62 }
 0x312   : > { %v4334_v12 = vmul.f32 %v9881_v10, %v4263_v6  ;;  %v4075_v51 = vmul.f32 %v5923_v59, %v10763_v44  ;;  %v4140_v47 = vmul.f32 %v5921_v9, %v10765_v46  ;;  %v4076_v33 = vmul.f32 %v5915_v14, %v10766_v41 }
 0x313   : > { %5928 = vrcp.f32 %v3946_v31  ;;  %v4509_v60 = vsel %vm2413_vm4, %v4333_v34, 0.0  ;;  %v4205_v5 = vsub.f32 %v4077_v7, %v4141_v26 }
 0x314   : > { %4519 = vadd.xlane.f32.xlu1 %v4518_v28  ;;  %v4512_v15 = vsel %vm2413_vm4, %v4334_v12, 0.0  ;;  %v4204_v53 = vsub.f32 %v4076_v33, %v4140_v47 }
 0x315   : > { %4516 = vadd.xlane.f32.xlu0 %v4515_v63  ;;  %v4269_v19 = vmul.f32 %v4205_v5, %v4205_v5 }
 0x316   : > { %v5925_v56 = vpop.eup %5924  ;;  %v4430_v50 = vpop.xlane.xlu1 %4429  ;;  %v4268_v54 = vmul.f32 %v4204_v53, %v4204_v53 }
 0x317   : > { %v4139_v16 = vmul.f32 %v5925_v56, %v10764_v25  ;;  %v5927_v52 = vpop.eup %5926  ;;  %4563 = vst.msk [vmem:[%s10037_s12 + $0xe8] sm:$0xff] %vm4533_vm10, %v4430_v50  ;;  %v4427_v1 = vpop.xlane.xlu0 %4426  ;;  %v4340_v20 = vmul.f32 %v9881_v10, %v4269_v19 }
 0x318   : > { %4513 = vadd.xlane.f32.xlu1 %v4512_v15  ;;  %4562 = vst.msk [vmem:[%s10037_s12 + $0xe0] sm:$0xff] %vm4533_vm10, %v4427_v1  ;;  %v4074_v57 = vmul.f32 %v5927_v52, %v10767_v36  ;;  %v4339_v21 = vmul.f32 %v9881_v10, %v4268_v54 }
 0x319   : > { %4510 = vadd.xlane.f32.xlu0 %v4509_v60  ;;  %v4203_v32 = vsub.f32 %v4075_v51, %v4139_v16  ;;  %v4530_v14 = vsel %vm2413_vm4, %v4340_v20, 0.0 }
 0x31a   : > { %v4527_v29 = vsel %vm2413_vm4, %v4339_v21, 0.0 }
 0x31b   : > { %v4267_v37 = vmul.f32 %v4203_v32, %v4203_v32 }
 0x31d   : > { %v4338_v45 = vmul.f32 %v9881_v10, %v4267_v37  ;;  %v5929_v48 = vpop.eup %5928  ;;  %v4448_v43 = vpop.xlane.xlu1 %4447 }
 0x31e   : > { %v4138_v55 = vmul.f32 %v5929_v48, %v10768_v13  ;;  %4569 = vst.msk [vmem:[%s10037_s12 + $0x118] sm:$0xff] %vm4533_vm10, %v4448_v43 }
 0x31f   : > { %v4524_v18 = vsel %vm2413_vm4, %v4338_v45, 0.0 }
 0x320   : > { %4525 = vadd.xlane.f32.xlu1 %v4524_v18  ;;  %v4202_v2 = vsub.f32 %v4074_v57, %v4138_v55  ;;  %v4445_v40 = vpop.xlane.xlu0 %4444 }
 0x321   : > { %4568 = vst.msk [vmem:[%s10037_s12 + $0x110] sm:$0xff] %vm4533_vm10, %v4445_v40 }
 0x322   : > { %v4266_v61 = vmul.f32 %v4202_v2, %v4202_v2 }
 0x324   : > { %4531 = vadd.xlane.f32.xlu1 %v4530_v14  ;;  %v4337_v42 = vmul.f32 %v9881_v10, %v4266_v61 }
 0x325   : > { %v4442_v24 = vpop.xlane.xlu1 %4441 }
 0x326   : > { %v4521_v27 = vsel %vm2413_vm4, %v4337_v42, 0.0  ;;  %4567 = vst.msk [vmem:[%s10037_s12 + $0x108] sm:$0xff] %vm4533_vm10, %v4442_v24  ;;  %v4439_v3 = vpop.xlane.xlu0 %4438 }
 0x327   : > { %4522 = vadd.xlane.f32.xlu0 %v4521_v27  ;;  %4566 = vst.msk [vmem:[%s10037_s12 + $0x100] sm:$0xff] %vm4533_vm10, %v4439_v3 }
 0x32b   : > { %4528 = vadd.xlane.f32.xlu0 %v4527_v29 }
 0x32d   : > { %v4460_v4 = vpop.xlane.xlu1 %4459 }
 0x32e   : > { %4573 = vst.msk [vmem:[%s10037_s12 + $0x138] sm:$0xff] %vm4533_vm10, %v4460_v4  ;;  %v4457_v0 = vpop.xlane.xlu0 %4456 }
 0x32f   : > { %4572 = vst.msk [vmem:[%s10037_s12 + $0x130] sm:$0xff] %vm4533_vm10, %v4457_v0 }
 0x338   : > { %v4454_v10 = vpop.xlane.xlu1 %4453 }
 0x339   : > { %4571 = vst.msk [vmem:[%s10037_s12 + $0x128] sm:$0xff] %vm4533_vm10, %v4454_v10  ;;  %v4451_v22 = vpop.xlane.xlu0 %4450 }
 0x33a   : > { %4570 = vst.msk [vmem:[%s10037_s12 + $0x120] sm:$0xff] %vm4533_vm10, %v4451_v22 }
 0x345   : > { %v4472_v38 = vpop.xlane.xlu1 %4471  ;;  %v4469_v30 = vpop.xlane.xlu0 %4468 }
 0x346   : > { %4577 = vst.msk [vmem:[%s10037_s12 + $0x158] sm:$0xff] %vm4533_vm10, %v4472_v38  ;;  %4576 = vst.msk [vmem:[%s10037_s12 + $0x150] sm:$0xff] %vm4533_vm10, %v4469_v30 }
 0x351   : > { %v4466_v6 = vpop.xlane.xlu1 %4465 }
 0x352   : > { %4575 = vst.msk [vmem:[%s10037_s12 + $0x148] sm:$0xff] %vm4533_vm10, %v4466_v6  ;;  %v4463_v9 = vpop.xlane.xlu0 %4462 }
 0x353   : > { %4574 = vst.msk [vmem:[%s10037_s12 + $0x140] sm:$0xff] %vm4533_vm10, %v4463_v9 }
 0x35b   : > { %v4484_v17 = vpop.xlane.xlu1 %4483 }
 0x35c   : > { %4581 = vst.msk [vmem:[%s10037_s12 + $0x178] sm:$0xff] %vm4533_vm10, %v4484_v17 }
 0x35d   : > { %v4481_v35 = vpop.xlane.xlu0 %4480 }
 0x35e   : > { %4580 = vst.msk [vmem:[%s10037_s12 + $0x170] sm:$0xff] %vm4533_vm10, %v4481_v35 }
 0x369   : > { %v4478_v23 = vpop.xlane.xlu1 %4477 }
 0x36a   : > { %4579 = vst.msk [vmem:[%s10037_s12 + $0x168] sm:$0xff] %vm4533_vm10, %v4478_v23  ;;  %v4475_v59 = vpop.xlane.xlu0 %4474 }
 0x36b   : > { %4578 = vst.msk [vmem:[%s10037_s12 + $0x160] sm:$0xff] %vm4533_vm10, %v4475_v59 }
 0x373   : > { %v4496_v39 = vpop.xlane.xlu1 %4495 }
 0x374   : > { %4585 = vst.msk [vmem:[%s10037_s12 + $0x198] sm:$0xff] %vm4533_vm10, %v4496_v39 }
 0x375   : > { %v4493_v28 = vpop.xlane.xlu0 %4492 }
 0x376   : > { %4584 = vst.msk [vmem:[%s10037_s12 + $0x190] sm:$0xff] %vm4533_vm10, %v4493_v28 }
 0x382   : > { %v4490_v12 = vpop.xlane.xlu1 %4489 }
 0x383   : > { %4583 = vst.msk [vmem:[%s10037_s12 + $0x188] sm:$0xff] %vm4533_vm10, %v4490_v12  ;;  %v4487_v49 = vpop.xlane.xlu0 %4486 }
 0x384   : > { %4582 = vst.msk [vmem:[%s10037_s12 + $0x180] sm:$0xff] %vm4533_vm10, %v4487_v49 }
 0x38b   : > { %v4508_v63 = vpop.xlane.xlu1 %4507 }
 0x38c   : > { %v4505_v34 = vpop.xlane.xlu0 %4504  ;;  %4589 = vst.msk [vmem:[%s10037_s12 + $0x1b8] sm:$0xff] %vm4533_vm10, %v4508_v63 }
 0x38d   : > { %4588 = vst.msk [vmem:[%s10037_s12 + $0x1b0] sm:$0xff] %vm4533_vm10, %v4505_v34 }
 0x39d   : > { %v4502_v31 = vpop.xlane.xlu1 %4501 }
 0x39e   : > { %4587 = vst.msk [vmem:[%s10037_s12 + $0x1a8] sm:$0xff] %vm4533_vm10, %v4502_v31  ;;  %v4499_v8 = vpop.xlane.xlu0 %4498 }
 0x39f   : > { %4586 = vst.msk [vmem:[%s10037_s12 + $0x1a0] sm:$0xff] %vm4533_vm10, %v4499_v8 }
 0x3a1   : > { %v4520_v26 = vpop.xlane.xlu1 %4519 }
 0x3a2   : > { %4593 = vst.msk [vmem:[%s10037_s12 + $0x1d8] sm:$0xff] %vm4533_vm10, %v4520_v26  ;;  %v4517_v15 = vpop.xlane.xlu0 %4516 }
 0x3a3   : > { %4592 = vst.msk [vmem:[%s10037_s12 + $0x1d0] sm:$0xff] %vm4533_vm10, %v4517_v15 }
 0x3a5   : > { %v4514_v58 = vpop.xlane.xlu1 %4513 }
 0x3a6   : > { %4591 = vst.msk [vmem:[%s10037_s12 + $0x1c8] sm:$0xff] %vm4533_vm10, %v4514_v58  ;;  %v4511_v60 = vpop.xlane.xlu0 %4510 }
 0x3a7   : > { %4590 = vst.msk [vmem:[%s10037_s12 + $0x1c0] sm:$0xff] %vm4533_vm10, %v4511_v60 }
 0x3ad   : > { %v4526_v11 = vpop.xlane.xlu1 %4525 }
 0x3ae   : > { %4595 = vst.msk [vmem:[%s10037_s12 + $0x1e8] sm:$0xff] %vm4533_vm10, %v4526_v11 }
 0x3b1   : > { %v4532_v7 = vpop.xlane.xlu1 %4531 }
 0x3b2   : > { %4597 = vst.msk [vmem:[%s10037_s12 + $0x1f8] sm:$0xff] %vm4533_vm10, %v4532_v7 }
 0x3b4   : > { %v4523_v62 = vpop.xlane.xlu0 %4522 }
 0x3b5   : > { %4594 = vst.msk [vmem:[%s10037_s12 + $0x1e0] sm:$0xff] %vm4533_vm10, %v4523_v62 }
 0x3b8   : > { %v4529_v56 = vpop.xlane.xlu0 %4528 }
 0x3b9   : > { %4596 = vst.msk [vmem:[%s10037_s12 + $0x1f0] sm:$0xff] %vm4533_vm10, %v4529_v56 }
 0x3ba PF: > { %s18_s24 = sadd.s32 1, %s5939_s24  }
 0x3bb   : > { %p15_p4 = scmp.ge.s32.totalorder %s18_s24, 5  }
 0x3bd   :  { %17 = sbr.rel (!%p15_p4) target bundleno = 1 (0x1), region = 97 }

// kernel: _lpips_forward.4
= control target key start
LH: loop header
LB: loop body
LE: loop exit
PB: predicated region body
PF: predicated region fallthrough
CT: control target
= control target key end

     0   :  { %v4393_v0 = vmov 0   ;;  %vm367_vm0 = vcmask 130048   ;;  %vm1514_vm1 = vcmask 257024   ;;  %vm1851_vm2 = vcmask 261120   ;;  %s7832_s2 = inlined_call_operand.vmem [shape: bf16[144,32], index: 2, kind: input, shape index: {}]   ;;  %s7833_s0 = inlined_call_operand.vmem [shape: bf16[384,144], index: 0, kind: input, shape index: {}]   ;;  %s7834_s1 = inlined_call_operand.vmem [shape: bf16[384,144], index: 1, kind: input, shape index: {}]   ;;  %s7835_s3 = inlined_call_operand.vmem [shape: f32[1,32], index: 3, kind: input, shape index: {}]   ;;  %s7836_s5 = inlined_call_operand.vmem [shape: bf16[384,32], index: 5, kind: output, shape index: {0}]   ;;  %s7837_s6 = inlined_call_operand.vmem [shape: bf16[384,32], index: 6, kind: output, shape index: {1}]   ;;  %s7838_s4 = inlined_call_operand.vmem [shape: f32[1,32], index: 4, kind: input, shape index: {}]   ;;  %s7839_s7 = inlined_call_operand.vmem [shape: f32[384,1], index: 7, kind: output, shape index: {2}]  }
   0x1   :  { %440 = vmatprep.subr.bf16.mxu0 %v4393_v0  ;;  %1001 = vmatprep.subr.bf16.mxu1 %v4393_v0  ;;  %v3852_v1 = vld [vmem:[%s7832_s2] sm:$0xff]   ;;  %v3853_v2 = vld [vmem:[%s7832_s2 + $0x8] sm:$0xff]   ;;  %v3854_v3 = vld [vmem:[%s7832_s2 + $0x10] sm:$0xff]  }
   0x2   :  { %441 = vmatpush1.bf16.msra.mxu0 %v3852_v1  ;;  %1002 = vmatpush1.bf16.msra.mxu1 %v3852_v1  ;;  %v3855_v4 = vld [vmem:[%s7832_s2 + $0x18] sm:$0xff]   ;;  %v3863_v5 = vld [vmem:[%s7833_s0 + $0x4] ss:$8 sps:$4 sm:$0xff]   ;;  %v3858_v9 = vld [vmem:[%s7832_s2 + $0x30] sm:$0xff]  }
   0x3   :  { %442 = vmatprep.subr.bf16.mxu0 %v4393_v0  ;;  %1003 = vmatprep.subr.bf16.mxu1 %v4393_v0  ;;  %v3866_v6 = vld [vmem:[%s7834_s1 + $0x4] ss:$8 sps:$4 sm:$0xff]   ;;  %v3859_v10 = vld [vmem:[%s7832_s2 + $0x38] sm:$0xff]   ;;  %v3861_v12 = vld [vmem:[%s7833_s0] ss:$8 sps:$4 sm:$0xff]  }
   0x4   :  { %3562 = vmatprep.mubr.msk.bf16.mxu0 %vm367_vm0, %v3863_v5  ;;  %3634 = vmatprep.mubr.msk.bf16.mxu1 %vm367_vm0, %v3866_v6  ;;  %v3856_v7 = vld [vmem:[%s7832_s2 + $0x20] sm:$0xff]   ;;  %v3857_v8 = vld [vmem:[%s7832_s2 + $0x28] sm:$0xff]   ;;  %v3867_v14 = vld [vmem:[%s7833_s0 + $0x14] ss:$8 sps:$4 sm:$0xff]  }
   0x5   :  { %v3860_v11 = vld [vmem:[%s7832_s2 + $0x40] sm:$0xff]   ;;  %v3870_v15 = vld [vmem:[%s7834_s1 + $0x14] ss:$8 sps:$4 sm:$0xff]   ;;  %v3869_v16 = vld [vmem:[%s7833_s0 + $0x10] ss:$8 sps:$4 sm:$0xff]  }
   0x6   :  { %443 = vmatpush1.bf16.msra.mxu0 %v3853_v2  ;;  %1004 = vmatpush1.bf16.msra.mxu1 %v3853_v2  ;;  %v3864_v13 = vld [vmem:[%s7834_s1] ss:$8 sps:$4 sm:$0xff]   ;;  %v3872_v17 = vld [vmem:[%s7834_s1 + $0x10] ss:$8 sps:$4 sm:$0xff]   ;;  %v3873_v18 = vld [vmem:[%s7833_s0 + $0x24] ss:$8 sps:$4 sm:$0xff]  }
   0x7   :  { %444 = vmatprep.subr.bf16.mxu0 %v4393_v0  ;;  %1005 = vmatprep.subr.bf16.mxu1 %v4393_v0  ;;  %v3876_v19 = vld [vmem:[%s7834_s1 + $0x24] ss:$8 sps:$4 sm:$0xff]   ;;  %v3875_v20 = vld [vmem:[%s7833_s0 + $0x20] ss:$8 sps:$4 sm:$0xff]   ;;  %v3879_v22 = vld [vmem:[%s7833_s0 + $0x34] ss:$8 sps:$4 sm:$0xff]  }
   0x8   :  { %v3878_v21 = vld [vmem:[%s7834_s1 + $0x20] ss:$8 sps:$4 sm:$0xff]   ;;  %v3882_v23 = vld [vmem:[%s7834_s1 + $0x34] ss:$8 sps:$4 sm:$0xff]   ;;  %v3881_v24 = vld [vmem:[%s7833_s0 + $0x30] ss:$8 sps:$4 sm:$0xff]  }
   0x9   :  { %v3884_v25 = vld [vmem:[%s7834_s1 + $0x30] ss:$8 sps:$4 sm:$0xff]   ;;  %v3885_v26 = vld [vmem:[%s7833_s0 + $0x44] ss:$8 sps:$4 sm:$0xff]   ;;  %v3887_v28 = vld [vmem:[%s7833_s0 + $0x40] ss:$8 sps:$4 sm:$0xff]  }
   0xa   :  { %445 = vmatpush1.bf16.msra.mxu0 %v3854_v3  ;;  %1006 = vmatpush1.bf16.msra.mxu1 %v3854_v3  ;;  %v3888_v27 = vld [vmem:[%s7834_s1 + $0x44] ss:$8 sps:$4 sm:$0xff]   ;;  %v3890_v29 = vld [vmem:[%s7834_s1 + $0x40] ss:$8 sps:$4 sm:$0xff]   ;;  %v3891_v30 = vld [vmem:[%s7833_s0 + $0x54] ss:$8 sps:$4 sm:$0xff]  }
   0xb   :  { %446 = vmatprep.subr.bf16.mxu0 %v4393_v0  ;;  %1007 = vmatprep.subr.bf16.mxu1 %v4393_v0  ;;  %v3894_v31 = vld [vmem:[%s7834_s1 + $0x54] ss:$8 sps:$4 sm:$0xff]   ;;  %v3893_v32 = vld [vmem:[%s7833_s0 + $0x50] ss:$8 sps:$4 sm:$0xff]   ;;  %v3897_v34 = vld [vmem:[%s7833_s0 + $0x64] ss:$8 sps:$4 sm:$0xff]  }
   0xc   :  { %v3896_v33 = vld [vmem:[%s7834_s1 + $0x50] ss:$8 sps:$4 sm:$0xff]   ;;  %v3900_v35 = vld [vmem:[%s7834_s1 + $0x64] ss:$8 sps:$4 sm:$0xff]   ;;  %v3899_v36 = vld [vmem:[%s7833_s0 + $0x60] ss:$8 sps:$4 sm:$0xff]  }
   0xd   :  { %v3902_v37 = vld [vmem:[%s7834_s1 + $0x60] ss:$8 sps:$4 sm:$0xff]   ;;  %v3903_v38 = vld [vmem:[%s7833_s0 + $0x74] ss:$8 sps:$4 sm:$0xff]   ;;  %v3905_v40 = vld [vmem:[%s7833_s0 + $0x70] ss:$8 sps:$4 sm:$0xff]  }
   0xe   :  { %447 = vmatpush1.bf16.msra.mxu0 %v3855_v4  ;;  %1008 = vmatpush1.bf16.msra.mxu1 %v3855_v4  ;;  %v3906_v39 = vld [vmem:[%s7834_s1 + $0x74] ss:$8 sps:$4 sm:$0xff]   ;;  %v3908_v41 = vld [vmem:[%s7834_s1 + $0x70] ss:$8 sps:$4 sm:$0xff]   ;;  %v3909_v42 = vld [vmem:[%s7833_s0 + $0x84] ss:$8 sps:$4 sm:$0xff]  }
   0xf   :  { %448 = vmatprep.subr.bf16.mxu0 %v4393_v0  ;;  %1009 = vmatprep.subr.bf16.mxu1 %v4393_v0  ;;  %v3912_v43 = vld [vmem:[%s7834_s1 + $0x84] ss:$8 sps:$4 sm:$0xff]   ;;  %v3911_v44 = vld [vmem:[%s7833_s0 + $0x80] ss:$8 sps:$4 sm:$0xff]   ;;  %v3915_v46 = vld [vmem:[%s7833_s0 + $0x94] ss:$8 sps:$4 sm:$0xff]  }
  0x10   :  { %v3914_v45 = vld [vmem:[%s7834_s1 + $0x80] ss:$8 sps:$4 sm:$0xff]   ;;  %v3918_v47 = vld [vmem:[%s7834_s1 + $0x94] ss:$8 sps:$4 sm:$0xff]   ;;  %v3917_v48 = vld [vmem:[%s7833_s0 + $0x90] ss:$8 sps:$4 sm:$0xff]  }
  0x11   :  { %v3920_v49 = vld [vmem:[%s7834_s1 + $0x90] ss:$8 sps:$4 sm:$0xff]   ;;  %v3921_v50 = vld [vmem:[%s7833_s0 + $0xa4] ss:$8 sps:$4 sm:$0xff]   ;;  %v3923_v52 = vld [vmem:[%s7833_s0 + $0xa0] ss:$8 sps:$4 sm:$0xff]  }
  0x12   :  { %449 = vmatpush1.bf16.msra.mxu0 %v3856_v7  ;;  %1010 = vmatpush1.bf16.msra.mxu1 %v3856_v7  ;;  %v3924_v51 = vld [vmem:[%s7834_s1 + $0xa4] ss:$8 sps:$4 sm:$0xff]   ;;  %v3926_v53 = vld [vmem:[%s7834_s1 + $0xa0] ss:$8 sps:$4 sm:$0xff]   ;;  %v3927_v54 = vld [vmem:[%s7833_s0 + $0xb4] ss:$8 sps:$4 sm:$0xff]  }
  0x13   :  { %450 = vmatprep.subr.bf16.mxu0 %v4393_v0  ;;  %1011 = vmatprep.subr.bf16.mxu1 %v4393_v0  ;;  %v3930_v55 = vld [vmem:[%s7834_s1 + $0xb4] ss:$8 sps:$4 sm:$0xff]   ;;  %v3929_v56 = vld [vmem:[%s7833_s0 + $0xb0] ss:$8 sps:$4 sm:$0xff]   ;;  %v3933_v58 = vld [vmem:[%s7833_s0 + $0xc4] ss:$8 sps:$4 sm:$0xff]  }
  0x14   :  { %v3932_v57 = vld [vmem:[%s7834_s1 + $0xb0] ss:$8 sps:$4 sm:$0xff]   ;;  %v3936_v59 = vld [vmem:[%s7834_s1 + $0xc4] ss:$8 sps:$4 sm:$0xff]   ;;  %v3935_v60 = vld [vmem:[%s7833_s0 + $0xc0] ss:$8 sps:$4 sm:$0xff]  }
  0x15   :  { %v3938_v61 = vld [vmem:[%s7834_s1 + $0xc0] ss:$8 sps:$4 sm:$0xff]   ;;  %v3939_v62 = vld [vmem:[%s7833_s0 + $0xd4] ss:$8 sps:$4 sm:$0xff]   ;;  %v3944_v1 = vld [vmem:[%s7834_s1 + $0xd0] ss:$8 sps:$4 sm:$0xff]  }
  0x16   :  { %451 = vmatpush1.bf16.msra.mxu0 %v3857_v8  ;;  %1012 = vmatpush1.bf16.msra.mxu1 %v3857_v8  ;;  %v3942_v63 = vld [vmem:[%s7834_s1 + $0xd4] ss:$8 sps:$4 sm:$0xff]   ;;  %v3945_v2 = vld [vmem:[%s7833_s0 + $0xe4] ss:$8 sps:$4 sm:$0xff]   ;;  %v3947_v4 = vld [vmem:[%s7833_s0 + $0xe0] ss:$8 sps:$4 sm:$0xff]  }
  0x17   :  { %452 = vmatprep.subr.bf16.mxu0 %v4393_v0  ;;  %1013 = vmatprep.subr.bf16.mxu1 %v4393_v0  ;;  %v3948_v3 = vld [vmem:[%s7834_s1 + $0xe4] ss:$8 sps:$4 sm:$0xff]   ;;  %v3950_v5 = vld [vmem:[%s7834_s1 + $0xe0] ss:$8 sps:$4 sm:$0xff]   ;;  %v3951_v6 = vld [vmem:[%s7833_s0 + $0xf4] ss:$8 sps:$4 sm:$0xff]  }
  0x18   :  { %v3954_v7 = vld [vmem:[%s7834_s1 + $0xf4] ss:$8 sps:$4 sm:$0xff]   ;;  %v3953_v8 = vld [vmem:[%s7833_s0 + $0xf0] ss:$8 sps:$4 sm:$0xff]  }
  0x1a   :  { %453 = vmatpush1.bf16.msra.mxu0 %v3858_v9  ;;  %1014 = vmatpush1.bf16.msra.mxu1 %v3858_v9  ;;  %v3956_v9 = vld [vmem:[%s7834_s1 + $0xf0] ss:$8 sps:$4 sm:$0xff]  }
  0x1b   :  { %454 = vmatprep.subr.bf16.mxu0 %v4393_v0  ;;  %1015 = vmatprep.subr.bf16.mxu1 %v4393_v0 }
  0x1e   :  { %455 = vmatpush1.bf16.msra.mxu0 %v3859_v10  ;;  %1016 = vmatpush1.bf16.msra.mxu1 %v3859_v10  ;;  %v3957_v10 = vld [vmem:[%s7833_s0 + $0x104] ss:$8 sps:$4 sm:$0xff]  }
  0x1f   :  { %456 = vmatprep.subr.bf16.mxu0 %v4393_v0  ;;  %1017 = vmatprep.subr.bf16.mxu1 %v4393_v0  ;;  %v3941_v0 = vld [vmem:[%s7833_s0 + $0xd0] ss:$8 sps:$4 sm:$0xff]  }
  0x22   :  { %457 = vmatpush1.bf16.msra.mxu0 %v3860_v11  ;;  %1018 = vmatpush1.bf16.msra.mxu1 %v3860_v11  ;;  %v3960_v11 = vld [vmem:[%s7834_s1 + $0x104] ss:$8 sps:$4 sm:$0xff]  }
  0x25   :  { %473 = vmatmul.mubr.bf16.vlgmr.msra.gmra.mrb[0].mxu0 %v3861_v12  ;;  %1034 = vmatmul.mubr.bf16.vlgmr.msra.gmra.mrb[0].mxu1 %v3864_v13  ;;  %v3959_v12 = vld [vmem:[%s7833_s0 + $0x100] ss:$8 sps:$4 sm:$0xff]  }
  0x26   :  { %3563 = vmatprep.mubr.msk.bf16.mxu0 %vm367_vm0, %v3867_v14  ;;  %3635 = vmatprep.mubr.msk.bf16.mxu1 %vm367_vm0, %v3870_v15  ;;  %v3962_v13 = vld [vmem:[%s7834_s1 + $0x100] ss:$8 sps:$4 sm:$0xff]   ;;  %v3963_v14 = vld [vmem:[%s7833_s0 + $0x114] ss:$8 sps:$4 sm:$0xff]  }
  0x27   :  { %v3966_v15 = vld [vmem:[%s7834_s1 + $0x114] ss:$8 sps:$4 sm:$0xff]  }
  0x2d   :  { %481 = vmatmul.mubr.bf16.gmra.mrb[4].mxu0 %v3869_v16  ;;  %1042 = vmatmul.mubr.bf16.gmra.mrb[4].mxu1 %v3872_v17  ;;  %v3965_v16 = vld [vmem:[%s7833_s0 + $0x110] ss:$8 sps:$4 sm:$0xff]  }
  0x2e   :  { %3564 = vmatprep.mubr.msk.bf16.mxu0 %vm367_vm0, %v3873_v18  ;;  %3636 = vmatprep.mubr.msk.bf16.mxu1 %vm367_vm0, %v3876_v19  ;;  %v3968_v17 = vld [vmem:[%s7834_s1 + $0x110] ss:$8 sps:$4 sm:$0xff]   ;;  %v3969_v18 = vld [vmem:[%s7833_s0 + $0x124] ss:$8 sps:$4 sm:$0xff]  }
  0x2f   :  { %v3972_v19 = vld [vmem:[%s7834_s1 + $0x124] ss:$8 sps:$4 sm:$0xff]  }
  0x35   :  { %489 = vmatmul.mubr.bf16.gmra.mrb[8].mxu0 %v3875_v20  ;;  %1050 = vmatmul.mubr.bf16.gmra.mrb[8].mxu1 %v3878_v21  ;;  %v3971_v20 = vld [vmem:[%s7833_s0 + $0x120] ss:$8 sps:$4 sm:$0xff]  }
  0x36   :  { %3565 = vmatprep.mubr.msk.bf16.mxu0 %vm367_vm0, %v3879_v22  ;;  %3637 = vmatprep.mubr.msk.bf16.mxu1 %vm367_vm0, %v3882_v23  ;;  %v3974_v21 = vld [vmem:[%s7834_s1 + $0x120] ss:$8 sps:$4 sm:$0xff]   ;;  %v3975_v22 = vld [vmem:[%s7833_s0 + $0x134] ss:$8 sps:$4 sm:$0xff]  }
  0x37   :  { %v3978_v23 = vld [vmem:[%s7834_s1 + $0x134] ss:$8 sps:$4 sm:$0xff]  }
  0x3d   :  { %497 = vmatmul.mubr.bf16.gmra.mrb[12].mxu0 %v3881_v24  ;;  %1058 = vmatmul.mubr.bf16.gmra.mrb[12].mxu1 %v3884_v25  ;;  %v3977_v24 = vld [vmem:[%s7833_s0 + $0x130] ss:$8 sps:$4 sm:$0xff]  }
  0x3e   :  { %3566 = vmatprep.mubr.msk.bf16.mxu0 %vm367_vm0, %v3885_v26  ;;  %3638 = vmatprep.mubr.msk.bf16.mxu1 %vm367_vm0, %v3888_v27  ;;  %v3980_v25 = vld [vmem:[%s7834_s1 + $0x130] ss:$8 sps:$4 sm:$0xff]   ;;  %v3981_v26 = vld [vmem:[%s7833_s0 + $0x144] ss:$8 sps:$4 sm:$0xff]  }
  0x3f   :  { %v3984_v27 = vld [vmem:[%s7834_s1 + $0x144] ss:$8 sps:$4 sm:$0xff]  }
  0x45   :  { %505 = vmatmul.mubr.bf16.gmra.mrb[16].mxu0 %v3887_v28  ;;  %1066 = vmatmul.mubr.bf16.gmra.mrb[16].mxu1 %v3890_v29  ;;  %v3983_v28 = vld [vmem:[%s7833_s0 + $0x140] ss:$8 sps:$4 sm:$0xff]  }
  0x46   :  { %3567 = vmatprep.mubr.msk.bf16.mxu0 %vm367_vm0, %v3891_v30  ;;  %3639 = vmatprep.mubr.msk.bf16.mxu1 %vm367_vm0, %v3894_v31  ;;  %v3986_v29 = vld [vmem:[%s7834_s1 + $0x140] ss:$8 sps:$4 sm:$0xff]   ;;  %v3987_v30 = vld [vmem:[%s7833_s0 + $0x154] ss:$8 sps:$4 sm:$0xff]  }
  0x47   :  { %v3990_v31 = vld [vmem:[%s7834_s1 + $0x154] ss:$8 sps:$4 sm:$0xff]  }
  0x4d   :  { %513 = vmatmul.mubr.bf16.gmra.mrb[20].mxu0 %v3893_v32  ;;  %1074 = vmatmul.mubr.bf16.gmra.mrb[20].mxu1 %v3896_v33  ;;  %v3989_v32 = vld [vmem:[%s7833_s0 + $0x150] ss:$8 sps:$4 sm:$0xff]  }
  0x4e   :  { %3568 = vmatprep.mubr.msk.bf16.mxu0 %vm367_vm0, %v3897_v34  ;;  %3640 = vmatprep.mubr.msk.bf16.mxu1 %vm367_vm0, %v3900_v35  ;;  %v3992_v33 = vld [vmem:[%s7834_s1 + $0x150] ss:$8 sps:$4 sm:$0xff]   ;;  %v3993_v34 = vld [vmem:[%s7833_s0 + $0x164] ss:$8 sps:$4 sm:$0xff]  }
  0x4f   :  { %v3996_v35 = vld [vmem:[%s7834_s1 + $0x164] ss:$8 sps:$4 sm:$0xff]  }
  0x55   :  { %521 = vmatmul.mubr.bf16.gmra.mrb[24].mxu0 %v3899_v36  ;;  %1082 = vmatmul.mubr.bf16.gmra.mrb[24].mxu1 %v3902_v37  ;;  %v3995_v36 = vld [vmem:[%s7833_s0 + $0x160] ss:$8 sps:$4 sm:$0xff]  }
  0x56   :  { %3569 = vmatprep.mubr.msk.bf16.mxu0 %vm367_vm0, %v3903_v38  ;;  %3641 = vmatprep.mubr.msk.bf16.mxu1 %vm367_vm0, %v3906_v39  ;;  %v3998_v37 = vld [vmem:[%s7834_s1 + $0x160] ss:$8 sps:$4 sm:$0xff]   ;;  %v3999_v38 = vld [vmem:[%s7833_s0 + $0x174] ss:$8 sps:$4 sm:$0xff]  }
  0x57   :  { %v4002_v39 = vld [vmem:[%s7834_s1 + $0x174] ss:$8 sps:$4 sm:$0xff]  }
  0x5d   :  { %529 = vmatmul.mubr.bf16.gmra.mrb[28].mxu0 %v3905_v40  ;;  %1090 = vmatmul.mubr.bf16.gmra.mrb[28].mxu1 %v3908_v41  ;;  %v4001_v40 = vld [vmem:[%s7833_s0 + $0x170] ss:$8 sps:$4 sm:$0xff]  }
  0x5e   :  { %3570 = vmatprep.mubr.msk.bf16.mxu0 %vm367_vm0, %v3909_v42  ;;  %3642 = vmatprep.mubr.msk.bf16.mxu1 %vm367_vm0, %v3912_v43  ;;  %v4004_v41 = vld [vmem:[%s7834_s1 + $0x170] ss:$8 sps:$4 sm:$0xff]   ;;  %v4800_v42 = vld [vmem:[%s7835_s3] ss:$0 sm:$0xff] }
  0x65   :  { %537 = vmatmul.mubr.bf16.gmra.mrb[32].mxu0 %v3911_v44  ;;  %1098 = vmatmul.mubr.bf16.gmra.mrb[32].mxu1 %v3914_v45 }
  0x66   :  { %3571 = vmatprep.mubr.msk.bf16.mxu0 %vm367_vm0, %v3915_v46  ;;  %3643 = vmatprep.mubr.msk.bf16.mxu1 %vm367_vm0, %v3918_v47 }
  0x6d   :  { %545 = vmatmul.mubr.bf16.gmra.mrb[36].mxu0 %v3917_v48  ;;  %1106 = vmatmul.mubr.bf16.gmra.mrb[36].mxu1 %v3920_v49 }
  0x6e   :  { %3572 = vmatprep.mubr.msk.bf16.mxu0 %vm367_vm0, %v3921_v50  ;;  %3644 = vmatprep.mubr.msk.bf16.mxu1 %vm367_vm0, %v3924_v51 }
  0x75   :  { %553 = vmatmul.mubr.bf16.gmra.mrb[40].mxu0 %v3923_v52  ;;  %1114 = vmatmul.mubr.bf16.gmra.mrb[40].mxu1 %v3926_v53 }
  0x76   :  { %3573 = vmatprep.mubr.msk.bf16.mxu0 %vm367_vm0, %v3927_v54  ;;  %3645 = vmatprep.mubr.msk.bf16.mxu1 %vm367_vm0, %v3930_v55 }
  0x7d   :  { %561 = vmatmul.mubr.bf16.gmra.mrb[44].mxu0 %v3929_v56  ;;  %1122 = vmatmul.mubr.bf16.gmra.mrb[44].mxu1 %v3932_v57 }
  0x7e   :  { %3574 = vmatprep.mubr.msk.bf16.mxu0 %vm367_vm0, %v3933_v58  ;;  %3646 = vmatprep.mubr.msk.bf16.mxu1 %vm367_vm0, %v3936_v59 }
  0x85   :  { %569 = vmatmul.mubr.bf16.gmra.mrb[48].mxu0 %v3935_v60  ;;  %1130 = vmatmul.mubr.bf16.gmra.mrb[48].mxu1 %v3938_v61 }
  0x86   :  { %3575 = vmatprep.mubr.msk.bf16.mxu0 %vm367_vm0, %v3939_v62  ;;  %3647 = vmatprep.mubr.msk.bf16.mxu1 %vm367_vm0, %v3942_v63 }
  0x8d   :  { %577 = vmatmul.mubr.bf16.gmra.mrb[52].mxu0 %v3941_v0  ;;  %1138 = vmatmul.mubr.bf16.gmra.mrb[52].mxu1 %v3944_v1 }
  0x8e   :  { %3576 = vmatprep.mubr.msk.bf16.mxu0 %vm367_vm0, %v3945_v2  ;;  %3648 = vmatprep.mubr.msk.bf16.mxu1 %vm367_vm0, %v3948_v3 }
  0x95   :  { %585 = vmatmul.mubr.bf16.gmra.mrb[56].mxu0 %v3947_v4  ;;  %1146 = vmatmul.mubr.bf16.gmra.mrb[56].mxu1 %v3950_v5 }
  0x96   :  { %3577 = vmatprep.mubr.msk.bf16.mxu0 %vm367_vm0, %v3951_v6  ;;  %3649 = vmatprep.mubr.msk.bf16.mxu1 %vm367_vm0, %v3954_v7 }
  0x9d   :  { %593 = vmatmul.mubr.bf16.gmra.mrb[60].mxu0 %v3953_v8  ;;  %1154 = vmatmul.mubr.bf16.gmra.mrb[60].mxu1 %v3956_v9 }
  0x9e   :  { %3578 = vmatprep.mubr.msk.bf16.mxu0 %vm367_vm0, %v3957_v10  ;;  %3650 = vmatprep.mubr.msk.bf16.mxu1 %vm367_vm0, %v3960_v11 }
  0xa5   :  { %601 = vmatmul.mubr.bf16.gmra.mrb[64].mxu0 %v3959_v12  ;;  %1162 = vmatmul.mubr.bf16.gmra.mrb[64].mxu1 %v3962_v13 }
  0xa6   :  { %3579 = vmatprep.mubr.msk.bf16.mxu0 %vm367_vm0, %v3963_v14  ;;  %3651 = vmatprep.mubr.msk.bf16.mxu1 %vm367_vm0, %v3966_v15 }
  0xad   :  { %609 = vmatmul.mubr.bf16.gmra.mrb[68].mxu0 %v3965_v16  ;;  %1170 = vmatmul.mubr.bf16.gmra.mrb[68].mxu1 %v3968_v17 }
  0xae   :  { %3580 = vmatprep.mubr.msk.bf16.mxu0 %vm367_vm0, %v3969_v18  ;;  %3652 = vmatprep.mubr.msk.bf16.mxu1 %vm367_vm0, %v3972_v19 }
  0xb5   :  { %617 = vmatmul.mubr.bf16.gmra.mrb[72].mxu0 %v3971_v20  ;;  %1178 = vmatmul.mubr.bf16.gmra.mrb[72].mxu1 %v3974_v21 }
  0xb6   :  { %3581 = vmatprep.mubr.msk.bf16.mxu0 %vm367_vm0, %v3975_v22  ;;  %3653 = vmatprep.mubr.msk.bf16.mxu1 %vm367_vm0, %v3978_v23 }
  0xbd   :  { %625 = vmatmul.mubr.bf16.gmra.mrb[76].mxu0 %v3977_v24  ;;  %1186 = vmatmul.mubr.bf16.gmra.mrb[76].mxu1 %v3980_v25 }
  0xbe   :  { %3582 = vmatprep.mubr.msk.bf16.mxu0 %vm367_vm0, %v3981_v26  ;;  %3654 = vmatprep.mubr.msk.bf16.mxu1 %vm367_vm0, %v3984_v27 }
  0xc5   :  { %633 = vmatmul.mubr.bf16.gmra.mrb[80].mxu0 %v3983_v28  ;;  %1194 = vmatmul.mubr.bf16.gmra.mrb[80].mxu1 %v3986_v29 }
  0xc6   :  { %3583 = vmatprep.mubr.msk.bf16.mxu0 %vm367_vm0, %v3987_v30  ;;  %3655 = vmatprep.mubr.msk.bf16.mxu1 %vm367_vm0, %v3990_v31 }
  0xcd   :  { %641 = vmatmul.mubr.bf16.gmra.mrb[84].mxu0 %v3989_v32  ;;  %1202 = vmatmul.mubr.bf16.gmra.mrb[84].mxu1 %v3992_v33 }
  0xce   :  { %3584 = vmatprep.mubr.msk.bf16.mxu0 %vm367_vm0, %v3993_v34  ;;  %3656 = vmatprep.mubr.msk.bf16.mxu1 %vm367_vm0, %v3996_v35 }
  0xd5   :  { %649 = vmatmul.mubr.bf16.gmra.mrb[88].mxu0 %v3995_v36  ;;  %1210 = vmatmul.mubr.bf16.gmra.mrb[88].mxu1 %v3998_v37 }
  0xd6   :  { %3585 = vmatprep.mubr.msk.bf16.mxu0 %vm367_vm0, %v3999_v38  ;;  %3657 = vmatprep.mubr.msk.bf16.mxu1 %vm367_vm0, %v4002_v39 }
  0xdd   :  { %657 = vmatmul.mubr.bf16.gmra.mrb[92].mxu0 %v4001_v40  ;;  %1218 = vmatmul.mubr.bf16.gmra.mrb[92].mxu1 %v4004_v41 }
  0xf8   :  { %v474_v43 = vpop.f32.mrb[0].mxu0  ;;  %v1035_v44 = vpop.f32.mrb[0].mxu1 }
  0xf9   :  { %v475_v45 = vadd.f32 %v4800_v42, %v474_v43  ;;  %v1036_v46 = vadd.f32 %v4800_v42, %v1035_v44  ;;  %v476_v47 = vpop.f32.mrb[1].mxu0  ;;  %v1037_v48 = vpop.f32.mrb[1].mxu1 }
  0xfa   :  { %v477_v49 = vpop.f32.mrb[2].mxu0  ;;  %v1038_v50 = vpop.f32.mrb[2].mxu1 }
  0xfb   :  { %v4804_v51 = vmax.f32 %v475_v45, 0.0  ;;  %v4806_v52 = vmax.f32 %v1036_v46, 0.0  ;;  %v478_v53 = vadd.f32 %v4800_v42, %v477_v49  ;;  %v1039_v54 = vadd.f32 %v4800_v42, %v1038_v50  ;;  %v479_v55 = vpop.f32.mrb[3].mxu0  ;;  %v1040_v56 = vpop.f32.mrb[3].mxu1 }
  0xfd   :  { %v3755_v57 = vpack.c.bf16 %v4804_v51, %v4804_v51  ;;  %v3803_v58 = vpack.c.bf16 %v4806_v52, %v4806_v52  ;;  %v4814_v59 = vmax.f32 %v478_v53, 0.0  ;;  %v4816_v60 = vmax.f32 %v1039_v54, 0.0 }
  0xfe   :  { %v1803_v61 = vmul.f32 %v4804_v51, %v4804_v51  ;;  %v2428_v4 = vmul.f32 %v4806_v52, %v4806_v52 }
  0xff   :  { %1515 = vst.msk [vmem:[%s7836_s5] sm:$0xf] %vm1514_vm1, %v3755_v57  ;;  %1755 = vst.msk [vmem:[%s7837_s6] sm:$0xf] %vm1514_vm1, %v3803_v58  ;;  %v3756_v62 = vpack.c.bf16 %v4814_v59, %v4814_v59  ;;  %v3804_v63 = vpack.c.bf16 %v4816_v60, %v4816_v60  ;;  %v2429_v0 = vmul.f32 %v4816_v60, %v4816_v60 }
 0x100   :  { %v482_v1 = vpop.f32.mrb[4].mxu0  ;;  %v1852_v2 = vsel %vm1851_vm2, %v1803_v61, 0.0  ;;  %v1043_v3 = vpop.f32.mrb[4].mxu1  ;;  %v2476_v18 = vsel %vm1851_vm2, %v2428_v4, 0.0  ;;  %v1804_v19 = vmul.f32 %v4814_v59, %v4814_v59 }
 0x101   :  { %1516 = vst.msk [vmem:[%s7836_s5 + $0x4] sm:$0xf] %vm1514_vm1, %v3756_v62  ;;  %1756 = vst.msk [vmem:[%s7837_s6 + $0x4] sm:$0xf] %vm1514_vm1, %v3804_v63  ;;  %v483_v5 = vadd.f32 %v4800_v42, %v482_v1  ;;  %1853 = vadd.xlane.f32.xlu0 %v1852_v2  ;;  %v484_v6 = vpop.f32.mrb[5].mxu0  ;;  %v2479_v7 = vsel %vm1851_vm2, %v2429_v0, 0.0  ;;  %v1044_v8 = vadd.f32 %v4800_v42, %v1043_v3 }
 0x102   :  { %v1045_v9 = vpop.f32.mrb[5].mxu1  ;;  %2480 = vadd.xlane.f32.xlu1 %v2479_v7  ;;  %v485_v10 = vpop.f32.mrb[6].mxu0  ;;  %v1855_v30 = vsel %vm1851_vm2, %v1804_v19, 0.0 }
 0x103   :  { %v1046_v11 = vpop.f32.mrb[6].mxu1  ;;  %v4848_v12 = vmax.f32 %v483_v5, 0.0  ;;  %v486_v13 = vadd.f32 %v4800_v42, %v485_v10  ;;  %v487_v14 = vpop.f32.mrb[7].mxu0  ;;  %v4851_v15 = vmax.f32 %v1044_v8, 0.0 }
 0x104   :  { %v1047_v16 = vadd.f32 %v4800_v42, %v1046_v11  ;;  %v1048_v17 = vpop.f32.mrb[7].mxu1 }
 0x105   :  { %v3757_v20 = vpack.c.bf16 %v4848_v12, %v4848_v12  ;;  %v4859_v21 = vmax.f32 %v486_v13, 0.0  ;;  %v3805_v22 = vpack.c.bf16 %v4851_v15, %v4851_v15  ;;  %2477 = vadd.xlane.f32.xlu0 %v2476_v18  ;;  %v1805_v24 = vmul.f32 %v4848_v12, %v4848_v12 }
 0x106   :  { %v4863_v23 = vmax.f32 %v1047_v16, 0.0  ;;  %v2430_v25 = vmul.f32 %v4851_v15, %v4851_v15 }
 0x107   :  { %1517 = vst.msk [vmem:[%s7836_s5 + $0x8] sm:$0xf] %vm1514_vm1, %v3757_v20  ;;  %v3758_v26 = vpack.c.bf16 %v4859_v21, %v4859_v21  ;;  %1757 = vst.msk [vmem:[%s7837_s6 + $0x8] sm:$0xf] %vm1514_vm1, %v3805_v22  ;;  %v1858_v29 = vsel %vm1851_vm2, %v1805_v24, 0.0  ;;  %v1806_v32 = vmul.f32 %v4859_v21, %v4859_v21 }
 0x108   :  { %v3806_v27 = vpack.c.bf16 %v4863_v23, %v4863_v23  ;;  %v490_v28 = vpop.f32.mrb[8].mxu0  ;;  %v1051_v31 = vpop.f32.mrb[8].mxu1  ;;  %1859 = vadd.xlane.f32.xlu1 %v1858_v29  ;;  %v2482_v38 = vsel %vm1851_vm2, %v2430_v25, 0.0  ;;  %v2431_v48 = vmul.f32 %v4863_v23, %v4863_v23 }
 0x109   :  { %1518 = vst.msk [vmem:[%s7836_s5 + $0xc] sm:$0xf] %vm1514_vm1, %v3758_v26  ;;  %v491_v33 = vadd.f32 %v4800_v42, %v490_v28  ;;  %1856 = vadd.xlane.f32.xlu0 %v1855_v30  ;;  %v492_v34 = vpop.f32.mrb[9].mxu0  ;;  %v1052_v35 = vadd.f32 %v4800_v42, %v1051_v31  ;;  %v1053_v36 = vpop.f32.mrb[9].mxu1  ;;  %v1861_v47 = vsel %vm1851_vm2, %v1806_v32, 0.0 }
 0x10a   :  { %1758 = vst.msk [vmem:[%s7837_s6 + $0xc] sm:$0xf] %vm1514_vm1, %v3806_v27  ;;  %v493_v37 = vpop.f32.mrb[10].mxu0  ;;  %v1054_v39 = vpop.f32.mrb[10].mxu1  ;;  %v2485_v62 = vsel %vm1851_vm2, %v2431_v48, 0.0 }
 0x10b   :  { %v4896_v40 = vmax.f32 %v491_v33, 0.0  ;;  %v494_v41 = vadd.f32 %v4800_v42, %v493_v37  ;;  %v495_v43 = vpop.f32.mrb[11].mxu0  ;;  %v4899_v44 = vmax.f32 %v1052_v35, 0.0  ;;  %v1055_v45 = vadd.f32 %v4800_v42, %v1054_v39  ;;  %v1056_v46 = vpop.f32.mrb[11].mxu1 }
 0x10c   :  { %1862 = vadd.xlane.f32.xlu1 %v1861_v47 }
 0x10d   :  { %v3759_v49 = vpack.c.bf16 %v4896_v40, %v4896_v40  ;;  %v4907_v50 = vmax.f32 %v494_v41, 0.0  ;;  %v3807_v53 = vpack.c.bf16 %v4899_v44, %v4899_v44  ;;  %2483 = vadd.xlane.f32.xlu0 %v2482_v38  ;;  %v4911_v54 = vmax.f32 %v1055_v45, 0.0 }
 0x10e   :  { %v1807_v55 = vmul.f32 %v4896_v40, %v4896_v40  ;;  %v2432_v56 = vmul.f32 %v4899_v44, %v4899_v44 }
 0x10f   :  { %1519 = vst.msk [vmem:[%s7836_s5 + $0x10] sm:$0xf] %vm1514_vm1, %v3759_v49  ;;  %v3760_v57 = vpack.c.bf16 %v4907_v50, %v4907_v50  ;;  %1759 = vst.msk [vmem:[%s7837_s6 + $0x10] sm:$0xf] %vm1514_vm1, %v3807_v53  ;;  %v3808_v58 = vpack.c.bf16 %v4911_v54, %v4911_v54  ;;  %v1808_v1 = vmul.f32 %v4907_v50, %v4907_v50 }
 0x110   :  { %v498_v61 = vpop.f32.mrb[12].mxu0  ;;  %v1864_v63 = vsel %vm1851_vm2, %v1807_v55, 0.0  ;;  %v1059_v0 = vpop.f32.mrb[12].mxu1  ;;  %2486 = vadd.xlane.f32.xlu1 %v2485_v62  ;;  %v2488_v7 = vsel %vm1851_vm2, %v2432_v56, 0.0  ;;  %v2433_v18 = vmul.f32 %v4911_v54, %v4911_v54 }
 0x111   :  { %1520 = vst.msk [vmem:[%s7836_s5 + $0x14] sm:$0xf] %vm1514_vm1, %v3760_v57  ;;  %1760 = vst.msk [vmem:[%s7837_s6 + $0x14] sm:$0xf] %vm1514_vm1, %v3808_v58  ;;  %v499_v2 = vadd.f32 %v4800_v42, %v498_v61  ;;  %1865 = vadd.xlane.f32.xlu0 %v1864_v63  ;;  %v500_v3 = vpop.f32.mrb[13].mxu0  ;;  %v1060_v4 = vadd.f32 %v4800_v42, %v1059_v0  ;;  %v1061_v5 = vpop.f32.mrb[13].mxu1 }
 0x112   :  { %v501_v6 = vpop.f32.mrb[14].mxu0  ;;  %v1062_v8 = vpop.f32.mrb[14].mxu1  ;;  %v1867_v17 = vsel %vm1851_vm2, %v1808_v1, 0.0  ;;  %v2491_v30 = vsel %vm1851_vm2, %v2433_v18, 0.0 }
 0x113   :  { %v4944_v9 = vmax.f32 %v499_v2, 0.0  ;;  %v502_v10 = vadd.f32 %v4800_v42, %v501_v6  ;;  %v503_v11 = vpop.f32.mrb[15].mxu0  ;;  %v4947_v13 = vmax.f32 %v1060_v4, 0.0  ;;  %v1063_v14 = vadd.f32 %v4800_v42, %v1062_v8  ;;  %v1064_v16 = vpop.f32.mrb[15].mxu1 }
 0x114   :  { %1868 = vadd.xlane.f32.xlu1 %v1867_v17 }
 0x115   :  { %v3761_v19 = vpack.c.bf16 %v4944_v9, %v4944_v9  ;;  %v4955_v20 = vmax.f32 %v502_v10, 0.0  ;;  %v3809_v22 = vpack.c.bf16 %v4947_v13, %v4947_v13  ;;  %2489 = vadd.xlane.f32.xlu0 %v2488_v7  ;;  %v4959_v24 = vmax.f32 %v1063_v14, 0.0 }
 0x116   :  { %v1809_v25 = vmul.f32 %v4944_v9, %v4944_v9  ;;  %v2434_v26 = vmul.f32 %v4947_v13, %v4947_v13 }
 0x117   :  { %1521 = vst.msk [vmem:[%s7836_s5 + $0x18] sm:$0xf] %vm1514_vm1, %v3761_v19  ;;  %v3762_v27 = vpack.c.bf16 %v4955_v20, %v4955_v20  ;;  %1761 = vst.msk [vmem:[%s7837_s6 + $0x18] sm:$0xf] %vm1514_vm1, %v3809_v22  ;;  %v3810_v28 = vpack.c.bf16 %v4959_v24, %v4959_v24  ;;  %v1810_v33 = vmul.f32 %v4955_v20, %v4955_v20 }
 0x118   :  { %v506_v29 = vpop.f32.mrb[16].mxu0  ;;  %v1870_v31 = vsel %vm1851_vm2, %v1809_v25, 0.0  ;;  %v1067_v32 = vpop.f32.mrb[16].mxu1  ;;  %2492 = vadd.xlane.f32.xlu1 %v2491_v30  ;;  %v2494_v39 = vsel %vm1851_vm2, %v2434_v26, 0.0  ;;  %v2435_v55 = vmul.f32 %v4959_v24, %v4959_v24 }
 0x119   :  { %1522 = vst.msk [vmem:[%s7836_s5 + $0x1c] sm:$0xf] %vm1514_vm1, %v3762_v27  ;;  %1762 = vst.msk [vmem:[%s7837_s6 + $0x1c] sm:$0xf] %vm1514_vm1, %v3810_v28  ;;  %v507_v34 = vadd.f32 %v4800_v42, %v506_v29  ;;  %1871 = vadd.xlane.f32.xlu0 %v1870_v31  ;;  %v508_v35 = vpop.f32.mrb[17].mxu0  ;;  %v1068_v36 = vadd.f32 %v4800_v42, %v1067_v32  ;;  %v1069_v37 = vpop.f32.mrb[17].mxu1 }
 0x11a   :  { %v509_v38 = vpop.f32.mrb[18].mxu0  ;;  %v1070_v41 = vpop.f32.mrb[18].mxu1  ;;  %v1873_v53 = vsel %vm1851_vm2, %v1810_v33, 0.0  ;;  %v2497_v3 = vsel %vm1851_vm2, %v2435_v55, 0.0 }
 0x11b   :  { %v4992_v43 = vmax.f32 %v507_v34, 0.0  ;;  %v510_v45 = vadd.f32 %v4800_v42, %v509_v38  ;;  %v511_v46 = vpop.f32.mrb[19].mxu0  ;;  %v4995_v47 = vmax.f32 %v1068_v36, 0.0  ;;  %v1071_v48 = vadd.f32 %v4800_v42, %v1070_v41  ;;  %v1072_v49 = vpop.f32.mrb[19].mxu1 }
 0x11c   :  { %1874 = vadd.xlane.f32.xlu1 %v1873_v53 }
 0x11d   :  { %7915 = vst [vmem:[#allocation2_spill] sm:$0xff] %v4992_v43  ;;  %7916 = vst [vmem:[#allocation3_spill] sm:$0xff] %v4995_v47  ;;  %v3763_v56 = vpack.c.bf16 %v4992_v43, %v4992_v43  ;;  %v5003_v57 = vmax.f32 %v510_v45, 0.0  ;;  %v3811_v58 = vpack.c.bf16 %v4995_v47, %v4995_v47  ;;  %2495 = vadd.xlane.f32.xlu0 %v2494_v39  ;;  %v5007_v61 = vmax.f32 %v1071_v48, 0.0 }
 0x11e   :  { %v1811_v62 = vmul.f32 %v4992_v43, %v4992_v43  ;;  %v2436_v63 = vmul.f32 %v4995_v47, %v4995_v47 }
 0x11f   :  { %7917 = vst [vmem:[#allocation4_spill] sm:$0xff] %v5003_v57  ;;  %7918 = vst [vmem:[#allocation5_spill] sm:$0xff] %v5007_v61  ;;  %v3764_v0 = vpack.c.bf16 %v5003_v57, %v5003_v57  ;;  %v3812_v1 = vpack.c.bf16 %v5007_v61, %v5007_v61  ;;  %v1812_v6 = vmul.f32 %v5003_v57, %v5003_v57 }
 0x120   :  { %1523 = vst.msk [vmem:[%s7836_s5 + $0x20] sm:$0xf] %vm1514_vm1, %v3763_v56  ;;  %1763 = vst.msk [vmem:[%s7837_s6 + $0x20] sm:$0xf] %vm1514_vm1, %v3811_v58  ;;  %v514_v2 = vpop.f32.mrb[20].mxu0  ;;  %v1876_v4 = vsel %vm1851_vm2, %v1811_v62, 0.0  ;;  %2498 = vadd.xlane.f32.xlu1 %v2497_v3  ;;  %v2437_v29 = vmul.f32 %v5007_v61, %v5007_v61 }
 0x121   :  { %v1075_v5 = vpop.f32.mrb[20].mxu1  ;;  %1524 = vst.msk [vmem:[%s7836_s5 + $0x24] sm:$0xf] %vm1514_vm1, %v3764_v0  ;;  %1764 = vst.msk [vmem:[%s7837_s6 + $0x24] sm:$0xf] %vm1514_vm1, %v3812_v1  ;;  %v515_v7 = vadd.f32 %v4800_v42, %v514_v2  ;;  %1877 = vadd.xlane.f32.xlu0 %v1876_v4  ;;  %v516_v8 = vpop.f32.mrb[21].mxu0 }
 0x122   :  { %v1076_v10 = vadd.f32 %v4800_v42, %v1075_v5  ;;  %v1077_v11 = vpop.f32.mrb[21].mxu1  ;;  %v517_v14 = vpop.f32.mrb[22].mxu0  ;;  %v2500_v16 = vsel %vm1851_vm2, %v2436_v63, 0.0  ;;  %v1879_v28 = vsel %vm1851_vm2, %v1812_v6, 0.0  ;;  %v2503_v39 = vsel %vm1851_vm2, %v2437_v29, 0.0 }
 0x123   :  { %v1078_v17 = vpop.f32.mrb[22].mxu1  ;;  %v5040_v18 = vmax.f32 %v515_v7, 0.0  ;;  %v518_v19 = vadd.f32 %v4800_v42, %v517_v14  ;;  %v519_v22 = vpop.f32.mrb[23].mxu0 }
 0x124   :  { %v5043_v25 = vmax.f32 %v1076_v10, 0.0  ;;  %v1079_v26 = vadd.f32 %v4800_v42, %v1078_v17  ;;  %v1080_v27 = vpop.f32.mrb[23].mxu1  ;;  %1880 = vadd.xlane.f32.xlu1 %v1879_v28 }
 0x125   :  { %7919 = vst [vmem:[#allocation6_spill] sm:$0xff] %v5040_v18  ;;  %v3765_v30 = vpack.c.bf16 %v5040_v18, %v5040_v18  ;;  %v5051_v31 = vmax.f32 %v518_v19, 0.0  ;;  %2501 = vadd.xlane.f32.xlu0 %v2500_v16  ;;  %v1813_v34 = vmul.f32 %v5040_v18, %v5040_v18 }
 0x126   :  { %7920 = vst [vmem:[#allocation7_spill] sm:$0xff] %v5043_v25  ;;  %v3813_v32 = vpack.c.bf16 %v5043_v25, %v5043_v25  ;;  %v5055_v33 = vmax.f32 %v1079_v26, 0.0  ;;  %v2438_v35 = vmul.f32 %v5043_v25, %v5043_v25 }
 0x127   :  { %7921 = vst [vmem:[#allocation8_spill] sm:$0xff] %v5051_v31  ;;  %1525 = vst.msk [vmem:[%s7836_s5 + $0x28] sm:$0xf] %vm1514_vm1, %v3765_v30  ;;  %v3766_v36 = vpack.c.bf16 %v5051_v31, %v5051_v31  ;;  %v1882_v41 = vsel %vm1851_vm2, %v1813_v34, 0.0  ;;  %v1814_v46 = vmul.f32 %v5051_v31, %v5051_v31 }
 0x128   :  { %7922 = vst [vmem:[#allocation9_spill] sm:$0xff] %v5055_v33  ;;  %1765 = vst.msk [vmem:[%s7837_s6 + $0x28] sm:$0xf] %vm1514_vm1, %v3813_v32  ;;  %v3814_v37 = vpack.c.bf16 %v5055_v33, %v5055_v33  ;;  %v522_v38 = vpop.f32.mrb[24].mxu0  ;;  %v1083_v45 = vpop.f32.mrb[24].mxu1  ;;  %2504 = vadd.xlane.f32.xlu1 %v2503_v39  ;;  %v2506_v58 = vsel %vm1851_vm2, %v2438_v35, 0.0  ;;  %v2439_v6 = vmul.f32 %v5055_v33, %v5055_v33 }
 0x129   :  { %1526 = vst.msk [vmem:[%s7836_s5 + $0x2c] sm:$0xf] %vm1514_vm1, %v3766_v36  ;;  %v523_v48 = vadd.f32 %v4800_v42, %v522_v38  ;;  %1883 = vadd.xlane.f32.xlu0 %v1882_v41  ;;  %v524_v49 = vpop.f32.mrb[25].mxu0  ;;  %v1084_v53 = vadd.f32 %v4800_v42, %v1083_v45  ;;  %v1085_v55 = vpop.f32.mrb[25].mxu1  ;;  %v1885_v5 = vsel %vm1851_vm2, %v1814_v46, 0.0 }
 0x12a   :  { %1766 = vst.msk [vmem:[%s7837_s6 + $0x2c] sm:$0xf] %vm1514_vm1, %v3814_v37  ;;  %v525_v56 = vpop.f32.mrb[26].mxu0  ;;  %v1086_v62 = vpop.f32.mrb[26].mxu1  ;;  %v2509_v26 = vsel %vm1851_vm2, %v2439_v6, 0.0 }
 0x12b   :  { %v5088_v63 = vmax.f32 %v523_v48, 0.0  ;;  %v526_v0 = vadd.f32 %v4800_v42, %v525_v56  ;;  %v527_v1 = vpop.f32.mrb[27].mxu0  ;;  %v5091_v2 = vmax.f32 %v1084_v53, 0.0  ;;  %v1087_v3 = vadd.f32 %v4800_v42, %v1086_v62  ;;  %v1088_v4 = vpop.f32.mrb[27].mxu1 }
 0x12c   :  { %1886 = vadd.xlane.f32.xlu1 %v1885_v5 }
 0x12d   :  { %7923 = vst [vmem:[#allocation10_spill] sm:$0xff] %v5088_v63  ;;  %7924 = vst [vmem:[#allocation11_spill] sm:$0xff] %v5091_v2  ;;  %v3767_v7 = vpack.c.bf16 %v5088_v63, %v5088_v63  ;;  %v5099_v8 = vmax.f32 %v526_v0, 0.0  ;;  %v3815_v10 = vpack.c.bf16 %v5091_v2, %v5091_v2  ;;  %2507 = vadd.xlane.f32.xlu0 %v2506_v58  ;;  %v5103_v11 = vmax.f32 %v1087_v3, 0.0 }
 0x12e   :  { %v1815_v14 = vmul.f32 %v5088_v63, %v5088_v63  ;;  %v2440_v16 = vmul.f32 %v5091_v2, %v5091_v2 }
 0x12f   :  { %7925 = vst [vmem:[#allocation12_spill] sm:$0xff] %v5099_v8  ;;  %7926 = vst [vmem:[#allocation13_spill] sm:$0xff] %v5103_v11  ;;  %v3768_v17 = vpack.c.bf16 %v5099_v8, %v5099_v8  ;;  %v3816_v19 = vpack.c.bf16 %v5103_v11, %v5103_v11  ;;  %v1816_v29 = vmul.f32 %v5099_v8, %v5099_v8 }
 0x130   :  { %1527 = vst.msk [vmem:[%s7836_s5 + $0x30] sm:$0xf] %vm1514_vm1, %v3767_v7  ;;  %1767 = vst.msk [vmem:[%s7837_s6 + $0x30] sm:$0xf] %vm1514_vm1, %v3815_v10  ;;  %v530_v22 = vpop.f32.mrb[28].mxu0  ;;  %v1888_v27 = vsel %vm1851_vm2, %v1815_v14, 0.0  ;;  %2510 = vadd.xlane.f32.xlu1 %v2509_v26  ;;  %v2441_v55 = vmul.f32 %v5103_v11, %v5103_v11 }
 0x131   :  { %v1091_v28 = vpop.f32.mrb[28].mxu1  ;;  %1528 = vst.msk [vmem:[%s7836_s5 + $0x34] sm:$0xf] %vm1514_vm1, %v3768_v17  ;;  %1768 = vst.msk [vmem:[%s7837_s6 + $0x34] sm:$0xf] %vm1514_vm1, %v3816_v19  ;;  %v531_v30 = vadd.f32 %v4800_v42, %v530_v22  ;;  %1889 = vadd.xlane.f32.xlu0 %v1888_v27  ;;  %v532_v32 = vpop.f32.mrb[29].mxu0 }
 0x132   :  { %v1092_v34 = vadd.f32 %v4800_v42, %v1091_v28  ;;  %v1093_v35 = vpop.f32.mrb[29].mxu1  ;;  %v533_v36 = vpop.f32.mrb[30].mxu0  ;;  %v2512_v37 = vsel %vm1851_vm2, %v2440_v16, 0.0  ;;  %v1891_v53 = vsel %vm1851_vm2, %v1816_v29, 0.0  ;;  %v2515_v7 = vsel %vm1851_vm2, %v2441_v55, 0.0 }
 0x133   :  { %v1094_v38 = vpop.f32.mrb[30].mxu1  ;;  %v5136_v39 = vmax.f32 %v531_v30, 0.0  ;;  %v534_v41 = vadd.f32 %v4800_v42, %v533_v36  ;;  %v535_v45 = vpop.f32.mrb[31].mxu0 }
 0x134   :  { %v5139_v46 = vmax.f32 %v1092_v34, 0.0  ;;  %v1095_v48 = vadd.f32 %v4800_v42, %v1094_v38  ;;  %v1096_v49 = vpop.f32.mrb[31].mxu1  ;;  %1892 = vadd.xlane.f32.xlu1 %v1891_v53 }
 0x135   :  { %7927 = vst [vmem:[#allocation14_spill] sm:$0xff] %v5136_v39  ;;  %v3769_v56 = vpack.c.bf16 %v5136_v39, %v5136_v39  ;;  %v5147_v58 = vmax.f32 %v534_v41, 0.0  ;;  %2513 = vadd.xlane.f32.xlu0 %v2512_v37  ;;  %v1817_v1 = vmul.f32 %v5136_v39, %v5136_v39 }
 0x136   :  { %7928 = vst [vmem:[#allocation15_spill] sm:$0xff] %v5139_v46  ;;  %v3817_v62 = vpack.c.bf16 %v5139_v46, %v5139_v46  ;;  %v5151_v0 = vmax.f32 %v1095_v48, 0.0  ;;  %v2442_v3 = vmul.f32 %v5139_v46, %v5139_v46 }
 0x137   :  { %7929 = vst [vmem:[#allocation16_spill] sm:$0xff] %v5147_v58  ;;  %1529 = vst.msk [vmem:[%s7836_s5 + $0x38] sm:$0xf] %vm1514_vm1, %v3769_v56  ;;  %v3770_v4 = vpack.c.bf16 %v5147_v58, %v5147_v58  ;;  %v1894_v10 = vsel %vm1851_vm2, %v1817_v1, 0.0  ;;  %v1818_v16 = vmul.f32 %v5147_v58, %v5147_v58 }
 0x138   :  { %7930 = vst [vmem:[#allocation17_spill] sm:$0xff] %v5151_v0  ;;  %1769 = vst.msk [vmem:[%s7837_s6 + $0x38] sm:$0xf] %vm1514_vm1, %v3817_v62  ;;  %v3818_v5 = vpack.c.bf16 %v5151_v0, %v5151_v0  ;;  %v538_v6 = vpop.f32.mrb[32].mxu0  ;;  %v1099_v14 = vpop.f32.mrb[32].mxu1  ;;  %2516 = vadd.xlane.f32.xlu1 %v2515_v7  ;;  %v2518_v28 = vsel %vm1851_vm2, %v2442_v3, 0.0  ;;  %v2443_v41 = vmul.f32 %v5151_v0, %v5151_v0 }
 0x139   :  { %1530 = vst.msk [vmem:[%s7836_s5 + $0x3c] sm:$0xf] %vm1514_vm1, %v3770_v4  ;;  %v539_v17 = vadd.f32 %v4800_v42, %v538_v6  ;;  %1895 = vadd.xlane.f32.xlu0 %v1894_v10  ;;  %v540_v19 = vpop.f32.mrb[33].mxu0  ;;  %v1100_v22 = vadd.f32 %v4800_v42, %v1099_v14  ;;  %v1101_v26 = vpop.f32.mrb[33].mxu1  ;;  %v1897_v38 = vsel %vm1851_vm2, %v1818_v16, 0.0 }
 0x13a   :  { %1770 = vst.msk [vmem:[%s7837_s6 + $0x3c] sm:$0xf] %vm1514_vm1, %v3818_v5  ;;  %v541_v27 = vpop.f32.mrb[34].mxu0  ;;  %v1102_v29 = vpop.f32.mrb[34].mxu1  ;;  %v2521_v4 = vsel %vm1851_vm2, %v2443_v41, 0.0 }
 0x13b   :  { %v5184_v30 = vmax.f32 %v539_v17, 0.0  ;;  %v542_v32 = vadd.f32 %v4800_v42, %v541_v27  ;;  %v543_v34 = vpop.f32.mrb[35].mxu0  ;;  %v5187_v35 = vmax.f32 %v1100_v22, 0.0  ;;  %v1103_v36 = vadd.f32 %v4800_v42, %v1102_v29  ;;  %v1104_v37 = vpop.f32.mrb[35].mxu1 }
 0x13c   :  { %1898 = vadd.xlane.f32.xlu1 %v1897_v38 }
 0x13d   :  { %7931 = vst [vmem:[#allocation18_spill] sm:$0xff] %v5184_v30  ;;  %7932 = vst [vmem:[#allocation19_spill] sm:$0xff] %v5187_v35  ;;  %v3771_v45 = vpack.c.bf16 %v5184_v30, %v5184_v30  ;;  %v5195_v48 = vmax.f32 %v542_v32, 0.0  ;;  %v3819_v49 = vpack.c.bf16 %v5187_v35, %v5187_v35  ;;  %2519 = vadd.xlane.f32.xlu0 %v2518_v28  ;;  %v5199_v53 = vmax.f32 %v1103_v36, 0.0 }
 0x13e   :  { %v1819_v55 = vmul.f32 %v5184_v30, %v5184_v30  ;;  %v2444_v56 = vmul.f32 %v5187_v35, %v5187_v35 }
 0x13f   :  { %7933 = vst [vmem:[#allocation20_spill] sm:$0xff] %v5195_v48  ;;  %7934 = vst [vmem:[#allocation21_spill] sm:$0xff] %v5199_v53  ;;  %v3772_v62 = vpack.c.bf16 %v5195_v48, %v5195_v48  ;;  %v3820_v1 = vpack.c.bf16 %v5199_v53, %v5199_v53  ;;  %v1820_v7 = vmul.f32 %v5195_v48, %v5195_v48 }
 0x140   :  { %1531 = vst.msk [vmem:[%s7836_s5 + $0x40] sm:$0xf] %vm1514_vm1, %v3771_v45  ;;  %1771 = vst.msk [vmem:[%s7837_s6 + $0x40] sm:$0xf] %vm1514_vm1, %v3819_v49  ;;  %v546_v3 = vpop.f32.mrb[36].mxu0  ;;  %v1900_v5 = vsel %vm1851_vm2, %v1819_v55, 0.0  ;;  %2522 = vadd.xlane.f32.xlu1 %v2521_v4  ;;  %v2445_v38 = vmul.f32 %v5199_v53, %v5199_v53 }
 0x141   :  { %v1107_v6 = vpop.f32.mrb[36].mxu1  ;;  %1532 = vst.msk [vmem:[%s7836_s5 + $0x44] sm:$0xf] %vm1514_vm1, %v3772_v62  ;;  %1772 = vst.msk [vmem:[%s7837_s6 + $0x44] sm:$0xf] %vm1514_vm1, %v3820_v1  ;;  %v547_v10 = vadd.f32 %v4800_v42, %v546_v3  ;;  %1901 = vadd.xlane.f32.xlu0 %v1900_v5  ;;  %v548_v14 = vpop.f32.mrb[37].mxu0 }
 0x142   :  { %v1108_v16 = vadd.f32 %v4800_v42, %v1107_v6  ;;  %v1109_v17 = vpop.f32.mrb[37].mxu1  ;;  %v549_v19 = vpop.f32.mrb[38].mxu0  ;;  %v2524_v22 = vsel %vm1851_vm2, %v2444_v56, 0.0  ;;  %v1903_v37 = vsel %vm1851_vm2, %v1820_v7, 0.0  ;;  %v2527_v5 = vsel %vm1851_vm2, %v2445_v38, 0.0 }
 0x143   :  { %v1110_v26 = vpop.f32.mrb[38].mxu1  ;;  %v5232_v27 = vmax.f32 %v547_v10, 0.0  ;;  %v550_v28 = vadd.f32 %v4800_v42, %v549_v19  ;;  %v551_v29 = vpop.f32.mrb[39].mxu0 }
 0x144   :  { %v5235_v32 = vmax.f32 %v1108_v16, 0.0  ;;  %v1111_v34 = vadd.f32 %v4800_v42, %v1110_v26  ;;  %v1112_v36 = vpop.f32.mrb[39].mxu1  ;;  %1904 = vadd.xlane.f32.xlu1 %v1903_v37 }
 0x145   :  { %7935 = vst [vmem:[#allocation22_spill] sm:$0xff] %v5232_v27  ;;  %v3773_v41 = vpack.c.bf16 %v5232_v27, %v5232_v27  ;;  %v5243_v45 = vmax.f32 %v550_v28, 0.0  ;;  %2525 = vadd.xlane.f32.xlu0 %v2524_v22  ;;  %v1821_v56 = vmul.f32 %v5232_v27, %v5232_v27 }
 0x146   :  { %7936 = vst [vmem:[#allocation23_spill] sm:$0xff] %v5235_v32  ;;  %v3821_v49 = vpack.c.bf16 %v5235_v32, %v5235_v32  ;;  %v5247_v55 = vmax.f32 %v1111_v34, 0.0  ;;  %v2446_v62 = vmul.f32 %v5235_v32, %v5235_v32 }
 0x147   :  { %7937 = vst [vmem:[#allocation24_spill] sm:$0xff] %v5243_v45  ;;  %1533 = vst.msk [vmem:[%s7836_s5 + $0x48] sm:$0xf] %vm1514_vm1, %v3773_v41  ;;  %v3774_v1 = vpack.c.bf16 %v5243_v45, %v5243_v45  ;;  %v1906_v6 = vsel %vm1851_vm2, %v1821_v56, 0.0  ;;  %v1822_v10 = vmul.f32 %v5243_v45, %v5243_v45 }
 0x148   :  { %7938 = vst [vmem:[#allocation25_spill] sm:$0xff] %v5247_v55  ;;  %1773 = vst.msk [vmem:[%s7837_s6 + $0x48] sm:$0xf] %vm1514_vm1, %v3821_v49  ;;  %v3822_v3 = vpack.c.bf16 %v5247_v55, %v5247_v55  ;;  %v554_v4 = vpop.f32.mrb[40].mxu0  ;;  %v1115_v7 = vpop.f32.mrb[40].mxu1  ;;  %2528 = vadd.xlane.f32.xlu1 %v2527_v5  ;;  %v2530_v26 = vsel %vm1851_vm2, %v2446_v62, 0.0  ;;  %v2447_v56 = vmul.f32 %v5247_v55, %v5247_v55 }
 0x149   :  { %1534 = vst.msk [vmem:[%s7836_s5 + $0x4c] sm:$0xf] %vm1514_vm1, %v3774_v1  ;;  %v555_v14 = vadd.f32 %v4800_v42, %v554_v4  ;;  %1907 = vadd.xlane.f32.xlu0 %v1906_v6  ;;  %v556_v16 = vpop.f32.mrb[41].mxu0  ;;  %v1116_v17 = vadd.f32 %v4800_v42, %v1115_v7  ;;  %v1117_v19 = vpop.f32.mrb[41].mxu1  ;;  %v1909_v49 = vsel %vm1851_vm2, %v1822_v10, 0.0 }
 0x14a   :  { %1774 = vst.msk [vmem:[%s7837_s6 + $0x4c] sm:$0xf] %vm1514_vm1, %v3822_v3  ;;  %v557_v22 = vpop.f32.mrb[42].mxu0  ;;  %v1118_v28 = vpop.f32.mrb[42].mxu1  ;;  %v2533_v16 = vsel %vm1851_vm2, %v2447_v56, 0.0 }
 0x14b   :  { %v5280_v29 = vmax.f32 %v555_v14, 0.0  ;;  %v558_v34 = vadd.f32 %v4800_v42, %v557_v22  ;;  %v559_v36 = vpop.f32.mrb[43].mxu0  ;;  %v5283_v37 = vmax.f32 %v1116_v17, 0.0  ;;  %v1119_v38 = vadd.f32 %v4800_v42, %v1118_v28  ;;  %v1120_v41 = vpop.f32.mrb[43].mxu1 }
 0x14c   :  { %1910 = vadd.xlane.f32.xlu1 %v1909_v49 }
 0x14d   :  { %7939 = vst [vmem:[#allocation26_spill] sm:$0xff] %v5280_v29  ;;  %7940 = vst [vmem:[#allocation27_spill] sm:$0xff] %v5283_v37  ;;  %v3775_v1 = vpack.c.bf16 %v5280_v29, %v5280_v29  ;;  %v5291_v62 = vmax.f32 %v558_v34, 0.0  ;;  %v3823_v3 = vpack.c.bf16 %v5283_v37, %v5283_v37  ;;  %2531 = vadd.xlane.f32.xlu0 %v2530_v26  ;;  %v5295_v4 = vmax.f32 %v1119_v38, 0.0 }
 0x14e   :  { %v1823_v5 = vmul.f32 %v5280_v29, %v5280_v29  ;;  %v2448_v6 = vmul.f32 %v5283_v37, %v5283_v37 }
 0x14f   :  { %7941 = vst [vmem:[#allocation28_spill] sm:$0xff] %v5291_v62  ;;  %7942 = vst [vmem:[#allocation29_spill] sm:$0xff] %v5295_v4  ;;  %v3776_v7 = vpack.c.bf16 %v5291_v62, %v5291_v62  ;;  %v3824_v10 = vpack.c.bf16 %v5295_v4, %v5295_v4  ;;  %v1824_v22 = vmul.f32 %v5291_v62, %v5291_v62 }
 0x150   :  { %1535 = vst.msk [vmem:[%s7836_s5 + $0x50] sm:$0xf] %vm1514_vm1, %v3775_v1  ;;  %1775 = vst.msk [vmem:[%s7837_s6 + $0x50] sm:$0xf] %vm1514_vm1, %v3823_v3  ;;  %v562_v14 = vpop.f32.mrb[44].mxu0  ;;  %v1912_v17 = vsel %vm1851_vm2, %v1823_v5, 0.0  ;;  %2534 = vadd.xlane.f32.xlu1 %v2533_v16  ;;  %v2449_v16 = vmul.f32 %v5295_v4, %v5295_v4 }
 0x151   :  { %v1123_v19 = vpop.f32.mrb[44].mxu1  ;;  %1536 = vst.msk [vmem:[%s7836_s5 + $0x54] sm:$0xf] %vm1514_vm1, %v3776_v7  ;;  %1776 = vst.msk [vmem:[%s7837_s6 + $0x54] sm:$0xf] %vm1514_vm1, %v3824_v10  ;;  %v563_v26 = vadd.f32 %v4800_v42, %v562_v14  ;;  %1913 = vadd.xlane.f32.xlu0 %v1912_v17  ;;  %v564_v28 = vpop.f32.mrb[45].mxu0 }
 0x152   :  { %v1124_v34 = vadd.f32 %v4800_v42, %v1123_v19  ;;  %v1125_v36 = vpop.f32.mrb[45].mxu1  ;;  %v565_v38 = vpop.f32.mrb[46].mxu0  ;;  %v2536_v41 = vsel %vm1851_vm2, %v2448_v6, 0.0  ;;  %v1915_v14 = vsel %vm1851_vm2, %v1824_v22, 0.0 }
 0x153   :  { %v1126_v49 = vpop.f32.mrb[46].mxu1  ;;  %v5328_v56 = vmax.f32 %v563_v26, 0.0  ;;  %v566_v1 = vadd.f32 %v4800_v42, %v565_v38  ;;  %v567_v3 = vpop.f32.mrb[47].mxu0 }
 0x154   :  { %v5331_v5 = vmax.f32 %v1124_v34, 0.0  ;;  %v1127_v7 = vadd.f32 %v4800_v42, %v1126_v49  ;;  %v1128_v10 = vpop.f32.mrb[47].mxu1  ;;  %1916 = vadd.xlane.f32.xlu1 %v1915_v14 }
 0x155   :  { %7943 = vst [vmem:[#allocation30_spill] sm:$0xff] %v5328_v56  ;;  %v3777_v17 = vpack.c.bf16 %v5328_v56, %v5328_v56  ;;  %v5339_v6 = vmax.f32 %v566_v1, 0.0  ;;  %2537 = vadd.xlane.f32.xlu0 %v2536_v41  ;;  %v1825_v28 = vmul.f32 %v5328_v56, %v5328_v56  ;;  %v2539_v41 = vsel %vm1851_vm2, %v2449_v16, 0.0 }
 0x156   :  { %7944 = vst [vmem:[#allocation31_spill] sm:$0xff] %v5331_v5  ;;  %v3825_v19 = vpack.c.bf16 %v5331_v5, %v5331_v5  ;;  %v5343_v26 = vmax.f32 %v1127_v7, 0.0  ;;  %v2450_v22 = vmul.f32 %v5331_v5, %v5331_v5 }
 0x157   :  { %7945 = vst [vmem:[#allocation32_spill] sm:$0xff] %v5339_v6  ;;  %1537 = vst.msk [vmem:[%s7836_s5 + $0x58] sm:$0xf] %vm1514_vm1, %v3777_v17  ;;  %v3778_v34 = vpack.c.bf16 %v5339_v6, %v5339_v6  ;;  %v1918_v49 = vsel %vm1851_vm2, %v1825_v28, 0.0  ;;  %v1826_v3 = vmul.f32 %v5339_v6, %v5339_v6 }
 0x158   :  { %7946 = vst [vmem:[#allocation33_spill] sm:$0xff] %v5343_v26  ;;  %1777 = vst.msk [vmem:[%s7837_s6 + $0x58] sm:$0xf] %vm1514_vm1, %v3825_v19  ;;  %v3826_v36 = vpack.c.bf16 %v5343_v26, %v5343_v26  ;;  %v570_v38 = vpop.f32.mrb[48].mxu0  ;;  %v1131_v1 = vpop.f32.mrb[48].mxu1  ;;  %2540 = vadd.xlane.f32.xlu1 %v2539_v41  ;;  %v2542_v19 = vsel %vm1851_vm2, %v2450_v22, 0.0 }
 0x159   :  { %1538 = vst.msk [vmem:[%s7836_s5 + $0x5c] sm:$0xf] %vm1514_vm1, %v3778_v34  ;;  %v571_v7 = vadd.f32 %v4800_v42, %v570_v38  ;;  %1919 = vadd.xlane.f32.xlu0 %v1918_v49  ;;  %v572_v10 = vpop.f32.mrb[49].mxu0  ;;  %v1132_v14 = vadd.f32 %v4800_v42, %v1131_v1  ;;  %v1133_v16 = vpop.f32.mrb[49].mxu1  ;;  %v1921_v41 = vsel %vm1851_vm2, %v1826_v3, 0.0  ;;  %v2451_v49 = vmul.f32 %v5343_v26, %v5343_v26 }
 0x15a   :  { %1778 = vst.msk [vmem:[%s7837_s6 + $0x5c] sm:$0xf] %vm1514_vm1, %v3826_v36  ;;  %v573_v17 = vpop.f32.mrb[50].mxu0  ;;  %v1134_v28 = vpop.f32.mrb[50].mxu1 }
 0x15b   :  { %v5376_v6 = vmax.f32 %v571_v7, 0.0  ;;  %v574_v34 = vadd.f32 %v4800_v42, %v573_v17  ;;  %v575_v5 = vpop.f32.mrb[51].mxu0  ;;  %v5379_v56 = vmax.f32 %v1132_v14, 0.0  ;;  %v1135_v36 = vadd.f32 %v4800_v42, %v1134_v28  ;;  %v1136_v38 = vpop.f32.mrb[51].mxu1 }
 0x15c   :  { %1922 = vadd.xlane.f32.xlu1 %v1921_v41 }
 0x15d   :  { %7947 = vst [vmem:[#allocation34_spill] sm:$0xff] %v5376_v6  ;;  %7948 = vst [vmem:[#allocation35_spill] sm:$0xff] %v5379_v56  ;;  %v3779_v1 = vpack.c.bf16 %v5376_v6, %v5376_v6  ;;  %v5387_v22 = vmax.f32 %v574_v34, 0.0  ;;  %v3827_v7 = vpack.c.bf16 %v5379_v56, %v5379_v56  ;;  %2543 = vadd.xlane.f32.xlu0 %v2542_v19  ;;  %v5391_v5 = vmax.f32 %v1135_v36, 0.0 }
 0x15e   :  { %v1827_v10 = vmul.f32 %v5376_v6, %v5376_v6  ;;  %v2452_v3 = vmul.f32 %v5379_v56, %v5379_v56  ;;  %v2545_v19 = vsel %vm1851_vm2, %v2451_v49, 0.0 }
 0x15f   :  { %7949 = vst [vmem:[#allocation36_spill] sm:$0xff] %v5387_v22  ;;  %7950 = vst [vmem:[#allocation37_spill] sm:$0xff] %v5391_v5  ;;  %v3780_v14 = vpack.c.bf16 %v5387_v22, %v5387_v22  ;;  %v3828_v16 = vpack.c.bf16 %v5391_v5, %v5391_v5  ;;  %v1828_v36 = vmul.f32 %v5387_v22, %v5387_v22 }
 0x160   :  { %1539 = vst.msk [vmem:[%s7836_s5 + $0x60] sm:$0xf] %vm1514_vm1, %v3779_v1  ;;  %1779 = vst.msk [vmem:[%s7837_s6 + $0x60] sm:$0xf] %vm1514_vm1, %v3827_v7  ;;  %v578_v17 = vpop.f32.mrb[52].mxu0  ;;  %v1924_v28 = vsel %vm1851_vm2, %v1827_v10, 0.0  ;;  %2546 = vadd.xlane.f32.xlu1 %v2545_v19 }
 0x161   :  { %v1139_v34 = vpop.f32.mrb[52].mxu1  ;;  %1540 = vst.msk [vmem:[%s7836_s5 + $0x64] sm:$0xf] %vm1514_vm1, %v3780_v14  ;;  %1780 = vst.msk [vmem:[%s7837_s6 + $0x64] sm:$0xf] %vm1514_vm1, %v3828_v16  ;;  %v579_v38 = vadd.f32 %v4800_v42, %v578_v17  ;;  %1925 = vadd.xlane.f32.xlu0 %v1924_v28  ;;  %v580_v41 = vpop.f32.mrb[53].mxu0  ;;  %v2453_v28 = vmul.f32 %v5391_v5, %v5391_v5 }
 0x162   :  { %v1140_v49 = vadd.f32 %v4800_v42, %v1139_v34  ;;  %v1141_v1 = vpop.f32.mrb[53].mxu1  ;;  %v581_v7 = vpop.f32.mrb[54].mxu0  ;;  %v2548_v10 = vsel %vm1851_vm2, %v2452_v3, 0.0  ;;  %v1927_v19 = vsel %vm1851_vm2, %v1828_v36, 0.0 }
 0x163   :  { %v1142_v22 = vpop.f32.mrb[54].mxu1  ;;  %v5424_v56 = vmax.f32 %v579_v38, 0.0  ;;  %v582_v14 = vadd.f32 %v4800_v42, %v581_v7  ;;  %v583_v6 = vpop.f32.mrb[55].mxu0  ;;  %v2551_v7 = vsel %vm1851_vm2, %v2453_v28, 0.0 }
 0x164   :  { %v5427_v26 = vmax.f32 %v1140_v49, 0.0  ;;  %v1143_v16 = vadd.f32 %v4800_v42, %v1142_v22  ;;  %v1144_v17 = vpop.f32.mrb[55].mxu1  ;;  %1928 = vadd.xlane.f32.xlu1 %v1927_v19 }
 0x165   :  { %7951 = vst [vmem:[#allocation38_spill] sm:$0xff] %v5424_v56  ;;  %v3781_v34 = vpack.c.bf16 %v5424_v56, %v5424_v56  ;;  %v5435_v3 = vmax.f32 %v582_v14, 0.0  ;;  %2549 = vadd.xlane.f32.xlu0 %v2548_v10  ;;  %v1829_v22 = vmul.f32 %v5424_v56, %v5424_v56 }
 0x166   :  { %7952 = vst [vmem:[#allocation39_spill] sm:$0xff] %v5427_v26  ;;  %v3829_v38 = vpack.c.bf16 %v5427_v26, %v5427_v26  ;;  %v5439_v6 = vmax.f32 %v1143_v16, 0.0  ;;  %v2454_v36 = vmul.f32 %v5427_v26, %v5427_v26 }
 0x167   :  { %7953 = vst [vmem:[#allocation40_spill] sm:$0xff] %v5435_v3  ;;  %1541 = vst.msk [vmem:[%s7836_s5 + $0x68] sm:$0xf] %vm1514_vm1, %v3781_v34  ;;  %v3782_v41 = vpack.c.bf16 %v5435_v3, %v5435_v3  ;;  %v1930_v10 = vsel %vm1851_vm2, %v1829_v22, 0.0  ;;  %v1830_v16 = vmul.f32 %v5435_v3, %v5435_v3 }
 0x168   :  { %7954 = vst [vmem:[#allocation41_spill] sm:$0xff] %v5439_v6  ;;  %1781 = vst.msk [vmem:[%s7837_s6 + $0x68] sm:$0xf] %vm1514_vm1, %v3829_v38  ;;  %v3830_v49 = vpack.c.bf16 %v5439_v6, %v5439_v6  ;;  %v586_v1 = vpop.f32.mrb[56].mxu0  ;;  %v1147_v14 = vpop.f32.mrb[56].mxu1  ;;  %2552 = vadd.xlane.f32.xlu1 %v2551_v7  ;;  %v2554_v22 = vsel %vm1851_vm2, %v2454_v36, 0.0  ;;  %v2455_v36 = vmul.f32 %v5439_v6, %v5439_v6 }
 0x169   :  { %1542 = vst.msk [vmem:[%s7836_s5 + $0x6c] sm:$0xf] %vm1514_vm1, %v3782_v41  ;;  %v587_v17 = vadd.f32 %v4800_v42, %v586_v1  ;;  %1931 = vadd.xlane.f32.xlu0 %v1930_v10  ;;  %v588_v19 = vpop.f32.mrb[57].mxu0  ;;  %v1148_v28 = vadd.f32 %v4800_v42, %v1147_v14  ;;  %v1149_v34 = vpop.f32.mrb[57].mxu1  ;;  %v5477_v41 = vld [vmem:[%s7835_s3] ss:$0 sm:$0xff] }
 0x16a   :  { %1782 = vst.msk [vmem:[%s7837_s6 + $0x6c] sm:$0xf] %vm1514_vm1, %v3830_v49  ;;  %v589_v38 = vpop.f32.mrb[58].mxu0  ;;  %v1150_v3 = vpop.f32.mrb[58].mxu1  ;;  %v1933_v14 = vsel %vm1851_vm2, %v1830_v16, 0.0 }
 0x16b   :  { %v5472_v26 = vmax.f32 %v587_v17, 0.0  ;;  %v590_v49 = vadd.f32 %v5477_v41, %v589_v38  ;;  %v591_v1 = vpop.f32.mrb[59].mxu0  ;;  %v5480_v7 = vmax.f32 %v1148_v28, 0.0  ;;  %v1151_v10 = vadd.f32 %v5477_v41, %v1150_v3  ;;  %v1152_v42 = vpop.f32.mrb[59].mxu1 }
 0x16c   :  { %1934 = vadd.xlane.f32.xlu1 %v1933_v14  ;;  %v2557_v1 = vsel %vm1851_vm2, %v2455_v36, 0.0 }
 0x16d   :  { %7955 = vst [vmem:[#allocation42_spill] sm:$0xff] %v5472_v26  ;;  %7956 = vst [vmem:[#allocation43_spill] sm:$0xff] %v5480_v7  ;;  %v3783_v17 = vpack.c.bf16 %v5472_v26, %v5472_v26  ;;  %v5488_v19 = vmax.f32 %v590_v49, 0.0  ;;  %v3831_v34 = vpack.c.bf16 %v5480_v7, %v5480_v7  ;;  %2555 = vadd.xlane.f32.xlu0 %v2554_v22  ;;  %v5492_v28 = vmax.f32 %v1151_v10, 0.0 }
 0x16e   :  { %v1831_v3 = vmul.f32 %v5472_v26, %v5472_v26  ;;  %v2456_v16 = vmul.f32 %v5480_v7, %v5480_v7 }
 0x16f   :  { %7957 = vst [vmem:[#allocation44_spill] sm:$0xff] %v5488_v19  ;;  %7958 = vst [vmem:[#allocation45_spill] sm:$0xff] %v5492_v28  ;;  %v3784_v38 = vpack.c.bf16 %v5488_v19, %v5488_v19  ;;  %v3832_v22 = vpack.c.bf16 %v5492_v28, %v5492_v28  ;;  %v1832_v14 = vmul.f32 %v5488_v19, %v5488_v19 }
 0x170   :  { %1543 = vst.msk [vmem:[%s7836_s5 + $0x70] sm:$0xf] %vm1514_vm1, %v3783_v17  ;;  %1783 = vst.msk [vmem:[%s7837_s6 + $0x70] sm:$0xf] %vm1514_vm1, %v3831_v34  ;;  %v594_v49 = vpop.f32.mrb[60].mxu0  ;;  %v1936_v10 = vsel %vm1851_vm2, %v1831_v3, 0.0  ;;  %2558 = vadd.xlane.f32.xlu1 %v2557_v1 }
 0x171   :  { %v1155_v42 = vpop.f32.mrb[60].mxu1  ;;  %1544 = vst.msk [vmem:[%s7836_s5 + $0x74] sm:$0xf] %vm1514_vm1, %v3784_v38  ;;  %1784 = vst.msk [vmem:[%s7837_s6 + $0x74] sm:$0xf] %vm1514_vm1, %v3832_v22  ;;  %v595_v17 = vadd.f32 %v5477_v41, %v594_v49  ;;  %1937 = vadd.xlane.f32.xlu0 %v1936_v10  ;;  %v596_v36 = vpop.f32.mrb[61].mxu0  ;;  %v2457_v10 = vmul.f32 %v5492_v28, %v5492_v28 }
 0x172   :  { %v1156_v34 = vadd.f32 %v5477_v41, %v1155_v42  ;;  %v1157_v3 = vpop.f32.mrb[61].mxu1  ;;  %v597_v7 = vpop.f32.mrb[62].mxu0  ;;  %v2560_v19 = vsel %vm1851_vm2, %v2456_v16, 0.0  ;;  %v1939_v1 = vsel %vm1851_vm2, %v1832_v14, 0.0 }
 0x173   :  { %v1158_v26 = vpop.f32.mrb[62].mxu1  ;;  %v5525_v6 = vmax.f32 %v595_v17, 0.0  ;;  %v598_v38 = vadd.f32 %v5477_v41, %v597_v7  ;;  %v599_v56 = vpop.f32.mrb[63].mxu0 }
 0x174   :  { %v5528_v5 = vmax.f32 %v1156_v34, 0.0  ;;  %v1159_v22 = vadd.f32 %v5477_v41, %v1158_v26  ;;  %v1160_v49 = vpop.f32.mrb[63].mxu1  ;;  %1940 = vadd.xlane.f32.xlu1 %v1939_v1  ;;  %v2563_v34 = vsel %vm1851_vm2, %v2457_v10, 0.0 }
 0x175   :  { %7959 = vst [vmem:[#allocation46_spill] sm:$0xff] %v5525_v6  ;;  %v3785_v42 = vpack.c.bf16 %v5525_v6, %v5525_v6  ;;  %v5536_v16 = vmax.f32 %v598_v38, 0.0  ;;  %2561 = vadd.xlane.f32.xlu0 %v2560_v19  ;;  %v1833_v26 = vmul.f32 %v5525_v6, %v5525_v6 }
 0x176   :  { %7960 = vst [vmem:[#allocation47_spill] sm:$0xff] %v5528_v5  ;;  %v3833_v17 = vpack.c.bf16 %v5528_v5, %v5528_v5  ;;  %v5540_v56 = vmax.f32 %v1159_v22, 0.0  ;;  %v2458_v7 = vmul.f32 %v5528_v5, %v5528_v5 }
 0x177   :  { %7961 = vst [vmem:[#allocation48_spill] sm:$0xff] %v5536_v16  ;;  %1545 = vst.msk [vmem:[%s7836_s5 + $0x78] sm:$0xf] %vm1514_vm1, %v3785_v42  ;;  %v3786_v14 = vpack.c.bf16 %v5536_v16, %v5536_v16  ;;  %v1942_v3 = vsel %vm1851_vm2, %v1833_v26, 0.0  ;;  %v1834_v22 = vmul.f32 %v5536_v16, %v5536_v16 }
 0x178   :  { %7962 = vst [vmem:[#allocation49_spill] sm:$0xff] %v5540_v56  ;;  %1785 = vst.msk [vmem:[%s7837_s6 + $0x78] sm:$0xf] %vm1514_vm1, %v3833_v17  ;;  %v3834_v19 = vpack.c.bf16 %v5540_v56, %v5540_v56  ;;  %v602_v36 = vpop.f32.mrb[64].mxu0  ;;  %v1163_v38 = vpop.f32.mrb[64].mxu1  ;;  %2564 = vadd.xlane.f32.xlu1 %v2563_v34  ;;  %v2566_v26 = vsel %vm1851_vm2, %v2458_v7, 0.0 }
 0x179   :  { %1546 = vst.msk [vmem:[%s7836_s5 + $0x7c] sm:$0xf] %vm1514_vm1, %v3786_v14  ;;  %v603_v49 = vadd.f32 %v5477_v41, %v602_v36  ;;  %1943 = vadd.xlane.f32.xlu0 %v1942_v3  ;;  %v604_v1 = vpop.f32.mrb[65].mxu0  ;;  %v1164_v10 = vadd.f32 %v5477_v41, %v1163_v38  ;;  %v1165_v42 = vpop.f32.mrb[65].mxu1  ;;  %v1945_v34 = vsel %vm1851_vm2, %v1834_v22, 0.0  ;;  %v2459_v3 = vmul.f32 %v5540_v56, %v5540_v56 }
 0x17a   :  { %1786 = vst.msk [vmem:[%s7837_s6 + $0x7c] sm:$0xf] %vm1514_vm1, %v3834_v19  ;;  %v605_v17 = vpop.f32.mrb[66].mxu0  ;;  %v1166_v16 = vpop.f32.mrb[66].mxu1 }
 0x17b   :  { %v5573_v5 = vmax.f32 %v603_v49, 0.0  ;;  %v606_v14 = vadd.f32 %v5477_v41, %v605_v17  ;;  %v607_v6 = vpop.f32.mrb[67].mxu0  ;;  %v5576_v28 = vmax.f32 %v1164_v10, 0.0  ;;  %v1167_v19 = vadd.f32 %v5477_v41, %v1166_v16  ;;  %v1168_v36 = vpop.f32.mrb[67].mxu1 }
 0x17c   :  { %1946 = vadd.xlane.f32.xlu1 %v1945_v34  ;;  %v2569_v17 = vsel %vm1851_vm2, %v2459_v3, 0.0 }
 0x17d   :  { %7963 = vst [vmem:[#allocation50_spill] sm:$0xff] %v5573_v5  ;;  %7964 = vst [vmem:[#allocation51_spill] sm:$0xff] %v5576_v28  ;;  %v3787_v38 = vpack.c.bf16 %v5573_v5, %v5573_v5  ;;  %v5584_v7 = vmax.f32 %v606_v14, 0.0  ;;  %v3835_v49 = vpack.c.bf16 %v5576_v28, %v5576_v28  ;;  %2567 = vadd.xlane.f32.xlu0 %v2566_v26  ;;  %v5588_v6 = vmax.f32 %v1167_v19, 0.0 }
 0x17e   :  { %v1835_v16 = vmul.f32 %v5573_v5, %v5573_v5  ;;  %v2460_v22 = vmul.f32 %v5576_v28, %v5576_v28 }
 0x17f   :  { %7965 = vst [vmem:[#allocation52_spill] sm:$0xff] %v5584_v7  ;;  %7966 = vst [vmem:[#allocation53_spill] sm:$0xff] %v5588_v6  ;;  %v3788_v1 = vpack.c.bf16 %v5584_v7, %v5584_v7  ;;  %v3836_v10 = vpack.c.bf16 %v5588_v6, %v5588_v6  ;;  %v1836_v19 = vmul.f32 %v5584_v7, %v5584_v7 }
 0x180   :  { %1547 = vst.msk [vmem:[%s7836_s5 + $0x80] sm:$0xf] %vm1514_vm1, %v3787_v38  ;;  %1787 = vst.msk [vmem:[%s7837_s6 + $0x80] sm:$0xf] %vm1514_vm1, %v3835_v49  ;;  %v610_v42 = vpop.f32.mrb[68].mxu0  ;;  %v1948_v26 = vsel %vm1851_vm2, %v1835_v16, 0.0  ;;  %2570 = vadd.xlane.f32.xlu1 %v2569_v17 }
 0x181   :  { %v1171_v14 = vpop.f32.mrb[68].mxu1  ;;  %1548 = vst.msk [vmem:[%s7836_s5 + $0x84] sm:$0xf] %vm1514_vm1, %v3788_v1  ;;  %1788 = vst.msk [vmem:[%s7837_s6 + $0x84] sm:$0xf] %vm1514_vm1, %v3836_v10  ;;  %v611_v36 = vadd.f32 %v5477_v41, %v610_v42  ;;  %1949 = vadd.xlane.f32.xlu0 %v1948_v26  ;;  %v612_v34 = vpop.f32.mrb[69].mxu0  ;;  %v2461_v26 = vmul.f32 %v5588_v6, %v5588_v6 }
 0x182   :  { %v1172_v3 = vadd.f32 %v5477_v41, %v1171_v14  ;;  %v1173_v38 = vpop.f32.mrb[69].mxu1  ;;  %v613_v49 = vpop.f32.mrb[70].mxu0  ;;  %v2572_v16 = vsel %vm1851_vm2, %v2460_v22, 0.0  ;;  %v1951_v17 = vsel %vm1851_vm2, %v1836_v19, 0.0 }
 0x183   :  { %v1174_v7 = vpop.f32.mrb[70].mxu1  ;;  %v5621_v28 = vmax.f32 %v611_v36, 0.0  ;;  %v614_v1 = vadd.f32 %v5477_v41, %v613_v49  ;;  %v615_v5 = vpop.f32.mrb[71].mxu0  ;;  %v2575_v49 = vsel %vm1851_vm2, %v2461_v26, 0.0 }
 0x184   :  { %v5624_v56 = vmax.f32 %v1172_v3, 0.0  ;;  %v1175_v10 = vadd.f32 %v5477_v41, %v1174_v7  ;;  %v1176_v42 = vpop.f32.mrb[71].mxu1  ;;  %1952 = vadd.xlane.f32.xlu1 %v1951_v17 }
 0x185   :  { %7967 = vst [vmem:[#allocation54_spill] sm:$0xff] %v5621_v28  ;;  %v3789_v14 = vpack.c.bf16 %v5621_v28, %v5621_v28  ;;  %v5632_v22 = vmax.f32 %v614_v1, 0.0  ;;  %2573 = vadd.xlane.f32.xlu0 %v2572_v16  ;;  %v1837_v7 = vmul.f32 %v5621_v28, %v5621_v28 }
 0x186   :  { %7968 = vst [vmem:[#allocation55_spill] sm:$0xff] %v5624_v56  ;;  %v3837_v36 = vpack.c.bf16 %v5624_v56, %v5624_v56  ;;  %v5636_v5 = vmax.f32 %v1175_v10, 0.0  ;;  %v2462_v19 = vmul.f32 %v5624_v56, %v5624_v56 }
 0x187   :  { %7969 = vst [vmem:[#allocation56_spill] sm:$0xff] %v5632_v22  ;;  %1549 = vst.msk [vmem:[%s7836_s5 + $0x88] sm:$0xf] %vm1514_vm1, %v3789_v14  ;;  %v3790_v34 = vpack.c.bf16 %v5632_v22, %v5632_v22  ;;  %v1954_v16 = vsel %vm1851_vm2, %v1837_v7, 0.0  ;;  %v1838_v10 = vmul.f32 %v5632_v22, %v5632_v22 }
 0x188   :  { %7970 = vst [vmem:[#allocation57_spill] sm:$0xff] %v5636_v5  ;;  %1789 = vst.msk [vmem:[%s7837_s6 + $0x88] sm:$0xf] %vm1514_vm1, %v3837_v36  ;;  %v3838_v3 = vpack.c.bf16 %v5636_v5, %v5636_v5  ;;  %v618_v38 = vpop.f32.mrb[72].mxu0  ;;  %v1179_v1 = vpop.f32.mrb[72].mxu1  ;;  %2576 = vadd.xlane.f32.xlu1 %v2575_v49  ;;  %v2578_v7 = vsel %vm1851_vm2, %v2462_v19, 0.0 }
 0x189   :  { %1550 = vst.msk [vmem:[%s7836_s5 + $0x8c] sm:$0xf] %vm1514_vm1, %v3790_v34  ;;  %v619_v42 = vadd.f32 %v5477_v41, %v618_v38  ;;  %1955 = vadd.xlane.f32.xlu0 %v1954_v16  ;;  %v620_v17 = vpop.f32.mrb[73].mxu0  ;;  %v1180_v26 = vadd.f32 %v5477_v41, %v1179_v1  ;;  %v1181_v14 = vpop.f32.mrb[73].mxu1  ;;  %v1957_v49 = vsel %vm1851_vm2, %v1838_v10, 0.0  ;;  %v2463_v16 = vmul.f32 %v5636_v5, %v5636_v5 }
 0x18a   :  { %1790 = vst.msk [vmem:[%s7837_s6 + $0x8c] sm:$0xf] %vm1514_vm1, %v3838_v3  ;;  %v621_v36 = vpop.f32.mrb[74].mxu0  ;;  %v1182_v22 = vpop.f32.mrb[74].mxu1 }
 0x18b   :  { %v5669_v56 = vmax.f32 %v619_v42, 0.0  ;;  %v622_v34 = vadd.f32 %v5477_v41, %v621_v36  ;;  %v623_v28 = vpop.f32.mrb[75].mxu0  ;;  %v5672_v6 = vmax.f32 %v1180_v26, 0.0  ;;  %v1183_v3 = vadd.f32 %v5477_v41, %v1182_v22  ;;  %v1184_v38 = vpop.f32.mrb[75].mxu1 }
 0x18c   :  { %1958 = vadd.xlane.f32.xlu1 %v1957_v49 }
 0x18d   :  { %7971 = vst [vmem:[#allocation58_spill] sm:$0xff] %v5669_v56  ;;  %7972 = vst [vmem:[#allocation59_spill] sm:$0xff] %v5672_v6  ;;  %v3791_v1 = vpack.c.bf16 %v5669_v56, %v5669_v56  ;;  %v5680_v19 = vmax.f32 %v622_v34, 0.0  ;;  %v3839_v42 = vpack.c.bf16 %v5672_v6, %v5672_v6  ;;  %2579 = vadd.xlane.f32.xlu0 %v2578_v7  ;;  %v5684_v28 = vmax.f32 %v1183_v3, 0.0 }
 0x18e   :  { %v5686_v17 = vpop.xlane.xlu0 %1853  ;;  %v1839_v22 = vmul.f32 %v5669_v56, %v5669_v56  ;;  %v2464_v36 = vmul.f32 %v5672_v6, %v5672_v6  ;;  %v2581_v34 = vsel %vm1851_vm2, %v2463_v16, 0.0 }
 0x18f   :  { %7973 = vst [vmem:[#allocation60_spill] sm:$0xff] %v5680_v19  ;;  %7974 = vst [vmem:[#allocation61_spill] sm:$0xff] %v5684_v28  ;;  %v3792_v10 = vpack.c.bf16 %v5680_v19, %v5680_v19  ;;  %v3840_v26 = vpack.c.bf16 %v5684_v28, %v5684_v28  ;;  %4005 = vrsqrt.f32 %v5686_v17  ;;  %v5703_v14 = vpop.xlane.xlu1 %2480  ;;  %vm1998_vm3 = vcmp.eq.f32.partialorder %v5686_v17, inf }
 0x190   :  { %1551 = vst.msk [vmem:[%s7836_s5 + $0x90] sm:$0xf] %vm1514_vm1, %v3791_v1  ;;  %1791 = vst.msk [vmem:[%s7837_s6 + $0x90] sm:$0xf] %vm1514_vm1, %v3839_v42  ;;  %4007 = vrsqrt.f32 %v5703_v14  ;;  %v626_v7 = vpop.f32.mrb[76].mxu0  ;;  %v1187_v3 = vpop.f32.mrb[76].mxu1  ;;  %2582 = vadd.xlane.f32.xlu1 %v2581_v34 }
 0x191   :  { %1552 = vst.msk [vmem:[%s7836_s5 + $0x94] sm:$0xf] %vm1514_vm1, %v3792_v10  ;;  %1792 = vst.msk [vmem:[%s7837_s6 + $0x94] sm:$0xf] %vm1514_vm1, %v3840_v26  ;;  %v627_v38 = vadd.f32 %v5477_v41, %v626_v7  ;;  %v1960_v49 = vsel %vm1851_vm2, %v1839_v22, 0.0  ;;  %v628_v1 = vpop.f32.mrb[77].mxu0  ;;  %v1188_v56 = vadd.f32 %v5477_v41, %v1187_v3  ;;  %v1840_v10 = vmul.f32 %v5680_v19, %v5680_v19 }
 0x192   :  { %v1189_v42 = vpop.f32.mrb[77].mxu1  ;;  %1961 = vadd.xlane.f32.xlu0 %v1960_v49  ;;  %v5719_v16 = vpop.xlane.xlu0 %2477  ;;  %v2584_v7 = vsel %vm1851_vm2, %v2464_v36, 0.0  ;;  %v2465_v3 = vmul.f32 %v5684_v28, %v5684_v28  ;;  %vm2000_vm4 = vcmp.eq.f32.partialorder %v5686_v17, 0.0  ;;  %vm2629_vm5 = vcmp.eq.f32.partialorder %v5703_v14, inf }
 0x193   :  { %v629_v6 = vpop.f32.mrb[78].mxu0  ;;  %v5724_v5 = vmax.f32 %v627_v38, 0.0  ;;  %4009 = vrsqrt.f32 %v5719_v16  ;;  %v1190_v34 = vpop.f32.mrb[78].mxu1  ;;  %v5729_v1 = vmax.f32 %v1188_v56, 0.0  ;;  %v1963_v49 = vsel %vm1851_vm2, %v1840_v10, 0.0 }
 0x194   :  { %v631_v26 = vpop.f32.mrb[79].mxu0  ;;  %v630_v22 = vadd.f32 %v5477_v41, %v629_v6  ;;  %v1192_v42 = vpop.f32.mrb[79].mxu1  ;;  %1964 = vadd.xlane.f32.xlu1 %v1963_v49  ;;  %v1191_v19 = vadd.f32 %v5477_v41, %v1190_v34  ;;  %vm2631_vm6 = vcmp.eq.f32.partialorder %v5703_v14, 0.0  ;;  %v2632_v45 = vand.u32 2147483648, %v5703_v14 }
 0x195   :  { %7975 = vst [vmem:[#allocation62_spill] sm:$0xff] %v5724_v5  ;;  %7976 = vst [vmem:[#allocation63_spill] sm:$0xff] %v5729_v1  ;;  %v3793_v38 = vpack.c.bf16 %v5724_v5, %v5724_v5  ;;  %v3841_v36 = vpack.c.bf16 %v5729_v1, %v5729_v1  ;;  %v5741_v56 = vpop.xlane.xlu1 %1859  ;;  %v1841_v10 = vmul.f32 %v5724_v5, %v5724_v5  ;;  %vm2622_vm7 = vcmp.eq.f32.partialorder %v5719_v16, inf }
 0x196   :  { %v5737_v26 = vmax.f32 %v630_v22, 0.0  ;;  %2585 = vadd.xlane.f32.xlu0 %v2584_v7  ;;  %v5743_v6 = vpop.xlane.xlu0 %1856  ;;  %v5751_v49 = vmax.f32 %v1191_v19, 0.0  ;;  %4011 = vrsqrt.f32 %v5741_v56  ;;  %v2587_v22 = vsel %vm1851_vm2, %v2465_v3, 0.0 }
 0x197   :  { %1553 = vst.msk [vmem:[%s7836_s5 + $0x98] sm:$0xf] %vm1514_vm1, %v3793_v38  ;;  %1793 = vst.msk [vmem:[%s7837_s6 + $0x98] sm:$0xf] %vm1514_vm1, %v3841_v36  ;;  %4013 = vrsqrt.f32 %v5743_v6  ;;  %v2001_v36 = vand.u32 2147483648, %v5686_v17  ;;  %v1966_v3 = vsel %vm1851_vm2, %v1841_v10, 0.0 }
 0x198   :  { %7977 = vst [vmem:[#allocation64_spill] sm:$0xff] %v5737_v26  ;;  %7978 = vst [vmem:[#allocation65_spill] sm:$0xff] %v5751_v49  ;;  %v3794_v34 = vpack.c.bf16 %v5737_v26, %v5737_v26  ;;  %v634_v7 = vpop.f32.mrb[80].mxu0  ;;  %v1195_v42 = vpop.f32.mrb[80].mxu1  ;;  %v3842_v19 = vpack.c.bf16 %v5751_v49, %v5751_v49  ;;  %2588 = vadd.xlane.f32.xlu1 %v2587_v22  ;;  %vm2624_vm8 = vcmp.eq.f32.partialorder %v5719_v16, 0.0  ;;  %vm2012_vm9 = vcmp.eq.f32.partialorder %v5741_v56, inf }
 0x199   :  { %v4006_v5 = vpop.eup %4005  ;;  %v635_v38 = vadd.f32 %v5477_v41, %v634_v7  ;;  %v636_v28 = vpop.f32.mrb[81].mxu0  ;;  %vm2014_vm10 = vcmp.eq.f32.partialorder %v5741_v56, 0.0  ;;  %vm2005_vm11 = vcmp.eq.f32.partialorder %v5743_v6, inf  ;;  %vm2007_vm12 = vcmp.eq.f32.partialorder %v5743_v6, 0.0 }
 0x19a   :  { %v1197_v4 = vpop.f32.mrb[81].mxu1  ;;  %v4008_v62 = vpop.eup %4007  ;;  %1554 = vst.msk [vmem:[%s7836_s5 + $0x9c] sm:$0xf] %vm1514_vm1, %v3794_v34  ;;  %1794 = vst.msk [vmem:[%s7837_s6 + $0x9c] sm:$0xf] %vm1514_vm1, %v3842_v19  ;;  %1967 = vadd.xlane.f32.xlu0 %v1966_v3  ;;  %v1196_v34 = vadd.f32 %v5477_v41, %v1195_v42  ;;  %v2466_v19 = vmul.f32 %v5729_v1, %v5729_v1 }
 0x19b   :  { %v5774_v37 = vpop.xlane.xlu1 %1862  ;;  %v5776_v7 = vpop.xlane.xlu0 %2483  ;;  %v1997_v4 = vmul.f32 %v4006_v5, %v5686_v17  ;;  %v5783_v28 = vmax.f32 %v635_v38, 0.0  ;;  %v1842_v5 = vmul.f32 %v5737_v26, %v5737_v26  ;;  %v2628_v3 = vmul.f32 %v4008_v62, %v5703_v14 }
 0x19c   :  { %4015 = vrsqrt.f32 %v5774_v37  ;;  %v637_v22 = vpop.f32.mrb[82].mxu0  ;;  %v1198_v10 = vpop.f32.mrb[82].mxu1  ;;  %v5815_v27 = vmax.f32 %v1196_v34, 0.0  ;;  %v2590_v48 = vsel %vm1851_vm2, %v2466_v19, 0.0  ;;  %vm2019_vm13 = vcmp.eq.f32.partialorder %v5774_v37, inf }
 0x19d   :  { %7979 = vst [vmem:[#allocation66_spill] sm:$0xff] %v5783_v28  ;;  %4017 = vrsqrt.f32 %v5776_v7  ;;  %v639_v29 = vpop.f32.mrb[83].mxu0  ;;  %v1200_v38 = vpop.f32.mrb[83].mxu1  ;;  %v3795_v42 = vpack.c.bf16 %v5783_v28, %v5783_v28  ;;  %v1999_v62 = vsel %vm1998_vm3, %v5686_v17, %v1997_v4  ;;  %v1969_v53 = vsel %vm1851_vm2, %v1842_v5, 0.0 }
 0x19e   :  { %v4010_v55 = vpop.eup %4009  ;;  %v2625_v29 = vand.u32 2147483648, %v5719_v16  ;;  %7980 = vst [vmem:[#allocation67_spill] sm:$0xff] %v5815_v27  ;;  %v1199_v4 = vadd.f32 %v5477_v41, %v1198_v10  ;;  %1970 = vadd.xlane.f32.xlu1 %v1969_v53  ;;  %2591 = vadd.xlane.f32.xlu0 %v2590_v48  ;;  %v2002_v0 = vsel %vm2000_vm4, %v2001_v36, %v1999_v62  ;;  %vm2021_vm14 = vcmp.eq.f32.partialorder %v5774_v37, 0.0 }
 0x19f   :  { %v2621_v32 = vmul.f32 %v4010_v55, %v5719_v16  ;;  %v5802_v26 = vpop.xlane.xlu1 %2486  ;;  %v5804_v38 = vpop.xlane.xlu0 %1865  ;;  %1555 = vst.msk [vmem:[%s7836_s5 + $0xa0] sm:$0xf] %vm1514_vm1, %v3795_v42  ;;  %v638_v55 = vadd.f32 %v5477_v41, %v637_v22  ;;  %v2630_v22 = vsel %vm2629_vm5, %v5703_v14, %v2628_v3  ;;  %v3843_v42 = vpack.c.bf16 %v5815_v27, %v5815_v27 }
 0x1a0   :  { %v642_v1 = vpop.f32.mrb[84].mxu0  ;;  %v5822_v35 = vpop.f32.mrb[84].mxu1  ;;  %4019 = vrsqrt.f32 %v5802_v26  ;;  %v5839_v58 = vmax.f32 %v1199_v4, 0.0  ;;  %v2633_v36 = vsel %vm2631_vm6, %v2632_v45, %v2630_v22  ;;  %v5864_v39 = vadd.f32 1e-10, %v2002_v0 }
 0x1a1   :  { %v4012_v30 = vpop.eup %4011  ;;  %v5828_v34 = vmax.f32 %v638_v55, 0.0  ;;  %v644_v10 = vpop.f32.mrb[85].mxu0  ;;  %v2623_v3 = vsel %vm2622_vm7, %v5719_v16, %v2621_v32  ;;  %1795 = vst.msk [vmem:[%s7837_s6 + $0xa0] sm:$0xf] %vm1514_vm1, %v3843_v42  ;;  %4021 = vrsqrt.f32 %v5804_v38  ;;  %v2022_v11 = vand.u32 2147483648, %v5774_v37 }
 0x1a2   :  { %v1205_v5 = vpop.f32.mrb[85].mxu1  ;;  %v4014_v19 = vpop.eup %4013  ;;  %v2011_v55 = vmul.f32 %v4012_v30, %v5741_v56  ;;  %7982 = vst [vmem:[#allocation69_spill] sm:$0xff] %v5839_v58  ;;  %v2008_v10 = vand.u32 2147483648, %v5743_v6  ;;  %v3844_v62 = vpack.c.bf16 %v5839_v58, %v5839_v58  ;;  %v2626_v42 = vsel %vm2624_vm8, %v2625_v29, %v2623_v3 }
 0x1a3   :  { %7981 = vst [vmem:[#allocation68_spill] sm:$0xff] %v5828_v34  ;;  %v5841_v46 = vpop.xlane.xlu1 %1868  ;;  %v5843_v53 = vpop.xlane.xlu0 %2489  ;;  %v2004_v48 = vmul.f32 %v4014_v19, %v5743_v6  ;;  %v3796_v17 = vpack.c.bf16 %v5828_v34, %v5828_v34  ;;  %vm2636_vm15 = vcmp.eq.f32.partialorder %v5776_v7, inf  ;;  %vm2638_vm0 = vcmp.eq.f32.partialorder %v5776_v7, 0.0 }
 0x1a4   :  { %v5854_v30 = vpop.f32.mrb[86].mxu0  ;;  %v5856_v32 = vpop.f32.mrb[86].mxu1  ;;  %v2013_v14 = vsel %vm2012_vm9, %v5741_v56, %v2011_v55  ;;  %1796 = vst.msk [vmem:[%s7837_s6 + $0xa4] sm:$0xf] %vm1514_vm1, %v3844_v62  ;;  %v643_v16 = vadd.f32 %v5477_v41, %v642_v1  ;;  %v5888_v3 = vadd.f32 1e-10, %v2633_v36  ;;  %4023 = vrsqrt.f32 %v5841_v46 }
 0x1a5   :  { %v647_v4 = vpop.f32.mrb[87].mxu0  ;;  %v1208_v5 = vpop.f32.mrb[87].mxu1  ;;  %1556 = vst.msk [vmem:[%s7836_s5 + $0xa4] sm:$0xf] %vm1514_vm1, %v3796_v17  ;;  %v2006_v55 = vsel %vm2005_vm11, %v5743_v6, %v2004_v48  ;;  %v2467_v17 = vmul.f32 %v5751_v49, %v5751_v49  ;;  %v2639_v62 = vand.u32 2147483648, %v5776_v7  ;;  %v7984_v48 = vand.u32 2147483648, %v5741_v56 }
 0x1a6   :  { %v4016_v19 = vpop.eup %4015  ;;  %v1843_v4 = vmul.f32 %v5783_v28, %v5783_v28  ;;  %v5897_v5 = vadd.f32 1e-10, %v2626_v42  ;;  %vm2643_vm3 = vcmp.eq.f32.partialorder %v5802_v26, inf  ;;  %vm2645_vm4 = vcmp.eq.f32.partialorder %v5802_v26, 0.0 }
 0x1a7   :  { %v4018_v45 = vpop.eup %4017  ;;  %v2018_v0 = vmul.f32 %v4016_v19, %v5774_v37  ;;  %v5884_v29 = vpop.xlane.xlu1 %2492  ;;  %v5901_v19 = vmax.f32 %v643_v16, 0.0  ;;  %v2016_v49 = vsel %vm2014_vm10, %v7984_v48, %v2013_v14  ;;  %v2593_v42 = vsel %vm1851_vm2, %v2467_v17, 0.0 }
 0x1a8   :  { %v5886_v22 = vpop.xlane.xlu0 %1871  ;;  %v2635_v1 = vmul.f32 %v4018_v45, %v5776_v7  ;;  %v5903_v36 = vpop.f32.mrb[88].mxu0  ;;  %v1972_v28 = vsel %vm1851_vm2, %v1843_v4, 0.0  ;;  %v2009_v16 = vsel %vm2007_vm12, %v2008_v10, %v2006_v55  ;;  %2594 = vadd.xlane.f32.xlu1 %v2593_v42  ;;  %vm2026_vm5 = vcmp.eq.f32.partialorder %v5804_v38, inf }
 0x1a9   :  { %7983 = vst [vmem:[#allocation70_spill] sm:$0xff] %v5901_v19  ;;  %v5905_v8 = vpop.f32.mrb[88].mxu1  ;;  %v652_v45 = vpop.f32.mrb[89].mxu0  ;;  %v2020_v63 = vsel %vm2019_vm13, %v5774_v37, %v2018_v0  ;;  %v3797_v33 = vpack.c.bf16 %v5901_v19, %v5901_v19  ;;  %1973 = vadd.xlane.f32.xlu0 %v1972_v28  ;;  %4025 = vrsqrt.f32 %v5843_v53  ;;  %v2334_v28 = vadd.f32 1e-10, %v2016_v49 }
 0x1aa   :  { %v1213_v2 = vpop.f32.mrb[89].mxu1  ;;  %v4020_v17 = vpop.eup %4019  ;;  %v2637_v0 = vsel %vm2636_vm15, %v5776_v7, %v2635_v1  ;;  %v2029_v4 = vand.u32 2147483648, %v5804_v38  ;;  %v5943_v45 = vadd.f32 1e-10, %v2009_v16  ;;  %v2023_v49 = vsel %vm2021_vm14, %v2022_v11, %v2020_v63 }
 0x1ab   :  { %v5922_v56 = vpop.xlane.xlu1 %1874  ;;  %v2646_v2 = vand.u32 2147483648, %v5802_v26  ;;  %v5930_v6 = vpop.f32.mrb[90].mxu0  ;;  %v2642_v55 = vmul.f32 %v4020_v17, %v5802_v26  ;;  %1557 = vst.msk [vmem:[%s7836_s5 + $0xa8] sm:$0xf] %vm1514_vm1, %v3797_v33  ;;  %vm2028_vm6 = vcmp.eq.f32.partialorder %v5804_v38, 0.0  ;;  %v646_v1 = vadd.f32 %v5477_v41, %v5854_v30 }
 0x1ac   :  { %v5924_v14 = vpop.xlane.xlu0 %2495  ;;  %v5932_v10 = vpop.f32.mrb[90].mxu1  ;;  %v1204_v17 = vadd.f32 %v5477_v41, %v5822_v35  ;;  %v1844_v16 = vmul.f32 %v5828_v34, %v5828_v34  ;;  %v2468_v37 = vmul.f32 %v5815_v27, %v5815_v27  ;;  %v1207_v63 = vadd.f32 %v5477_v41, %v5856_v32 }
 0x1ad   :  { %v655_v48 = vpop.f32.mrb[91].mxu0  ;;  %v1216_v42 = vpop.f32.mrb[91].mxu1  ;;  %v2644_v33 = vsel %vm2643_vm3, %v5802_v26, %v2642_v55  ;;  %v2640_v35 = vsel %vm2638_vm0, %v2639_v62, %v2637_v0  ;;  %v2335_v34 = vadd.f32 1e-10, %v2023_v49  ;;  %4027 = vrsqrt.f32 %v5884_v29 }
 0x1ae   :  { %v4022_v31 = vpop.eup %4021  ;;  %v5968_v42 = vmax.f32 %v646_v1, 0.0  ;;  %v5970_v55 = vmax.f32 %v1204_v17, 0.0  ;;  %v1975_v25 = vsel %vm1851_vm2, %v1844_v16, 0.0  ;;  %v2596_v27 = vsel %vm1851_vm2, %v2468_v37, 0.0 }
 0x1af   :  { %v5961_v11 = vpop.xlane.xlu1 %2498  ;;  %v2025_v48 = vmul.f32 %v4022_v31, %v5804_v38  ;;  %v5974_v18 = vmax.f32 %v1207_v63, 0.0  ;;  %v2647_v61 = vsel %vm2645_vm4, %v2646_v2, %v2644_v33  ;;  %1976 = vadd.xlane.f32.xlu1 %v1975_v25  ;;  %2597 = vadd.xlane.f32.xlu0 %v2596_v27  ;;  %4029 = vrcp.f32 %v2334_v28  ;;  %v4024_v33 = vpop.eup %4023 }
 0x1b0   :  { %v5963_v30 = vpop.xlane.xlu0 %1877  ;;  %7985 = vst [vmem:[#allocation71_spill] sm:$0xff] %v5968_v42  ;;  %7986 = vst [vmem:[#allocation72_spill] sm:$0xff] %v5970_v55  ;;  %v5976_v32 = vpop.f32.mrb[92].mxu0  ;;  %v3798_v7 = vpack.c.bf16 %v5968_v42, %v5968_v42  ;;  %v3845_v31 = vpack.c.bf16 %v5970_v55, %v5970_v55  ;;  %v2958_v49 = vadd.f32 1e-10, %v2640_v35  ;;  %vm2033_vm7 = vcmp.eq.f32.partialorder %v5841_v46, inf }
 0x1b1   :  { %7987 = vst [vmem:[#allocation73_spill] sm:$0xff] %v5974_v18  ;;  %v660_v62 = vpop.f32.mrb[93].mxu0  ;;  %v5985_v0 = vpop.f32.mrb[92].mxu1  ;;  %v3846_v26 = vpack.c.bf16 %v5974_v18, %v5974_v18  ;;  %v2027_v25 = vsel %vm2026_vm5, %v5804_v38, %v2025_v48  ;;  %vm2035_vm8 = vcmp.eq.f32.partialorder %v5841_v46, 0.0  ;;  %v2036_v27 = vand.u32 2147483648, %v5841_v46 }
 0x1b2   :  { %1558 = vst.msk [vmem:[%s7836_s5 + $0xac] sm:$0xf] %vm1514_vm1, %v3798_v7  ;;  %1797 = vst.msk [vmem:[%s7837_s6 + $0xa8] sm:$0xf] %vm1514_vm1, %v3845_v31  ;;  %4031 = vrsqrt.f32 %v5886_v22  ;;  %v6008_v28 = vpop.f32.mrb[94].mxu0  ;;  %v1221_v17 = vpop.f32.mrb[93].mxu1  ;;  %v651_v37 = vadd.f32 %v5477_v41, %v5903_v36  ;;  %v2032_v7 = vmul.f32 %v4024_v33, %v5841_v46  ;;  %v2030_v62 = vsel %vm2028_vm6, %v2029_v4, %v2027_v25 }
 0x1b3   :  { %v5990_v2 = vpop.xlane.xlu1 %1880  ;;  %4033 = vrcp.f32 %v2335_v34  ;;  %v2959_v16 = vadd.f32 1e-10, %v2647_v61  ;;  %vm2650_vm9 = vcmp.eq.f32.partialorder %v5843_v53, inf  ;;  %1798 = vst.msk [vmem:[%s7837_s6 + $0xac] sm:$0xf] %vm1514_vm1, %v3846_v26  ;;  %v663_v63 = vpop.f32.mrb[95].mxu0  ;;  %v2469_v61 = vmul.f32 %v5839_v58, %v5839_v58 }
 0x1b4   :  { %v5992_v1 = vpop.xlane.xlu0 %2501  ;;  %v6017_v35 = vpop.f32.mrb[94].mxu1  ;;  %vm2652_vm10 = vcmp.eq.f32.partialorder %v5843_v53, 0.0  ;;  %v1845_v34 = vmul.f32 %v5901_v19, %v5901_v19  ;;  %v6028_v26 = vmax.f32 %v651_v37, 0.0  ;;  %4035 = vrsqrt.f32 %v5922_v56 }
 0x1b5   :  { %v4026_v48 = vpop.eup %4025  ;;  %v1224_v31 = vpop.f32.mrb[95].mxu1  ;;  %4037 = vrcp.f32 %v2958_v49  ;;  %v2034_v63 = vsel %vm2033_vm7, %v5841_v46, %v2032_v7  ;;  %v2653_v25 = vand.u32 2147483648, %v5843_v53  ;;  %v2336_v49 = vadd.f32 1e-10, %v2030_v62 }
 0x1b6   :  { %v2649_v36 = vmul.f32 %v4026_v48, %v5843_v53  ;;  %7988 = vst [vmem:[#allocation74_spill] sm:$0xff] %v6028_v26  ;;  %v2599_v31 = vsel %vm1851_vm2, %v2469_v61, 0.0  ;;  %v1978_v38 = vsel %vm1851_vm2, %v1845_v34, 0.0  ;;  %4039 = vrcp.f32 %v2959_v16 }
 0x1b7   :  { %v6031_v17 = vpop.xlane.xlu1 %2504  ;;  %v2037_v4 = vsel %vm2035_vm8, %v2036_v27, %v2034_v63  ;;  %v3799_v37 = vpack.c.bf16 %v6028_v26, %v6028_v26  ;;  %2600 = vadd.xlane.f32.xlu1 %v2599_v31  ;;  %1979 = vadd.xlane.f32.xlu0 %v1978_v38  ;;  %vm2657_vm11 = vcmp.eq.f32.partialorder %v5884_v29, inf  ;;  %4041 = vrsqrt.f32 %v5924_v14  ;;  %v4028_v61 = vpop.eup %4027 }
 0x1b8   :  { %v6033_v33 = vpop.xlane.xlu0 %1883  ;;  %v2651_v48 = vsel %vm2650_vm9, %v5843_v53, %v2649_v36  ;;  %vm2659_vm12 = vcmp.eq.f32.partialorder %v5884_v29, 0.0  ;;  %v2660_v46 = vand.u32 2147483648, %v5884_v29  ;;  %vm2040_vm13 = vcmp.eq.f32.partialorder %v5886_v22, inf }
 0x1b9   :  { %1559 = vst.msk [vmem:[%s7836_s5 + $0xb0] sm:$0xf] %vm1514_vm1, %v3799_v37  ;;  %v654_v27 = vadd.f32 %v5477_v41, %v5930_v6  ;;  %v2337_v34 = vadd.f32 1e-10, %v2037_v4  ;;  %v1212_v62 = vadd.f32 %v5477_v41, %v5905_v8  ;;  %v1846_v36 = vmul.f32 %v5968_v42, %v5968_v42  ;;  %v6069_v31 = vpop.eup %4029 }
 0x1ba   :  { %v2470_v63 = vmul.f32 %v5970_v55, %v5970_v55  ;;  %v2654_v6 = vsel %vm2652_vm10, %v2653_v25, %v2651_v48  ;;  %v2656_v38 = vmul.f32 %v4028_v61, %v5884_v29  ;;  %v1215_v4 = vadd.f32 %v5477_v41, %v5932_v10 }
 0x1bb   :  { %v6059_v16 = vpop.xlane.xlu1 %1886  ;;  %v6074_v37 = vmax.f32 %v654_v27, 0.0  ;;  %v6078_v8 = vmax.f32 %v1212_v62, 0.0  ;;  %v1981_v42 = vsel %vm1851_vm2, %v1846_v36, 0.0  ;;  %4043 = vrsqrt.f32 %v5961_v11 }
 0x1bc   :  { %v6061_v7 = vpop.xlane.xlu0 %2507  ;;  %v4032_v19 = vpop.eup %4031  ;;  %v2602_v58 = vsel %vm1851_vm2, %v2470_v63, 0.0  ;;  %v2658_v53 = vsel %vm2657_vm11, %v5884_v29, %v2656_v38  ;;  %1982 = vadd.xlane.f32.xlu1 %v1981_v42  ;;  %v6091_v48 = vmax.f32 %v1215_v4, 0.0  ;;  %4045 = vrcp.f32 %v2336_v49 }
 0x1bd   :  { %7989 = vst [vmem:[#allocation75_spill] sm:$0xff] %v6074_v37  ;;  %7990 = vst [vmem:[#allocation76_spill] sm:$0xff] %v6078_v8  ;;  %v6083_v55 = vpop.eup %4033  ;;  %v2039_v25 = vmul.f32 %v4032_v19, %v5886_v22  ;;  %v3800_v10 = vpack.c.bf16 %v6074_v37, %v6074_v37  ;;  %2603 = vadd.xlane.f32.xlu0 %v2602_v58  ;;  %vm2042_vm14 = vcmp.eq.f32.partialorder %v5886_v22, 0.0  ;;  %v2043_v61 = vand.u32 2147483648, %v5886_v22 }
 0x1be   :  { %v3847_v62 = vpack.c.bf16 %v6078_v8, %v6078_v8  ;;  %v4036_v19 = vpop.eup %4035  ;;  %v2960_v63 = vadd.f32 1e-10, %v2654_v6  ;;  %v2661_v42 = vsel %vm2659_vm12, %v2660_v46, %v2658_v53  ;;  %vm2047_vm15 = vcmp.eq.f32.partialorder %v5922_v56, inf }
 0x1bf   :  { %v6093_v27 = vpop.xlane.xlu1 %2510  ;;  %1560 = vst.msk [vmem:[%s7836_s5 + $0xb4] sm:$0xf] %vm1514_vm1, %v3800_v10  ;;  %v3848_v58 = vpack.c.bf16 %v6091_v48, %v6091_v48  ;;  %v6110_v49 = vpop.eup %4037  ;;  %v2041_v38 = vsel %vm2040_vm13, %v5886_v22, %v2039_v25  ;;  %vm2049_vm0 = vcmp.eq.f32.partialorder %v5922_v56, 0.0  ;;  %v2050_v29 = vand.u32 2147483648, %v5922_v56 }
 0x1c0   :  { %v6099_v36 = vpop.xlane.xlu0 %1889  ;;  %1799 = vst.msk [vmem:[%s7837_s6 + $0xb0] sm:$0xf] %vm1514_vm1, %v3847_v62  ;;  %4047 = vrsqrt.f32 %v5963_v30  ;;  %v6122_v46 = vpop.eup %4039  ;;  %v2046_v6 = vmul.f32 %v4036_v19, %v5922_v56  ;;  %vm2664_vm3 = vcmp.eq.f32.partialorder %v5924_v14, inf  ;;  %vm2666_vm4 = vcmp.eq.f32.partialorder %v5924_v14, 0.0 }
 0x1c1   :  { %4049 = vrcp.f32 %v2337_v34  ;;  %1800 = vst.msk [vmem:[%s7837_s6 + $0xb4] sm:$0xf] %vm1514_vm1, %v3848_v58  ;;  %v4042_v4 = vpop.eup %4041  ;;  %v2961_v53 = vadd.f32 1e-10, %v2661_v42  ;;  %v659_v25 = vadd.f32 %v5477_v41, %v5976_v32  ;;  %v2471_v10 = vmul.f32 %v5974_v18, %v5974_v18 }
 0x1c2   :  { %v1847_v34 = vmul.f32 %v6028_v26, %v6028_v26  ;;  %4051 = vrcp.f32 %v2960_v63  ;;  %v2044_v19 = vsel %vm2042_vm14, %v2043_v61, %v2041_v38  ;;  %v2663_v57 = vmul.f32 %v4042_v4, %v5924_v14 }
 0x1c3   :  { %v6137_v62 = vpop.xlane.xlu1 %1892  ;;  %v2667_v58 = vand.u32 2147483648, %v5924_v14  ;;  %vm2671_vm5 = vcmp.eq.f32.partialorder %v5961_v11, inf  ;;  %v6144_v42 = vmax.f32 %v659_v25, 0.0  ;;  %v2605_v32 = vsel %vm1851_vm2, %v2471_v10, 0.0 }
 0x1c4   :  { %v1984_v18 = vsel %vm1851_vm2, %v1847_v34, 0.0  ;;  %v6148_v47 = vpop.xlane.xlu0 %2513  ;;  %v2048_v63 = vsel %vm2047_vm15, %v5922_v56, %v2046_v6  ;;  %vm2673_vm6 = vcmp.eq.f32.partialorder %v5961_v11, 0.0  ;;  %v2674_v22 = vand.u32 2147483648, %v5961_v11  ;;  %2606 = vadd.xlane.f32.xlu1 %v2605_v32 }
 0x1c5   :  { %1985 = vadd.xlane.f32.xlu0 %v1984_v18  ;;  %4053 = vrsqrt.f32 %v5990_v2  ;;  %v4044_v61 = vpop.eup %4043  ;;  %v2338_v38 = vadd.f32 1e-10, %v2044_v19  ;;  %vm2054_vm7 = vcmp.eq.f32.partialorder %v5963_v30, inf  ;;  %v3801_v4 = vpack.c.bf16 %v6144_v42, %v6144_v42 }
 0x1c6   :  { %4055 = vrcp.f32 %v2961_v53  ;;  %v2665_v6 = vsel %vm2664_vm3, %v5924_v14, %v2663_v57  ;;  %v2670_v25 = vmul.f32 %v4044_v61, %v5961_v11  ;;  %vm2056_vm8 = vcmp.eq.f32.partialorder %v5963_v30, 0.0  ;;  %v6165_v18 = vpop.eup %4045 }
 0x1c7   :  { %4057 = vrsqrt.f32 %v5992_v1  ;;  %v2051_v53 = vsel %vm2049_vm0, %v2050_v29, %v2048_v63  ;;  %1561 = vst.msk [vmem:[%s7836_s5 + $0xb8] sm:$0xf] %vm1514_vm1, %v3801_v4  ;;  %v662_v10 = vadd.f32 %v5477_v41, %v6008_v28  ;;  %v1220_v57 = vadd.f32 %v5477_v41, %v5985_v0  ;;  %v6179_v19 = vpop.xlane.xlu1 %2516  ;;  %v4390_v28 = vld [vmem:[%s7835_s3] ss:$0 sm:$0xff] }
 0x1c8   :  { %v1848_v34 = vmul.f32 %v6074_v37, %v6074_v37  ;;  %v2672_v56 = vsel %vm2671_vm5, %v5961_v11, %v2670_v25  ;;  %v2057_v29 = vand.u32 2147483648, %v5963_v30  ;;  %v2472_v32 = vmul.f32 %v6078_v8, %v6078_v8  ;;  %v6198_v37 = vpop.xlane.xlu0 %1895 }
 0x1c9   :  { %v1223_v41 = vadd.f32 %v4390_v28, %v6017_v35  ;;  %v2668_v63 = vsel %vm2666_vm4, %v2667_v58, %v2665_v6  ;;  %v6193_v61 = vmax.f32 %v662_v10, 0.0  ;;  %v6195_v4 = vmax.f32 %v1220_v57, 0.0 }
 0x1ca   :  { %v4048_v0 = vpop.eup %4047  ;;  %v1987_v25 = vsel %vm1851_vm2, %v1848_v34, 0.0  ;;  %v2339_v8 = vadd.f32 1e-10, %v2051_v53  ;;  %v2608_v35 = vsel %vm1851_vm2, %v2472_v32, 0.0  ;;  %v2675_v14 = vsel %vm2673_vm6, %v2674_v22, %v2672_v56 }
 0x1cb   :  { %v6200_v26 = vpop.eup %4049  ;;  %v2053_v43 = vmul.f32 %v4048_v0, %v5963_v30  ;;  %1988 = vadd.xlane.f32.xlu1 %v1987_v25  ;;  %v6204_v28 = vmax.f32 %v1223_v41, 0.0  ;;  %v3802_v58 = vpack.c.bf16 %v6193_v61, %v6193_v61  ;;  %v3849_v6 = vpack.c.bf16 %v6195_v4, %v6195_v4  ;;  %2609 = vadd.xlane.f32.xlu0 %v2608_v35 }
 0x1cc   :  { %4059 = vrsqrt.f32 %v6031_v17  ;;  %v6213_v53 = vpop.eup %4051  ;;  %v2962_v10 = vadd.f32 1e-10, %v2668_v63  ;;  %vm2061_vm9 = vcmp.eq.f32.partialorder %v5990_v2, inf  ;;  %vm2063_vm10 = vcmp.eq.f32.partialorder %v5990_v2, 0.0  ;;  %v6249_v41 = vpop.xlane.xlu0 %2519 }
 0x1cd   :  { %4061 = vrcp.f32 %v2338_v38  ;;  %v2055_v57 = vsel %vm2054_vm7, %v5963_v30, %v2053_v43  ;;  %v3850_v11 = vpack.c.bf16 %v6204_v28, %v6204_v28  ;;  %1562 = vst.msk [vmem:[%s7836_s5 + $0xbc] sm:$0xf] %vm1514_vm1, %v3802_v58  ;;  %1801 = vst.msk [vmem:[%s7837_s6 + $0xb8] sm:$0xf] %vm1514_vm1, %v3849_v6  ;;  %v6233_v43 = vpop.xlane.xlu1 %1898  ;;  %v2963_v38 = vadd.f32 1e-10, %v2675_v14 }
 0x1ce   :  { %v2058_v22 = vsel %vm2056_vm8, %v2057_v29, %v2055_v57  ;;  %4063 = vrsqrt.f32 %v6033_v33  ;;  %v2064_v34 = vand.u32 2147483648, %v5990_v2  ;;  %v2473_v56 = vmul.f32 %v6091_v48, %v6091_v48 }
 0x1cf   :  { %v4054_v30 = vpop.eup %4053  ;;  %4065 = vrcp.f32 %v2339_v8  ;;  %1802 = vst.msk [vmem:[%s7837_s6 + $0xbc] sm:$0xf] %vm1514_vm1, %v3850_v11  ;;  %vm2678_vm11 = vcmp.eq.f32.partialorder %v5992_v1, inf  ;;  %v1849_v8 = vmul.f32 %v6144_v42, %v6144_v42  ;;  %v2340_v63 = vadd.f32 1e-10, %v2058_v22 }
 0x1d0   :  { %v6242_v29 = vpop.eup %4055  ;;  %v2060_v32 = vmul.f32 %v4054_v30, %v5990_v2  ;;  %4067 = vrsqrt.f32 %v6059_v16  ;;  %vm2680_vm1 = vcmp.eq.f32.partialorder %v5992_v1, 0.0  ;;  %v2611_v25 = vsel %vm1851_vm2, %v2473_v56, 0.0 }
 0x1d1   :  { %v4058_v0 = vpop.eup %4057  ;;  %4069 = vrcp.f32 %v2962_v10  ;;  %2612 = vadd.xlane.f32.xlu1 %v2611_v25  ;;  %v1990_v58 = vsel %vm1851_vm2, %v1849_v8, 0.0  ;;  %v2681_v10 = vand.u32 2147483648, %v5992_v1  ;;  %vm2685_vm12 = vcmp.eq.f32.partialorder %v6031_v17, inf }
 0x1d2   :  { %v2062_v35 = vsel %vm2061_vm9, %v5990_v2, %v2060_v32  ;;  %v2677_v14 = vmul.f32 %v4058_v0, %v5992_v1  ;;  %4071 = vrsqrt.f32 %v6061_v7  ;;  %1991 = vadd.xlane.f32.xlu0 %v1990_v58  ;;  %v1850_v22 = vmul.f32 %v6193_v61, %v6193_v61  ;;  %v6280_v0 = vpop.xlane.xlu0 %1901 }
 0x1d3   :  { %4073 = vrcp.f32 %v2963_v38  ;;  %v2065_v6 = vsel %vm2063_vm10, %v2064_v34, %v2062_v35  ;;  %v2474_v30 = vmul.f32 %v6195_v4, %v6195_v4  ;;  %v6270_v38 = vpop.xlane.xlu1 %2522  ;;  %vm2687_vm13 = vcmp.eq.f32.partialorder %v6031_v17, 0.0 }
 0x1d4   :  { %v2341_v57 = vadd.f32 1e-10, %v2065_v6  ;;  %v2679_v11 = vsel %vm2678_vm11, %v5992_v1, %v2677_v14  ;;  %v2688_v2 = vand.u32 2147483648, %v6031_v17  ;;  %vm2068_vm14 = vcmp.eq.f32.partialorder %v6033_v33, inf }
 0x1d5   :  { %4075 = vrsqrt.f32 %v6093_v27  ;;  %v2682_v56 = vsel %vm2680_vm1, %v2681_v10, %v2679_v11  ;;  %v1993_v32 = vsel %vm1851_vm2, %v1850_v22, 0.0  ;;  %v2614_v8 = vsel %vm1851_vm2, %v2474_v30, 0.0 }
 0x1d6   :  { %v4060_v34 = vpop.eup %4059  ;;  %4077 = vrcp.f32 %v2340_v63  ;;  %vm2070_vm15 = vcmp.eq.f32.partialorder %v6033_v33, 0.0  ;;  %v2071_v14 = vand.u32 2147483648, %v6033_v33  ;;  %1994 = vadd.xlane.f32.xlu1 %v1993_v32  ;;  %2615 = vadd.xlane.f32.xlu0 %v2614_v8  ;;  %vm2075_vm0 = vcmp.eq.f32.partialorder %v6059_v16, inf }
 0x1d7   :  { %v6282_v25 = vpop.eup %4061  ;;  %v2684_v35 = vmul.f32 %v4060_v34, %v6031_v17  ;;  %4079 = vrsqrt.f32 %v6099_v36  ;;  %vm2077_vm3 = vcmp.eq.f32.partialorder %v6059_v16, 0.0  ;;  %v2475_v63 = vmul.f32 %v6204_v28, %v6204_v28  ;;  %v6303_v34 = vpop.xlane.xlu1 %1904 }
 0x1d8   :  { %v4064_v1 = vpop.eup %4063  ;;  %4081 = vrcp.f32 %v2341_v57  ;;  %v2964_v6 = vadd.f32 1e-10, %v2682_v56  ;;  %v2078_v57 = vand.u32 2147483648, %v6059_v16  ;;  %vm2692_vm4 = vcmp.eq.f32.partialorder %v6061_v7, inf }
 0x1d9   :  { %v6292_v58 = vpop.eup %4065  ;;  %v2686_v10 = vsel %vm2685_vm12, %v6031_v17, %v2684_v35  ;;  %v2067_v11 = vmul.f32 %v4064_v1, %v6033_v33  ;;  %4083 = vrcp.f32 %v5864_v39  ;;  %v2617_v30 = vsel %vm1851_vm2, %v2475_v63, 0.0  ;;  %v6319_v63 = vpop.xlane.xlu0 %2525 }
 0x1da   :  { %v4068_v22 = vpop.eup %4067  ;;  %4085 = vrcp.f32 %v5897_v5  ;;  %vm2694_vm5 = vcmp.eq.f32.partialorder %v6061_v7, 0.0  ;;  %2618 = vadd.xlane.f32.xlu1 %v2617_v30  ;;  %v2689_v35 = vsel %vm2687_vm13, %v2688_v2, %v2686_v10  ;;  %v2695_v1 = vand.u32 2147483648, %v6061_v7 }
 0x1db   :  { %v6305_v56 = vpop.eup %4069  ;;  %v2069_v32 = vsel %vm2068_vm14, %v6033_v33, %v2067_v11  ;;  %v2074_v8 = vmul.f32 %v4068_v22, %v6059_v16  ;;  %4087 = vrsqrt.f32 %v6137_v62  ;;  %vm2699_vm6 = vcmp.eq.f32.partialorder %v6093_v27, inf }
 0x1dc   :  { %v4072_v39 = vpop.eup %4071  ;;  %v2072_v5 = vsel %vm2070_vm15, %v2071_v14, %v2069_v32  ;;  %4089 = vrsqrt.f32 %v6148_v47  ;;  %vm2701_vm7 = vcmp.eq.f32.partialorder %v6093_v27, 0.0  ;;  %v2702_v17 = vand.u32 2147483648, %v6093_v27 }
 0x1dd   :  { %v6321_v11 = vpop.eup %4073  ;;  %4091 = vrcp.f32 %v2964_v6  ;;  %v2076_v22 = vsel %vm2075_vm0, %v6059_v16, %v2074_v8  ;;  %v2691_v30 = vmul.f32 %v4072_v39, %v6061_v7  ;;  %vm2082_vm8 = vcmp.eq.f32.partialorder %v6099_v36, inf  ;;  %v6346_v16 = vpop.xlane.xlu1 %2528 }
 0x1de   :  { %4093 = vrcp.f32 %v5943_v45  ;;  %v2965_v2 = vadd.f32 1e-10, %v2689_v35  ;;  %v2342_v14 = vadd.f32 1e-10, %v2072_v5  ;;  %v2079_v6 = vsel %vm2077_vm3, %v2078_v57, %v2076_v22 }
 0x1df   :  { %v4076_v33 = vpop.eup %4075  ;;  %v2693_v10 = vsel %vm2692_vm4, %v6061_v7, %v2691_v30  ;;  %vm2084_vm9 = vcmp.eq.f32.partialorder %v6099_v36, 0.0  ;;  %4095 = vrcp.f32 %v5888_v3  ;;  %v3102_v45 = vmul.f32 %v6110_v49, %v4851_v15  ;;  %v6360_v49 = vpop.xlane.xlu0 %1907 }
 0x1e0   :  { %v6338_v32 = vpop.eup %4077  ;;  %v2696_v8 = vsel %vm2694_vm5, %v2695_v1, %v2693_v10  ;;  %v2698_v39 = vmul.f32 %v4076_v33, %v6093_v27  ;;  %v2085_v35 = vand.u32 2147483648, %v6099_v36  ;;  %vm2089_vm10 = vcmp.eq.f32.partialorder %v6137_v62, inf }
 0x1e1   :  { %v4080_v57 = vpop.eup %4079  ;;  %vm2091_vm11 = vcmp.eq.f32.partialorder %v6137_v62, 0.0  ;;  %v3054_v7 = vmul.f32 %v6069_v31, %v4848_v12  ;;  %v2343_v1 = vadd.f32 1e-10, %v2079_v6  ;;  %4097 = vrsqrt.f32 %v6179_v19 }
 0x1e2   :  { %v6353_v5 = vpop.eup %4081  ;;  %v2700_v3 = vsel %vm2699_vm6, %v6093_v27, %v2698_v39  ;;  %v2081_v15 = vmul.f32 %v4080_v57, %v6099_v36  ;;  %4099 = vrcp.f32 %v2965_v2  ;;  %v2966_v30 = vadd.f32 1e-10, %v2696_v8  ;;  %v6375_v57 = vpop.xlane.xlu1 %1910 }
 0x1e3   :  { %v4084_v22 = vpop.eup %4083  ;;  %v2703_v33 = vsel %vm2701_vm7, %v2702_v17, %v2700_v3  ;;  %v3150_v12 = vsub.f32 %v3054_v7, %v3102_v45  ;;  %4101 = vrcp.f32 %v2342_v14  ;;  %v2092_v6 = vand.u32 2147483648, %v6137_v62 }
 0x1e4   :  { %v4086_v31 = vpop.eup %4085  ;;  %vm2706_vm1 = vcmp.eq.f32.partialorder %v6148_v47, inf  ;;  %vm2708_vm12 = vcmp.eq.f32.partialorder %v6148_v47, 0.0  ;;  %v2083_v39 = vsel %vm2082_vm8, %v6099_v36, %v2081_v15  ;;  %v3052_v2 = vmul.f32 %v4084_v22, %v4804_v51 }
 0x1e5   :  { %v4088_v10 = vpop.eup %4087  ;;  %v3100_v8 = vmul.f32 %v4086_v31, %v4806_v52  ;;  %4103 = vrsqrt.f32 %v6198_v37  ;;  %v2967_v17 = vadd.f32 1e-10, %v2703_v33  ;;  %v2709_v45 = vand.u32 2147483648, %v6148_v47 }
 0x1e6   :  { %v4090_v27 = vpop.eup %4089  ;;  %4105 = vrcp.f32 %v2343_v1  ;;  %v2088_v14 = vmul.f32 %v4088_v10, %v6137_v62  ;;  %v3198_v51 = vmul.f32 %v3150_v12, %v3150_v12  ;;  %v2086_v52 = vsel %vm2084_vm9, %v2085_v35, %v2083_v39  ;;  %v6385_v1 = vld [vmem:[%s7838_s4] ss:$0 sm:$0xff]  ;;  %v6394_v12 = vpop.xlane.xlu0 %2531 }
 0x1e7   :  { %v6377_v7 = vpop.eup %4091  ;;  %4107 = vrcp.f32 %v2966_v30  ;;  %v3148_v3 = vsub.f32 %v3052_v2, %v3100_v8  ;;  %v2705_v15 = vmul.f32 %v4090_v27, %v6148_v47  ;;  %v3055_v30 = vmul.f32 %v6083_v55, %v4859_v21 }
 0x1e8   :  { %v4094_v22 = vpop.eup %4093  ;;  %v2090_v33 = vsel %vm2089_vm10, %v6137_v62, %v2088_v14  ;;  %v3103_v31 = vmul.f32 %v6122_v46, %v4863_v23  ;;  %4109 = vrcp.f32 %v2967_v17  ;;  %vm2713_vm13 = vcmp.eq.f32.partialorder %v6179_v19, inf  ;;  %v6413_v14 = vpop.xlane.xlu1 %2534 }
 0x1e9   :  { %v3196_v10 = vmul.f32 %v3148_v3, %v3148_v3  ;;  %v2093_v36 = vsel %vm2091_vm11, %v2092_v6, %v2090_v33  ;;  %v2707_v35 = vsel %vm2706_vm1, %v6148_v47, %v2705_v15  ;;  %v3053_v39 = vmul.f32 %v4094_v22, %v4814_v59  ;;  %v4096_v2 = vpop.eup %4095 }
 0x1ea   :  { %vm2715_vm14 = vcmp.eq.f32.partialorder %v6179_v19, 0.0  ;;  %v3151_v21 = vsub.f32 %v3055_v30, %v3103_v31  ;;  %v2344_v23 = vadd.f32 1e-10, %v2086_v52  ;;  %v3101_v46 = vmul.f32 %v4096_v2, %v4816_v60 }
 0x1eb   :  { %v3251_v55 = vmul.f32 %v6385_v1, %v3196_v10  ;;  %v3104_v62 = vmul.f32 %v6213_v53, %v4899_v44  ;;  %v4098_v6 = vpop.eup %4097  ;;  %v2345_v8 = vadd.f32 1e-10, %v2093_v36  ;;  %v2710_v59 = vsel %vm2708_vm12, %v2709_v45, %v2707_v35 }
 0x1ec   :  { %v3253_v27 = vmul.f32 %v6385_v1, %v3198_v51  ;;  %v3056_v17 = vmul.f32 %v6165_v18, %v4896_v40  ;;  %v6415_v3 = vpop.eup %4099  ;;  %v3149_v60 = vsub.f32 %v3053_v39, %v3101_v46  ;;  %v2712_v22 = vmul.f32 %v4098_v6, %v6179_v19  ;;  %v6424_v40 = vpop.xlane.xlu0 %1913 }
 0x1ed   :  { %v3299_v15 = vsel %vm1851_vm2, %v3251_v55, 0.0  ;;  %v3199_v44 = vmul.f32 %v3151_v21, %v3151_v21  ;;  %v6419_v53 = vpop.eup %4101  ;;  %v2716_v47 = vand.u32 2147483648, %v6179_v19  ;;  %vm2096_vm15 = vcmp.eq.f32.partialorder %v6198_v37, inf  ;;  %v6448_v6 = vpop.xlane.xlu1 %1916 }
 0x1ee   :  { %3300 = vadd.xlane.f32.xlu0 %v3299_v15  ;;  %v3152_v45 = vsub.f32 %v3056_v17, %v3104_v62  ;;  %4111 = vrsqrt.f32 %v6233_v43  ;;  %v2968_v51 = vadd.f32 1e-10, %v2710_v59  ;;  %v3197_v52 = vmul.f32 %v3149_v60, %v3149_v60 }
 0x1ef   :  { %v4104_v18 = vpop.eup %4103  ;;  %v2714_v33 = vsel %vm2713_vm13, %v6179_v19, %v2712_v22  ;;  %4113 = vrsqrt.f32 %v6249_v41  ;;  %v3305_v31 = vsel %vm1851_vm2, %v3253_v27, 0.0  ;;  %v3254_v21 = vmul.f32 %v6385_v1, %v3199_v44 }
 0x1f0   :  { %v6430_v30 = vpop.eup %4105  ;;  %4115 = vrcp.f32 %v2344_v23  ;;  %v2095_v10 = vmul.f32 %v4104_v18, %v6198_v37  ;;  %v3200_v36 = vmul.f32 %v3152_v45, %v3152_v45  ;;  %v3252_v39 = vmul.f32 %v6385_v1, %v3197_v52 }
 0x1f1   :  { %v6434_v35 = vpop.eup %4107  ;;  %4117 = vrcp.f32 %v2345_v8  ;;  %v2717_v2 = vsel %vm2715_vm14, %v2716_v47, %v2714_v33  ;;  %v3057_v46 = vmul.f32 %v6200_v26, %v4907_v50  ;;  %v3105_v62 = vmul.f32 %v6242_v29, %v4911_v54  ;;  %v6458_v54 = vpop.xlane.xlu0 %2537 }
 0x1f2   :  { %3306 = vadd.xlane.f32.xlu0 %v3305_v31  ;;  %v2097_v23 = vsel %vm2096_vm15, %v6198_v37, %v2095_v10  ;;  %v3255_v55 = vmul.f32 %v6385_v1, %v3200_v36  ;;  %4119 = vrcp.f32 %v2968_v51  ;;  %v3302_v19 = vsel %vm1851_vm2, %v3252_v39, 0.0  ;;  %v6453_v59 = vpop.eup %4109  ;;  %v6474_v51 = vpop.xlane.xlu1 %2540 }
 0x1f3   :  { %vm2098_vm0 = vcmp.eq.f32.partialorder %v6198_v37, 0.0  ;;  %v2099_v8 = vand.u32 2147483648, %v6198_v37  ;;  %3303 = vadd.xlane.f32.xlu1 %v3302_v19  ;;  %vm2103_vm3 = vcmp.eq.f32.partialorder %v6233_v43, inf  ;;  %v3153_v50 = vsub.f32 %v3057_v46, %v3105_v62 }
 0x1f4   :  { %v3311_v27 = vsel %vm1851_vm2, %v3255_v55, 0.0  ;;  %4121 = vrsqrt.f32 %v6270_v38  ;;  %v2969_v26 = vadd.f32 1e-10, %v2717_v2  ;;  %vm2105_vm4 = vcmp.eq.f32.partialorder %v6233_v43, 0.0 }
 0x1f5   :  { %v2100_v29 = vsel %vm2098_vm0, %v2099_v8, %v2097_v23  ;;  %4123 = vrsqrt.f32 %v6280_v0  ;;  %v3308_v37 = vsel %vm1851_vm2, %v3254_v21, 0.0  ;;  %v2106_v17 = vand.u32 2147483648, %v6233_v43  ;;  %v6485_v10 = vpop.xlane.xlu0 %1919 }
 0x1f6   :  { %3312 = vadd.xlane.f32.xlu0 %v3311_v27  ;;  %vm2720_vm5 = vcmp.eq.f32.partialorder %v6249_v41, inf  ;;  %v3201_v15 = vmul.f32 %v3153_v50, %v3153_v50  ;;  %vm2722_vm6 = vcmp.eq.f32.partialorder %v6249_v41, 0.0  ;;  %v3058_v60 = vmul.f32 %v6282_v25, %v4944_v9  ;;  %v6511_v8 = vpop.xlane.xlu1 %1922 }
 0x1f7   :  { %v3106_v22 = vmul.f32 %v6305_v56, %v4947_v13  ;;  %4125 = vrsqrt.f32 %v6303_v34  ;;  %v2346_v47 = vadd.f32 1e-10, %v2100_v29  ;;  %3309 = vadd.xlane.f32.xlu1 %v3308_v37  ;;  %v2723_v45 = vand.u32 2147483648, %v6249_v41 }
 0x1f8   :  { %v4112_v44 = vpop.eup %4111  ;;  %v3256_v18 = vmul.f32 %v6385_v1, %v3201_v15  ;;  %4127 = vrsqrt.f32 %v6319_v63  ;;  %vm2727_vm7 = vcmp.eq.f32.partialorder %v6270_v38, inf  ;;  %vm2729_vm8 = vcmp.eq.f32.partialorder %v6270_v38, 0.0 }
 0x1f9   :  { %v4114_v52 = vpop.eup %4113  ;;  %4129 = vrcp.f32 %v2969_v26  ;;  %v2102_v9 = vmul.f32 %v4112_v44, %v6233_v43  ;;  %v3154_v13 = vsub.f32 %v3058_v60, %v3106_v22  ;;  %v3059_v31 = vmul.f32 %v6292_v58, %v4955_v20  ;;  %v6518_v15 = vpop.xlane.xlu0 %2543 }
 0x1fa   :  { %v6478_v25 = vpop.eup %4115  ;;  %v2719_v56 = vmul.f32 %v4114_v52, %v6249_v41  ;;  %v3314_v33 = vsel %vm1851_vm2, %v3256_v18, 0.0  ;;  %v3107_v21 = vmul.f32 %v6321_v11, %v4959_v24  ;;  %4131 = vrsqrt.f32 %v6346_v16  ;;  %v7992_v18 = vld [vmem:[#allocation3_spill] sm:$0xff] }
 0x1fb   :  { %v6487_v36 = vpop.eup %4117  ;;  %v2104_v39 = vsel %vm2103_vm3, %v6233_v43, %v2102_v9  ;;  %v3202_v2 = vmul.f32 %v3154_v13, %v3154_v13  ;;  %4133 = vrcp.f32 %v2346_v47  ;;  %3315 = vadd.xlane.f32.xlu1 %v3314_v33  ;;  %v2730_v20 = vand.u32 2147483648, %v6270_v38  ;;  %v7991_v47 = vld [vmem:[#allocation2_spill] sm:$0xff] }
 0x1fc   :  { %v2721_v23 = vsel %vm2720_vm5, %v6249_v41, %v2719_v56  ;;  %vm2110_vm9 = vcmp.eq.f32.partialorder %v6280_v0, inf  ;;  %v6500_v58 = vpop.eup %4119  ;;  %v2107_v55 = vsel %vm2105_vm4, %v2106_v17, %v2104_v39  ;;  %v3155_v46 = vsub.f32 %v3059_v31, %v3107_v21  ;;  %v6546_v21 = vpop.xlane.xlu1 %2546 }
 0x1fd   :  { %v2724_v24 = vsel %vm2722_vm6, %v2723_v45, %v2721_v23  ;;  %v3257_v11 = vmul.f32 %v6385_v1, %v3202_v2  ;;  %vm2112_vm10 = vcmp.eq.f32.partialorder %v6280_v0, 0.0  ;;  %v2113_v19 = vand.u32 2147483648, %v6280_v0 }
 0x1fe   :  { %v4122_v62 = vpop.eup %4121  ;;  %vm2117_vm11 = vcmp.eq.f32.partialorder %v6303_v34, inf  ;;  %4135 = vrsqrt.f32 %v6360_v49  ;;  %vm2119_vm1 = vcmp.eq.f32.partialorder %v6303_v34, 0.0  ;;  %v3203_v50 = vmul.f32 %v3155_v46, %v3155_v46 }
 0x1ff   :  { %v4124_v27 = vpop.eup %4123  ;;  %v2726_v43 = vmul.f32 %v4122_v62, %v6270_v38  ;;  %v3317_v41 = vsel %vm1851_vm2, %v3257_v11, 0.0  ;;  %v2347_v26 = vadd.f32 1e-10, %v2107_v55  ;;  %v2970_v29 = vadd.f32 1e-10, %v2724_v24 }
 0x200   :  { %v2109_v37 = vmul.f32 %v4124_v27, %v6280_v0  ;;  %3318 = vadd.xlane.f32.xlu0 %v3317_v41  ;;  %v2120_v17 = vand.u32 2147483648, %v6303_v34  ;;  %v3258_v44 = vmul.f32 %v6385_v1, %v3203_v50  ;;  %v3060_v45 = vmul.f32 %v6338_v32, %v7991_v47  ;;  %v6556_v27 = vpop.xlane.xlu0 %1925 }
 0x201   :  { %v4126_v60 = vpop.eup %4125  ;;  %v2728_v22 = vsel %vm2727_vm7, %v6270_v38, %v2726_v43  ;;  %v3108_v52 = vmul.f32 %v6377_v7, %v7992_v18  ;;  %4137 = vrsqrt.f32 %v6375_v57  ;;  %vm2734_vm12 = vcmp.eq.f32.partialorder %v6319_v63, inf }
 0x202   :  { %v4128_v9 = vpop.eup %4127  ;;  %v2731_v13 = vsel %vm2729_vm8, %v2730_v20, %v2728_v22  ;;  %v2111_v56 = vsel %vm2110_vm9, %v6280_v0, %v2109_v37  ;;  %v2116_v33 = vmul.f32 %v4126_v60, %v6303_v34  ;;  %vm2736_vm13 = vcmp.eq.f32.partialorder %v6319_v63, 0.0  ;;  %v7993_v22 = vld [vmem:[#allocation4_spill] sm:$0xff] }
 0x203   :  { %v6535_v31 = vpop.eup %4129  ;;  %v2733_v39 = vmul.f32 %v4128_v9, %v6319_v63  ;;  %v3320_v32 = vsel %vm1851_vm2, %v3258_v44, 0.0  ;;  %v2737_v7 = vand.u32 2147483648, %v6319_v63  ;;  %vm2741_vm14 = vcmp.eq.f32.partialorder %v6346_v16, inf  ;;  %v7994_v44 = vld [vmem:[#allocation5_spill] sm:$0xff] }
 0x204   :  { %v2118_v38 = vsel %vm2117_vm11, %v6303_v34, %v2116_v33  ;;  %3321 = vadd.xlane.f32.xlu1 %v3320_v32  ;;  %v3156_v2 = vsub.f32 %v3060_v45, %v3108_v52  ;;  %v4132_v23 = vpop.eup %4131  ;;  %4139 = vrcp.f32 %v2347_v26  ;;  %v2971_v20 = vadd.f32 1e-10, %v2731_v13  ;;  %v6577_v45 = vpop.xlane.xlu1 %1928 }
 0x205   :  { %v2114_v55 = vsel %vm2112_vm10, %v2113_v19, %v2111_v56  ;;  %v2735_v24 = vsel %vm2734_vm12, %v6319_v63, %v2733_v39  ;;  %v6551_v11 = vpop.eup %4133  ;;  %4141 = vrcp.f32 %v2970_v29  ;;  %v2740_v46 = vmul.f32 %v4132_v23, %v6346_v16 }
 0x206   :  { %vm2743_vm15 = vcmp.eq.f32.partialorder %v6346_v16, 0.0  ;;  %v2744_v62 = vand.u32 2147483648, %v6346_v16  ;;  %v2121_v43 = vsel %vm2119_vm1, %v2120_v17, %v2118_v38  ;;  %vm2124_vm0 = vcmp.eq.f32.partialorder %v6360_v49, inf }
 0x207   :  { %v3204_v0 = vmul.f32 %v3156_v2, %v3156_v2  ;;  %4143 = vrsqrt.f32 %v6394_v12  ;;  %v2348_v41 = vadd.f32 1e-10, %v2114_v55  ;;  %v2738_v50 = vsel %vm2736_vm13, %v2737_v7, %v2735_v24  ;;  %v7995_v2 = vld [vmem:[#allocation6_spill] sm:$0xff] }
 0x208   :  { %v4136_v19 = vpop.eup %4135  ;;  %v2742_v26 = vsel %vm2741_vm14, %v6346_v16, %v2740_v46  ;;  %vm2126_vm3 = vcmp.eq.f32.partialorder %v6360_v49, 0.0  ;;  %4145 = vrcp.f32 %v2971_v20  ;;  %v2127_v29 = vand.u32 2147483648, %v6360_v49  ;;  %v7996_v20 = vld [vmem:[#allocation7_spill] sm:$0xff] }
 0x209   :  { %v2123_v34 = vmul.f32 %v4136_v19, %v6360_v49  ;;  %v3259_v37 = vmul.f32 %v6385_v1, %v3204_v0  ;;  %v2349_v17 = vadd.f32 1e-10, %v2121_v43  ;;  %v2745_v60 = vsel %vm2743_vm15, %v2744_v62, %v2742_v26  ;;  %v6607_v62 = vpop.xlane.xlu1 %2552 }
 0x20a   :  { %v3061_v63 = vmul.f32 %v6353_v5, %v7993_v22  ;;  %v3109_v47 = vmul.f32 %v6415_v3, %v7994_v44  ;;  %v2972_v18 = vadd.f32 1e-10, %v2738_v50  ;;  %4147 = vrsqrt.f32 %v6413_v14  ;;  %v6586_v5 = vpop.xlane.xlu0 %2549 }
 0x20b   :  { %v2125_v52 = vsel %vm2124_vm0, %v6360_v49, %v2123_v34  ;;  %v3323_v9 = vsel %vm1851_vm2, %v3259_v37, 0.0  ;;  %v4138_v13 = vpop.eup %4137  ;;  %4149 = vrcp.f32 %v2348_v41  ;;  %vm2131_vm4 = vcmp.eq.f32.partialorder %v6375_v57, inf  ;;  %v7997_v37 = vld [vmem:[#allocation8_spill] sm:$0xff] }
 0x20c   :  { %3324 = vadd.xlane.f32.xlu0 %v3323_v9  ;;  %vm2133_vm5 = vcmp.eq.f32.partialorder %v6375_v57, 0.0  ;;  %v3157_v16 = vsub.f32 %v3061_v63, %v3109_v47  ;;  %v2973_v3 = vadd.f32 1e-10, %v2745_v60  ;;  %v2130_v56 = vmul.f32 %v4138_v13, %v6375_v57  ;;  %v7998_v60 = vld [vmem:[#allocation9_spill] sm:$0xff] }
 0x20d   :  { %v2134_v33 = vand.u32 2147483648, %v6375_v57  ;;  %4151 = vrsqrt.f32 %v6424_v40  ;;  %v2128_v39 = vsel %vm2126_vm3, %v2127_v29, %v2125_v52  ;;  %vm2748_vm6 = vcmp.eq.f32.partialorder %v6394_v12, inf  ;;  %v6637_v13 = vpop.xlane.xlu1 %1934 }
 0x20e   :  { %4153 = vrcp.f32 %v2349_v17  ;;  %v3205_v32 = vmul.f32 %v3157_v16, %v3157_v16  ;;  %v6594_v38 = vpop.eup %4139  ;;  %v2132_v7 = vsel %vm2131_vm4, %v6375_v57, %v2130_v56  ;;  %v3062_v23 = vmul.f32 %v6419_v53, %v7995_v2  ;;  %v6615_v50 = vpop.xlane.xlu0 %1931 }
 0x20f   :  { %4155 = vrcp.f32 %v2972_v18  ;;  %v3110_v55 = vmul.f32 %v6434_v35, %v7996_v20  ;;  %v6601_v24 = vpop.eup %4141  ;;  %vm2750_vm7 = vcmp.eq.f32.partialorder %v6394_v12, 0.0  ;;  %v2751_v49 = vand.u32 2147483648, %v6394_v12 }
 0x210   :  { %v3260_v46 = vmul.f32 %v6385_v1, %v3205_v32  ;;  %4157 = vrsqrt.f32 %v6448_v6  ;;  %v2350_v0 = vadd.f32 1e-10, %v2128_v39  ;;  %vm2755_vm8 = vcmp.eq.f32.partialorder %v6413_v14, inf }
 0x211   :  { %v4144_v43 = vpop.eup %4143  ;;  %4159 = vrcp.f32 %v2973_v3  ;;  %v3158_v53 = vsub.f32 %v3062_v23, %v3110_v55  ;;  %v2135_v35 = vsel %vm2133_vm5, %v2134_v33, %v2132_v7  ;;  %vm2757_vm9 = vcmp.eq.f32.partialorder %v6413_v14, 0.0  ;;  %v7999_v23 = vld [vmem:[#allocation10_spill] sm:$0xff]  ;;  %v8000_v55 = vld [vmem:[#allocation11_spill] sm:$0xff] }
 0x212   :  { %v2747_v19 = vmul.f32 %v4144_v43, %v6394_v12  ;;  %v3326_v41 = vsel %vm1851_vm2, %v3260_v46, 0.0  ;;  %4161 = vrsqrt.f32 %v6458_v54  ;;  %v6617_v26 = vpop.eup %4145  ;;  %v2758_v34 = vand.u32 2147483648, %v6413_v14  ;;  %v6649_v7 = vpop.xlane.xlu0 %2555 }
 0x213   :  { %3327 = vadd.xlane.f32.xlu1 %v3326_v41  ;;  %vm2138_vm10 = vcmp.eq.f32.partialorder %v6424_v40, inf  ;;  %v3206_v29 = vmul.f32 %v3158_v53, %v3158_v53  ;;  %v3063_v17 = vmul.f32 %v6430_v30, %v7997_v37  ;;  %v3111_v22 = vmul.f32 %v6453_v59, %v7998_v60  ;;  %v6675_v37 = vpop.xlane.xlu1 %2558 }
 0x214   :  { %v2749_v57 = vsel %vm2748_vm6, %v6394_v12, %v2747_v19  ;;  %4163 = vrsqrt.f32 %v6474_v51  ;;  %v4148_v63 = vpop.eup %4147  ;;  %v2351_v44 = vadd.f32 1e-10, %v2135_v35  ;;  %vm2140_vm11 = vcmp.eq.f32.partialorder %v6424_v40, 0.0 }
 0x215   :  { %v2141_v47 = vand.u32 2147483648, %v6424_v40  ;;  %v3261_v18 = vmul.f32 %v6385_v1, %v3206_v29  ;;  %v6633_v52 = vpop.eup %4149  ;;  %4165 = vrcp.f32 %v2350_v0  ;;  %v2754_v9 = vmul.f32 %v4148_v63, %v6413_v14 }
 0x216   :  { %vm2145_vm1 = vcmp.eq.f32.partialorder %v6448_v6, inf  ;;  %v3159_v30 = vsub.f32 %v3063_v17, %v3111_v22  ;;  %v2752_v16 = vsel %vm2750_vm7, %v2751_v49, %v2749_v57  ;;  %vm2147_vm12 = vcmp.eq.f32.partialorder %v6448_v6, 0.0 }
 0x217   :  { %v4152_v59 = vpop.eup %4151  ;;  %v3329_v3 = vsel %vm1851_vm2, %v3261_v18, 0.0  ;;  %4167 = vrsqrt.f32 %v6485_v10  ;;  %v2148_v39 = vand.u32 2147483648, %v6448_v6  ;;  %vm2762_vm13 = vcmp.eq.f32.partialorder %v6458_v54, inf  ;;  %v6687_v18 = vpop.xlane.xlu0 %1937 }
 0x218   :  { %v6644_v56 = vpop.eup %4153  ;;  %v2137_v33 = vmul.f32 %v4152_v59, %v6424_v40  ;;  %3330 = vadd.xlane.f32.xlu0 %v3329_v3  ;;  %v3207_v32 = vmul.f32 %v3159_v30, %v3159_v30  ;;  %4169 = vrcp.f32 %v2351_v44  ;;  %v2756_v2 = vsel %vm2755_vm8, %v6413_v14, %v2754_v9 }
 0x219   :  { %v6651_v12 = vpop.eup %4155  ;;  %v3064_v20 = vmul.f32 %v6478_v25, %v7999_v23  ;;  %v3112_v49 = vmul.f32 %v6500_v58, %v8000_v55  ;;  %v2974_v43 = vadd.f32 1e-10, %v2752_v16  ;;  %4171 = vrsqrt.f32 %v6511_v8 }
 0x21a   :  { %v4158_v46 = vpop.eup %4157  ;;  %v2139_v0 = vsel %vm2138_vm10, %v6424_v40, %v2137_v33  ;;  %v3262_v53 = vmul.f32 %v6385_v1, %v3207_v32  ;;  %vm2764_vm14 = vcmp.eq.f32.partialorder %v6458_v54, 0.0  ;;  %v2765_v25 = vand.u32 2147483648, %v6458_v54 }
 0x21b   :  { %v6665_v35 = vpop.eup %4159  ;;  %v2144_v19 = vmul.f32 %v4158_v46, %v6448_v6  ;;  %v3160_v41 = vsub.f32 %v3064_v20, %v3112_v49  ;;  %v2759_v29 = vsel %vm2757_vm9, %v2758_v34, %v2756_v2  ;;  %vm2769_vm15 = vcmp.eq.f32.partialorder %v6474_v51, inf  ;;  %v8001_v2 = vld [vmem:[#allocation12_spill] sm:$0xff]  ;;  %v8002_v49 = vld [vmem:[#allocation13_spill] sm:$0xff] }
 0x21c   :  { %v4162_v58 = vpop.eup %4161  ;;  %v3332_v57 = vsel %vm1851_vm2, %v3262_v53, 0.0  ;;  %vm2771_vm0 = vcmp.eq.f32.partialorder %v6474_v51, 0.0  ;;  %v2142_v17 = vsel %vm2140_vm11, %v2141_v47, %v2139_v0  ;;  %4173 = vrcp.f32 %v2974_v43 }
 0x21d   :  { %v2146_v60 = vsel %vm2145_vm1, %v6448_v6, %v2144_v19  ;;  %v2761_v22 = vmul.f32 %v4162_v58, %v6458_v54  ;;  %3333 = vadd.xlane.f32.xlu1 %v3332_v57  ;;  %v3208_v14 = vmul.f32 %v3160_v41, %v3160_v41  ;;  %v2772_v44 = vand.u32 2147483648, %v6474_v51 }
 0x21e   :  { %v4164_v34 = vpop.eup %4163  ;;  %v2149_v63 = vsel %vm2147_vm12, %v2148_v39, %v2146_v60  ;;  %vm2152_vm3 = vcmp.eq.f32.partialorder %v6485_v10, inf  ;;  %v2975_v40 = vadd.f32 1e-10, %v2759_v29  ;;  %v2352_v16 = vadd.f32 1e-10, %v2142_v17  ;;  %v8003_v17 = vld [vmem:[#allocation14_spill] sm:$0xff] }
 0x21f   :  { %v2763_v47 = vsel %vm2762_vm13, %v6458_v54, %v2761_v22  ;;  %v2768_v9 = vmul.f32 %v4164_v34, %v6474_v51  ;;  %v3263_v30 = vmul.f32 %v6385_v1, %v3208_v14  ;;  %v6694_v59 = vpop.eup %4165  ;;  %v2353_v6 = vadd.f32 1e-10, %v2149_v63  ;;  %v6712_v54 = vpop.xlane.xlu1 %1940  ;;  %v8004_v22 = vld [vmem:[#allocation15_spill] sm:$0xff] }
 0x220   :  { %vm2154_vm4 = vcmp.eq.f32.partialorder %v6485_v10, 0.0  ;;  %4175 = vrsqrt.f32 %v6518_v15  ;;  %v2766_v33 = vsel %vm2764_vm14, %v2765_v25, %v2763_v47  ;;  %v3065_v23 = vmul.f32 %v6487_v36, %v8001_v2 }
 0x221   :  { %v4168_v3 = vpop.eup %4167  ;;  %v2770_v39 = vsel %vm2769_vm15, %v6474_v51, %v2768_v9  ;;  %v3335_v32 = vsel %vm1851_vm2, %v3263_v30, 0.0  ;;  %v3113_v46 = vmul.f32 %v6535_v31, %v8002_v49  ;;  %4177 = vrsqrt.f32 %v6546_v21  ;;  %v6721_v31 = vpop.xlane.xlu0 %2561 }
 0x222   :  { %v2773_v20 = vsel %vm2771_vm0, %v2772_v44, %v2770_v39  ;;  %v2151_v55 = vmul.f32 %v4168_v3, %v6485_v10  ;;  %3336 = vadd.xlane.f32.xlu0 %v3335_v32  ;;  %v6714_v43 = vpop.eup %4169  ;;  %4179 = vrcp.f32 %v2975_v40  ;;  %v2155_v0 = vand.u32 2147483648, %v6485_v10  ;;  %v8005_v32 = vld [vmem:[#allocation16_spill] sm:$0xff] }
 0x223   :  { %vm2159_vm5 = vcmp.eq.f32.partialorder %v6511_v8, inf  ;;  %vm2161_vm6 = vcmp.eq.f32.partialorder %v6511_v8, 0.0  ;;  %v4172_v51 = vpop.eup %4171  ;;  %v2976_v36 = vadd.f32 1e-10, %v2766_v33  ;;  %v2162_v53 = vand.u32 2147483648, %v6511_v8  ;;  %v6743_v47 = vpop.xlane.xlu1 %2564 }
 0x224   :  { %v3161_v19 = vsub.f32 %v3065_v23, %v3113_v46  ;;  %4181 = vrsqrt.f32 %v6556_v27  ;;  %v2977_v25 = vadd.f32 1e-10, %v2773_v20  ;;  %v2153_v41 = vsel %vm2152_vm3, %v6485_v10, %v2151_v55  ;;  %v8006_v23 = vld [vmem:[#allocation17_spill] sm:$0xff] }
 0x225   :  { %4183 = vrcp.f32 %v2352_v16  ;;  %v2158_v58 = vmul.f32 %v4172_v51, %v6511_v8  ;;  %vm2776_vm7 = vcmp.eq.f32.partialorder %v6518_v15, inf  ;;  %vm2778_vm8 = vcmp.eq.f32.partialorder %v6518_v15, 0.0  ;;  %v6751_v30 = vpop.xlane.xlu0 %1943 }
 0x226   :  { %4185 = vrcp.f32 %v2353_v6  ;;  %v3209_v29 = vmul.f32 %v3161_v19, %v3161_v19  ;;  %v2779_v57 = vand.u32 2147483648, %v6518_v15  ;;  %v3066_v60 = vmul.f32 %v6551_v11, %v8003_v17  ;;  %v6735_v34 = vpop.eup %4173 }
 0x227   :  { %v3114_v14 = vmul.f32 %v6601_v24, %v8004_v22  ;;  %4187 = vrsqrt.f32 %v6577_v45  ;;  %v2156_v63 = vsel %vm2154_vm4, %v2155_v0, %v2153_v41  ;;  %v2160_v44 = vsel %vm2159_vm5, %v6511_v8, %v2158_v58 }
 0x228   :  { %4189 = vrcp.f32 %v2976_v36  ;;  %v3264_v40 = vmul.f32 %v6385_v1, %v3209_v29  ;;  %vm2783_vm9 = vcmp.eq.f32.partialorder %v6546_v21, inf  ;;  %vm2785_vm10 = vcmp.eq.f32.partialorder %v6546_v21, 0.0 }
 0x229   :  { %4191 = vrcp.f32 %v2977_v25  ;;  %v3162_v11 = vsub.f32 %v3066_v60, %v3114_v14  ;;  %v2786_v10 = vand.u32 2147483648, %v6546_v21  ;;  %vm2166_vm11 = vcmp.eq.f32.partialorder %v6556_v27, inf  ;;  %v6788_v17 = vpop.xlane.xlu0 %2567 }
 0x22a   :  { %v4176_v24 = vpop.eup %4175  ;;  %v3338_v9 = vsel %vm1851_vm2, %v3264_v40, 0.0  ;;  %4193 = vrsqrt.f32 %v6586_v5  ;;  %v2354_v16 = vadd.f32 1e-10, %v2156_v63  ;;  %v2163_v6 = vsel %vm2161_vm6, %v2162_v53, %v2160_v44  ;;  %v6773_v53 = vpop.xlane.xlu1 %1946 }
 0x22b   :  { %v2775_v3 = vmul.f32 %v4176_v24, %v6518_v15  ;;  %3339 = vadd.xlane.f32.xlu1 %v3338_v9  ;;  %v3210_v33 = vmul.f32 %v3162_v11, %v3162_v11  ;;  %v4178_v39 = vpop.eup %4177  ;;  %vm2168_vm1 = vcmp.eq.f32.partialorder %v6556_v27, 0.0  ;;  %v3067_v2 = vmul.f32 %v6594_v38, %v8005_v32 }
 0x22c   :  { %v3115_v20 = vmul.f32 %v6617_v26, %v8006_v23  ;;  %4195 = vrsqrt.f32 %v6607_v62  ;;  %v6762_v55 = vpop.eup %4179  ;;  %v2782_v49 = vmul.f32 %v4178_v39, %v6546_v21  ;;  %v2169_v46 = vand.u32 2147483648, %v6556_v27 }
 0x22d   :  { %v2777_v8 = vsel %vm2776_vm7, %v6518_v15, %v2775_v3  ;;  %v3265_v0 = vmul.f32 %v6385_v1, %v3210_v33  ;;  %v2355_v36 = vadd.f32 1e-10, %v2163_v6  ;;  %4197 = vrsqrt.f32 %v6615_v50  ;;  %v8008_v6 = vld [vmem:[#allocation19_spill] sm:$0xff] }
 0x22e   :  { %v4182_v51 = vpop.eup %4181  ;;  %v2780_v38 = vsel %vm2778_vm8, %v2779_v57, %v2777_v8  ;;  %v3163_v26 = vsub.f32 %v3067_v2, %v3115_v20  ;;  %4199 = vrcp.f32 %v2354_v16  ;;  %v2784_v25 = vsel %vm2783_vm9, %v6546_v21, %v2782_v49  ;;  %v6814_v23 = vpop.xlane.xlu1 %2570 }
 0x22f   :  { %v6775_v19 = vpop.eup %4183  ;;  %v2165_v41 = vmul.f32 %v4182_v51, %v6556_v27  ;;  %v3341_v58 = vsel %vm1851_vm2, %v3265_v0, 0.0  ;;  %v2787_v15 = vsel %vm2785_vm10, %v2786_v10, %v2784_v25  ;;  %vm2173_vm12 = vcmp.eq.f32.partialorder %v6577_v45, inf  ;;  %v8007_v10 = vld [vmem:[#allocation18_spill] sm:$0xff]  ;;  %v6823_v49 = vpop.xlane.xlu0 %1949 }
 0x230   :  { %v6782_v29 = vpop.eup %4185  ;;  %3342 = vadd.xlane.f32.xlu0 %v3341_v58  ;;  %vm2175_vm13 = vcmp.eq.f32.partialorder %v6577_v45, 0.0  ;;  %v3211_v57 = vmul.f32 %v3163_v26, %v3163_v26  ;;  %v2978_v22 = vadd.f32 1e-10, %v2780_v38  ;;  %v2176_v63 = vand.u32 2147483648, %v6577_v45 }
 0x231   :  { %v4188_v60 = vpop.eup %4187  ;;  %v2167_v14 = vsel %vm2166_vm11, %v6556_v27, %v2165_v41  ;;  %vm2790_vm14 = vcmp.eq.f32.partialorder %v6586_v5, inf  ;;  %4201 = vrcp.f32 %v2355_v36  ;;  %vm2792_vm15 = vcmp.eq.f32.partialorder %v6586_v5, 0.0 }
 0x232   :  { %v6795_v21 = vpop.eup %4189  ;;  %v2172_v44 = vmul.f32 %v4188_v60, %v6577_v45  ;;  %v3266_v40 = vmul.f32 %v6385_v1, %v3211_v57  ;;  %v2979_v24 = vadd.f32 1e-10, %v2787_v15  ;;  %v2793_v9 = vand.u32 2147483648, %v6586_v5  ;;  %v8009_v60 = vld [vmem:[#allocation20_spill] sm:$0xff] }
 0x233   :  { %v6800_v11 = vpop.eup %4191  ;;  %v3068_v16 = vmul.f32 %v6633_v52, %v8007_v10  ;;  %v3116_v3 = vmul.f32 %v6651_v12, %v8008_v6  ;;  %v2170_v39 = vsel %vm2168_vm1, %v2169_v46, %v2167_v14  ;;  %4203 = vrsqrt.f32 %v6637_v13  ;;  %v6857_v10 = vpop.xlane.xlu0 %2573 }
 0x234   :  { %v4194_v33 = vpop.eup %4193  ;;  %v2174_v32 = vsel %vm2173_vm12, %v6577_v45, %v2172_v44  ;;  %v3344_v2 = vsel %vm1851_vm2, %v3266_v40, 0.0  ;;  %4205 = vrcp.f32 %v2978_v22  ;;  %vm2797_vm0 = vcmp.eq.f32.partialorder %v6607_v62, inf }
 0x235   :  { %v2177_v52 = vsel %vm2175_vm13, %v2176_v63, %v2174_v32  ;;  %v2789_v12 = vmul.f32 %v4194_v33, %v6586_v5  ;;  %3345 = vadd.xlane.f32.xlu1 %v3344_v2  ;;  %v3164_v20 = vsub.f32 %v3068_v16, %v3116_v3  ;;  %vm2799_vm3 = vcmp.eq.f32.partialorder %v6607_v62, 0.0  ;;  %v6845_v63 = vpop.xlane.xlu1 %1952 }
 0x236   :  { %v4196_v27 = vpop.eup %4195  ;;  %v2800_v8 = vand.u32 2147483648, %v6607_v62  ;;  %4207 = vrsqrt.f32 %v6649_v7  ;;  %v2356_v46 = vadd.f32 1e-10, %v2170_v39  ;;  %v2357_v38 = vadd.f32 1e-10, %v2177_v52  ;;  %v8011_v52 = vld [vmem:[#allocation22_spill] sm:$0xff] }
 0x237   :  { %v2791_v45 = vsel %vm2790_vm14, %v6586_v5, %v2789_v12  ;;  %v2796_v0 = vmul.f32 %v4196_v27, %v6607_v62  ;;  %v3212_v51 = vmul.f32 %v3164_v20, %v3164_v20  ;;  %v4198_v36 = vpop.eup %4197  ;;  %4209 = vrcp.f32 %v2979_v24  ;;  %v8010_v5 = vld [vmem:[#allocation21_spill] sm:$0xff]  ;;  %v8012_v20 = vld [vmem:[#allocation23_spill] sm:$0xff] }
 0x238   :  { %v2794_v26 = vsel %vm2792_vm15, %v2793_v9, %v2791_v45  ;;  %vm2180_vm4 = vcmp.eq.f32.partialorder %v6615_v50, inf  ;;  %v6832_v25 = vpop.eup %4199  ;;  %v2179_v15 = vmul.f32 %v4198_v36, %v6615_v50  ;;  %vm2182_vm5 = vcmp.eq.f32.partialorder %v6615_v50, 0.0 }
 0x239   :  { %v2980_v41 = vadd.f32 1e-10, %v2794_v26  ;;  %v2798_v58 = vsel %vm2797_vm0, %v6607_v62, %v2796_v0  ;;  %v3267_v57 = vmul.f32 %v6385_v1, %v3212_v51  ;;  %v3069_v22 = vmul.f32 %v6644_v56, %v8009_v60  ;;  %v8013_v60 = vld [vmem:[#allocation24_spill] sm:$0xff] }
 0x23a   :  { %v3117_v14 = vmul.f32 %v6665_v35, %v8010_v5  ;;  %4211 = vrsqrt.f32 %v6675_v37  ;;  %v2801_v44 = vsel %vm2799_vm3, %v2800_v8, %v2798_v58  ;;  %v2183_v40 = vand.u32 2147483648, %v6615_v50 }
 0x23b   :  { %4213 = vrcp.f32 %v2356_v46  ;;  %v3347_v24 = vsel %vm1851_vm2, %v3267_v57, 0.0  ;;  %v6851_v9 = vpop.eup %4201  ;;  %v2181_v56 = vsel %vm2180_vm4, %v6615_v50, %v2179_v15  ;;  %vm2187_vm6 = vcmp.eq.f32.partialorder %v6637_v13, inf  ;;  %v6878_v50 = vpop.xlane.xlu1 %2576 }
 0x23c   :  { %4215 = vrcp.f32 %v2357_v38  ;;  %3348 = vadd.xlane.f32.xlu0 %v3347_v24  ;;  %v3165_v35 = vsub.f32 %v3069_v22, %v3117_v14  ;;  %vm2189_vm7 = vcmp.eq.f32.partialorder %v6637_v13, 0.0  ;;  %v2190_v62 = vand.u32 2147483648, %v6637_v13  ;;  %v8014_v22 = vld [vmem:[#allocation25_spill] sm:$0xff] }
 0x23d   :  { %4217 = vrcp.f32 %v2980_v41  ;;  %vm2804_vm8 = vcmp.eq.f32.partialorder %v6649_v7, inf  ;;  %v4204_v16 = vpop.eup %4203  ;;  %v2981_v6 = vadd.f32 1e-10, %v2801_v44  ;;  %v2807_v3 = vand.u32 2147483648, %v6649_v7  ;;  %v6891_v41 = vpop.xlane.xlu0 %1955 }
 0x23e   :  { %v3213_v33 = vmul.f32 %v3165_v35, %v3165_v35  ;;  %4219 = vrsqrt.f32 %v6687_v18  ;;  %v6864_v39 = vpop.eup %4205  ;;  %v2184_v32 = vsel %vm2182_vm5, %v2183_v40, %v2181_v56  ;;  %v2186_v2 = vmul.f32 %v4204_v16, %v6637_v13 }
 0x23f   :  { %vm2806_vm9 = vcmp.eq.f32.partialorder %v6649_v7, 0.0  ;;  %v3070_v12 = vmul.f32 %v6694_v59, %v8011_v52  ;;  %v3118_v27 = vmul.f32 %v6735_v34, %v8012_v20  ;;  %vm2811_vm10 = vcmp.eq.f32.partialorder %v6675_v37, inf }
 0x240   :  { %v4208_v8 = vpop.eup %4207  ;;  %v3268_v46 = vmul.f32 %v6385_v1, %v3213_v33  ;;  %vm2813_vm11 = vcmp.eq.f32.partialorder %v6675_v37, 0.0  ;;  %4221 = vrsqrt.f32 %v6712_v54  ;;  %v2188_v45 = vsel %vm2187_vm6, %v6637_v13, %v2186_v2 }
 0x241   :  { %v2803_v59 = vmul.f32 %v4208_v8, %v6649_v7  ;;  %v3166_v0 = vsub.f32 %v3070_v12, %v3118_v27  ;;  %4223 = vrsqrt.f32 %v6721_v31  ;;  %v6885_v34 = vpop.eup %4209  ;;  %v2358_v51 = vadd.f32 1e-10, %v2184_v32  ;;  %v6927_v20 = vpop.xlane.xlu0 %2579 }
 0x242   :  { %v2191_v36 = vsel %vm2189_vm7, %v2190_v62, %v2188_v45  ;;  %v3350_v38 = vsel %vm1851_vm2, %v3268_v46, 0.0  ;;  %v2814_v26 = vand.u32 2147483648, %v6675_v37  ;;  %4225 = vrcp.f32 %v2981_v6  ;;  %v8016_v45 = vld [vmem:[#allocation27_spill] sm:$0xff] }
 0x243   :  { %3351 = vadd.xlane.f32.xlu1 %v3350_v38  ;;  %vm2194_vm1 = vcmp.eq.f32.partialorder %v6687_v18, inf  ;;  %vm2196_vm12 = vcmp.eq.f32.partialorder %v6687_v18, 0.0  ;;  %v3214_v58 = vmul.f32 %v3166_v0, %v3166_v0  ;;  %v2197_v57 = vand.u32 2147483648, %v6687_v18 }
 0x244   :  { %v4212_v15 = vpop.eup %4211  ;;  %v3071_v13 = vmul.f32 %v6714_v43, %v8013_v60  ;;  %v3119_v5 = vmul.f32 %v6762_v55, %v8014_v22  ;;  %4227 = vrsqrt.f32 %v6743_v47  ;;  %v2359_v44 = vadd.f32 1e-10, %v2191_v36  ;;  %v6912_v55 = vpop.xlane.xlu1 %1958 }
 0x245   :  { %v6901_v14 = vpop.eup %4213  ;;  %v2805_v40 = vsel %vm2804_vm8, %v6649_v7, %v2803_v59  ;;  %v2810_v24 = vmul.f32 %v4212_v15, %v6675_v37  ;;  %v3269_v56 = vmul.f32 %v6385_v1, %v3214_v58  ;;  %4229 = vrcp.f32 %v2358_v51 }
 0x246   :  { %v6908_v35 = vpop.eup %4215  ;;  %vm2201_vm13 = vcmp.eq.f32.partialorder %v6712_v54, inf  ;;  %vm2203_vm14 = vcmp.eq.f32.partialorder %v6712_v54, 0.0  ;;  %v3167_v43 = vsub.f32 %v3071_v13, %v3119_v5  ;;  %v2204_v33 = vand.u32 2147483648, %v6712_v54 }
 0x247   :  { %v6914_v62 = vpop.eup %4217  ;;  %v2812_v16 = vsel %vm2811_vm10, %v6675_v37, %v2810_v24  ;;  %v3353_v6 = vsel %vm1851_vm2, %v3269_v56, 0.0  ;;  %vm2818_vm15 = vcmp.eq.f32.partialorder %v6721_v31, inf  ;;  %v2808_v2 = vsel %vm2806_vm9, %v2807_v3, %v2805_v40  ;;  %v8015_v3 = vld [vmem:[#allocation26_spill] sm:$0xff]  ;;  %v6961_v40 = vpop.xlane.xlu0 %1961 }
 0x248   :  { %v4220_v32 = vpop.eup %4219  ;;  %v2815_v52 = vsel %vm2813_vm11, %v2814_v26, %v2812_v16  ;;  %3354 = vadd.xlane.f32.xlu0 %v3353_v6  ;;  %v3215_v12 = vmul.f32 %v3167_v43, %v3167_v43  ;;  %4231 = vrsqrt.f32 %v6751_v30  ;;  %vm2820_vm0 = vcmp.eq.f32.partialorder %v6721_v31, 0.0 }
 0x249   :  { %4233 = vrcp.f32 %v2359_v44  ;;  %v2193_v27 = vmul.f32 %v4220_v32, %v6687_v18  ;;  %v2821_v8 = vand.u32 2147483648, %v6721_v31  ;;  %v3072_v37 = vmul.f32 %v6775_v19, %v8015_v3  ;;  %v8017_v32 = vld [vmem:[#allocation28_spill] sm:$0xff] }
 0x24a   :  { %v4222_v46 = vpop.eup %4221  ;;  %v3270_v7 = vmul.f32 %v6385_v1, %v3215_v12  ;;  %v3120_v59 = vmul.f32 %v6795_v21, %v8016_v45  ;;  %4235 = vrsqrt.f32 %v6773_v53  ;;  %v2982_v51 = vadd.f32 1e-10, %v2808_v2  ;;  %v6946_v21 = vpop.xlane.xlu1 %2582 }
 0x24b   :  { %v4224_v0 = vpop.eup %4223  ;;  %v2983_v36 = vadd.f32 1e-10, %v2815_v52  ;;  %v2195_v38 = vsel %vm2194_vm1, %v6687_v18, %v2193_v27  ;;  %v2200_v26 = vmul.f32 %v4222_v46, %v6712_v54  ;;  %vm2825_vm3 = vcmp.eq.f32.partialorder %v6743_v47, inf  ;;  %v8018_v52 = vld [vmem:[#allocation29_spill] sm:$0xff] }
 0x24c   :  { %v2198_v1 = vsel %vm2196_vm12, %v2197_v57, %v2195_v38  ;;  %v2817_v58 = vmul.f32 %v4224_v0, %v6721_v31  ;;  %v3356_v19 = vsel %vm1851_vm2, %v3270_v7, 0.0  ;;  %v3168_v15 = vsub.f32 %v3072_v37, %v3120_v59  ;;  %v6948_v60 = vpop.eup %4225 }
 0x24d   :  { %v2202_v13 = vsel %vm2201_vm13, %v6712_v54, %v2200_v26  ;;  %3357 = vadd.xlane.f32.xlu1 %v3356_v19  ;;  %vm2827_vm4 = vcmp.eq.f32.partialorder %v6743_v47, 0.0  ;;  %4237 = vrsqrt.f32 %v6788_v17  ;;  %v2360_v57 = vadd.f32 1e-10, %v2198_v1  ;;  %v6974_v54 = vld [vmem:[%s7838_s4] ss:$0 sm:$0xff] }
 0x24e   :  { %v4228_v18 = vpop.eup %4227  ;;  %v2205_v22 = vsel %vm2203_vm14, %v2204_v33, %v2202_v13  ;;  %v2819_v5 = vsel %vm2818_vm15, %v6721_v31, %v2817_v58  ;;  %v3216_v44 = vmul.f32 %v3168_v15, %v3168_v15  ;;  %4239 = vrcp.f32 %v2982_v51  ;;  %v6986_v3 = vpop.xlane.xlu1 %1964  ;;  %v8019_v13 = vld [vmem:[#allocation30_spill] sm:$0xff] }
 0x24f   :  { %v2822_v24 = vsel %vm2820_vm0, %v2821_v8, %v2819_v5  ;;  %v2824_v56 = vmul.f32 %v4228_v18, %v6743_v47  ;;  %v2828_v43 = vand.u32 2147483648, %v6743_v47  ;;  %v6967_v16 = vpop.eup %4229  ;;  %4241 = vrcp.f32 %v2983_v36  ;;  %v6998_v51 = vpop.xlane.xlu0 %2585 }
 0x250   :  { %vm2208_vm5 = vcmp.eq.f32.partialorder %v6751_v30, inf  ;;  %vm2210_vm6 = vcmp.eq.f32.partialorder %v6751_v30, 0.0  ;;  %v3271_v6 = vmul.f32 %v6974_v54, %v3216_v44  ;;  %v2361_v31 = vadd.f32 1e-10, %v2205_v22 }
 0x251   :  { %v2826_v33 = vsel %vm2825_vm3, %v6743_v47, %v2824_v56  ;;  %v3073_v2 = vmul.f32 %v6782_v29, %v8017_v32  ;;  %v3121_v12 = vmul.f32 %v6800_v11, %v8018_v52  ;;  %4243 = vrcp.f32 %v2360_v57  ;;  %v8020_v57 = vld [vmem:[#allocation31_spill] sm:$0xff] }
 0x252   :  { %v4232_v27 = vpop.eup %4231  ;;  %v2984_v8 = vadd.f32 1e-10, %v2822_v24  ;;  %v2211_v46 = vand.u32 2147483648, %v6751_v30  ;;  %v3359_v7 = vsel %vm1851_vm2, %v3271_v6, 0.0  ;;  %v2829_v45 = vsel %vm2827_vm4, %v2828_v43, %v2826_v33  ;;  %v7017_v44 = vpop.xlane.xlu1 %2588 }
 0x253   :  { %v6988_v37 = vpop.eup %4233  ;;  %v2207_v59 = vmul.f32 %v4232_v27, %v6751_v30  ;;  %3360 = vadd.xlane.f32.xlu0 %v3359_v7  ;;  %v3169_v29 = vsub.f32 %v3073_v2, %v3121_v12  ;;  %4245 = vrsqrt.f32 %v6814_v23  ;;  %vm2215_vm7 = vcmp.eq.f32.partialorder %v6773_v53, inf  ;;  %v7032_v33 = vpop.xlane.xlu0 %1967  ;;  %v8021_v7 = vld [vmem:[#allocation32_spill] sm:$0xff] }
 0x254   :  { %v4236_v11 = vpop.eup %4235  ;;  %vm2217_vm8 = vcmp.eq.f32.partialorder %v6773_v53, 0.0  ;;  %v2218_v0 = vand.u32 2147483648, %v6773_v53  ;;  %4247 = vrsqrt.f32 %v6823_v49  ;;  %v2985_v26 = vadd.f32 1e-10, %v2829_v45 }
 0x255   :  { %4249 = vrcp.f32 %v2361_v31  ;;  %v2209_v47 = vsel %vm2208_vm5, %v6751_v30, %v2207_v59  ;;  %v2214_v36 = vmul.f32 %v4236_v11, %v6773_v53  ;;  %v3217_v38 = vmul.f32 %v3169_v29, %v3169_v29  ;;  %v8022_v59 = vld [vmem:[#allocation33_spill] sm:$0xff] }
 0x256   :  { %4251 = vrcp.f32 %v2984_v8  ;;  %v2212_v1 = vsel %vm2210_vm6, %v2211_v46, %v2209_v47  ;;  %vm2832_vm9 = vcmp.eq.f32.partialorder %v6788_v17, inf  ;;  %v3074_v18 = vmul.f32 %v6832_v25, %v8019_v13 }
 0x257   :  { %v4238_v58 = vpop.eup %4237  ;;  %v2216_v19 = vsel %vm2215_vm7, %v6773_v53, %v2214_v36  ;;  %v3272_v15 = vmul.f32 %v6974_v54, %v3217_v38  ;;  %v3122_v22 = vmul.f32 %v6864_v39, %v8020_v57  ;;  %vm2834_vm10 = vcmp.eq.f32.partialorder %v6788_v17, 0.0 }
 0x258   :  { %v2831_v5 = vmul.f32 %v4238_v58, %v6788_v17  ;;  %v2835_v30 = vand.u32 2147483648, %v6788_v17  ;;  %4253 = vrsqrt.f32 %v6845_v63  ;;  %v7019_v24 = vpop.eup %4239  ;;  %v2219_v56 = vsel %vm2217_vm8, %v2218_v0, %v2216_v19  ;;  %v7051_v0 = vpop.xlane.xlu1 %1970 }
 0x259   :  { %v3362_v25 = vsel %vm1851_vm2, %v3272_v15, 0.0  ;;  %vm2839_vm11 = vcmp.eq.f32.partialorder %v6814_v23, inf  ;;  %v3170_v39 = vsub.f32 %v3074_v18, %v3122_v22  ;;  %v7025_v43 = vpop.eup %4241  ;;  %v2362_v6 = vadd.f32 1e-10, %v2212_v1  ;;  %v7064_v19 = vpop.xlane.xlu0 %2591  ;;  %v8023_v22 = vld [vmem:[#allocation34_spill] sm:$0xff] }
 0x25a   :  { %v2833_v31 = vsel %vm2832_vm9, %v6788_v17, %v2831_v5  ;;  %3363 = vadd.xlane.f32.xlu1 %v3362_v25  ;;  %vm2841_vm1 = vcmp.eq.f32.partialorder %v6814_v23, 0.0  ;;  %4255 = vrsqrt.f32 %v6857_v10  ;;  %v2842_v53 = vand.u32 2147483648, %v6814_v23 }
 0x25b   :  { %4257 = vrcp.f32 %v2985_v26  ;;  %vm2222_vm12 = vcmp.eq.f32.partialorder %v6823_v49, inf  ;;  %v3218_v32 = vmul.f32 %v3170_v39, %v3170_v39  ;;  %v7036_v2 = vpop.eup %4243  ;;  %v2363_v52 = vadd.f32 1e-10, %v2219_v56 }
 0x25c   :  { %v2836_v12 = vsel %vm2834_vm10, %v2835_v30, %v2833_v31  ;;  %vm2224_vm13 = vcmp.eq.f32.partialorder %v6823_v49, 0.0  ;;  %v2225_v27 = vand.u32 2147483648, %v6823_v49  ;;  %v3075_v45 = vmul.f32 %v6851_v9, %v8021_v7  ;;  %v8024_v30 = vld [vmem:[#allocation35_spill] sm:$0xff] }
 0x25d   :  { %v4246_v8 = vpop.eup %4245  ;;  %v3273_v46 = vmul.f32 %v6974_v54, %v3218_v32  ;;  %v3123_v29 = vmul.f32 %v6885_v34, %v8022_v59  ;;  %4259 = vrsqrt.f32 %v6878_v50  ;;  %vm2229_vm14 = vcmp.eq.f32.partialorder %v6845_v63, inf  ;;  %v7084_v32 = vpop.xlane.xlu1 %2594 }
 0x25e   :  { %v4248_v11 = vpop.eup %4247  ;;  %4261 = vrcp.f32 %v2362_v6  ;;  %v2838_v17 = vmul.f32 %v4246_v8, %v6814_v23  ;;  %vm2231_vm15 = vcmp.eq.f32.partialorder %v6845_v63, 0.0  ;;  %v2986_v26 = vadd.f32 1e-10, %v2836_v12  ;;  %v7098_v7 = vpop.xlane.xlu0 %1973 }
 0x25f   :  { %v7053_v47 = vpop.eup %4249  ;;  %v2221_v36 = vmul.f32 %v4248_v11, %v6823_v49  ;;  %v3365_v9 = vsel %vm1851_vm2, %v3273_v46, 0.0  ;;  %v3171_v38 = vsub.f32 %v3075_v45, %v3123_v29  ;;  %4263 = vrsqrt.f32 %v6891_v41 }
 0x260   :  { %v7058_v34 = vpop.eup %4251  ;;  %4265 = vrcp.f32 %v2363_v52  ;;  %v2840_v1 = vsel %vm2839_vm11, %v6814_v23, %v2838_v17  ;;  %3366 = vadd.xlane.f32.xlu0 %v3365_v9  ;;  %v2232_v58 = vand.u32 2147483648, %v6845_v63  ;;  %vm2846_vm0 = vcmp.eq.f32.partialorder %v6857_v10, inf }
 0x261   :  { %v2843_v15 = vsel %vm2841_vm1, %v2842_v53, %v2840_v1  ;;  %v2223_v13 = vsel %vm2222_vm12, %v6823_v49, %v2221_v36  ;;  %v3219_v18 = vmul.f32 %v3171_v38, %v3171_v38  ;;  %vm2848_vm3 = vcmp.eq.f32.partialorder %v6857_v10, 0.0  ;;  %v8025_v1 = vld [vmem:[#allocation36_spill] sm:$0xff] }
 0x262   :  { %v4254_v57 = vpop.eup %4253  ;;  %v3076_v5 = vmul.f32 %v6901_v14, %v8023_v22  ;;  %v3124_v56 = vmul.f32 %v6914_v62, %v8024_v30  ;;  %4267 = vrsqrt.f32 %v6912_v55  ;;  %v2849_v25 = vand.u32 2147483648, %v6857_v10 }
 0x263   :  { %v2228_v23 = vmul.f32 %v4254_v57, %v6845_v63  ;;  %v3274_v39 = vmul.f32 %v6974_v54, %v3219_v18  ;;  %vm2853_vm4 = vcmp.eq.f32.partialorder %v6878_v50, inf  ;;  %4269 = vrcp.f32 %v2986_v26 }
 0x264   :  { %v4256_v6 = vpop.eup %4255  ;;  %v2987_v31 = vadd.f32 1e-10, %v2843_v15  ;;  %v2226_v53 = vsel %vm2224_vm13, %v2225_v27, %v2223_v13  ;;  %v3172_v14 = vsub.f32 %v3076_v5, %v3124_v56  ;;  %vm2855_vm5 = vcmp.eq.f32.partialorder %v6878_v50, 0.0  ;;  %v8026_v15 = vld [vmem:[#allocation37_spill] sm:$0xff] }
 0x265   :  { %v7086_v62 = vpop.eup %4257  ;;  %v2230_v52 = vsel %vm2229_vm14, %v6845_v63, %v2228_v23  ;;  %v2845_v12 = vmul.f32 %v4256_v6, %v6857_v10  ;;  %v3368_v8 = vsel %vm1851_vm2, %v3274_v39, 0.0  ;;  %v2856_v49 = vand.u32 2147483648, %v6878_v50 }
 0x266   :  { %v2233_v46 = vsel %vm2231_vm15, %v2232_v58, %v2230_v52  ;;  %3369 = vadd.xlane.f32.xlu1 %v3368_v8  ;;  %v3220_v27 = vmul.f32 %v3172_v14, %v3172_v14  ;;  %4271 = vrsqrt.f32 %v6927_v20  ;;  %v2364_v59 = vadd.f32 1e-10, %v2226_v53  ;;  %v8027_v8 = vld [vmem:[#allocation38_spill] sm:$0xff] }
 0x267   :  { %v4260_v45 = vpop.eup %4259  ;;  %v2847_v29 = vsel %vm2846_vm0, %v6857_v10, %v2845_v12  ;;  %vm2236_vm6 = vcmp.eq.f32.partialorder %v6891_v41, inf  ;;  %vm2238_vm7 = vcmp.eq.f32.partialorder %v6891_v41, 0.0  ;;  %4273 = vrcp.f32 %v2987_v31  ;;  %v7124_v10 = vpop.xlane.xlu1 %1976 }
 0x268   :  { %v7105_v63 = vpop.eup %4261  ;;  %v2852_v11 = vmul.f32 %v4260_v45, %v6878_v50  ;;  %v2239_v17 = vand.u32 2147483648, %v6891_v41  ;;  %v3275_v36 = vmul.f32 %v6974_v54, %v3220_v27  ;;  %v2365_v38 = vadd.f32 1e-10, %v2233_v46 }
 0x269   :  { %v4264_v9 = vpop.eup %4263  ;;  %v2850_v26 = vsel %vm2848_vm3, %v2849_v25, %v2847_v29  ;;  %v3077_v58 = vmul.f32 %v6908_v35, %v8025_v1  ;;  %v3125_v13 = vmul.f32 %v6948_v60, %v8026_v15  ;;  %4275 = vrsqrt.f32 %v6946_v21  ;;  %v7134_v25 = vpop.xlane.xlu0 %2597  ;;  %v8029_v15 = vld [vmem:[#allocation40_spill] sm:$0xff] }
 0x26a   :  { %v7116_v18 = vpop.eup %4265  ;;  %v2854_v57 = vsel %vm2853_vm4, %v6878_v50, %v2852_v11  ;;  %v2235_v22 = vmul.f32 %v4264_v9, %v6891_v41  ;;  %v3371_v5 = vsel %vm1851_vm2, %v3275_v36, 0.0  ;;  %4277 = vrcp.f32 %v2364_v59 }
 0x26b   :  { %v2857_v35 = vsel %vm2855_vm5, %v2856_v49, %v2854_v57  ;;  %3372 = vadd.xlane.f32.xlu0 %v3371_v5  ;;  %vm2243_vm8 = vcmp.eq.f32.partialorder %v6912_v55, inf  ;;  %v3173_v60 = vsub.f32 %v3077_v58, %v3125_v13  ;;  %v2988_v56 = vadd.f32 1e-10, %v2850_v26  ;;  %v7154_v29 = vpop.xlane.xlu1 %2600  ;;  %v8030_v57 = vld [vmem:[#allocation41_spill] sm:$0xff] }
 0x26c   :  { %v4268_v30 = vpop.eup %4267  ;;  %v2237_v23 = vsel %vm2236_vm6, %v6891_v41, %v2235_v22  ;;  %vm2245_vm9 = vcmp.eq.f32.partialorder %v6912_v55, 0.0  ;;  %4279 = vrsqrt.f32 %v6961_v40  ;;  %v2989_v39 = vadd.f32 1e-10, %v2857_v35  ;;  %v8028_v41 = vld [vmem:[#allocation39_spill] sm:$0xff] }
 0x26d   :  { %v2240_v50 = vsel %vm2238_vm7, %v2239_v17, %v2237_v23  ;;  %v2242_v6 = vmul.f32 %v4268_v30, %v6912_v55  ;;  %v3221_v31 = vmul.f32 %v3173_v60, %v3173_v60  ;;  %v7139_v53 = vpop.eup %4269  ;;  %4281 = vrcp.f32 %v2365_v38  ;;  %v7164_v9 = vpop.xlane.xlu0 %1979 }
 0x26e   :  { %v2246_v14 = vand.u32 2147483648, %v6912_v55  ;;  %vm2860_vm10 = vcmp.eq.f32.partialorder %v6927_v20, inf  ;;  %vm2862_vm11 = vcmp.eq.f32.partialorder %v6927_v20, 0.0  ;;  %v2366_v52 = vadd.f32 1e-10, %v2240_v50 }
 0x26f   :  { %v3276_v12 = vmul.f32 %v6974_v54, %v3221_v31  ;;  %v3078_v46 = vmul.f32 %v6967_v16, %v8027_v8  ;;  %v3126_v49 = vmul.f32 %v7019_v24, %v8028_v41  ;;  %4283 = vrcp.f32 %v2988_v56 }
 0x270   :  { %v4272_v27 = vpop.eup %4271  ;;  %v2244_v45 = vsel %vm2243_vm8, %v6912_v55, %v2242_v6  ;;  %v2863_v59 = vand.u32 2147483648, %v6927_v20  ;;  %vm2867_vm1 = vcmp.eq.f32.partialorder %v6946_v21, inf  ;;  %4285 = vrcp.f32 %v2989_v39  ;;  %v7186_v39 = vpop.xlane.xlu1 %1982 }
 0x271   :  { %v2859_v11 = vmul.f32 %v4272_v27, %v6927_v20  ;;  %v3374_v16 = vsel %vm1851_vm2, %v3276_v12, 0.0  ;;  %v3174_v17 = vsub.f32 %v3078_v46, %v3126_v49  ;;  %v7158_v36 = vpop.eup %4273  ;;  %vm2869_vm12 = vcmp.eq.f32.partialorder %v6946_v21, 0.0  ;;  %v8031_v27 = vld [vmem:[#allocation42_spill] sm:$0xff] }
 0x272   :  { %3375 = vadd.xlane.f32.xlu1 %v3374_v16  ;;  %v2870_v24 = vand.u32 2147483648, %v6946_v21  ;;  %vm2250_vm13 = vcmp.eq.f32.partialorder %v6961_v40, inf  ;;  %4287 = vrsqrt.f32 %v6986_v3  ;;  %v2247_v38 = vsel %vm2245_vm9, %v2246_v14, %v2244_v45 }
 0x273   :  { %4289 = vrcp.f32 %v2366_v52  ;;  %v2861_v26 = vsel %vm2860_vm10, %v6927_v20, %v2859_v11  ;;  %v3222_v1 = vmul.f32 %v3174_v17, %v3174_v17  ;;  %v4276_v58 = vpop.eup %4275  ;;  %vm2252_vm14 = vcmp.eq.f32.partialorder %v6961_v40, 0.0  ;;  %v7199_v52 = vpop.xlane.xlu0 %2603 }
 0x274   :  { %4291 = vrsqrt.f32 %v6998_v51  ;;  %v3079_v13 = vmul.f32 %v6988_v37, %v8029_v15  ;;  %v3127_v22 = vmul.f32 %v7025_v43, %v8030_v57  ;;  %v7177_v5 = vpop.eup %4277  ;;  %v2866_v55 = vmul.f32 %v4276_v58, %v6946_v21 }
 0x275   :  { %v2253_v35 = vand.u32 2147483648, %v6961_v40  ;;  %v3277_v60 = vmul.f32 %v6974_v54, %v3222_v1  ;;  %4293 = vrsqrt.f32 %v7017_v44  ;;  %v2367_v56 = vadd.f32 1e-10, %v2247_v38 }
 0x276   :  { %v4280_v30 = vpop.eup %4279  ;;  %v2864_v23 = vsel %vm2862_vm11, %v2863_v59, %v2861_v26  ;;  %vm2257_vm15 = vcmp.eq.f32.partialorder %v6986_v3, inf  ;;  %v3175_v37 = vsub.f32 %v3079_v13, %v3127_v22  ;;  %v2868_v43 = vsel %vm2867_vm1, %v6946_v21, %v2866_v55  ;;  %v8032_v59 = vld [vmem:[#allocation43_spill] sm:$0xff]  ;;  %v8033_v55 = vld [vmem:[#allocation44_spill] sm:$0xff] }
 0x277   :  { %v2249_v50 = vmul.f32 %v4280_v30, %v6961_v40  ;;  %v3377_v6 = vsel %vm1851_vm2, %v3277_v60, 0.0  ;;  %vm2259_vm0 = vcmp.eq.f32.partialorder %v6986_v3, 0.0  ;;  %v7194_v31 = vpop.eup %4281  ;;  %v2260_v20 = vand.u32 2147483648, %v6986_v3  ;;  %v7234_v60 = vpop.xlane.xlu0 %1985 }
 0x278   :  { %3378 = vadd.xlane.f32.xlu0 %v3377_v6  ;;  %vm2874_vm3 = vcmp.eq.f32.partialorder %v6998_v51, inf  ;;  %v3223_v14 = vmul.f32 %v3175_v37, %v3175_v37  ;;  %4295 = vrsqrt.f32 %v7032_v33  ;;  %v2990_v12 = vadd.f32 1e-10, %v2864_v23  ;;  %v8034_v37 = vld [vmem:[#allocation45_spill] sm:$0xff] }
 0x279   :  { %v2871_v8 = vsel %vm2869_vm12, %v2870_v24, %v2868_v43  ;;  %v2251_v46 = vsel %vm2250_vm13, %v6961_v40, %v2249_v50  ;;  %vm2876_vm4 = vcmp.eq.f32.partialorder %v6998_v51, 0.0  ;;  %v7207_v41 = vpop.eup %4283  ;;  %4297 = vrcp.f32 %v2367_v56 }
 0x27a   :  { %v3278_v49 = vmul.f32 %v6974_v54, %v3223_v14  ;;  %v3080_v45 = vmul.f32 %v7036_v2, %v8031_v27  ;;  %v3128_v11 = vmul.f32 %v7058_v34, %v8032_v59  ;;  %v7214_v16 = vpop.eup %4285  ;;  %v2254_v21 = vsel %vm2252_vm14, %v2253_v35, %v2251_v46  ;;  %v7224_v34 = vpop.xlane.xlu1 %2606 }
 0x27b   :  { %v2877_v17 = vand.u32 2147483648, %v6998_v51  ;;  %vm2881_vm5 = vcmp.eq.f32.partialorder %v7017_v44, inf  ;;  %v2884_v24 = vand.u32 2147483648, %v7017_v44  ;;  %v2991_v26 = vadd.f32 1e-10, %v2871_v8 }
 0x27c   :  { %v4288_v38 = vpop.eup %4287  ;;  %v3380_v1 = vsel %vm1851_vm2, %v3278_v49, 0.0  ;;  %vm2883_vm6 = vcmp.eq.f32.partialorder %v7017_v44, 0.0  ;;  %v3176_v2 = vsub.f32 %v3080_v45, %v3128_v11  ;;  %4299 = vrsqrt.f32 %v7051_v0 }
 0x27d   :  { %v7226_v58 = vpop.eup %4289  ;;  %4301 = vrcp.f32 %v2990_v12  ;;  %v2256_v40 = vmul.f32 %v4288_v38, %v6986_v3  ;;  %3381 = vadd.xlane.f32.xlu1 %v3380_v1  ;;  %vm2264_vm7 = vcmp.eq.f32.partialorder %v7032_v33, inf  ;;  %v2267_v15 = vand.u32 2147483648, %v7032_v33 }
 0x27e   :  { %v4292_v13 = vpop.eup %4291  ;;  %v2368_v57 = vadd.f32 1e-10, %v2254_v21  ;;  %v3224_v22 = vmul.f32 %v3176_v2, %v3176_v2  ;;  %4303 = vrsqrt.f32 %v7064_v19  ;;  %v3081_v35 = vmul.f32 %v7053_v47, %v8033_v55  ;;  %v7259_v49 = vpop.xlane.xlu1 %1988 }
 0x27f   :  { %v4294_v30 = vpop.eup %4293  ;;  %v2258_v56 = vsel %vm2257_vm15, %v6986_v3, %v2256_v40  ;;  %v2873_v23 = vmul.f32 %v4292_v13, %v6998_v51  ;;  %vm2266_vm8 = vcmp.eq.f32.partialorder %v7032_v33, 0.0  ;;  %v3129_v43 = vmul.f32 %v7086_v62, %v8034_v37  ;;  %v7269_v21 = vpop.xlane.xlu0 %2609 }
 0x280   :  { %4305 = vrsqrt.f32 %v7084_v32  ;;  %v2261_v47 = vsel %vm2259_vm0, %v2260_v20, %v2258_v56  ;;  %v2880_v50 = vmul.f32 %v4294_v30, %v7017_v44  ;;  %v3279_v6 = vmul.f32 %v6974_v54, %v3224_v22  ;;  %v8036_v22 = vld [vmem:[#allocation47_spill] sm:$0xff] }
 0x281   :  { %4307 = vrcp.f32 %v2991_v26  ;;  %v2875_v14 = vsel %vm2874_vm3, %v6998_v51, %v2873_v23  ;;  %vm2271_vm9 = vcmp.eq.f32.partialorder %v7051_v0, inf  ;;  %vm2273_vm10 = vcmp.eq.f32.partialorder %v7051_v0, 0.0 }
 0x282   :  { %v3177_v12 = vsub.f32 %v3081_v35, %v3129_v43  ;;  %v4296_v62 = vpop.eup %4295  ;;  %v2369_v8 = vadd.f32 1e-10, %v2261_v47  ;;  %v2878_v46 = vsel %vm2876_vm4, %v2877_v17, %v2875_v14  ;;  %v2882_v3 = vsel %vm2881_vm5, %v7017_v44, %v2880_v50  ;;  %v8035_v44 = vld [vmem:[#allocation46_spill] sm:$0xff]  ;;  %v7292_v37 = vpop.xlane.xlu1 %2612 }
 0x283   :  { %v3383_v20 = vsel %vm1851_vm2, %v3279_v6, 0.0  ;;  %4309 = vrcp.f32 %v2368_v57  ;;  %v2263_v27 = vmul.f32 %v4296_v62, %v7032_v33  ;;  %v2274_v45 = vand.u32 2147483648, %v7051_v0  ;;  %v7264_v59 = vpop.eup %4297  ;;  %v7305_v6 = vpop.xlane.xlu0 %1991 }
 0x284   :  { %3384 = vadd.xlane.f32.xlu0 %v3383_v20  ;;  %vm2888_vm11 = vcmp.eq.f32.partialorder %v7064_v19, inf  ;;  %vm2890_vm1 = vcmp.eq.f32.partialorder %v7064_v19, 0.0  ;;  %v2891_v51 = vand.u32 2147483648, %v7064_v19  ;;  %v3225_v11 = vmul.f32 %v3177_v12, %v3177_v12 }
 0x285   :  { %4311 = vrsqrt.f32 %v7098_v7  ;;  %v2992_v17 = vadd.f32 1e-10, %v2878_v46  ;;  %v2885_v38 = vsel %vm2883_vm6, %v2884_v24, %v2882_v3  ;;  %v2265_v26 = vsel %vm2264_vm7, %v7032_v33, %v2263_v27 }
 0x286   :  { %vm2895_vm12 = vcmp.eq.f32.partialorder %v7084_v32, inf  ;;  %v4300_v1 = vpop.eup %4299  ;;  %4313 = vrcp.f32 %v2369_v8  ;;  %v3280_v2 = vmul.f32 %v6974_v54, %v3225_v11  ;;  %vm2897_vm13 = vcmp.eq.f32.partialorder %v7084_v32, 0.0 }
 0x287   :  { %v2898_v40 = vand.u32 2147483648, %v7084_v32  ;;  %v7280_v13 = vpop.eup %4301  ;;  %v2270_v57 = vmul.f32 %v4300_v1, %v7051_v0  ;;  %v3082_v24 = vmul.f32 %v7105_v63, %v8035_v44  ;;  %v3130_v55 = vmul.f32 %v7139_v53, %v8036_v22  ;;  %v7328_v1 = vpop.xlane.xlu1 %1994 }
 0x288   :  { %4315 = vrsqrt.f32 %v7124_v10  ;;  %v4304_v35 = vpop.eup %4303  ;;  %v2993_v30 = vadd.f32 1e-10, %v2885_v38  ;;  %v2268_v56 = vsel %vm2266_vm8, %v2267_v15, %v2265_v26  ;;  %v3386_v23 = vsel %vm1851_vm2, %v3280_v2, 0.0  ;;  %v8037_v38 = vld [vmem:[#allocation48_spill] sm:$0xff] }
 0x289   :  { %vm2278_vm14 = vcmp.eq.f32.partialorder %v7098_v7, inf  ;;  %4317 = vrcp.f32 %v2992_v17  ;;  %v2272_v63 = vsel %vm2271_vm9, %v7051_v0, %v2270_v57  ;;  %v2887_v53 = vmul.f32 %v4304_v35, %v7064_v19  ;;  %3387 = vadd.xlane.f32.xlu1 %v3386_v23 }
 0x28a   :  { %v4306_v43 = vpop.eup %4305  ;;  %v3178_v47 = vsub.f32 %v3082_v24, %v3130_v55  ;;  %v2275_v33 = vsel %vm2273_vm10, %v2274_v45, %v2272_v63  ;;  %vm2280_vm15 = vcmp.eq.f32.partialorder %v7098_v7, 0.0  ;;  %4319 = vrsqrt.f32 %v7134_v25 }
 0x28b   :  { %v7298_v50 = vpop.eup %4307  ;;  %v2894_v15 = vmul.f32 %v4306_v43, %v7084_v32  ;;  %v2370_v14 = vadd.f32 1e-10, %v2268_v56  ;;  %v2889_v12 = vsel %vm2888_vm11, %v7064_v19, %v2887_v53  ;;  %v2281_v62 = vand.u32 2147483648, %v7098_v7  ;;  %v8039_v43 = vld [vmem:[#allocation50_spill] sm:$0xff]  ;;  %v8040_v53 = vld [vmem:[#allocation51_spill] sm:$0xff] }
 0x28c   :  { %v3226_v8 = vmul.f32 %v3178_v47, %v3178_v47  ;;  %4321 = vrcp.f32 %v2993_v30  ;;  %v2371_v46 = vadd.f32 1e-10, %v2275_v33  ;;  %v2892_v0 = vsel %vm2890_vm1, %v2891_v51, %v2889_v12  ;;  %v8038_v51 = vld [vmem:[#allocation49_spill] sm:$0xff] }
 0x28d   :  { %v2896_v3 = vsel %vm2895_vm12, %v7084_v32, %v2894_v15  ;;  %v7316_v20 = vpop.eup %4309  ;;  %vm2285_vm0 = vcmp.eq.f32.partialorder %v7124_v10, inf  ;;  %vm2287_vm3 = vcmp.eq.f32.partialorder %v7124_v10, 0.0  ;;  %v2994_v17 = vadd.f32 1e-10, %v2892_v0 }
 0x28e   :  { %v2899_v27 = vsel %vm2897_vm13, %v2898_v40, %v2896_v3  ;;  %v3281_v45 = vmul.f32 %v6974_v54, %v3226_v8  ;;  %v3083_v19 = vmul.f32 %v7116_v18, %v8037_v38  ;;  %v3131_v26 = vmul.f32 %v7158_v36, %v8038_v51  ;;  %v7336_v36 = vpop.xlane.xlu0 %2615  ;;  %v8041_v38 = vld [vmem:[#allocation52_spill] sm:$0xff]  ;;  %v8042_v51 = vld [vmem:[#allocation53_spill] sm:$0xff] }
 0x28f   :  { %v4312_v11 = vpop.eup %4311  ;;  %4323 = vrsqrt.f32 %v7154_v29  ;;  %v2288_v40 = vand.u32 2147483648, %v7124_v10  ;;  %v2995_v44 = vadd.f32 1e-10, %v2899_v27  ;;  %vm2902_vm4 = vcmp.eq.f32.partialorder %v7134_v25, inf }
 0x290   :  { %4325 = vrcp.f32 %v2370_v14  ;;  %v2277_v32 = vmul.f32 %v4312_v11, %v7098_v7  ;;  %v3389_v2 = vsel %vm1851_vm2, %v3281_v45, 0.0  ;;  %v7333_v57 = vpop.eup %4313  ;;  %v3179_v18 = vsub.f32 %v3083_v19, %v3131_v26 }
 0x291   :  { %4327 = vrcp.f32 %v2371_v46  ;;  %3390 = vadd.xlane.f32.xlu0 %v3389_v2  ;;  %vm2904_vm5 = vcmp.eq.f32.partialorder %v7134_v25, 0.0  ;;  %v2905_v55 = vand.u32 2147483648, %v7134_v25  ;;  %vm2909_vm6 = vcmp.eq.f32.partialorder %v7154_v29, inf }
 0x292   :  { %v4316_v24 = vpop.eup %4315  ;;  %v2279_v22 = vsel %vm2278_vm14, %v7098_v7, %v2277_v32  ;;  %4329 = vrsqrt.f32 %v7164_v9  ;;  %v3227_v30 = vmul.f32 %v3179_v18, %v3179_v18  ;;  %v3084_v63 = vmul.f32 %v7177_v5, %v8039_v43  ;;  %v7360_v7 = vpop.xlane.xlu1 %2618 }
 0x293   :  { %4331 = vrcp.f32 %v2994_v17  ;;  %v2284_v35 = vmul.f32 %v4316_v24, %v7124_v10  ;;  %v7346_v56 = vpop.eup %4317  ;;  %v2282_v23 = vsel %vm2280_vm15, %v2281_v62, %v2279_v22  ;;  %v3132_v47 = vmul.f32 %v7207_v41, %v8040_v53  ;;  %v7371_v3 = vpop.xlane.xlu0 %3300 }
 0x294   :  { %4333 = vrsqrt.f32 %v7186_v39  ;;  %v4320_v33 = vpop.eup %4319  ;;  %v3282_v14 = vmul.f32 %v6974_v54, %v3227_v30  ;;  %vm2911_vm7 = vcmp.eq.f32.partialorder %v7154_v29, 0.0  ;;  %v2912_v5 = vand.u32 2147483648, %v7154_v29 }
 0x295   :  { %4335 = vrcp.f32 %v2995_v44  ;;  %v2286_v15 = vsel %vm2285_vm0, %v7124_v10, %v2284_v35  ;;  %v2901_v12 = vmul.f32 %v4320_v33, %v7134_v25  ;;  %vm2292_vm8 = vcmp.eq.f32.partialorder %v7164_v9, inf }
 0x296   :  { %v3180_v41 = vsub.f32 %v3084_v63, %v3132_v47  ;;  %v7365_v62 = vpop.eup %4321  ;;  %v2372_v8 = vadd.f32 1e-10, %v2282_v23  ;;  %v2289_v46 = vsel %vm2287_vm3, %v2288_v40, %v2286_v15  ;;  %v3392_v0 = vsel %vm1851_vm2, %v3282_v14, 0.0  ;;  %v7394_v24 = vpop.xlane.xlu1 %3303  ;;  %v8043_v15 = vld [vmem:[#allocation54_spill] sm:$0xff] }
 0x297   :  { %4337 = vrsqrt.f32 %v7199_v52  ;;  %v2903_v27 = vsel %vm2902_vm4, %v7134_v25, %v2901_v12  ;;  %3393 = vadd.xlane.f32.xlu1 %v3392_v0  ;;  %vm2294_vm9 = vcmp.eq.f32.partialorder %v7164_v9, 0.0  ;;  %v2295_v45 = vand.u32 2147483648, %v7164_v9  ;;  %v7406_v63 = vpop.xlane.xlu0 %3306  ;;  %v8044_v0 = vld [vmem:[#allocation55_spill] sm:$0xff] }
 0x298   :  { %v3228_v11 = vmul.f32 %v3180_v41, %v3180_v41  ;;  %v2906_v10 = vsel %vm2904_vm5, %v2905_v55, %v2903_v27  ;;  %vm2299_vm10 = vcmp.eq.f32.partialorder %v7186_v39, inf  ;;  %v3085_v19 = vmul.f32 %v7194_v31, %v8041_v38 }
 0x299   :  { %v4324_v17 = vpop.eup %4323  ;;  %v3133_v26 = vmul.f32 %v7214_v16, %v8042_v51  ;;  %v2373_v2 = vadd.f32 1e-10, %v2289_v46  ;;  %4339 = vrsqrt.f32 %v7224_v34  ;;  %vm2301_vm11 = vcmp.eq.f32.partialorder %v7186_v39, 0.0 }
 0x29a   :  { %v7385_v32 = vpop.eup %4325  ;;  %v2908_v40 = vmul.f32 %v4324_v17, %v7154_v29  ;;  %v3283_v44 = vmul.f32 %v6974_v54, %v3228_v11  ;;  %4341 = vrcp.f32 %v2372_v8  ;;  %v2302_v25 = vand.u32 2147483648, %v7186_v39  ;;  %v7430_v38 = vpop.xlane.xlu1 %3309 }
 0x29b   :  { %v7390_v18 = vpop.eup %4327  ;;  %v3181_v31 = vsub.f32 %v3085_v19, %v3133_v26  ;;  %v2996_v22 = vadd.f32 1e-10, %v2906_v10  ;;  %vm2916_vm1 = vcmp.eq.f32.partialorder %v7199_v52, inf  ;;  %vm2918_vm12 = vcmp.eq.f32.partialorder %v7199_v52, 0.0  ;;  %v7439_v26 = vpop.xlane.xlu0 %3312 }
 0x29c   :  { %v4330_v16 = vpop.eup %4329  ;;  %v2910_v55 = vsel %vm2909_vm6, %v7154_v29, %v2908_v40  ;;  %v3395_v35 = vsel %vm1851_vm2, %v3283_v44, 0.0  ;;  %4343 = vrsqrt.f32 %v7234_v60  ;;  %v2919_v33 = vand.u32 2147483648, %v7199_v52 }
 0x29d   :  { %v7401_v30 = vpop.eup %4331  ;;  %v2291_v23 = vmul.f32 %v4330_v16, %v7164_v9  ;;  %3396 = vadd.xlane.f32.xlu0 %v3395_v35  ;;  %v3229_v43 = vmul.f32 %v3181_v31, %v3181_v31  ;;  %4345 = vrcp.f32 %v2373_v2  ;;  %v2913_v47 = vsel %vm2911_vm7, %v2912_v5, %v2910_v55  ;;  %v8045_v35 = vld [vmem:[#allocation56_spill] sm:$0xff] }
 0x29e   :  { %v4334_v53 = vpop.eup %4333  ;;  %v3086_v14 = vmul.f32 %v7226_v58, %v8043_v15  ;;  %v3134_v27 = vmul.f32 %v7280_v13, %v8044_v0  ;;  %4347 = vrcp.f32 %v2996_v22  ;;  %vm2923_vm13 = vcmp.eq.f32.partialorder %v7224_v34, inf }
 0x29f   :  { %v7413_v12 = vpop.eup %4335  ;;  %v2293_v41 = vsel %vm2292_vm8, %v7164_v9, %v2291_v23  ;;  %v2298_v8 = vmul.f32 %v4334_v53, %v7186_v39  ;;  %v3284_v46 = vmul.f32 %v6974_v54, %v3229_v43  ;;  %vm2925_vm14 = vcmp.eq.f32.partialorder %v7224_v34, 0.0  ;;  %v8046_v43 = vld [vmem:[#allocation57_spill] sm:$0xff] }
 0x2a0   :  { %v2296_v29 = vsel %vm2294_vm9, %v2295_v45, %v2293_v41  ;;  %v2997_v5 = vadd.f32 1e-10, %v2913_v47  ;;  %v3182_v10 = vsub.f32 %v3086_v14, %v3134_v27  ;;  %v2926_v45 = vand.u32 2147483648, %v7224_v34  ;;  %v7464_v14 = vpop.xlane.xlu1 %3315  ;;  %v7466_v41 = vpop.xlane.xlu0 %3318 }
 0x2a1   :  { %v4338_v58 = vpop.eup %4337  ;;  %v2300_v11 = vsel %vm2299_vm10, %v7186_v39, %v2298_v8  ;;  %v3398_v17 = vsel %vm1851_vm2, %v3284_v46, 0.0  ;;  %4349 = vrsqrt.f32 %v7259_v49  ;;  %v2374_v19 = vadd.f32 1e-10, %v2296_v29 }
 0x2a2   :  { %v2303_v13 = vsel %vm2301_vm11, %v2302_v25, %v2300_v11  ;;  %v2915_v9 = vmul.f32 %v4338_v58, %v7199_v52  ;;  %3399 = vadd.xlane.f32.xlu1 %v3398_v17  ;;  %vm2306_vm15 = vcmp.eq.f32.partialorder %v7234_v60, inf  ;;  %vm2308_vm0 = vcmp.eq.f32.partialorder %v7234_v60, 0.0  ;;  %v8047_v11 = vld [vmem:[#allocation58_spill] sm:$0xff] }
 0x2a3   :  { %v3230_v51 = vmul.f32 %v3182_v10, %v3182_v10  ;;  %v4340_v2 = vpop.eup %4339  ;;  %v2375_v40 = vadd.f32 1e-10, %v2303_v13  ;;  %v2309_v44 = vand.u32 2147483648, %v7234_v60  ;;  %4351 = vrsqrt.f32 %v7269_v21  ;;  %v8048_v10 = vld [vmem:[#allocation59_spill] sm:$0xff] }
 0x2a4   :  { %v2917_v39 = vsel %vm2916_vm1, %v7199_v52, %v2915_v9  ;;  %v7446_v25 = vpop.eup %4341  ;;  %4353 = vrcp.f32 %v2997_v5  ;;  %v2922_v16 = vmul.f32 %v4340_v2, %v7224_v34  ;;  %vm2313_vm3 = vcmp.eq.f32.partialorder %v7259_v49, inf  ;;  %v7489_v9 = vpop.xlane.xlu1 %3321 }
 0x2a5   :  { %v2920_v31 = vsel %vm2918_vm12, %v2919_v33, %v2917_v39  ;;  %v3285_v22 = vmul.f32 %v6974_v54, %v3230_v51  ;;  %v2316_v55 = vand.u32 2147483648, %v7259_v49  ;;  %v3087_v23 = vmul.f32 %v7264_v59, %v8045_v35 }
 0x2a6   :  { %v3135_v53 = vmul.f32 %v7298_v50, %v8046_v43  ;;  %4355 = vrsqrt.f32 %v7292_v37  ;;  %v4344_v47 = vpop.eup %4343  ;;  %v2998_v52 = vadd.f32 1e-10, %v2920_v31  ;;  %v2924_v33 = vsel %vm2923_vm13, %v7224_v34, %v2922_v16 }
 0x2a7   :  { %4357 = vrcp.f32 %v2374_v19  ;;  %v3401_v15 = vsel %vm1851_vm2, %v3285_v22, 0.0  ;;  %vm2315_vm4 = vcmp.eq.f32.partialorder %v7259_v49, 0.0  ;;  %v7468_v59 = vpop.eup %4345  ;;  %v2927_v50 = vsel %vm2925_vm14, %v2926_v45, %v2924_v33  ;;  %v7491_v45 = vpop.xlane.xlu0 %3324 }
 0x2a8   :  { %4359 = vrcp.f32 %v2375_v40  ;;  %v2305_v8 = vmul.f32 %v4344_v47, %v7234_v60  ;;  %3402 = vadd.xlane.f32.xlu0 %v3401_v15  ;;  %v3183_v46 = vsub.f32 %v3087_v23, %v3135_v53  ;;  %vm2930_vm5 = vcmp.eq.f32.partialorder %v7269_v21, inf  ;;  %v7477_v27 = vpop.eup %4347  ;;  %v3328_v23 = vpop.xlane.xlu1 %3327  ;;  %v8050_v15 = vld [vmem:[#allocation61_spill] sm:$0xff] }
 0x2a9   :  { %vm2932_vm6 = vcmp.eq.f32.partialorder %v7269_v21, 0.0  ;;  %v2933_v0 = vand.u32 2147483648, %v7269_v21  ;;  %4361 = vrsqrt.f32 %v7305_v6  ;;  %v2999_v29 = vadd.f32 1e-10, %v2927_v50 }
 0x2aa   :  { %v2307_v34 = vsel %vm2306_vm15, %v7234_v60, %v2305_v8  ;;  %v3231_v58 = vmul.f32 %v3183_v46, %v3183_v46  ;;  %vm2937_vm7 = vcmp.eq.f32.partialorder %v7292_v37, inf  ;;  %4363 = vrcp.f32 %v2998_v52  ;;  %v8049_v52 = vld [vmem:[#allocation60_spill] sm:$0xff] }
 0x2ab   :  { %v2310_v5 = vsel %vm2308_vm0, %v2309_v44, %v2307_v34  ;;  %v3088_v17 = vmul.f32 %v7316_v20, %v8047_v11  ;;  %v3136_v13 = vmul.f32 %v7346_v56, %v8048_v10  ;;  %v4350_v19 = vpop.eup %4349  ;;  %vm2939_vm8 = vcmp.eq.f32.partialorder %v7292_v37, 0.0  ;;  %v3331_v43 = vpop.xlane.xlu0 %3330 }
 0x2ac   :  { %v2376_v51 = vadd.f32 1e-10, %v2310_v5  ;;  %v3286_v2 = vmul.f32 %v6974_v54, %v3231_v58  ;;  %4365 = vrsqrt.f32 %v7328_v1  ;;  %v2312_v60 = vmul.f32 %v4350_v19, %v7259_v49 }
 0x2ad   :  { %v2940_v40 = vand.u32 2147483648, %v7292_v37  ;;  %vm2320_vm9 = vcmp.eq.f32.partialorder %v7305_v6, inf  ;;  %v3184_v20 = vsub.f32 %v3088_v17, %v3136_v13  ;;  %v4352_v56 = vpop.eup %4351  ;;  %4367 = vrcp.f32 %v2999_v29  ;;  %v3334_v13 = vpop.xlane.xlu1 %3333 }
 0x2ae   :  { %v3404_v39 = vsel %vm1851_vm2, %v3286_v2, 0.0  ;;  %vm2322_vm10 = vcmp.eq.f32.partialorder %v7305_v6, 0.0  ;;  %v2323_v44 = vand.u32 2147483648, %v7305_v6  ;;  %v7502_v31 = vpop.eup %4353  ;;  %v2314_v16 = vsel %vm2313_vm3, %v7259_v49, %v2312_v60 }
 0x2af   :  { %v2929_v22 = vmul.f32 %v4352_v56, %v7269_v21  ;;  %3405 = vadd.xlane.f32.xlu1 %v3404_v39  ;;  %v3232_v35 = vmul.f32 %v3184_v20, %v3184_v20  ;;  %4369 = vrsqrt.f32 %v7336_v36  ;;  %v2317_v47 = vsel %vm2315_vm4, %v2316_v55, %v2314_v16  ;;  %v8051_v16 = vld [vmem:[#allocation62_spill] sm:$0xff] }
 0x2b0   :  { %v4356_v53 = vpop.eup %4355  ;;  %4371 = vrcp.f32 %v2376_v51  ;;  %vm2327_vm11 = vcmp.eq.f32.partialorder %v7328_v1, inf  ;;  %v3089_v33 = vmul.f32 %v7333_v57, %v8049_v52  ;;  %v3137_v50 = vmul.f32 %v7365_v62, %v8050_v15 }
 0x2b1   :  { %v7516_v8 = vpop.eup %4357  ;;  %v2377_v46 = vadd.f32 1e-10, %v2317_v47  ;;  %v2931_v29 = vsel %vm2930_vm5, %v7269_v21, %v2929_v22  ;;  %v2936_v34 = vmul.f32 %v4356_v53, %v7292_v37  ;;  %v3287_v49 = vmul.f32 %v6974_v54, %v3232_v35  ;;  %v3337_v21 = vpop.xlane.xlu0 %3336  ;;  %v8052_v35 = vld [vmem:[#allocation63_spill] sm:$0xff]  ;;  %v8057_v47 = vld [vmem:[#allocation68_spill] sm:$0xff] }
 0x2b2   :  { %vm2329_vm1 = vcmp.eq.f32.partialorder %v7328_v1, 0.0  ;;  %v7524_v55 = vpop.eup %4359  ;;  %v2934_v57 = vsel %vm2932_vm6, %v2933_v0, %v2931_v29  ;;  %v2330_v62 = vand.u32 2147483648, %v7328_v1  ;;  %v3185_v58 = vsub.f32 %v3089_v33, %v3137_v50 }
 0x2b3   :  { %4373 = vrsqrt.f32 %v7360_v7  ;;  %v4362_v5 = vpop.eup %4361  ;;  %v3000_v11 = vadd.f32 1e-10, %v2934_v57  ;;  %v2938_v17 = vsel %vm2937_vm7, %v7292_v37, %v2936_v34  ;;  %v3407_v54 = vsel %vm1851_vm2, %v3287_v49, 0.0  ;;  %v7547_v37 = vld [vmem:[%s7838_s4] ss:$0 sm:$0xff] }
 0x2b4   :  { %vm2944_vm12 = vcmp.eq.f32.partialorder %v7336_v36, inf  ;;  %v2947_v10 = vand.u32 2147483648, %v7336_v36  ;;  %4375 = vrcp.f32 %v2377_v46  ;;  %v2941_v0 = vsel %vm2939_vm8, %v2940_v40, %v2938_v17  ;;  %3408 = vadd.xlane.f32.xlu0 %v3407_v54  ;;  %v4364_v2 = vpop.eup %4363 }
 0x2b5   :  { %v2319_v19 = vmul.f32 %v4362_v5, %v7305_v6  ;;  %vm2946_vm13 = vcmp.eq.f32.partialorder %v7336_v36, 0.0  ;;  %v3233_v51 = vmul.f32 %v3185_v58, %v3185_v58  ;;  %4377 = vrcp.f32 %v3000_v11  ;;  %v8060_v5 = vld [vmem:[#allocation72_spill] sm:$0xff] }
 0x2b6   :  { %v3001_v60 = vadd.f32 1e-10, %v2941_v0  ;;  %v2954_v20 = vand.u32 2147483648, %v7360_v7  ;;  %vm3443_vm14 = vcmask 7168   ;;  %v4366_v56 = vpop.eup %4365  ;;  %vm2951_vm15 = vcmp.eq.f32.partialorder %v7360_v7, inf }
 0x2b7   :  { %v2321_v39 = vsel %vm2320_vm9, %v7305_v6, %v2319_v19  ;;  %v3288_v40 = vmul.f32 %v7547_v37, %v3233_v51  ;;  %3444 = vst.msk [vmem:[%s7839_s7] sm:$0xff] %vm3443_vm14, %v7371_v3  ;;  %v3090_v22 = vmul.f32 %v7385_v32, %v8051_v16  ;;  %v3138_v53 = vmul.f32 %v7401_v30, %v8052_v35 }
 0x2b8   :  { %3445 = vst.msk [vmem:[%s7839_s7 + $0x8] sm:$0xff] %vm3443_vm14, %v7394_v24  ;;  %3446 = vst.msk [vmem:[%s7839_s7 + $0x10] sm:$0xff] %vm3443_vm14, %v7406_v63  ;;  %4379 = vrcp.f32 %v3001_v60  ;;  %v2324_v3 = vsel %vm2322_vm10, %v2323_v44, %v2321_v39  ;;  %v2326_v32 = vmul.f32 %v4366_v56, %v7328_v1  ;;  %vm2953_vm0 = vcmp.eq.f32.partialorder %v7360_v7, 0.0  ;;  %v8053_v24 = vld [vmem:[#allocation64_spill] sm:$0xff]  ;;  %v4368_v63 = vpop.eup %4367  ;;  %v8055_v44 = vld [vmem:[#allocation66_spill] sm:$0xff]  ;;  %v3340_v33 = vpop.xlane.xlu1 %3339 }
 0x2b9   :  { %3447 = vst.msk [vmem:[%s7839_s7 + $0x18] sm:$0xff] %vm3443_vm14, %v7430_v38  ;;  %3448 = vst.msk [vmem:[%s7839_s7 + $0x20] sm:$0xff] %vm3443_vm14, %v7439_v26  ;;  %v3091_v30 = vmul.f32 %v7390_v18, %v8053_v24  ;;  %v2378_v38 = vadd.f32 1e-10, %v2324_v3  ;;  %v3410_v26 = vsel %vm1851_vm2, %v3288_v40, 0.0  ;;  %v3093_v52 = vmul.f32 %v7468_v59, %v8057_v47  ;;  %v8058_v59 = vld [vmem:[#allocation69_spill] sm:$0xff] }
 0x2ba   :  { %3449 = vst.msk [vmem:[%s7839_s7 + $0x28] sm:$0xff] %vm3443_vm14, %v7464_v14  ;;  %3450 = vst.msk [vmem:[%s7839_s7 + $0x30] sm:$0xff] %vm3443_vm14, %v7466_v41  ;;  %v3186_v14 = vsub.f32 %v3090_v22, %v3138_v53  ;;  %v8054_v41 = vld [vmem:[#allocation65_spill] sm:$0xff]  ;;  %v2328_v6 = vsel %vm2327_vm11, %v7328_v1, %v2326_v32  ;;  %3411 = vadd.xlane.f32.xlu1 %v3410_v26  ;;  %v3141_v34 = vmul.f32 %v7502_v31, %v8058_v59  ;;  %v8063_v26 = vld [vmem:[#allocation74_spill] sm:$0xff] }
 0x2bb   :  { %3451 = vst.msk [vmem:[%s7839_s7 + $0x38] sm:$0xff] %vm3443_vm14, %v7489_v9  ;;  %3452 = vst.msk [vmem:[%s7839_s7 + $0x40] sm:$0xff] %vm3443_vm14, %v7491_v45  ;;  %v3139_v9 = vmul.f32 %v7413_v12, %v8054_v41  ;;  %v4370_v45 = vpop.eup %4369  ;;  %4381 = vrcp.f32 %v2378_v38  ;;  %v2331_v12 = vsel %vm2329_vm1, %v2330_v62, %v2328_v6  ;;  %v8059_v62 = vld [vmem:[#allocation70_spill] sm:$0xff]  ;;  %v3142_v11 = vmul.f32 %v4364_v2, %v8060_v5  ;;  %v8064_v41 = vld [vmem:[#allocation76_spill] sm:$0xff] }
 0x2bc   :  { %3453 = vst.msk [vmem:[%s7839_s7 + $0x48] sm:$0xff] %vm3443_vm14, %v3328_v23  ;;  %3454 = vst.msk [vmem:[%s7839_s7 + $0x50] sm:$0xff] %vm3443_vm14, %v3331_v43  ;;  %v3092_v23 = vmul.f32 %v7446_v25, %v8055_v44  ;;  %v8056_v43 = vld [vmem:[#allocation67_spill] sm:$0xff]  ;;  %v4372_v15 = vpop.eup %4371  ;;  %v2943_v50 = vmul.f32 %v4370_v45, %v7336_v36  ;;  %v3234_v46 = vmul.f32 %v3186_v14, %v3186_v14  ;;  %v2379_v25 = vadd.f32 1e-10, %v2331_v12 }
 0x2bd   :  { %3455 = vst.msk [vmem:[%s7839_s7 + $0x58] sm:$0xff] %vm3443_vm14, %v3334_v13  ;;  %3456 = vst.msk [vmem:[%s7839_s7 + $0x60] sm:$0xff] %vm3443_vm14, %v3337_v21  ;;  %v3140_v18 = vmul.f32 %v7477_v27, %v8056_v43  ;;  %v3187_v27 = vsub.f32 %v3091_v30, %v3139_v9  ;;  %v4374_v49 = vpop.eup %4373  ;;  %v3094_v58 = vmul.f32 %v7516_v8, %v8059_v62  ;;  %v3343_v60 = vpop.xlane.xlu0 %3342 }
 0x2be   :  { %3457 = vst.msk [vmem:[%s7839_s7 + $0x68] sm:$0xff] %vm3443_vm14, %v3340_v33  ;;  %v2945_v1 = vsel %vm2944_vm12, %v7336_v36, %v2943_v50  ;;  %v3289_v57 = vmul.f32 %v7547_v37, %v3234_v46  ;;  %4383 = vrcp.f32 %v2379_v25  ;;  %v2950_v31 = vmul.f32 %v4374_v49, %v7360_v7  ;;  %v4376_v13 = vpop.eup %4375  ;;  %3458 = vst.msk [vmem:[%s7839_s7 + $0x70] sm:$0xff] %vm3443_vm14, %v3343_v60 }
 0x2bf   :  { %v3188_v29 = vsub.f32 %v3092_v23, %v3140_v18  ;;  %v2948_v17 = vsel %vm2946_vm13, %v2947_v10, %v2945_v1  ;;  %v3235_v54 = vmul.f32 %v3187_v27, %v3187_v27  ;;  %v3189_v51 = vsub.f32 %v3093_v52, %v3141_v34  ;;  %v4378_v56 = vpop.eup %4377  ;;  %v8061_v10 = vld [vmem:[#allocation71_spill] sm:$0xff] }
 0x2c0   :  { %v3002_v21 = vadd.f32 1e-10, %v2948_v17  ;;  %v3413_v0 = vsel %vm1851_vm2, %v3289_v57, 0.0  ;;  %v2952_v8 = vsel %vm2951_vm15, %v7360_v7, %v2950_v31  ;;  %v3190_v36 = vsub.f32 %v3094_v58, %v3142_v11 }
 0x2c1   :  { %v3236_v19 = vmul.f32 %v3188_v29, %v3188_v29  ;;  %3414 = vadd.xlane.f32.xlu0 %v3413_v0  ;;  %v3290_v2 = vmul.f32 %v7547_v37, %v3235_v54  ;;  %v3095_v39 = vmul.f32 %v7524_v55, %v8061_v10  ;;  %v2955_v40 = vsel %vm2953_vm0, %v2954_v20, %v2952_v8  ;;  %v8062_v55 = vld [vmem:[#allocation73_spill] sm:$0xff] }
 0x2c2   :  { %4385 = vrcp.f32 %v3002_v21  ;;  %v3237_v22 = vmul.f32 %v3189_v51, %v3189_v51  ;;  %v4380_v35 = vpop.eup %4379  ;;  %v3003_v53 = vadd.f32 1e-10, %v2955_v40  ;;  %v3238_v32 = vmul.f32 %v3190_v36, %v3190_v36  ;;  %v3346_v45 = vpop.xlane.xlu1 %3345 }
 0x2c3   :  { %v3291_v16 = vmul.f32 %v7547_v37, %v3236_v19  ;;  %v3416_v3 = vsel %vm1851_vm2, %v3290_v2, 0.0  ;;  %v3143_v24 = vmul.f32 %v4368_v63, %v8062_v55  ;;  %v3096_v14 = vmul.f32 %v4372_v15, %v8063_v26  ;;  %v8065_v63 = vld [vmem:[#allocation75_spill] sm:$0xff]  ;;  %3459 = vst.msk [vmem:[%s7839_s7 + $0x78] sm:$0xff] %vm3443_vm14, %v3346_v45 }
 0x2c4   :  { %3417 = vadd.xlane.f32.xlu1 %v3416_v3  ;;  %v3292_v38 = vmul.f32 %v7547_v37, %v3237_v22  ;;  %v3144_v7 = vmul.f32 %v4378_v56, %v8064_v41  ;;  %4387 = vrcp.f32 %v3003_v53  ;;  %v3293_v20 = vmul.f32 %v7547_v37, %v3238_v32 }
 0x2c5   :  { %v3419_v30 = vsel %vm1851_vm2, %v3291_v16, 0.0  ;;  %v3191_v9 = vsub.f32 %v3095_v39, %v3143_v24  ;;  %v4382_v6 = vpop.eup %4381  ;;  %v3097_v43 = vmul.f32 %v4376_v13, %v8065_v63  ;;  %v3145_v18 = vmul.f32 %v4380_v35, %v6091_v48 }
 0x2c6   :  { %3420 = vadd.xlane.f32.xlu0 %v3419_v30  ;;  %v3422_v44 = vsel %vm1851_vm2, %v3292_v38, 0.0  ;;  %v3192_v23 = vsub.f32 %v3096_v14, %v3144_v7  ;;  %v3425_v47 = vsel %vm1851_vm2, %v3293_v20, 0.0  ;;  %v3098_v49 = vmul.f32 %v4382_v6, %v6144_v42 }
 0x2c7   :  { %v3239_v52 = vmul.f32 %v3191_v9, %v3191_v9  ;;  %v3193_v15 = vsub.f32 %v3097_v43, %v3145_v18 }
 0x2c8   :  { %3423 = vadd.xlane.f32.xlu1 %v3422_v44  ;;  %v3240_v33 = vmul.f32 %v3192_v23, %v3192_v23  ;;  %v4384_v12 = vpop.eup %4383 }
 0x2c9   :  { %v3294_v50 = vmul.f32 %v7547_v37, %v3239_v52  ;;  %v3241_v25 = vmul.f32 %v3193_v15, %v3193_v15  ;;  %v3349_v34 = vpop.xlane.xlu0 %3348  ;;  %v3099_v5 = vmul.f32 %v4384_v12, %v6193_v61 }
 0x2ca   :  { %3426 = vadd.xlane.f32.xlu0 %v3425_v47  ;;  %v3295_v46 = vmul.f32 %v7547_v37, %v3240_v33  ;;  %3460 = vst.msk [vmem:[%s7839_s7 + $0x80] sm:$0xff] %vm3443_vm14, %v3349_v34 }
 0x2cb   :  { %v3428_v48 = vsel %vm1851_vm2, %v3294_v50, 0.0  ;;  %v3296_v59 = vmul.f32 %v7547_v37, %v3241_v25 }
 0x2cc   :  { %v4386_v27 = vpop.eup %4385  ;;  %3429 = vadd.xlane.f32.xlu1 %v3428_v48  ;;  %v3431_v29 = vsel %vm1851_vm2, %v3295_v46, 0.0 }
 0x2cd   :  { %v3146_v1 = vmul.f32 %v4386_v27, %v6195_v4  ;;  %v3434_v57 = vsel %vm1851_vm2, %v3296_v59, 0.0 }
 0x2ce   :  { %3432 = vadd.xlane.f32.xlu0 %v3431_v29  ;;  %v4388_v62 = vpop.eup %4387 }
 0x2cf   :  { %v3194_v58 = vsub.f32 %v3098_v49, %v3146_v1  ;;  %v3147_v11 = vmul.f32 %v4388_v62, %v6204_v28 }
 0x2d0   :  { %3435 = vadd.xlane.f32.xlu1 %v3434_v57  ;;  %v3352_v54 = vpop.xlane.xlu1 %3351 }
 0x2d1   :  { %v3242_v17 = vmul.f32 %v3194_v58, %v3194_v58  ;;  %v3195_v31 = vsub.f32 %v3099_v5, %v3147_v11  ;;  %3461 = vst.msk [vmem:[%s7839_s7 + $0x88] sm:$0xff] %vm3443_vm14, %v3352_v54 }
 0x2d3   :  { %v3297_v42 = vmul.f32 %v7547_v37, %v3242_v17  ;;  %v3243_v4 = vmul.f32 %v3195_v31, %v3195_v31 }
 0x2d5   :  { %v3437_v13 = vsel %vm1851_vm2, %v3297_v42, 0.0  ;;  %v3298_v21 = vmul.f32 %v7547_v37, %v3243_v4  ;;  %v3355_v0 = vpop.xlane.xlu0 %3354 }
 0x2d6   :  { %3438 = vadd.xlane.f32.xlu0 %v3437_v13  ;;  %3462 = vst.msk [vmem:[%s7839_s7 + $0x90] sm:$0xff] %vm3443_vm14, %v3355_v0 }
 0x2d7   :  { %v3440_v61 = vsel %vm1851_vm2, %v3298_v21, 0.0 }
 0x2d8   :  { %3441 = vadd.xlane.f32.xlu1 %v3440_v61 }
 0x2da   :  { %v3358_v28 = vpop.xlane.xlu1 %3357 }
 0x2db   :  { %3463 = vst.msk [vmem:[%s7839_s7 + $0x98] sm:$0xff] %vm3443_vm14, %v3358_v28 }
 0x2e0   :  { %v3361_v19 = vpop.xlane.xlu0 %3360 }
 0x2e1   :  { %3464 = vst.msk [vmem:[%s7839_s7 + $0xa0] sm:$0xff] %vm3443_vm14, %v3361_v19 }
 0x2e7   :  { %v3364_v37 = vpop.xlane.xlu1 %3363 }
 0x2e8   :  { %3465 = vst.msk [vmem:[%s7839_s7 + $0xa8] sm:$0xff] %vm3443_vm14, %v3364_v37 }
 0x2ed   :  { %v3367_v51 = vpop.xlane.xlu0 %3366 }
 0x2ee   :  { %3466 = vst.msk [vmem:[%s7839_s7 + $0xb0] sm:$0xff] %vm3443_vm14, %v3367_v51 }
 0x2f3   :  { %v3370_v60 = vpop.xlane.xlu1 %3369 }
 0x2f4   :  { %3467 = vst.msk [vmem:[%s7839_s7 + $0xb8] sm:$0xff] %vm3443_vm14, %v3370_v60 }
 0x2f8   :  { %v3373_v56 = vpop.xlane.xlu0 %3372 }
 0x2f9   :  { %3468 = vst.msk [vmem:[%s7839_s7 + $0xc0] sm:$0xff] %vm3443_vm14, %v3373_v56 }
 0x2ff   :  { %v3376_v8 = vpop.xlane.xlu1 %3375 }
 0x300   :  { %3469 = vst.msk [vmem:[%s7839_s7 + $0xc8] sm:$0xff] %vm3443_vm14, %v3376_v8 }
 0x305   :  { %v3379_v2 = vpop.xlane.xlu0 %3378 }
 0x306   :  { %3470 = vst.msk [vmem:[%s7839_s7 + $0xd0] sm:$0xff] %vm3443_vm14, %v3379_v2 }
 0x30a   :  { %v3382_v36 = vpop.xlane.xlu1 %3381 }
 0x30b   :  { %3471 = vst.msk [vmem:[%s7839_s7 + $0xd8] sm:$0xff] %vm3443_vm14, %v3382_v36 }
 0x311   :  { %v3385_v10 = vpop.xlane.xlu0 %3384 }
 0x312   :  { %3472 = vst.msk [vmem:[%s7839_s7 + $0xe0] sm:$0xff] %vm3443_vm14, %v3385_v10 }
 0x316   :  { %v3388_v39 = vpop.xlane.xlu1 %3387 }
 0x317   :  { %3473 = vst.msk [vmem:[%s7839_s7 + $0xe8] sm:$0xff] %vm3443_vm14, %v3388_v39 }
 0x31e   :  { %v3391_v40 = vpop.xlane.xlu0 %3390 }
 0x31f   :  { %3474 = vst.msk [vmem:[%s7839_s7 + $0xf0] sm:$0xff] %vm3443_vm14, %v3391_v40 }
 0x324   :  { %v3394_v16 = vpop.xlane.xlu1 %3393 }
 0x325   :  { %3475 = vst.msk [vmem:[%s7839_s7 + $0xf8] sm:$0xff] %vm3443_vm14, %v3394_v16 }
 0x32a   :  { %v3397_v22 = vpop.xlane.xlu0 %3396 }
 0x32b   :  { %3476 = vst.msk [vmem:[%s7839_s7 + $0x100] sm:$0xff] %vm3443_vm14, %v3397_v22 }
 0x32f   :  { %v3400_v35 = vpop.xlane.xlu1 %3399 }
 0x330   :  { %3477 = vst.msk [vmem:[%s7839_s7 + $0x108] sm:$0xff] %vm3443_vm14, %v3400_v35 }
 0x335   :  { %v3403_v53 = vpop.xlane.xlu0 %3402 }
 0x336   :  { %3478 = vst.msk [vmem:[%s7839_s7 + $0x110] sm:$0xff] %vm3443_vm14, %v3403_v53 }
 0x33c   :  { %v3406_v3 = vpop.xlane.xlu1 %3405 }
 0x33d   :  { %3479 = vst.msk [vmem:[%s7839_s7 + $0x118] sm:$0xff] %vm3443_vm14, %v3406_v3 }
 0x341   :  { %v3409_v32 = vpop.xlane.xlu0 %3408 }
 0x342   :  { %3480 = vst.msk [vmem:[%s7839_s7 + $0x120] sm:$0xff] %vm3443_vm14, %v3409_v32 }
 0x347   :  { %v3412_v55 = vpop.xlane.xlu1 %3411 }
 0x348   :  { %3481 = vst.msk [vmem:[%s7839_s7 + $0x128] sm:$0xff] %vm3443_vm14, %v3412_v55 }
 0x34e   :  { %v3415_v24 = vpop.xlane.xlu0 %3414 }
 0x34f   :  { %3482 = vst.msk [vmem:[%s7839_s7 + $0x130] sm:$0xff] %vm3443_vm14, %v3415_v24 }
 0x351   :  { %v3418_v30 = vpop.xlane.xlu1 %3417 }
 0x352   :  { %3483 = vst.msk [vmem:[%s7839_s7 + $0x138] sm:$0xff] %vm3443_vm14, %v3418_v30 }
 0x353   :  { %v3421_v38 = vpop.xlane.xlu0 %3420 }
 0x354   :  { %3484 = vst.msk [vmem:[%s7839_s7 + $0x140] sm:$0xff] %vm3443_vm14, %v3421_v38 }
 0x355   :  { %v3424_v26 = vpop.xlane.xlu1 %3423 }
 0x356   :  { %3485 = vst.msk [vmem:[%s7839_s7 + $0x148] sm:$0xff] %vm3443_vm14, %v3424_v26 }
 0x357   :  { %v3427_v14 = vpop.xlane.xlu0 %3426 }
 0x358   :  { %3486 = vst.msk [vmem:[%s7839_s7 + $0x150] sm:$0xff] %vm3443_vm14, %v3427_v14 }
 0x359   :  { %v3430_v41 = vpop.xlane.xlu1 %3429 }
 0x35a   :  { %3487 = vst.msk [vmem:[%s7839_s7 + $0x158] sm:$0xff] %vm3443_vm14, %v3430_v41 }
 0x35b   :  { %v3433_v7 = vpop.xlane.xlu0 %3432 }
 0x35c   :  { %3488 = vst.msk [vmem:[%s7839_s7 + $0x160] sm:$0xff] %vm3443_vm14, %v3433_v7 }
 0x35d   :  { %v3436_v20 = vpop.xlane.xlu1 %3435 }
 0x35e   :  { %3489 = vst.msk [vmem:[%s7839_s7 + $0x168] sm:$0xff] %vm3443_vm14, %v3436_v20 }
 0x363   :  { %v3439_v9 = vpop.xlane.xlu0 %3438 }
 0x364   :  { %3490 = vst.msk [vmem:[%s7839_s7 + $0x170] sm:$0xff] %vm3443_vm14, %v3439_v9 }
 0x365   :  { %v3442_v45 = vpop.xlane.xlu1 %3441 }
 0x366   :  { %3491 = vst.msk [vmem:[%s7839_s7 + $0x178] sm:$0xff] %vm3443_vm14, %v3442_v45 }

// kernel: squeeze.5
= control target key start
LH: loop header
LB: loop body
LE: loop exit
PB: predicated region body
PF: predicated region fallthrough
CT: control target
= control target key end

     0   :  { %vm7_vm0 = vcmask 293888   ;;  %s39_s0 = inlined_call_operand.vmem [shape: f32[72], index: 0, kind: input, shape index: {}]   ;;  %s40_s1 = inlined_call_operand.vmem [shape: f32[2,36], index: 1, kind: output, shape index: {}]  }
   0x1   :  { %v4_v0 = vld [vmem:[%s39_s0] sm:$0x1]  ;;  %s22_s0 = smov 92  }
   0x2   :  { %5 = vst [vmem:[#allocation1] sm:$0x1] %v4_v0 }
   0x9   :  { %v9_v1 = vld [vmem:[#allocation1] sm:$0x1]  }
   0xa   :  { %v6_v2 = vld [vmem:[#allocation1] sm:$0x1]   ;;  %10 = vrot.lane.b32.xlu0 %v9_v1, %s22_s0 }
   0xb   :  { %8 = vst.msk [vmem:[#allocation0] sm:$0x1] %vm7_vm0, %v6_v2  }
  0x7c   :  { %v11_v3 = vpop.permute.xlu0 %10  }
  0x7d   :  { %14 = vst.msk [vmem:[#allocation0 + $0x1] sm:$0x1] %vm7_vm0, %v11_v3  }
  0x84   :  { %v18_v4 = vld [vmem:[#allocation0] sm:$0x3] }
  0x85   :  { %20 = vst [vmem:[%s40_s1] sm:$0x3] %v18_v4 }

// kernel: squeeze.4
= control target key start
LH: loop header
LB: loop body
LE: loop exit
PB: predicated region body
PF: predicated region fallthrough
CT: control target
= control target key end

     0   :  { %vm8_vm0 = vcmask 130048   ;;  %vm24_vm1 = vcmask 1048448   ;;  %vm31_vm2 = vcmask 916480   ;;  %s67_s0 = inlined_call_operand.vmem [shape: f32[288], index: 0, kind: input, shape index: {}]   ;;  %s68_s1 = inlined_call_operand.vmem [shape: f32[2,144], index: 1, kind: output, shape index: {}]  }
   0x1   :  { %v4_v0 = vld [vmem:[%s67_s0] sm:$0xf]  ;;  %s47_s0 = smov 112  }
   0x2   :  { %5 = vst [vmem:[#allocation1] sm:$0xf] %v4_v0 }
   0x9   :  { %v14_v1 = vld [vmem:[#allocation1 + $0x2] sm:$0x1]   ;;  %v7_v3 = vld [vmem:[#allocation1 + $0x1] sm:$0x1]   ;;  %v11_v5 = vld [vmem:[#allocation1] sm:$0x1]  }
   0xa   :  { %v16_v2 = vld [vmem:[#allocation1 + $0x2] sm:$0x1]   ;;  %10 = vst.msk [vmem:[#allocation0 + $0x8] sm:$0x1] %vm8_vm0, %v7_v3   ;;  %12 = vst [vmem:[#allocation0] sm:$0x1] %v11_v5  }
   0xb   :  { %v18_v4 = vsel %vm8_vm0, %v16_v2, %v14_v1  ;;  %v28_v6 = vld [vmem:[#allocation1 + $0x1] sm:$0x1]  }
   0xc   :  { %19 = vrot.lane.b32.xlu0 %v18_v4, %s47_s0 }
  0x10   :  { %29 = vrot.lane.b32.xlu0 %v28_v6, %s47_s0 }
  0x7e   :  { %v20_v7 = vpop.permute.xlu0 %19  }
  0x7f   :  { %23 = vst.msk [vmem:[#allocation0 + $0x9] sm:$0x1] %vm8_vm0, %v20_v7  }
  0x80   :  { %26 = vst.msk [vmem:[#allocation0 + $0x1] sm:$0x1] %vm24_vm1, %v20_v7  }
  0x82   :  { %v30_v8 = vpop.permute.xlu0 %29  }
  0x83   :  { %33 = vst.msk [vmem:[#allocation0 + $0x1] sm:$0x1] %vm31_vm2, %v30_v8  }
  0x86   :  { %v41_v9 = vld [vmem:[#allocation0 + $0x8] sm:$0x3] }
  0x87   :  { %45 = vst [vmem:[%s68_s1 + $0x2] sm:$0x3] %v41_v9 }
  0x8a   :  { %v37_v10 = vld [vmem:[#allocation0] sm:$0x3] }
  0x8b   :  { %39 = vst [vmem:[%s68_s1] sm:$0x3] %v37_v10 }

// kernel: squeeze.3
= control target key start
LH: loop header
LB: loop body
LE: loop exit
PB: predicated region body
PF: predicated region fallthrough
CT: control target
= control target key end

     0   :  { %vm4_vm0 = vcmask 138240   ;;  %s71_s12 = smov 111   ;;  %vm20_vm1 = vcmask 1048440   ;;  %vm27_vm2 = vcmask 908288   ;;  %s112_s0 = inlined_call_operand.vmem [shape: f32[1058], index: 0, kind: input, shape index: {}]   ;;  %s113_s1 = inlined_call_operand.vmem [shape: f32[2,529], index: 1, kind: output, shape index: {}]  }
   0x1   :  { %v63_v0 = vld [vmem:[%s112_s0 + $0x8] sm:$0x1]   ;;  %v62_v3 = vld [vmem:[%s112_s0 + $0x4] sm:$0x1]   ;;  %v7_v4 = vld [vmem:[%s112_s0] sm:$0xf]  }
   0x2   :  { %v64_v1 = vld [vmem:[%s112_s0 + $0x5] sm:$0xf]   ;;  %6 = vst.msk [vmem:[#allocation0 + $0x20] sm:$0x1] %vm4_vm0, %v62_v3  }
   0x3   :  { %v14_v2 = vsel %vm4_vm0, %v64_v1, %v63_v0  ;;  %v65_v5 = vld [vmem:[%s112_s0 + $0x4] sm:$0xf]   ;;  %8 = vst [vmem:[#allocation0] ss:$8 sm:$0xf] %v7_v4  }
   0x4   :  { %15 = vrot.lane.b32.xlu0 %v14_v2, %s71_s12 }
   0x8   :  { %25 = vrot.lane.b32.xlu0 %v65_v5, %s71_s12 }
  0x76   :  { %v16_v6 = vpop.permute.xlu0 %15  }
  0x77   :  { %19 = vst.msk [vmem:[#allocation0 + $0x21] sm:$0x1] %vm4_vm0, %v16_v6  }
  0x78   :  { %22 = vst.msk [vmem:[#allocation0 + $0x1] ss:$8 sm:$0xf] %vm20_vm1, %v16_v6  }
  0x7a   :  { %v26_v7 = vpop.permute.xlu0 %25  }
  0x7b   :  { %29 = vst.msk [vmem:[#allocation0 + $0x1] ss:$8 sm:$0xf] %vm27_vm2, %v26_v7  }
  0x7e   :  { %v54_v8 = vld [vmem:[#allocation0 + $0x20] sm:$0x3] }
  0x7f   :  { %69 = vst [vmem:[%s113_s1 + $0x8] sm:$0x3] %v54_v8 }
  0x82   :  { %v33_v9 = vld [vmem:[#allocation0] sm:$0x3]  ;;  %v37_v10 = vld [vmem:[#allocation0 + $0x8] sm:$0x3]  ;;  %v42_v11 = vld [vmem:[#allocation0 + $0x10] sm:$0x3] }
  0x83   :  { %35 = vst [vmem:[%s113_s1] sm:$0x3] %v33_v9  ;;  %66 = vst [vmem:[%s113_s1 + $0x2] sm:$0x3] %v37_v10  ;;  %v48_v12 = vld [vmem:[#allocation0 + $0x18] sm:$0x3] }
  0x84   :  { %67 = vst [vmem:[%s113_s1 + $0x4] sm:$0x3] %v42_v11  ;;  %68 = vst [vmem:[%s113_s1 + $0x6] sm:$0x3] %v48_v12 }

// kernel: _lpips_forward.5
= control target key start
LH: loop header
LB: loop body
LE: loop exit
PB: predicated region body
PF: predicated region fallthrough
CT: control target
= control target key end

     0   :  { %vm324_vm0 = vcmask 261120   ;;  %s3013_s2 = inlined_call_operand.vmem [shape: bf16[288,32], index: 2, kind: input, shape index: {}]   ;;  %s3014_s0 = inlined_call_operand.vmem [shape: bf16[128,288], index: 0, kind: input, shape index: {}]   ;;  %s3015_s1 = inlined_call_operand.vmem [shape: bf16[128,288], index: 1, kind: input, shape index: {}]   ;;  %s3016_s3 = inlined_call_operand.vmem [shape: f32[1,32], index: 3, kind: input, shape index: {}]   ;;  %s3017_s4 = inlined_call_operand.vmem [shape: f32[1,32], index: 4, kind: input, shape index: {}]   ;;  %s3018_s5 = inlined_call_operand.vmem [shape: f32[128,1], index: 5, kind: output, shape index: {}]  }
   0x1   :  { %v1793_v0 = vld [vmem:[%s3013_s2 + $0x40] sm:$0xff]   ;;  %v1796_v3 = vld [vmem:[%s3013_s2 + $0x48] sm:$0xff]   ;;  %v1800_v7 = vld [vmem:[%s3013_s2 + $0x50] sm:$0xff]  }
   0x2   :  { %v2039_v1 = vld [vmem:[%s3013_s2 + $0x80] sm:$0xff]   ;;  %1601 = vmatprep.subr.bf16.mxu0 %v1793_v0  ;;  %v2052_v4 = vld [vmem:[%s3013_s2 + $0x88] sm:$0xff]   ;;  %v1802_v9 = vld [vmem:[%s3013_s2 + $0x10] sm:$0xff]  }
   0x3   :  { %v1795_v2 = vld [vmem:[%s3013_s2] sm:$0xff]   ;;  %1749 = vmatprep.subr.bf16.mxu1 %v2039_v1  ;;  %v1798_v5 = vld [vmem:[%s3013_s2 + $0x8] sm:$0xff]   ;;  %v1803_v10 = vld [vmem:[%s3013_s2 + $0x58] sm:$0xff]  }
   0x4   :  { %1602 = vmatpush3.bf16.msra.mxu0 %v1795_v2  ;;  %1750 = vmatpush3.bf16.msra.mxu1 %v2039_v1  ;;  %v1799_v6 = vld [vmem:[%s3014_s0 + $0x8] ss:$12 sps:$4 sm:$0xff]   ;;  %v1801_v8 = vld [vmem:[%s3014_s0 + $0x20] ss:$12 sps:$4 sm:$0xff]   ;;  %v1804_v11 = vld [vmem:[%s3013_s2 + $0x18] sm:$0xff]  }
   0x5   :  { %1603 = vmatprep.subr.bf16.mxu0 %v1796_v3  ;;  %1751 = vmatprep.subr.bf16.mxu1 %v2052_v4  ;;  %v1805_v12 = vld [vmem:[%s3014_s0 + $0x38] ss:$12 sps:$4 sm:$0xff]   ;;  %v1807_v14 = vld [vmem:[%s3014_s0 + $0x50] ss:$12 sps:$4 sm:$0xff]   ;;  %v1809_v16 = vld [vmem:[%s3013_s2 + $0x68] sm:$0xff]  }
   0x6   :  { %1753 = vmatprep.mubr.msk.bf16.mxu1 %vm324_vm0, %v1799_v6  ;;  %v1806_v13 = vld [vmem:[%s3013_s2 + $0x60] sm:$0xff]   ;;  %v1811_v17 = vld [vmem:[%s3014_s0 + $0x68] ss:$12 sps:$4 sm:$0xff]   ;;  %v1815_v22 = vld [vmem:[%s3013_s2 + $0x78] sm:$0xff]  }
   0x7   :  { %v1808_v15 = vld [vmem:[%s3013_s2 + $0x20] sm:$0xff]   ;;  %v1810_v18 = vld [vmem:[%s3013_s2 + $0x28] sm:$0xff]   ;;  %v1812_v19 = vld [vmem:[%s3013_s2 + $0x70] sm:$0xff]  }
   0x8   :  { %1604 = vmatpush3.bf16.msra.mxu0 %v1798_v5  ;;  %1752 = vmatpush3.bf16.msra.mxu1 %v2052_v4  ;;  %v1813_v20 = vld [vmem:[%s3014_s0 + $0x80] ss:$12 sps:$4 sm:$0xff]   ;;  %v1814_v21 = vld [vmem:[%s3013_s2 + $0x30] sm:$0xff]   ;;  %v1820_v24 = vld [vmem:[%s3014_s0 + $0x98] ss:$12 sps:$4 sm:$0xff]  }
   0x9   :  { %1605 = vmatprep.subr.bf16.mxu0 %v1800_v7  ;;  %1675 = vmatprep.subr.bf16.mxu1 %v1793_v0  ;;  %v1819_v23 = vld [vmem:[%s3014_s0 + $0x4] ss:$12 sps:$4 sm:$0xff]   ;;  %v1816_v25 = vld [vmem:[%s3013_s2 + $0x38] sm:$0xff]   ;;  %v1817_v26 = vld [vmem:[%s3014_s0] ss:$12 sps:$4 sm:$0xff]  }
   0xa   :  { %381 = vmatprep.mubr.bf16.mxu0 %v1819_v23  ;;  %v1821_v27 = vld [vmem:[%s3014_s0 + $0xb0] ss:$12 sps:$4 sm:$0xff]   ;;  %v1824_v30 = vld [vmem:[%s3015_s1] ss:$12 sps:$4 sm:$0xff]   ;;  %v1827_v31 = vld [vmem:[%s3014_s0 + $0x18] ss:$12 sps:$4 sm:$0xff]  }
   0xb   :  { %1754 = vmatmul.mubr.msk.bf16.vlgmr.msra.gmra.mrb[0].mxu1 %vm324_vm0, %v1801_v8  ;;  %v1822_v28 = vld [vmem:[%s3014_s0 + $0x1c] ss:$12 sps:$4 sm:$0xff]   ;;  %v1826_v29 = vld [vmem:[%s3015_s1 + $0x4] ss:$12 sps:$4 sm:$0xff]   ;;  %v1828_v32 = vld [vmem:[%s3014_s0 + $0x34] ss:$12 sps:$4 sm:$0xff]  }
   0xc   :  { %1606 = vmatpush3.bf16.msra.mxu0 %v1802_v9  ;;  %1676 = vmatpush3.bf16.msra.mxu1 %v1795_v2  ;;  %v1830_v33 = vld [vmem:[%s3015_s1 + $0x1c] ss:$12 sps:$4 sm:$0xff]   ;;  %v1833_v35 = vld [vmem:[%s3015_s1 + $0x18] ss:$12 sps:$4 sm:$0xff]   ;;  %v1836_v37 = vld [vmem:[%s3015_s1 + $0x34] ss:$12 sps:$4 sm:$0xff]  }
   0xd   :  { %1607 = vmatprep.subr.bf16.mxu0 %v1803_v10  ;;  %1677 = vmatprep.subr.bf16.mxu1 %v1796_v3  ;;  %v1832_v34 = vld [vmem:[%s3014_s0 + $0x30] ss:$12 sps:$4 sm:$0xff]   ;;  %v1834_v36 = vld [vmem:[%s3014_s0 + $0x4c] ss:$12 sps:$4 sm:$0xff]   ;;  %v1838_v38 = vld [vmem:[%s3014_s0 + $0x48] ss:$12 sps:$4 sm:$0xff]  }
   0xe   :  { %1757 = vmatprep.mubr.msk.bf16.mxu1 %vm324_vm0, %v1805_v12  ;;  %v1839_v39 = vld [vmem:[%s3015_s1 + $0x30] ss:$12 sps:$4 sm:$0xff]   ;;  %v1842_v41 = vld [vmem:[%s3015_s1 + $0x4c] ss:$12 sps:$4 sm:$0xff]   ;;  %v1845_v43 = vld [vmem:[%s3015_s1 + $0x48] ss:$12 sps:$4 sm:$0xff]  }
   0xf   :  { %v1840_v40 = vld [vmem:[%s3014_s0 + $0x64] ss:$12 sps:$4 sm:$0xff]   ;;  %v1844_v42 = vld [vmem:[%s3014_s0 + $0x60] ss:$12 sps:$4 sm:$0xff]   ;;  %v1846_v44 = vld [vmem:[%s3014_s0 + $0x7c] ss:$12 sps:$4 sm:$0xff]  }
  0x10   :  { %1608 = vmatpush3.bf16.msra.mxu0 %v1804_v11  ;;  %1678 = vmatpush3.bf16.msra.mxu1 %v1798_v5  ;;  %v1848_v45 = vld [vmem:[%s3015_s1 + $0x64] ss:$12 sps:$4 sm:$0xff]   ;;  %v1851_v47 = vld [vmem:[%s3015_s1 + $0x60] ss:$12 sps:$4 sm:$0xff]   ;;  %v1854_v49 = vld [vmem:[%s3015_s1 + $0x7c] ss:$12 sps:$4 sm:$0xff]  }
  0x11   :  { %1609 = vmatprep.subr.bf16.mxu0 %v1806_v13  ;;  %1679 = vmatprep.subr.bf16.mxu1 %v1800_v7  ;;  %v1850_v46 = vld [vmem:[%s3014_s0 + $0x78] ss:$12 sps:$4 sm:$0xff]   ;;  %v1852_v48 = vld [vmem:[%s3014_s0 + $0x94] ss:$12 sps:$4 sm:$0xff]   ;;  %v1856_v50 = vld [vmem:[%s3014_s0 + $0x90] ss:$12 sps:$4 sm:$0xff]  }
  0x12   :  { %v1857_v51 = vld [vmem:[%s3015_s1 + $0x78] ss:$12 sps:$4 sm:$0xff]   ;;  %v1860_v53 = vld [vmem:[%s3015_s1 + $0x94] ss:$12 sps:$4 sm:$0xff]   ;;  %v1863_v55 = vld [vmem:[%s3015_s1 + $0x90] ss:$12 sps:$4 sm:$0xff]  }
  0x13   :  { %1758 = vmatmul.mubr.msk.bf16.gmra.mrb[4].mxu1 %vm324_vm0, %v1807_v14  ;;  %v1858_v52 = vld [vmem:[%s3014_s0 + $0xac] ss:$12 sps:$4 sm:$0xff]   ;;  %v1862_v54 = vld [vmem:[%s3014_s0 + $0xa8] ss:$12 sps:$4 sm:$0xff]   ;;  %v1871_v62 = vld [vmem:[%s3015_s1 + $0x50] ss:$12 sps:$4 sm:$0xff]  }
  0x14   :  { %1610 = vmatpush3.bf16.msra.mxu0 %v1808_v15  ;;  %1680 = vmatpush3.bf16.msra.mxu1 %v1802_v9  ;;  %v1864_v56 = vld [vmem:[%s3015_s1 + $0xac] ss:$12 sps:$4 sm:$0xff]   ;;  %v1866_v57 = vld [vmem:[%s3015_s1 + $0x8] ss:$12 sps:$4 sm:$0xff]   ;;  %v1872_v63 = vld [vmem:[%s3015_s1 + $0xb0] ss:$12 sps:$4 sm:$0xff]  }
  0x15   :  { %1611 = vmatprep.subr.bf16.mxu0 %v1809_v16  ;;  %1681 = vmatprep.subr.bf16.mxu1 %v1803_v10  ;;  %v1867_v58 = vld [vmem:[%s3015_s1 + $0xa8] ss:$12 sps:$4 sm:$0xff]   ;;  %v1868_v59 = vld [vmem:[%s3015_s1 + $0x20] ss:$12 sps:$4 sm:$0xff]   ;;  %v1869_v60 = vld [vmem:[%s3015_s1 + $0x38] ss:$12 sps:$4 sm:$0xff]  }
  0x16   :  { %1761 = vmatprep.mubr.msk.bf16.mxu1 %vm324_vm0, %v1811_v17  ;;  %v1870_v61 = vld [vmem:[%s3015_s1 + $0x98] ss:$12 sps:$4 sm:$0xff]   ;;  %v1873_v0 = vld [vmem:[%s3015_s1 + $0x68] ss:$12 sps:$4 sm:$0xff]  }
  0x18   :  { %1612 = vmatpush3.bf16.msra.mxu0 %v1810_v18  ;;  %1682 = vmatpush3.bf16.msra.mxu1 %v1804_v11 }
  0x19   :  { %1613 = vmatprep.subr.bf16.mxu0 %v1812_v19  ;;  %1683 = vmatprep.subr.bf16.mxu1 %v1806_v13 }
  0x1b   :  { %1762 = vmatmul.mubr.msk.bf16.gmra.mrb[8].mxu1 %vm324_vm0, %v1813_v20 }
  0x1c   :  { %1614 = vmatpush3.bf16.msra.mxu0 %v1814_v21  ;;  %1684 = vmatpush3.bf16.msra.mxu1 %v1808_v15 }
  0x1d   :  { %1615 = vmatprep.subr.bf16.mxu0 %v1815_v22  ;;  %1685 = vmatprep.subr.bf16.mxu1 %v1809_v16  ;;  %v2284_v16 = vld [vmem:[%s3016_s3] ss:$0 sm:$0xff] }
  0x1e   :  { %1765 = vmatprep.mubr.msk.bf16.mxu1 %vm324_vm0, %v1820_v24 }
  0x20   :  { %1616 = vmatpush3.bf16.msra.mxu0 %v1816_v25  ;;  %1686 = vmatpush3.bf16.msra.mxu1 %v1810_v18 }
  0x21   :  { %1687 = vmatprep.subr.bf16.mxu1 %v1812_v19  ;;  %1769 = vmatprep.subr.bf16.mxu0 %v2039_v1 }
  0x23   :  { %382 = vmatmul.mubr.bf16.vlgmr.msra.gmra.mrb[0].mxu0 %v1817_v26  ;;  %1766 = vmatmul.mubr.msk.bf16.gmra.mrb[12].mxu1 %vm324_vm0, %v1821_v27 }
  0x24   :  { %1688 = vmatpush3.bf16.msra.mxu1 %v1814_v21  ;;  %1770 = vmatpush3.bf16.msra.mxu0 %v2039_v1 }
  0x25   :  { %1689 = vmatprep.subr.bf16.mxu1 %v1815_v22  ;;  %389 = vmatprep.mubr.bf16.mxu0 %v1822_v28 }
  0x26   :  { %751 = vmatprep.mubr.bf16.mxu1 %v1826_v29  ;;  %1771 = vmatprep.subr.bf16.mxu0 %v2052_v4 }
  0x28   :  { %1690 = vmatpush3.bf16.msra.mxu1 %v1816_v25  ;;  %1772 = vmatpush3.bf16.msra.mxu0 %v2052_v4 }
  0x29   :  { %1789 = vmatprep.subr.bf16.mxu1 %v2039_v1 }
  0x2b   :  { %390 = vmatmul.mubr.bf16.gmra.mrb[4].mxu0 %v1827_v31  ;;  %752 = vmatmul.mubr.bf16.vlgmr.msra.gmra.mrb[16].mxu1 %v1824_v30 }
  0x2c   :  { %397 = vmatprep.mubr.bf16.mxu0 %v1828_v32  ;;  %759 = vmatprep.mubr.bf16.mxu1 %v1830_v33 }
  0x2d   :  { %1791 = vmatpush3.bf16.msra.mxu1 %v2039_v1  ;;  %v1874_v1 = vld [vmem:[%s3015_s1 + $0x80] ss:$12 sps:$4 sm:$0xff]  }
  0x2e   :  { %1790 = vmatprep.subr.bf16.mxu1 %v2052_v4 }
  0x31   :  { %1792 = vmatpush3.bf16.msra.mxu1 %v2052_v4 }
  0x33   :  { %398 = vmatmul.mubr.bf16.gmra.mrb[8].mxu0 %v1832_v34  ;;  %760 = vmatmul.mubr.bf16.gmra.mrb[20].mxu1 %v1833_v35 }
  0x34   :  { %405 = vmatprep.mubr.bf16.mxu0 %v1834_v36  ;;  %767 = vmatprep.mubr.bf16.mxu1 %v1836_v37 }
  0x3b   :  { %406 = vmatmul.mubr.bf16.gmra.mrb[12].mxu0 %v1838_v38  ;;  %768 = vmatmul.mubr.bf16.gmra.mrb[24].mxu1 %v1839_v39 }
  0x3c   :  { %413 = vmatprep.mubr.bf16.mxu0 %v1840_v40  ;;  %775 = vmatprep.mubr.bf16.mxu1 %v1842_v41 }
  0x43   :  { %414 = vmatmul.mubr.bf16.gmra.mrb[16].mxu0 %v1844_v42  ;;  %776 = vmatmul.mubr.bf16.gmra.mrb[28].mxu1 %v1845_v43 }
  0x44   :  { %421 = vmatprep.mubr.bf16.mxu0 %v1846_v44  ;;  %783 = vmatprep.mubr.bf16.mxu1 %v1848_v45 }
  0x4b   :  { %422 = vmatmul.mubr.bf16.gmra.mrb[20].mxu0 %v1850_v46  ;;  %784 = vmatmul.mubr.bf16.gmra.mrb[32].mxu1 %v1851_v47 }
  0x4c   :  { %429 = vmatprep.mubr.bf16.mxu0 %v1852_v48  ;;  %791 = vmatprep.mubr.bf16.mxu1 %v1854_v49 }
  0x53   :  { %430 = vmatmul.mubr.bf16.gmra.mrb[24].mxu0 %v1856_v50  ;;  %792 = vmatmul.mubr.bf16.gmra.mrb[36].mxu1 %v1857_v51 }
  0x54   :  { %437 = vmatprep.mubr.bf16.mxu0 %v1858_v52  ;;  %799 = vmatprep.mubr.bf16.mxu1 %v1860_v53 }
  0x5b   :  { %438 = vmatmul.mubr.bf16.gmra.mrb[28].mxu0 %v1862_v54  ;;  %800 = vmatmul.mubr.bf16.gmra.mrb[40].mxu1 %v1863_v55 }
  0x5c   :  { %807 = vmatprep.mubr.bf16.mxu1 %v1864_v56  ;;  %1773 = vmatprep.mubr.msk.bf16.mxu0 %vm324_vm0, %v1866_v57 }
  0x63   :  { %808 = vmatmul.mubr.bf16.gmra.mrb[44].mxu1 %v1867_v58  ;;  %1774 = vmatmul.mubr.msk.bf16.vlgmr.msra.gmra.mrb[32].mxu0 %vm324_vm0, %v1868_v59 }
  0x64   :  { %1777 = vmatprep.mubr.msk.bf16.mxu0 %vm324_vm0, %v1869_v60  ;;  %1785 = vmatprep.mubr.msk.bf16.mxu1 %vm324_vm0, %v1870_v61 }
  0x6b   :  { %1778 = vmatmul.mubr.msk.bf16.gmra.mrb[36].mxu0 %vm324_vm0, %v1871_v62  ;;  %1786 = vmatmul.mubr.msk.bf16.vlgmr.msra.gmra.mrb[48].mxu1 %vm324_vm0, %v1872_v63 }
  0x6c   :  { %1781 = vmatprep.mubr.msk.bf16.mxu0 %vm324_vm0, %v1873_v0 }
  0x73   :  { %1782 = vmatmul.mubr.msk.bf16.gmra.mrb[40].mxu0 %vm324_vm0, %v1874_v1 }
  0xde   :  { %v1755_v2 = vpop.f32.mrb[0].mxu1 }
  0xdf   :  { %v480_v3 = vpop.f32.mrb[1].mxu1 }
  0xe0   :  { %v1756_v4 = vpop.f32.mrb[2].mxu1 }
  0xe1   :  { %v483_v5 = vpop.f32.mrb[3].mxu1 }
  0xe6   :  { %v2263_v6 = vpop.f32.mrb[4].mxu1 }
  0xe7   :  { %v2265_v7 = vpop.f32.mrb[5].mxu1 }
  0xe8   :  { %v2267_v8 = vpop.f32.mrb[6].mxu1 }
  0xe9   :  { %v2269_v9 = vpop.f32.mrb[7].mxu1 }
  0xee   :  { %v2271_v10 = vpop.f32.mrb[8].mxu1 }
  0xef   :  { %v2273_v11 = vpop.f32.mrb[9].mxu1 }
  0xf0   :  { %v2275_v12 = vpop.f32.mrb[10].mxu1 }
  0xf1   :  { %v2277_v13 = vpop.f32.mrb[11].mxu1 }
  0xf6   :  { %v1617_v14 = vpop.f32.mrb[0].mxu0  ;;  %v2279_v15 = vpop.f32.mrb[12].mxu1 }
  0xf7   :  { %v1618_v17 = vpop.f32.mrb[1].mxu0  ;;  %v2286_v18 = vpop.f32.mrb[13].mxu1 }
  0xf8   :  { %v1619_v19 = vadd.f32 %v1618_v17, %v1617_v14  ;;  %v1620_v20 = vpop.f32.mrb[2].mxu0  ;;  %v2288_v21 = vpop.f32.mrb[14].mxu1 }
  0xf9   :  { %v1621_v22 = vpop.f32.mrb[3].mxu0  ;;  %v2290_v23 = vpop.f32.mrb[15].mxu1 }
  0xfa   :  { %v384_v24 = vadd.f32 %v1619_v19, %v2284_v16  ;;  %v1622_v25 = vadd.f32 %v1621_v22, %v1620_v20 }
  0xfc   :  { %v387_v26 = vadd.f32 %v1622_v25, %v2284_v16  ;;  %v481_v27 = vadd.f32 %v480_v3, %v384_v24 }
  0xfe   :  { %v484_v28 = vadd.f32 %v483_v5, %v387_v26  ;;  %v1623_v29 = vpop.f32.mrb[4].mxu0  ;;  %v1691_v30 = vpop.f32.mrb[16].mxu1  ;;  %v2294_v31 = vmax.f32 %v481_v27, 0.0 }
  0xff   :  { %v1624_v32 = vpop.f32.mrb[5].mxu0  ;;  %v1692_v33 = vpop.f32.mrb[17].mxu1 }
 0x100   :  { %v1625_v34 = vadd.f32 %v1624_v32, %v1623_v29  ;;  %v1626_v35 = vpop.f32.mrb[6].mxu0  ;;  %v945_v36 = vmul.f32 %v2294_v31, %v2294_v31  ;;  %v2298_v37 = vadd.f32 %v1692_v33, %v1691_v30  ;;  %v1694_v38 = vpop.f32.mrb[18].mxu1  ;;  %v2300_v39 = vmax.f32 %v484_v28, 0.0 }
 0x101   :  { %v1627_v40 = vpop.f32.mrb[7].mxu0  ;;  %v1695_v41 = vpop.f32.mrb[19].mxu1 }
 0x102   :  { %v392_v42 = vadd.f32 %v1625_v34, %v2284_v16  ;;  %v1628_v43 = vadd.f32 %v1627_v40, %v1626_v35  ;;  %v961_v44 = vsel %vm324_vm0, %v945_v36, 0.0  ;;  %v2304_v45 = vadd.f32 %v1695_v41, %v1694_v38 }
 0x103   :  { %962 = vadd.xlane.f32.xlu0 %v961_v44  ;;  %v946_v46 = vmul.f32 %v2300_v39, %v2300_v39 }
 0x104   :  { %v395_v47 = vadd.f32 %v1628_v43, %v2284_v16  ;;  %v489_v48 = vadd.f32 %v1755_v2, %v392_v42 }
 0x105   :  { %v964_v51 = vsel %vm324_vm0, %v946_v46, 0.0 }
 0x106   :  { %v492_v49 = vadd.f32 %v1756_v4, %v395_v47  ;;  %v1629_v50 = vpop.f32.mrb[8].mxu0  ;;  %v1697_v52 = vpop.f32.mrb[20].mxu1  ;;  %v2310_v53 = vmax.f32 %v489_v48, 0.0 }
 0x107   :  { %v1630_v54 = vpop.f32.mrb[9].mxu0  ;;  %965 = vadd.xlane.f32.xlu0 %v964_v51  ;;  %v1698_v55 = vpop.f32.mrb[21].mxu1 }
 0x108   :  { %v1631_v56 = vadd.f32 %v1630_v54, %v1629_v50  ;;  %v1632_v57 = vpop.f32.mrb[10].mxu0  ;;  %v947_v58 = vmul.f32 %v2310_v53, %v2310_v53  ;;  %v2314_v59 = vadd.f32 %v1698_v55, %v1697_v52  ;;  %v1700_v60 = vpop.f32.mrb[22].mxu1  ;;  %v2316_v61 = vmax.f32 %v492_v49, 0.0 }
 0x109   :  { %v1633_v62 = vpop.f32.mrb[11].mxu0  ;;  %v1701_v63 = vpop.f32.mrb[23].mxu1 }
 0x10a   :  { %v400_v0 = vadd.f32 %v1631_v56, %v2284_v16  ;;  %v1634_v1 = vadd.f32 %v1633_v62, %v1632_v57  ;;  %v967_v2 = vsel %vm324_vm0, %v947_v58, 0.0  ;;  %v2320_v3 = vadd.f32 %v1701_v63, %v1700_v60 }
 0x10b   :  { %968 = vadd.xlane.f32.xlu1 %v967_v2  ;;  %v948_v4 = vmul.f32 %v2316_v61, %v2316_v61 }
 0x10c   :  { %v497_v5 = vadd.f32 %v2265_v7, %v400_v0  ;;  %v403_v14 = vadd.f32 %v1634_v1, %v2284_v16 }
 0x10d   :  { %v970_v20 = vsel %vm324_vm0, %v948_v4, 0.0 }
 0x10e   :  { %v500_v17 = vadd.f32 %v2269_v9, %v403_v14  ;;  %v1635_v19 = vpop.f32.mrb[12].mxu0  ;;  %v1703_v22 = vpop.f32.mrb[24].mxu1  ;;  %v2328_v24 = vmax.f32 %v497_v5, 0.0 }
 0x10f   :  { %v1636_v25 = vpop.f32.mrb[13].mxu0  ;;  %971 = vadd.xlane.f32.xlu1 %v970_v20  ;;  %v1704_v26 = vpop.f32.mrb[25].mxu1 }
 0x110   :  { %v1637_v27 = vadd.f32 %v1636_v25, %v1635_v19  ;;  %v1638_v28 = vpop.f32.mrb[14].mxu0  ;;  %v949_v29 = vmul.f32 %v2328_v24, %v2328_v24  ;;  %v2332_v30 = vadd.f32 %v1704_v26, %v1703_v22  ;;  %v1706_v7 = vpop.f32.mrb[26].mxu1  ;;  %v2334_v32 = vmax.f32 %v500_v17, 0.0 }
 0x111   :  { %v1639_v9 = vpop.f32.mrb[15].mxu0  ;;  %v1707_v33 = vpop.f32.mrb[27].mxu1 }
 0x112   :  { %v408_v34 = vadd.f32 %v1637_v27, %v2284_v16  ;;  %v1640_v35 = vadd.f32 %v1639_v9, %v1638_v28  ;;  %v973_v36 = vsel %vm324_vm0, %v949_v29, 0.0  ;;  %v950_v38 = vmul.f32 %v2334_v32, %v2334_v32 }
 0x113   :  { %974 = vadd.xlane.f32.xlu0 %v973_v36  ;;  %v2340_v40 = vadd.f32 %v1707_v33, %v1706_v7 }
 0x114   :  { %v505_v41 = vadd.f32 %v2263_v6, %v408_v34  ;;  %v411_v42 = vadd.f32 %v1640_v35, %v2284_v16  ;;  %v976_v43 = vsel %vm324_vm0, %v950_v38, 0.0 }
 0x115   :  { %977 = vadd.xlane.f32.xlu1 %v976_v43 }
 0x116   :  { %v508_v44 = vadd.f32 %v2267_v8, %v411_v42  ;;  %v1641_v46 = vpop.f32.mrb[16].mxu0  ;;  %v1709_v47 = vpop.f32.mrb[28].mxu1  ;;  %v2346_v48 = vmax.f32 %v505_v41, 0.0 }
 0x117   :  { %v1642_v49 = vpop.f32.mrb[17].mxu0  ;;  %v1710_v50 = vpop.f32.mrb[29].mxu1 }
 0x118   :  { %v1643_v51 = vadd.f32 %v1642_v49, %v1641_v46  ;;  %v1644_v52 = vpop.f32.mrb[18].mxu0  ;;  %v951_v54 = vmul.f32 %v2346_v48, %v2346_v48  ;;  %v2350_v55 = vadd.f32 %v1710_v50, %v1709_v47  ;;  %v1712_v6 = vpop.f32.mrb[30].mxu1  ;;  %v2352_v56 = vmax.f32 %v508_v44, 0.0 }
 0x119   :  { %v1645_v57 = vpop.f32.mrb[19].mxu0  ;;  %v1713_v58 = vpop.f32.mrb[31].mxu1 }
 0x11a   :  { %v416_v8 = vadd.f32 %v1643_v51, %v2284_v16  ;;  %v1646_v60 = vadd.f32 %v1645_v57, %v1644_v52  ;;  %v979_v62 = vsel %vm324_vm0, %v951_v54, 0.0  ;;  %v952_v63 = vmul.f32 %v2352_v56, %v2352_v56 }
 0x11b   :  { %980 = vadd.xlane.f32.xlu0 %v979_v62  ;;  %v2358_v0 = vadd.f32 %v1713_v58, %v1712_v6 }
 0x11c   :  { %v513_v1 = vadd.f32 %v2273_v11, %v416_v8  ;;  %v419_v2 = vadd.f32 %v1646_v60, %v2284_v16  ;;  %v982_v4 = vsel %vm324_vm0, %v952_v63, 0.0 }
 0x11d   :  { %983 = vadd.xlane.f32.xlu1 %v982_v4 }
 0x11e   :  { %v516_v5 = vadd.f32 %v2277_v13, %v419_v2  ;;  %v1647_v14 = vpop.f32.mrb[20].mxu0  ;;  %v1715_v17 = vpop.f32.mrb[32].mxu1  ;;  %v2364_v19 = vmax.f32 %v513_v1, 0.0 }
 0x11f   :  { %v1648_v20 = vpop.f32.mrb[21].mxu0  ;;  %v1716_v22 = vpop.f32.mrb[33].mxu1 }
 0x120   :  { %v1649_v25 = vadd.f32 %v1648_v20, %v1647_v14  ;;  %v1650_v26 = vpop.f32.mrb[22].mxu0  ;;  %v953_v27 = vmul.f32 %v2364_v19, %v2364_v19  ;;  %v2368_v28 = vadd.f32 %v1716_v22, %v1715_v17  ;;  %v1718_v11 = vpop.f32.mrb[34].mxu1  ;;  %v2370_v29 = vmax.f32 %v516_v5, 0.0 }
 0x121   :  { %v1651_v7 = vpop.f32.mrb[23].mxu0  ;;  %v1719_v9 = vpop.f32.mrb[35].mxu1 }
 0x122   :  { %v424_v13 = vadd.f32 %v1649_v25, %v2284_v16  ;;  %v1652_v33 = vadd.f32 %v1651_v7, %v1650_v26  ;;  %v985_v34 = vsel %vm324_vm0, %v953_v27, 0.0  ;;  %v954_v35 = vmul.f32 %v2370_v29, %v2370_v29 }
 0x123   :  { %986 = vadd.xlane.f32.xlu0 %v985_v34  ;;  %v2376_v36 = vadd.f32 %v1719_v9, %v1718_v11 }
 0x124   :  { %v521_v38 = vadd.f32 %v2271_v10, %v424_v13  ;;  %v427_v41 = vadd.f32 %v1652_v33, %v2284_v16  ;;  %v988_v42 = vsel %vm324_vm0, %v954_v35, 0.0 }
 0x125   :  { %989 = vadd.xlane.f32.xlu1 %v988_v42 }
 0x126   :  { %v524_v43 = vadd.f32 %v2275_v12, %v427_v41  ;;  %v1653_v44 = vpop.f32.mrb[24].mxu0  ;;  %v1721_v46 = vpop.f32.mrb[36].mxu1  ;;  %v2382_v47 = vmax.f32 %v521_v38, 0.0 }
 0x127   :  { %v1654_v49 = vpop.f32.mrb[25].mxu0  ;;  %v1722_v50 = vpop.f32.mrb[37].mxu1 }
 0x128   :  { %v1655_v51 = vadd.f32 %v1654_v49, %v1653_v44  ;;  %v1656_v52 = vpop.f32.mrb[26].mxu0  ;;  %v955_v54 = vmul.f32 %v2382_v47, %v2382_v47  ;;  %v2386_v6 = vadd.f32 %v1722_v50, %v1721_v46  ;;  %v1724_v10 = vpop.f32.mrb[38].mxu1  ;;  %v2388_v57 = vmax.f32 %v524_v43, 0.0 }
 0x129   :  { %v1657_v58 = vpop.f32.mrb[27].mxu0  ;;  %v1725_v8 = vpop.f32.mrb[39].mxu1  ;;  %v762_v49 = vadd.f32 %v2314_v59, %v2284_v16 }
 0x12a   :  { %v432_v12 = vadd.f32 %v1655_v51, %v2284_v16  ;;  %v1658_v60 = vadd.f32 %v1657_v58, %v1656_v52  ;;  %v991_v62 = vsel %vm324_vm0, %v955_v54, 0.0  ;;  %v956_v63 = vmul.f32 %v2388_v57, %v2388_v57 }
 0x12b   :  { %992 = vadd.xlane.f32.xlu0 %v991_v62  ;;  %v2394_v1 = vadd.f32 %v1725_v8, %v1724_v10  ;;  %v754_v52 = vadd.f32 %v2298_v37, %v2284_v16 }
 0x12c   :  { %v529_v2 = vadd.f32 %v2286_v18, %v432_v12  ;;  %v435_v4 = vadd.f32 %v1658_v60, %v2284_v16  ;;  %v994_v5 = vsel %vm324_vm0, %v956_v63, 0.0  ;;  %v757_v12 = vadd.f32 %v2304_v45, %v2284_v16 }
 0x12d   :  { %995 = vadd.xlane.f32.xlu1 %v994_v5 }
 0x12e   :  { %v532_v14 = vadd.f32 %v2290_v23, %v435_v4  ;;  %v1659_v17 = vpop.f32.mrb[28].mxu0  ;;  %v1727_v20 = vpop.f32.mrb[40].mxu1  ;;  %v2400_v22 = vmax.f32 %v529_v2, 0.0 }
 0x12f   :  { %v1660_v25 = vpop.f32.mrb[29].mxu0  ;;  %v1728_v26 = vpop.f32.mrb[41].mxu1 }
 0x130   :  { %v1661_v27 = vadd.f32 %v1660_v25, %v1659_v17  ;;  %v1662_v11 = vpop.f32.mrb[30].mxu0  ;;  %v957_v7 = vmul.f32 %v2400_v22, %v2400_v22  ;;  %v1729_v9 = vadd.f32 %v1728_v26, %v1727_v20  ;;  %v1730_v18 = vpop.f32.mrb[42].mxu1  ;;  %v2404_v13 = vmax.f32 %v532_v14, 0.0 }
 0x131   :  { %v1663_v33 = vpop.f32.mrb[31].mxu0  ;;  %v1731_v34 = vpop.f32.mrb[43].mxu1 }
 0x132   :  { %v440_v35 = vadd.f32 %v1661_v27, %v2284_v16  ;;  %v1664_v23 = vadd.f32 %v1663_v33, %v1662_v11  ;;  %v997_v38 = vsel %vm324_vm0, %v957_v7, 0.0  ;;  %v958_v41 = vmul.f32 %v2404_v13, %v2404_v13 }
 0x133   :  { %998 = vadd.xlane.f32.xlu0 %v997_v38  ;;  %v1732_v42 = vadd.f32 %v1731_v34, %v1730_v18  ;;  %v778_v33 = vadd.f32 %v2350_v55, %v2284_v16 }
 0x134   :  { %v537_v43 = vadd.f32 %v2279_v15, %v440_v35  ;;  %v443_v44 = vadd.f32 %v1664_v23, %v2284_v16  ;;  %v1000_v46 = vsel %vm324_vm0, %v958_v41, 0.0  ;;  %v765_v15 = vadd.f32 %v2320_v3, %v2284_v16 }
 0x135   :  { %1001 = vadd.xlane.f32.xlu1 %v1000_v46  ;;  %v802_v46 = vadd.f32 %v1729_v9, %v2284_v16  ;;  %v773_v9 = vadd.f32 %v2340_v40, %v2284_v16 }
 0x136   :  { %v540_v50 = vadd.f32 %v2288_v21, %v443_v44  ;;  %v1775_v51 = vpop.f32.mrb[32].mxu0  ;;  %v1733_v54 = vpop.f32.mrb[44].mxu1  ;;  %v2418_v10 = vmax.f32 %v537_v43, 0.0  ;;  %v770_v44 = vadd.f32 %v2332_v30, %v2284_v16 }
 0x137   :  { %v859_v58 = vadd.f32 %v1775_v51, %v762_v49  ;;  %v850_v8 = vpop.f32.mrb[33].mxu0  ;;  %v1734_v60 = vpop.f32.mrb[45].mxu1 }
 0x138   :  { %v851_v62 = vadd.f32 %v850_v8, %v754_v52  ;;  %v1776_v59 = vpop.f32.mrb[34].mxu0  ;;  %v1735_v63 = vadd.f32 %v1734_v60, %v1733_v54  ;;  %v959_v21 = vmul.f32 %v2418_v10, %v2418_v10  ;;  %v1736_v2 = vpop.f32.mrb[46].mxu1  ;;  %v2426_v37 = vmax.f32 %v540_v50, 0.0 }
 0x139   :  { %v2428_v4 = vmax.f32 %v859_v58, 0.0  ;;  %v862_v5 = vadd.f32 %v1776_v59, %v765_v15  ;;  %v853_v14 = vpop.f32.mrb[35].mxu0  ;;  %v1737_v17 = vpop.f32.mrb[47].mxu1  ;;  %v781_v54 = vadd.f32 %v2358_v0, %v2284_v16  ;;  %v805_v60 = vadd.f32 %v1732_v42, %v2284_v16 }
 0x13a   :  { %v2430_v20 = vmax.f32 %v851_v62, 0.0  ;;  %v854_v3 = vadd.f32 %v853_v14, %v757_v12  ;;  %v1003_v45 = vsel %vm324_vm0, %v959_v21, 0.0  ;;  %v1738_v25 = vadd.f32 %v1737_v17, %v1736_v2 }
 0x13b   :  { %v2433_v26 = vmax.f32 %v862_v5, 0.0  ;;  %1004 = vadd.xlane.f32.xlu0 %v1003_v45  ;;  %v960_v27 = vmul.f32 %v2426_v37, %v2426_v37  ;;  %v810_v11 = vadd.f32 %v1735_v63, %v2284_v16  ;;  %v1155_v7 = vmul.f32 %v2428_v4, %v2428_v4 }
 0x13c   :  { %v2440_v18 = vmax.f32 %v854_v3, 0.0  ;;  %v813_v23 = vadd.f32 %v1738_v25, %v2284_v16  ;;  %v1153_v55 = vmul.f32 %v2430_v20, %v2430_v20  ;;  %v794_v42 = vadd.f32 %v2386_v6, %v2284_v16 }
 0x13d   :  { %v1006_v34 = vsel %vm324_vm0, %v960_v27, 0.0  ;;  %v1175_v35 = vsel %vm324_vm0, %v1155_v7, 0.0  ;;  %v1156_v38 = vmul.f32 %v2433_v26, %v2433_v26 }
 0x13e   :  { %1007 = vadd.xlane.f32.xlu1 %v1006_v34  ;;  %v1779_v41 = vpop.f32.mrb[36].mxu0  ;;  %v1787_v43 = vpop.f32.mrb[48].mxu1  ;;  %v1154_v0 = vmul.f32 %v2440_v18, %v2440_v18  ;;  %v1169_v3 = vsel %vm324_vm0, %v1153_v55, 0.0  ;;  %v789_v55 = vadd.f32 %v2376_v36, %v2284_v16 }
 0x13f   :  { %v875_v49 = vadd.f32 %v1779_v41, %v778_v33  ;;  %v2454_v50 = vadd.f32 %v1787_v43, %v810_v11  ;;  %v866_v51 = vpop.f32.mrb[37].mxu0  ;;  %v898_v52 = vpop.f32.mrb[49].mxu1  ;;  %1176 = vadd.xlane.f32.xlu0 %v1175_v35  ;;  %v1178_v58 = vsel %vm324_vm0, %v1156_v38, 0.0  ;;  %v786_v35 = vadd.f32 %v2368_v28, %v2284_v16 }
 0x140   :  { %v867_v8 = vadd.f32 %v866_v51, %v770_v44  ;;  %v899_v15 = vadd.f32 %v898_v52, %v802_v46  ;;  %v1780_v12 = vpop.f32.mrb[38].mxu0  ;;  %v1788_v30 = vpop.f32.mrb[50].mxu1  ;;  %v1172_v27 = vsel %vm324_vm0, %v1154_v0, 0.0  ;;  %v797_v41 = vadd.f32 %v2394_v1, %v2284_v16 }
 0x141   :  { %v2462_v62 = vmax.f32 %v875_v49, 0.0  ;;  %v878_v59 = vadd.f32 %v1780_v12, %v781_v54  ;;  %v910_v63 = vadd.f32 %v1788_v30, %v813_v23  ;;  %v869_v21 = vpop.f32.mrb[39].mxu0  ;;  %v901_v2 = vpop.f32.mrb[51].mxu1 }
 0x142   :  { %v2466_v5 = vmax.f32 %v867_v8, 0.0  ;;  %v870_v14 = vadd.f32 %v869_v21, %v773_v9  ;;  %v902_v17 = vadd.f32 %v901_v2, %v805_v60  ;;  %1179 = vadd.xlane.f32.xlu1 %v1178_v58  ;;  %v2481_v33 = vmax.f32 %v899_v15, 0.0 }
 0x143   :  { %v2469_v45 = vmax.f32 %v878_v59, 0.0  ;;  %1170 = vadd.xlane.f32.xlu0 %v1169_v3  ;;  %v1159_v40 = vmul.f32 %v2462_v62, %v2462_v62  ;;  %v2517_v2 = vmax.f32 %v2454_v50, 0.0 }
 0x144   :  { %v2475_v25 = vmax.f32 %v870_v14, 0.0  ;;  %v1157_v23 = vmul.f32 %v2466_v5, %v2466_v5  ;;  %v2492_v49 = vmax.f32 %v902_v17, 0.0  ;;  %v1165_v8 = vmul.f32 %v2481_v33, %v2481_v33 }
 0x145   :  { %v1187_v11 = vsel %vm324_vm0, %v1159_v40, 0.0  ;;  %v1160_v7 = vmul.f32 %v2469_v45, %v2469_v45  ;;  %v2522_v17 = vmax.f32 %v910_v63, 0.0  ;;  %v1167_v50 = vmul.f32 %v2517_v2, %v2517_v2 }
 0x146   :  { %1173 = vadd.xlane.f32.xlu1 %v1172_v27  ;;  %v1783_v34 = vpop.f32.mrb[40].mxu0  ;;  %v1158_v52 = vmul.f32 %v2475_v25, %v2475_v25  ;;  %v1181_v1 = vsel %vm324_vm0, %v1157_v23, 0.0  ;;  %v1166_v36 = vmul.f32 %v2492_v49, %v2492_v49  ;;  %v1205_v30 = vsel %vm324_vm0, %v1165_v8, 0.0 }
 0x147   :  { %v891_v6 = vadd.f32 %v1783_v34, %v794_v42  ;;  %v882_v38 = vpop.f32.mrb[41].mxu0  ;;  %1188 = vadd.xlane.f32.xlu0 %v1187_v11  ;;  %v1190_v43 = vsel %vm324_vm0, %v1160_v7, 0.0  ;;  %3020 = vst [vmem:[#allocation2_spill] sm:$0xff] %v2522_v17  ;;  %v1168_v11 = vmul.f32 %v2522_v17, %v2522_v17  ;;  %v1211_v63 = vsel %vm324_vm0, %v1167_v50, 0.0 }
 0x148   :  { %v883_v44 = vadd.f32 %v882_v38, %v786_v35  ;;  %v1784_v46 = vpop.f32.mrb[42].mxu0  ;;  %v1184_v16 = vsel %vm324_vm0, %v1158_v52, 0.0  ;;  %v1208_v59 = vsel %vm324_vm0, %v1166_v36, 0.0 }
 0x149   :  { %v894_v51 = vadd.f32 %v1784_v46, %v797_v41  ;;  %v885_v28 = vpop.f32.mrb[43].mxu0  ;;  %v2496_v54 = vmax.f32 %v891_v6, 0.0  ;;  %v1214_v7 = vsel %vm324_vm0, %v1168_v11, 0.0 }
 0x14a   :  { %v886_v58 = vadd.f32 %v885_v28, %v789_v55  ;;  %1191 = vadd.xlane.f32.xlu1 %v1190_v43  ;;  %v2506_v12 = vmax.f32 %v883_v44, 0.0 }
 0x14b   :  { %1182 = vadd.xlane.f32.xlu0 %v1181_v1  ;;  %v2501_v15 = vmax.f32 %v894_v51, 0.0  ;;  %v1163_v9 = vmul.f32 %v2496_v54, %v2496_v54 }
 0x14c   :  { %v2511_v60 = vmax.f32 %v886_v58, 0.0  ;;  %v1161_v14 = vmul.f32 %v2506_v12, %v2506_v12 }
 0x14d   :  { %v1164_v21 = vmul.f32 %v2501_v15, %v2501_v15  ;;  %v1199_v0 = vsel %vm324_vm0, %v1163_v9, 0.0 }
 0x14e   :  { %1185 = vadd.xlane.f32.xlu1 %v1184_v16  ;;  %v1162_v40 = vmul.f32 %v2511_v60, %v2511_v60  ;;  %v1193_v42 = vsel %vm324_vm0, %v1161_v14, 0.0 }
 0x14f   :  { %1206 = vadd.xlane.f32.xlu0 %v1205_v30  ;;  %v1202_v3 = vsel %vm324_vm0, %v1164_v21, 0.0 }
 0x150   :  { %v1196_v27 = vsel %vm324_vm0, %v1162_v40, 0.0 }
 0x152   :  { %1209 = vadd.xlane.f32.xlu1 %v1208_v59 }
 0x153   :  { %1200 = vadd.xlane.f32.xlu0 %v1199_v0 }
 0x156   :  { %1203 = vadd.xlane.f32.xlu1 %v1202_v3 }
 0x157   :  { %1194 = vadd.xlane.f32.xlu0 %v1193_v42 }
 0x15a   :  { %1197 = vadd.xlane.f32.xlu1 %v1196_v27 }
 0x15b   :  { %1212 = vadd.xlane.f32.xlu0 %v1211_v63 }
 0x15e   :  { %1215 = vadd.xlane.f32.xlu1 %v1214_v7 }
 0x190   :  { %v963_v34 = vpop.xlane.xlu0 %962 }
 0x191   :  { %1875 = vrsqrt.f32 %v963_v34  ;;  %vm1011_vm1 = vcmp.eq.f32.partialorder %v963_v34, inf  ;;  %vm1013_vm2 = vcmp.eq.f32.partialorder %v963_v34, 0.0  ;;  %v1014_v16 = vand.u32 2147483648, %v963_v34 }
 0x194   :  { %v966_v23 = vpop.xlane.xlu0 %965 }
 0x195   :  { %1877 = vrsqrt.f32 %v966_v23  ;;  %vm1018_vm3 = vcmp.eq.f32.partialorder %v966_v23, inf  ;;  %vm1020_vm4 = vcmp.eq.f32.partialorder %v966_v23, 0.0  ;;  %v1021_v0 = vand.u32 2147483648, %v966_v23 }
 0x198   :  { %v969_v35 = vpop.xlane.xlu1 %968 }
 0x199   :  { %1879 = vrsqrt.f32 %v969_v35  ;;  %vm1025_vm5 = vcmp.eq.f32.partialorder %v969_v35, inf  ;;  %vm1027_vm6 = vcmp.eq.f32.partialorder %v969_v35, 0.0  ;;  %v1028_v50 = vand.u32 2147483648, %v969_v35 }
 0x19b   :  { %v1876_v44 = vpop.eup %1875 }
 0x19c   :  { %v972_v6 = vpop.xlane.xlu1 %971  ;;  %v1010_v51 = vmul.f32 %v1876_v44, %v963_v34 }
 0x19d   :  { %1881 = vrsqrt.f32 %v972_v6  ;;  %vm1032_vm7 = vcmp.eq.f32.partialorder %v972_v6, inf  ;;  %vm1034_vm8 = vcmp.eq.f32.partialorder %v972_v6, 0.0  ;;  %v1035_v44 = vand.u32 2147483648, %v972_v6 }
 0x19e   :  { %v1012_v8 = vsel %vm1011_vm1, %v963_v34, %v1010_v51 }
 0x19f   :  { %v1878_v55 = vpop.eup %1877  ;;  %v1015_v42 = vsel %vm1013_vm2, %v1014_v16, %v1012_v8 }
 0x1a0   :  { %v975_v38 = vpop.xlane.xlu0 %974  ;;  %v1017_v58 = vmul.f32 %v1878_v55, %v966_v23  ;;  %v1121_v55 = vadd.f32 1e-10, %v1015_v42 }
 0x1a1   :  { %1883 = vrsqrt.f32 %v975_v38  ;;  %vm1039_vm9 = vcmp.eq.f32.partialorder %v975_v38, inf  ;;  %vm1041_vm10 = vcmp.eq.f32.partialorder %v975_v38, 0.0 }
 0x1a2   :  { %v2535_v41 = vpop.xlane.xlu1 %977  ;;  %v1019_v21 = vsel %vm1018_vm3, %v966_v23, %v1017_v58  ;;  %v1042_v58 = vand.u32 2147483648, %v975_v38 }
 0x1a3   :  { %1885 = vrsqrt.f32 %v2535_v41  ;;  %v1880_v28 = vpop.eup %1879  ;;  %v1022_v7 = vsel %vm1020_vm4, %v1021_v0, %v1019_v21  ;;  %vm1046_vm11 = vcmp.eq.f32.partialorder %v2535_v41, inf  ;;  %vm1048_vm12 = vcmp.eq.f32.partialorder %v2535_v41, 0.0 }
 0x1a4   :  { %v1024_v36 = vmul.f32 %v1880_v28, %v969_v35  ;;  %v1122_v8 = vadd.f32 1e-10, %v1022_v7 }
 0x1a6   :  { %v1026_v27 = vsel %vm1025_vm5, %v969_v35, %v1024_v36 }
 0x1a7   :  { %v1882_v52 = vpop.eup %1881 }
 0x1a8   :  { %v2538_v43 = vpop.xlane.xlu0 %980  ;;  %v1031_v59 = vmul.f32 %v1882_v52, %v972_v6  ;;  %v1029_v52 = vsel %vm1027_vm6, %v1028_v50, %v1026_v27 }
 0x1a9   :  { %1887 = vrsqrt.f32 %v2538_v43  ;;  %vm1053_vm13 = vcmp.eq.f32.partialorder %v2538_v43, inf  ;;  %v1123_v35 = vadd.f32 1e-10, %v1029_v52  ;;  %v1056_v21 = vand.u32 2147483648, %v2538_v43 }
 0x1aa   :  { %v2541_v46 = vpop.xlane.xlu1 %983  ;;  %v1033_v34 = vsel %vm1032_vm7, %v972_v6, %v1031_v59  ;;  %v1049_v59 = vand.u32 2147483648, %v2535_v41  ;;  %vm1055_vm15 = vcmp.eq.f32.partialorder %v2538_v43, 0.0 }
 0x1ab   :  { %1889 = vrsqrt.f32 %v2541_v46  ;;  %v1884_v1 = vpop.eup %1883  ;;  %v1036_v16 = vsel %vm1034_vm8, %v1035_v44, %v1033_v34  ;;  %vm1060_vm14 = vcmp.eq.f32.partialorder %v2541_v46, inf  ;;  %v1063_v50 = vand.u32 2147483648, %v2541_v46 }
 0x1ac   :  { %v1038_v14 = vmul.f32 %v1884_v1, %v975_v38  ;;  %vm1062_vm1 = vcmp.eq.f32.partialorder %v2541_v46, 0.0 }
 0x1ad   :  { %v1886_v9 = vpop.eup %1885 }
 0x1ae   :  { %v1045_v11 = vmul.f32 %v1886_v9, %v2535_v41  ;;  %v1040_v51 = vsel %vm1039_vm9, %v975_v38, %v1038_v14  ;;  %v1124_v14 = vadd.f32 1e-10, %v1036_v16 }
 0x1af   :  { %v1043_v9 = vsel %vm1041_vm10, %v1042_v58, %v1040_v51 }
 0x1b0   :  { %v2544_v30 = vpop.xlane.xlu0 %986  ;;  %v1047_v23 = vsel %vm1046_vm11, %v2535_v41, %v1045_v11  ;;  %v1125_v41 = vadd.f32 1e-10, %v1043_v9 }
 0x1b1   :  { %1891 = vrsqrt.f32 %v2544_v30  ;;  %vm1067_vm2 = vcmp.eq.f32.partialorder %v2544_v30, inf  ;;  %v1070_v58 = vand.u32 2147483648, %v2544_v30  ;;  %vm1069_vm3 = vcmp.eq.f32.partialorder %v2544_v30, 0.0 }
 0x1b2   :  { %v2547_v3 = vpop.xlane.xlu1 %989 }
 0x1b3   :  { %v1888_v40 = vpop.eup %1887  ;;  %1893 = vrsqrt.f32 %v2547_v3  ;;  %vm1074_vm4 = vcmp.eq.f32.partialorder %v2547_v3, inf  ;;  %vm1076_vm5 = vcmp.eq.f32.partialorder %v2547_v3, 0.0 }
 0x1b4   :  { %v1052_v28 = vmul.f32 %v1888_v40, %v2538_v43  ;;  %v1050_v40 = vsel %vm1048_vm12, %v1049_v59, %v1047_v23  ;;  %v1077_v59 = vand.u32 2147483648, %v2547_v3 }
 0x1b5   :  { %v1890_v63 = vpop.eup %1889 }
 0x1b6   :  { %v1059_v1 = vmul.f32 %v1890_v63, %v2541_v46  ;;  %v1054_v38 = vsel %vm1053_vm13, %v2538_v43, %v1052_v28  ;;  %v1126_v63 = vadd.f32 1e-10, %v1050_v40 }
 0x1b7   :  { %v1057_v27 = vsel %vm1055_vm15, %v1056_v21, %v1054_v38 }
 0x1b8   :  { %v2559_v36 = vpop.xlane.xlu0 %992  ;;  %v1061_v42 = vsel %vm1060_vm14, %v2541_v46, %v1059_v1  ;;  %v1127_v44 = vadd.f32 1e-10, %v1057_v27 }
 0x1b9   :  { %1895 = vrsqrt.f32 %v2559_v36  ;;  %v1064_v7 = vsel %vm1062_vm1, %v1063_v50, %v1061_v42  ;;  %vm1081_vm6 = vcmp.eq.f32.partialorder %v2559_v36, inf  ;;  %vm1083_vm8 = vcmp.eq.f32.partialorder %v2559_v36, 0.0 }
 0x1ba   :  { %v2567_v6 = vpop.xlane.xlu1 %995 }
 0x1bb   :  { %v1892_v0 = vpop.eup %1891  ;;  %1897 = vrsqrt.f32 %v2567_v6  ;;  %vm1088_vm7 = vcmp.eq.f32.partialorder %v2567_v6, inf  ;;  %vm1090_vm9 = vcmp.eq.f32.partialorder %v2567_v6, 0.0 }
 0x1bc   :  { %1899 = vrcp.f32 %v1121_v55  ;;  %v1066_v34 = vmul.f32 %v1892_v0, %v2544_v30  ;;  %v1128_v55 = vadd.f32 1e-10, %v1064_v7 }
 0x1bd   :  { %1901 = vrcp.f32 %v1122_v8  ;;  %v1894_v11 = vpop.eup %1893 }
 0x1be   :  { %1903 = vrcp.f32 %v1123_v35  ;;  %v1073_v43 = vmul.f32 %v1894_v11, %v2547_v3  ;;  %v1068_v46 = vsel %vm1067_vm2, %v2544_v30, %v1066_v34 }
 0x1bf   :  { %1905 = vrcp.f32 %v1124_v14  ;;  %v1071_v16 = vsel %vm1069_vm3, %v1070_v58, %v1068_v46 }
 0x1c0   :  { %1907 = vrcp.f32 %v1125_v41  ;;  %v2575_v51 = vpop.xlane.xlu0 %998  ;;  %v1075_v23 = vsel %vm1074_vm4, %v2547_v3, %v1073_v43  ;;  %v1129_v21 = vadd.f32 1e-10, %v1071_v16  ;;  %v1084_v41 = vand.u32 2147483648, %v2559_v36 }
 0x1c1   :  { %1909 = vrsqrt.f32 %v2575_v51  ;;  %v1078_v0 = vsel %vm1076_vm5, %v1077_v59, %v1075_v23  ;;  %v1091_v3 = vand.u32 2147483648, %v2567_v6  ;;  %vm1095_vm10 = vcmp.eq.f32.partialorder %v2575_v51, inf }
 0x1c2   :  { %1911 = vrcp.f32 %v1126_v63  ;;  %v2581_v28 = vpop.xlane.xlu1 %1001  ;;  %v1130_v34 = vadd.f32 1e-10, %v1078_v0  ;;  %vm1097_vm11 = vcmp.eq.f32.partialorder %v2575_v51, 0.0  ;;  %v1098_v58 = vand.u32 2147483648, %v2575_v51 }
 0x1c3   :  { %v1896_v52 = vpop.eup %1895  ;;  %1913 = vrsqrt.f32 %v2581_v28  ;;  %vm1102_vm12 = vcmp.eq.f32.partialorder %v2581_v28, inf  ;;  %v1105_v59 = vand.u32 2147483648, %v2581_v28  ;;  %vm1104_vm13 = vcmp.eq.f32.partialorder %v2581_v28, 0.0 }
 0x1c4   :  { %1915 = vrcp.f32 %v1127_v44  ;;  %v1080_v1 = vmul.f32 %v1896_v52, %v2559_v36 }
 0x1c5   :  { %v1898_v8 = vpop.eup %1897  ;;  %1917 = vrcp.f32 %v1128_v55 }
 0x1c6   :  { %v1900_v9 = vpop.eup %1899  ;;  %v1087_v35 = vmul.f32 %v1898_v8, %v2567_v6  ;;  %v1082_v14 = vsel %vm1081_vm6, %v2559_v36, %v1080_v1 }
 0x1c7   :  { %v1902_v38 = vpop.eup %1901  ;;  %v2603_v11 = vmul.f32 %v1900_v9, %v2294_v31  ;;  %v1085_v44 = vsel %vm1083_vm8, %v1084_v41, %v1082_v14 }
 0x1c8   :  { %v1904_v30 = vpop.eup %1903  ;;  %v2595_v40 = vpop.xlane.xlu0 %1004  ;;  %v1089_v50 = vsel %vm1088_vm7, %v2567_v6, %v1087_v35  ;;  %v2606_v63 = vmul.f32 %v1902_v38, %v2300_v39  ;;  %v1131_v6 = vadd.f32 1e-10, %v1085_v44 }
 0x1c9   :  { %v1906_v42 = vpop.eup %1905  ;;  %1919 = vrsqrt.f32 %v2595_v40  ;;  %v2612_v43 = vmul.f32 %v1904_v30, %v2310_v53  ;;  %v1092_v36 = vsel %vm1090_vm9, %v1091_v3, %v1089_v50  ;;  %vm1109_vm14 = vcmp.eq.f32.partialorder %v2595_v40, inf }
 0x1ca   :  { %v1908_v27 = vpop.eup %1907  ;;  %1921 = vrcp.f32 %v1129_v21  ;;  %v1132_v23 = vadd.f32 1e-10, %v1092_v36  ;;  %v2635_v0 = vmul.f32 %v1906_v42, %v2316_v61  ;;  %vm1111_vm15 = vcmp.eq.f32.partialorder %v2595_v40, 0.0 }
 0x1cb   :  { %v1910_v7 = vpop.eup %1909  ;;  %v2609_v55 = vpop.xlane.xlu1 %1007  ;;  %v2638_v14 = vmul.f32 %v1908_v27, %v2328_v24 }
 0x1cc   :  { %v1912_v46 = vpop.eup %1911  ;;  %v1094_v52 = vmul.f32 %v1910_v7, %v2575_v51  ;;  %v2616_v31 = vpop.xlane.xlu0 %1176  ;;  %1923 = vrsqrt.f32 %v2609_v55  ;;  %vm1116_vm1 = vcmp.eq.f32.partialorder %v2609_v55, inf  ;;  %vm1118_vm2 = vcmp.eq.f32.partialorder %v2609_v55, 0.0 }
 0x1cd   :  { %v1914_v39 = vpop.eup %1913  ;;  %1925 = vrsqrt.f32 %v2616_v31  ;;  %vm1233_vm3 = vcmp.eq.f32.partialorder %v2616_v31, inf  ;;  %vm1235_vm4 = vcmp.eq.f32.partialorder %v2616_v31, 0.0 }
 0x1ce   :  { %v1916_v53 = vpop.eup %1915  ;;  %v1096_v1 = vsel %vm1095_vm10, %v2575_v51, %v1094_v52  ;;  %v1101_v8 = vmul.f32 %v1914_v39, %v2581_v28  ;;  %1927 = vrcp.f32 %v1130_v34  ;;  %v1236_v34 = vand.u32 2147483648, %v2616_v31 }
 0x1cf   :  { %v1918_v16 = vpop.eup %1917  ;;  %v1099_v9 = vsel %vm1097_vm11, %v1098_v58, %v1096_v1  ;;  %v2626_v35 = vpop.xlane.xlu1 %1179  ;;  %v2641_v41 = vmul.f32 %v1916_v53, %v2346_v48  ;;  %v1112_v48 = vand.u32 2147483648, %v2595_v40 }
 0x1d0   :  { %v1133_v38 = vadd.f32 1e-10, %v1099_v9  ;;  %v1103_v30 = vsel %vm1102_vm12, %v2581_v28, %v1101_v8  ;;  %1929 = vrsqrt.f32 %v2626_v35  ;;  %v2631_v51 = vpop.xlane.xlu0 %1170  ;;  %v2644_v50 = vmul.f32 %v1918_v16, %v2352_v56 }
 0x1d1   :  { %v1106_v21 = vsel %vm1104_vm13, %v1105_v59, %v1103_v30  ;;  %1931 = vrsqrt.f32 %v2631_v51  ;;  %v2647_v28 = vmul.f32 %v1912_v46, %v2334_v32  ;;  %v1119_v32 = vand.u32 2147483648, %v2609_v55 }
 0x1d2   :  { %1933 = vrcp.f32 %v1131_v6  ;;  %v1134_v7 = vadd.f32 1e-10, %v1106_v21  ;;  %vm1240_vm5 = vcmp.eq.f32.partialorder %v2626_v35, inf  ;;  %vm1242_vm6 = vcmp.eq.f32.partialorder %v2626_v35, 0.0 }
 0x1d3   :  { %v1920_v3 = vpop.eup %1919  ;;  %1935 = vrcp.f32 %v1132_v23  ;;  %v2651_v61 = vpop.xlane.xlu1 %1173  ;;  %v1243_v36 = vand.u32 2147483648, %v2626_v35  ;;  %vm1219_vm7 = vcmp.eq.f32.partialorder %v2631_v51, inf  ;;  %vm1221_vm8 = vcmp.eq.f32.partialorder %v2631_v51, 0.0 }
 0x1d4   :  { %1937 = vrcp.f32 %v1133_v38  ;;  %v1108_v24 = vmul.f32 %v1920_v3, %v2595_v40  ;;  %v2656_v56 = vpop.xlane.xlu0 %1188  ;;  %v2663_v42 = vpop.eup %1921  ;;  %v1222_v1 = vand.u32 2147483648, %v2631_v51  ;;  %vm1226_vm9 = vcmp.eq.f32.partialorder %v2651_v61, inf }
 0x1d5   :  { %1939 = vrsqrt.f32 %v2651_v61  ;;  %vm1228_vm10 = vcmp.eq.f32.partialorder %v2651_v61, 0.0  ;;  %v1229_v23 = vand.u32 2147483648, %v2651_v61  ;;  %vm1261_vm11 = vcmp.eq.f32.partialorder %v2656_v56, inf }
 0x1d6   :  { %v1110_v27 = vsel %vm1109_vm14, %v2595_v40, %v1108_v24  ;;  %1941 = vrsqrt.f32 %v2656_v56  ;;  %v1924_v44 = vpop.eup %1923  ;;  %vm1263_vm12 = vcmp.eq.f32.partialorder %v2656_v56, 0.0 }
 0x1d7   :  { %1943 = vrcp.f32 %v1134_v7  ;;  %v1113_v46 = vsel %vm1111_vm15, %v1112_v48, %v1110_v27  ;;  %v2673_v52 = vpop.xlane.xlu1 %1191  ;;  %v1926_v39 = vpop.eup %1925  ;;  %v1115_v58 = vmul.f32 %v1924_v44, %v2609_v55  ;;  %v1264_v48 = vand.u32 2147483648, %v2656_v56 }
 0x1d8   :  { %1945 = vrsqrt.f32 %v2673_v52  ;;  %v2679_v53 = vpop.xlane.xlu0 %1182  ;;  %v2681_v6 = vpop.eup %1927  ;;  %v1232_v40 = vmul.f32 %v1926_v39, %v2616_v31  ;;  %v1135_v16 = vadd.f32 1e-10, %v1113_v46  ;;  %vm1268_vm13 = vcmp.eq.f32.partialorder %v2673_v52, inf }
 0x1d9   :  { %1947 = vrsqrt.f32 %v2679_v53  ;;  %v1117_v59 = vsel %vm1116_vm1, %v2609_v55, %v1115_v58  ;;  %vm1270_vm14 = vcmp.eq.f32.partialorder %v2673_v52, 0.0  ;;  %vm1247_vm15 = vcmp.eq.f32.partialorder %v2679_v53, inf }
 0x1da   :  { %v1930_v8 = vpop.eup %1929  ;;  %v1234_v38 = vsel %vm1233_vm3, %v2616_v31, %v1232_v40  ;;  %vm1249_vm1 = vcmp.eq.f32.partialorder %v2679_v53, 0.0 }
 0x1db   :  { %v1932_v9 = vpop.eup %1931  ;;  %v1239_v30 = vmul.f32 %v1930_v8, %v2626_v35  ;;  %v2698_v21 = vpop.xlane.xlu1 %1185  ;;  %v1237_v7 = vsel %vm1235_vm4, %v1236_v34, %v1234_v38  ;;  %v1120_v34 = vsel %vm1118_vm2, %v1119_v32, %v1117_v59 }
 0x1dc   :  { %v2700_v3 = vpop.eup %1933  ;;  %v1218_v24 = vmul.f32 %v1932_v9, %v2631_v51  ;;  %1949 = vrsqrt.f32 %v2698_v21  ;;  %v2707_v27 = vpop.xlane.xlu0 %1206  ;;  %v1331_v46 = vadd.f32 1e-10, %v1237_v7  ;;  %v1136_v59 = vadd.f32 1e-10, %v1120_v34 }
 0x1dd   :  { %v2709_v44 = vpop.eup %1935  ;;  %v1241_v39 = vsel %vm1240_vm5, %v2626_v35, %v1239_v30  ;;  %1951 = vrcp.f32 %v1135_v16  ;;  %v1271_v30 = vand.u32 2147483648, %v2673_v52  ;;  %vm1254_vm2 = vcmp.eq.f32.partialorder %v2698_v21, inf }
 0x1de   :  { %v2716_v31 = vpop.eup %1937  ;;  %v1244_v58 = vsel %vm1242_vm6, %v1243_v36, %v1241_v39  ;;  %v1220_v40 = vsel %vm1219_vm7, %v2631_v51, %v1218_v24  ;;  %1953 = vrcp.f32 %v1331_v46  ;;  %v1250_v46 = vand.u32 2147483648, %v2679_v53 }
 0x1df   :  { %v1940_v8 = vpop.eup %1939  ;;  %v1332_v9 = vadd.f32 1e-10, %v1244_v58  ;;  %v1223_v38 = vsel %vm1221_vm8, %v1222_v1, %v1220_v40  ;;  %v2728_v7 = vpop.xlane.xlu1 %1209  ;;  %1955 = vrsqrt.f32 %v2707_v27  ;;  %vm1256_vm3 = vcmp.eq.f32.partialorder %v2698_v21, 0.0 }
 0x1e0   :  { %v1942_v16 = vpop.eup %1941  ;;  %v1329_v55 = vadd.f32 1e-10, %v1223_v38  ;;  %v1225_v32 = vmul.f32 %v1940_v8, %v2651_v61  ;;  %v2733_v35 = vpop.xlane.xlu0 %1200  ;;  %vm1303_vm4 = vcmp.eq.f32.partialorder %v2707_v27, inf  ;;  %vm1305_vm5 = vcmp.eq.f32.partialorder %v2707_v27, 0.0 }
 0x1e1   :  { %v2735_v36 = vpop.eup %1943  ;;  %1957 = vrcp.f32 %v1332_v9  ;;  %v1260_v51 = vmul.f32 %v1942_v16, %v2656_v56  ;;  %vm1310_vm6 = vcmp.eq.f32.partialorder %v2728_v7, inf  ;;  %vm1312_vm7 = vcmp.eq.f32.partialorder %v2728_v7, 0.0 }
 0x1e2   :  { %v1946_v1 = vpop.eup %1945  ;;  %1959 = vrcp.f32 %v1329_v55  ;;  %v1227_v24 = vsel %vm1226_vm9, %v2651_v61, %v1225_v32  ;;  %vm1289_vm8 = vcmp.eq.f32.partialorder %v2733_v35, inf  ;;  %vm1291_vm9 = vcmp.eq.f32.partialorder %v2733_v35, 0.0 }
 0x1e3   :  { %v1948_v39 = vpop.eup %1947  ;;  %v1230_v58 = vsel %vm1228_vm10, %v1229_v23, %v1227_v24  ;;  %v1262_v34 = vsel %vm1261_vm11, %v2656_v56, %v1260_v51  ;;  %v1267_v40 = vmul.f32 %v1946_v1, %v2673_v52  ;;  %1961 = vrsqrt.f32 %v2728_v7  ;;  %v2751_v8 = vpop.xlane.xlu1 %1203 }
 0x1e4   :  { %v1330_v9 = vadd.f32 1e-10, %v1230_v58  ;;  %v1265_v38 = vsel %vm1263_vm12, %v1264_v48, %v1262_v34  ;;  %v1246_v16 = vmul.f32 %v1948_v39, %v2679_v53  ;;  %1963 = vrsqrt.f32 %v2733_v35  ;;  %v2761_v55 = vpop.xlane.xlu0 %1194 }
 0x1e5   :  { %1965 = vrcp.f32 %v1136_v59  ;;  %v1335_v61 = vadd.f32 1e-10, %v1265_v38  ;;  %v1269_v23 = vsel %vm1268_vm13, %v2673_v52, %v1267_v40  ;;  %v1257_v59 = vand.u32 2147483648, %v2698_v21 }
 0x1e6   :  { %v1950_v32 = vpop.eup %1949  ;;  %1967 = vrcp.f32 %v1330_v9  ;;  %v1272_v56 = vsel %vm1270_vm14, %v1271_v30, %v1269_v23  ;;  %v1248_v48 = vsel %vm1247_vm15, %v2679_v53, %v1246_v16  ;;  %v1306_v30 = vand.u32 2147483648, %v2707_v27 }
 0x1e7   :  { %1969 = vrcp.f32 %v1335_v61  ;;  %v1336_v51 = vadd.f32 1e-10, %v1272_v56  ;;  %v1251_v1 = vsel %vm1249_vm1, %v1250_v46, %v1248_v48  ;;  %v1253_v24 = vmul.f32 %v1950_v32, %v2698_v21  ;;  %v2772_v39 = vpop.xlane.xlu1 %1197  ;;  %v2774_v58 = vpop.eup %1951 }
 0x1e8   :  { %v1333_v34 = vadd.f32 1e-10, %v1251_v1  ;;  %1971 = vrsqrt.f32 %v2751_v8  ;;  %v1954_v52 = vpop.eup %1953  ;;  %v1313_v9 = vand.u32 2147483648, %v2728_v7  ;;  %v2791_v23 = vpop.xlane.xlu0 %1212  ;;  %vm1296_vm10 = vcmp.eq.f32.partialorder %v2751_v8, inf }
 0x1e9   :  { %1973 = vrcp.f32 %v1336_v51  ;;  %v1255_v53 = vsel %vm1254_vm2, %v2698_v21, %v1253_v24  ;;  %v1956_v46 = vpop.eup %1955  ;;  %v1292_v21 = vand.u32 2147483648, %v2733_v35  ;;  %vm1298_vm11 = vcmp.eq.f32.partialorder %v2751_v8, 0.0 }
 0x1ea   :  { %1975 = vrcp.f32 %v1333_v34  ;;  %v1258_v40 = vsel %vm1256_vm3, %v1257_v59, %v1255_v53  ;;  %v1302_v61 = vmul.f32 %v1956_v46, %v2707_v27  ;;  %v1299_v51 = vand.u32 2147483648, %v2751_v8 }
 0x1eb   :  { %v1958_v38 = vpop.eup %1957  ;;  %v1334_v16 = vadd.f32 1e-10, %v1258_v40  ;;  %1977 = vrsqrt.f32 %v2761_v55  ;;  %v2797_v56 = vpop.xlane.xlu1 %1215  ;;  %vm1275_vm12 = vcmp.eq.f32.partialorder %v2761_v55, inf  ;;  %vm1277_vm13 = vcmp.eq.f32.partialorder %v2761_v55, 0.0 }
 0x1ec   :  { %v1960_v32 = vpop.eup %1959  ;;  %1979 = vrsqrt.f32 %v2772_v39  ;;  %v1304_v59 = vsel %vm1303_vm4, %v2707_v27, %v1302_v61  ;;  %vm1282_vm14 = vcmp.eq.f32.partialorder %v2772_v39, inf  ;;  %vm1284_vm15 = vcmp.eq.f32.partialorder %v2772_v39, 0.0 }
 0x1ed   :  { %v1962_v48 = vpop.eup %1961  ;;  %1981 = vrcp.f32 %v1334_v16  ;;  %v1307_v34 = vsel %vm1305_vm5, %v1306_v30, %v1304_v59  ;;  %v1327_v30 = vand.u32 2147483648, %v2797_v56  ;;  %v1380_v59 = vmul.f32 %v1958_v38, %v2433_v26 }
 0x1ee   :  { %v1964_v24 = vpop.eup %1963  ;;  %v1309_v53 = vmul.f32 %v1962_v48, %v2728_v7  ;;  %1983 = vrsqrt.f32 %v2791_v23  ;;  %v1341_v16 = vadd.f32 1e-10, %v1307_v34  ;;  %v1379_v48 = vmul.f32 %v1954_v52, %v2428_v4 }
 0x1ef   :  { %v2810_v40 = vpop.eup %1965  ;;  %v1288_v61 = vmul.f32 %v1964_v24, %v2733_v35  ;;  %1985 = vrsqrt.f32 %v2797_v56  ;;  %vm1317_vm1 = vcmp.eq.f32.partialorder %v2791_v23, inf  ;;  %vm1319_vm2 = vcmp.eq.f32.partialorder %v2791_v23, 0.0 }
 0x1f0   :  { %3021 = vst [vmem:[#allocation3_spill] sm:$0xff] %v2810_v40  ;;  %v1968_v1 = vpop.eup %1967  ;;  %v1311_v27 = vsel %vm1310_vm6, %v2728_v7, %v1309_v53  ;;  %1987 = vrcp.f32 %v1341_v16  ;;  %v1377_v53 = vmul.f32 %v1960_v32, %v2430_v20  ;;  %v1395_v26 = vsub.f32 %v2612_v43, %v1379_v48  ;;  %v2842_v20 = vld [vmem:[%s3017_s4] ss:$0 sm:$0xff] }
 0x1f1   :  { %v1970_v24 = vpop.eup %1969  ;;  %v1314_v34 = vsel %vm1312_vm7, %v1313_v9, %v1311_v27  ;;  %v1290_v17 = vsel %vm1289_vm8, %v2733_v35, %v1288_v61  ;;  %v1396_v7 = vsub.f32 %v2635_v0, %v1380_v59  ;;  %vm1324_vm3 = vcmp.eq.f32.partialorder %v2797_v56, inf }
 0x1f2   :  { %v1972_v46 = vpop.eup %1971  ;;  %v1342_v40 = vadd.f32 1e-10, %v1314_v34  ;;  %v1293_v4 = vsel %vm1291_vm9, %v1292_v21, %v1290_v17  ;;  %v1393_v17 = vsub.f32 %v2603_v11, %v1377_v53  ;;  %v1378_v35 = vmul.f32 %v1968_v1, %v2440_v18 }
 0x1f3   :  { %v1974_v52 = vpop.eup %1973  ;;  %v1339_v9 = vadd.f32 1e-10, %v1293_v4  ;;  %v1295_v38 = vmul.f32 %v1972_v46, %v2751_v8  ;;  %vm1326_vm4 = vcmp.eq.f32.partialorder %v2797_v56, 0.0  ;;  %v1411_v0 = vmul.f32 %v1395_v26, %v1395_v26 }
 0x1f4   :  { %v1976_v43 = vpop.eup %1975  ;;  %1989 = vrcp.f32 %v1342_v40  ;;  %v1412_v32 = vmul.f32 %v1396_v7, %v1396_v7  ;;  %v1383_v21 = vmul.f32 %v1970_v24, %v2462_v62  ;;  %v1409_v61 = vmul.f32 %v1393_v17, %v1393_v17 }
 0x1f5   :  { %v1978_v46 = vpop.eup %1977  ;;  %1991 = vrcp.f32 %v1339_v9  ;;  %v1297_v16 = vsel %vm1296_vm10, %v2751_v8, %v1295_v38  ;;  %v1394_v27 = vsub.f32 %v2606_v63, %v1378_v35  ;;  %v1434_v40 = vmul.f32 %v2842_v20, %v1411_v0 }
 0x1f6   :  { %v1980_v11 = vpop.eup %1979  ;;  %v1300_v18 = vsel %vm1298_vm11, %v1299_v51, %v1297_v16  ;;  %v1274_v1 = vmul.f32 %v1978_v46, %v2761_v55  ;;  %v1435_v48 = vmul.f32 %v2842_v20, %v1412_v32  ;;  %v1432_v34 = vmul.f32 %v2842_v20, %v1409_v61 }
 0x1f7   :  { %v1982_v62 = vpop.eup %1981  ;;  %v1340_v59 = vadd.f32 1e-10, %v1300_v18  ;;  %v1281_v24 = vmul.f32 %v1980_v11, %v2772_v39  ;;  %v1410_v53 = vmul.f32 %v1394_v27, %v1394_v27  ;;  %v1454_v8 = vsel %vm324_vm0, %v1434_v40, 0.0 }
 0x1f8   :  { %v1984_v4 = vpop.eup %1983  ;;  %v1276_v63 = vsel %vm1275_vm12, %v2761_v55, %v1274_v1  ;;  %v1457_v51 = vsel %vm324_vm0, %v1435_v48, 0.0  ;;  %v1399_v26 = vsub.f32 %v2641_v41, %v1383_v21  ;;  %v3022_v9 = vand.u32 2147483648, %v2761_v55  ;;  %1455 = vadd.xlane.f32.xlu0 %v1454_v8 }
 0x1f9   :  { %v1986_v7 = vpop.eup %1985  ;;  %1993 = vrcp.f32 %v1340_v59  ;;  %v1283_v17 = vsel %vm1282_vm14, %v2772_v39, %v1281_v24  ;;  %v1316_v35 = vmul.f32 %v1984_v4, %v2791_v23  ;;  %1458 = vadd.xlane.f32.xlu1 %v1457_v51  ;;  %v3023_v32 = vand.u32 2147483648, %v2772_v39 }
 0x1fa   :  { %v1279_v38 = vsel %vm1277_vm13, %v3022_v9, %v1276_v63  ;;  %v1323_v21 = vmul.f32 %v1986_v7, %v2797_v56  ;;  %v1448_v46 = vsel %vm324_vm0, %v1432_v34, 0.0  ;;  %v1988_v55 = vpop.eup %1987  ;;  %v1433_v27 = vmul.f32 %v2842_v20, %v1410_v53 }
 0x1fb   :  { %v1337_v0 = vadd.f32 1e-10, %v1279_v38  ;;  %v1286_v41 = vsel %vm1284_vm15, %v3023_v32, %v1283_v17  ;;  %v1318_v61 = vsel %vm1317_vm1, %v2791_v23, %v1316_v35  ;;  %v1415_v11 = vmul.f32 %v1399_v26, %v1399_v26 }
 0x1fc   :  { %v1338_v16 = vadd.f32 1e-10, %v1286_v41  ;;  %v3024_v18 = vand.u32 2147483648, %v2791_v23  ;;  %v1325_v1 = vsel %vm1324_vm3, %v2797_v56, %v1323_v21  ;;  %v1384_v40 = vmul.f32 %v1974_v52, %v2469_v45  ;;  %1449 = vadd.xlane.f32.xlu0 %v1448_v46 }
 0x1fd   :  { %1995 = vrcp.f32 %v1337_v0  ;;  %v1328_v59 = vsel %vm1326_vm4, %v1327_v30, %v1325_v1  ;;  %v1451_v24 = vsel %vm324_vm0, %v1433_v27, 0.0  ;;  %v1438_v23 = vmul.f32 %v2842_v20, %v1415_v11 }
 0x1fe   :  { %v1321_v39 = vsel %vm1319_vm2, %v3024_v18, %v1318_v61  ;;  %1997 = vrcp.f32 %v1338_v16  ;;  %v1990_v34 = vpop.eup %1989  ;;  %v1344_v53 = vadd.f32 1e-10, %v1328_v59  ;;  %1452 = vadd.xlane.f32.xlu1 %v1451_v24  ;;  %v1400_v4 = vsub.f32 %v2644_v50, %v1384_v40 }
 0x1ff   :  { %v1343_v48 = vadd.f32 1e-10, %v1321_v39  ;;  %v1381_v63 = vmul.f32 %v1976_v43, %v2466_v5  ;;  %v1992_v45 = vpop.eup %1991  ;;  %v1382_v52 = vmul.f32 %v1982_v62, %v2475_v25  ;;  %v1373_v56 = vmul.f32 %v2716_v31, %v2400_v22 }
 0x200   :  { %v1389_v30 = vmul.f32 %v1988_v55, %v2481_v33  ;;  %v1466_v8 = vsel %vm324_vm0, %v1438_v23, 0.0  ;;  %v1416_v51 = vmul.f32 %v1400_v4, %v1400_v4  ;;  %v1374_v5 = vmul.f32 %v2735_v36, %v2404_v13 }
 0x201   :  { %1999 = vrcp.f32 %v1343_v48  ;;  %v1397_v26 = vsub.f32 %v2638_v14, %v1381_v63  ;;  %1467 = vadd.xlane.f32.xlu0 %v1466_v8  ;;  %v1398_v50 = vsub.f32 %v2647_v28, %v1382_v52  ;;  %v1390_v25 = vmul.f32 %v1990_v34, %v2492_v49  ;;  %v3025_v48 = vld [vmem:[#allocation3_spill] sm:$0xff] }
 0x202   :  { %2001 = vrcp.f32 %v1344_v53  ;;  %v1405_v7 = vsub.f32 %v1373_v56, %v1389_v30  ;;  %v1439_v43 = vmul.f32 %v2842_v20, %v1416_v51  ;;  %v1371_v33 = vmul.f32 %v2700_v3, %v2382_v47 }
 0x203   :  { %v1413_v22 = vmul.f32 %v1397_v26, %v1397_v26  ;;  %v1387_v31 = vmul.f32 %v1992_v45, %v2496_v54  ;;  %v1994_v62 = vpop.eup %1993  ;;  %v1414_v9 = vmul.f32 %v1398_v50, %v1398_v50  ;;  %v1406_v38 = vsub.f32 %v1374_v5, %v1390_v25 }
 0x204   :  { %v1421_v14 = vmul.f32 %v1405_v7, %v1405_v7  ;;  %v1372_v28 = vmul.f32 %v2709_v44, %v2388_v57  ;;  %v1469_v17 = vsel %vm324_vm0, %v1439_v43, 0.0  ;;  %v1388_v36 = vmul.f32 %v1994_v62, %v2501_v15 }
 0x205   :  { %v1436_v13 = vmul.f32 %v2842_v20, %v1413_v22  ;;  %v1403_v49 = vsub.f32 %v1371_v33, %v1387_v31  ;;  %1470 = vadd.xlane.f32.xlu1 %v1469_v17  ;;  %v1437_v35 = vmul.f32 %v2842_v20, %v1414_v9  ;;  %v1422_v54 = vmul.f32 %v1406_v38, %v1406_v38 }
 0x206   :  { %v1444_v47 = vmul.f32 %v2842_v20, %v1421_v14  ;;  %v1404_v41 = vsub.f32 %v1372_v28, %v1388_v36  ;;  %v1369_v57 = vmul.f32 %v2663_v42, %v2364_v19  ;;  %v1370_v55 = vmul.f32 %v2681_v6, %v2370_v29 }
 0x207   :  { %v1996_v3 = vpop.eup %1995  ;;  %v1460_v0 = vsel %vm324_vm0, %v1436_v13, 0.0  ;;  %v1419_v32 = vmul.f32 %v1403_v49, %v1403_v49  ;;  %v1463_v21 = vsel %vm324_vm0, %v1437_v35, 0.0  ;;  %v1445_v15 = vmul.f32 %v2842_v20, %v1422_v54 }
 0x208   :  { %v1998_v44 = vpop.eup %1997  ;;  %1461 = vadd.xlane.f32.xlu0 %v1460_v0  ;;  %v1385_v46 = vmul.f32 %v1996_v3, %v2506_v12  ;;  %v1484_v16 = vsel %vm324_vm0, %v1444_v47, 0.0  ;;  %v1420_v27 = vmul.f32 %v1404_v41, %v1404_v41  ;;  %v1375_v42 = vmul.f32 %v2774_v58, %v2418_v10 }
 0x209   :  { %v1442_v61 = vmul.f32 %v2842_v20, %v1419_v32  ;;  %v1386_v11 = vmul.f32 %v1998_v44, %v2511_v60  ;;  %1464 = vadd.xlane.f32.xlu1 %v1463_v21  ;;  %v1487_v1 = vsel %vm324_vm0, %v1445_v15, 0.0  ;;  %v1376_v59 = vmul.f32 %v3025_v48, %v2426_v37  ;;  %v3026_v60 = vld [vmem:[#allocation2_spill] sm:$0xff] }
 0x20a   :  { %v1401_v19 = vsub.f32 %v1369_v57, %v1385_v46  ;;  %v1443_v12 = vmul.f32 %v2842_v20, %v1420_v27  ;;  %vm1496_vm5 = vcmask 7168  }
 0x20b   :  { %v2000_v18 = vpop.eup %1999  ;;  %v1402_v40 = vsub.f32 %v1370_v55, %v1386_v11  ;;  %v1478_v34 = vsel %vm324_vm0, %v1442_v61, 0.0 }
 0x20c   :  { %v2002_v39 = vpop.eup %2001  ;;  %v1391_v29 = vmul.f32 %v2000_v18, %v2517_v2  ;;  %1485 = vadd.xlane.f32.xlu0 %v1484_v16  ;;  %v1417_v6 = vmul.f32 %v1401_v19, %v1401_v19  ;;  %v1481_v4 = vsel %vm324_vm0, %v1443_v12, 0.0 }
 0x20d   :  { %v1392_v24 = vmul.f32 %v2002_v39, %v3026_v60  ;;  %v1418_v53 = vmul.f32 %v1402_v40, %v1402_v40  ;;  %1488 = vadd.xlane.f32.xlu1 %v1487_v1 }
 0x20e   :  { %v1407_v23 = vsub.f32 %v1375_v42, %v1391_v29  ;;  %v1440_v10 = vmul.f32 %v2842_v20, %v1417_v6 }
 0x20f   :  { %v1408_v58 = vsub.f32 %v1376_v59, %v1392_v24  ;;  %v1441_v63 = vmul.f32 %v2842_v20, %v1418_v53 }
 0x210   :  { %v1423_v2 = vmul.f32 %v1407_v23, %v1407_v23  ;;  %1479 = vadd.xlane.f32.xlu0 %v1478_v34  ;;  %v1472_v52 = vsel %vm324_vm0, %v1440_v10, 0.0 }
 0x211   :  { %v1424_v45 = vmul.f32 %v1408_v58, %v1408_v58  ;;  %1482 = vadd.xlane.f32.xlu1 %v1481_v4  ;;  %v1475_v56 = vsel %vm324_vm0, %v1441_v63, 0.0 }
 0x212   :  { %v1446_v37 = vmul.f32 %v2842_v20, %v1423_v2 }
 0x213   :  { %v1447_v30 = vmul.f32 %v2842_v20, %v1424_v45 }
 0x214   :  { %1473 = vadd.xlane.f32.xlu0 %v1472_v52  ;;  %v1490_v8 = vsel %vm324_vm0, %v1446_v37, 0.0 }
 0x215   :  { %1476 = vadd.xlane.f32.xlu1 %v1475_v56  ;;  %v1493_v51 = vsel %vm324_vm0, %v1447_v30, 0.0 }
 0x218   :  { %1491 = vadd.xlane.f32.xlu0 %v1490_v8 }
 0x219   :  { %1494 = vadd.xlane.f32.xlu1 %v1493_v51 }
 0x285   :  { %v1456_v26 = vpop.xlane.xlu0 %1455 }
 0x286   :  { %v1459_v50 = vpop.xlane.xlu1 %1458  ;;  %1499 = vst.msk [vmem:[%s3018_s5 + $0x10] sm:$0xff] %vm1496_vm5, %v1456_v26 }
 0x287   :  { %1500 = vst.msk [vmem:[%s3018_s5 + $0x18] sm:$0xff] %vm1496_vm5, %v1459_v50 }
 0x289   :  { %v1450_v20 = vpop.xlane.xlu0 %1449 }
 0x28a   :  { %1497 = vst.msk [vmem:[%s3018_s5] sm:$0xff] %vm1496_vm5, %v1450_v20 }
 0x28b   :  { %v1453_v7 = vpop.xlane.xlu1 %1452 }
 0x28c   :  { %1498 = vst.msk [vmem:[%s3018_s5 + $0x8] sm:$0xff] %vm1496_vm5, %v1453_v7 }
 0x28e   :  { %v1468_v5 = vpop.xlane.xlu0 %1467 }
 0x28f   :  { %1503 = vst.msk [vmem:[%s3018_s5 + $0x30] sm:$0xff] %vm1496_vm5, %v1468_v5 }
 0x292   :  { %v1471_v25 = vpop.xlane.xlu1 %1470 }
 0x293   :  { %1504 = vst.msk [vmem:[%s3018_s5 + $0x38] sm:$0xff] %vm1496_vm5, %v1471_v25 }
 0x295   :  { %v1462_v43 = vpop.xlane.xlu0 %1461 }
 0x296   :  { %1501 = vst.msk [vmem:[%s3018_s5 + $0x20] sm:$0xff] %vm1496_vm5, %v1462_v43  ;;  %v1465_v22 = vpop.xlane.xlu1 %1464 }
 0x297   :  { %1502 = vst.msk [vmem:[%s3018_s5 + $0x28] sm:$0xff] %vm1496_vm5, %v1465_v22 }
 0x299   :  { %v1486_v33 = vpop.xlane.xlu0 %1485 }
 0x29a   :  { %1509 = vst.msk [vmem:[%s3018_s5 + $0x60] sm:$0xff] %vm1496_vm5, %v1486_v33  ;;  %v1489_v31 = vpop.xlane.xlu1 %1488 }
 0x29b   :  { %1510 = vst.msk [vmem:[%s3018_s5 + $0x68] sm:$0xff] %vm1496_vm5, %v1489_v31 }
 0x29d   :  { %v1480_v62 = vpop.xlane.xlu0 %1479 }
 0x29e   :  { %1507 = vst.msk [vmem:[%s3018_s5 + $0x50] sm:$0xff] %vm1496_vm5, %v1480_v62  ;;  %v1483_v9 = vpop.xlane.xlu1 %1482 }
 0x29f   :  { %1508 = vst.msk [vmem:[%s3018_s5 + $0x58] sm:$0xff] %vm1496_vm5, %v1483_v9 }
 0x2a1   :  { %v1474_v14 = vpop.xlane.xlu0 %1473 }
 0x2a2   :  { %1505 = vst.msk [vmem:[%s3018_s5 + $0x40] sm:$0xff] %vm1496_vm5, %v1474_v14  ;;  %v1477_v38 = vpop.xlane.xlu1 %1476 }
 0x2a3   :  { %1506 = vst.msk [vmem:[%s3018_s5 + $0x48] sm:$0xff] %vm1496_vm5, %v1477_v38 }
 0x2a5   :  { %v1492_v28 = vpop.xlane.xlu0 %1491 }
 0x2a6   :  { %1511 = vst.msk [vmem:[%s3018_s5 + $0x70] sm:$0xff] %vm1496_vm5, %v1492_v28  ;;  %v1495_v17 = vpop.xlane.xlu1 %1494 }
 0x2a7   :  { %1512 = vst.msk [vmem:[%s3018_s5 + $0x78] sm:$0xff] %vm1496_vm5, %v1495_v17 }

</bundles_post_ra>
